<compile_context>
chip_gen: v5e
topology: v5e:2x2
jax: 0.10.0
libtpu: 0.0.40
codegen_flags: <defaults>
</compile_context>

<pallas_src>
import math
import functools

import jax
import jax.numpy as jnp
from jax.experimental import pallas as pl
from jax.experimental.pallas import tpu as pltpu


# ----------------------------------------------------------------------------
# Kernel: one (batch, query-tile) grid point per invocation.
# ----------------------------------------------------------------------------
def self_attn_layer_kernel(*refs, nhead, tq, has_pos):
    if has_pos:
        (x_ref, pos_ref, wq_ref, bq_ref, wkt_ref, bkt_ref, wv_ref, bv_ref,
         wo_ref, bo_ref, gamma_ref, beta_ref, out_ref, q_sc, kt_sc, v_sc) = refs
    else:
        (x_ref, wq_ref, bq_ref, wkt_ref, bkt_ref, wv_ref, bv_ref,
         wo_ref, bo_ref, gamma_ref, beta_ref, out_ref, q_sc, kt_sc, v_sc) = refs
        pos_ref = None

    L, C = q_sc.shape
    hd = C // nhead

    # ---- per-batch-element projections (only at the first query tile) -------
    @pl.when(pl.program_id(1) == 0)
    def _project_qkv():
        x_all = x_ref[0]                                        # (L, C) f32
        if has_pos:
            qk_in_f32 = x_all + pos_ref[0].astype(jnp.float32)  # add in f32
        else:
            qk_in_f32 = x_all
        qk_in = qk_in_f32.astype(jnp.bfloat16)

        # Q projection (softmax 1/sqrt(hd) folded into wq/bq in the wrapper).
        q_sc[...] = (jnp.dot(qk_in, wq_ref[...],
                             preferred_element_type=jnp.float32)
                     + bq_ref[...]).astype(jnp.bfloat16)        # (L, C)

        # K projected directly in transposed orientation: K^T = Wk^T @ (x+pos)^T.
        # kt_sc is (C, L): lane-dense, head blocks are sublane slices, and it is
        # already the canonical (contract, n) RHS for the score matmul.
        qk_in_t = jnp.transpose(qk_in_f32).astype(jnp.bfloat16)  # (C, L)
        kt_sc[...] = (jnp.dot(wkt_ref[...], qk_in_t,
                              preferred_element_type=jnp.float32)
                      + bkt_ref[...]).astype(jnp.bfloat16)       # (C, L)

        # V projection (value path uses x without pos).
        v_sc[...] = (jnp.dot(x_all.astype(jnp.bfloat16), wv_ref[...],
                             preferred_element_type=jnp.float32)
                     + bv_ref[...]).astype(jnp.bfloat16)         # (L, C)

    # ---- attention for this query tile ---------------------------------------
    qoff = pl.multiple_of(pl.program_id(1) * tq, tq)
    q_tile = q_sc[pl.ds(qoff, tq), :]                            # (tq, C) bf16

    o_heads = []
    for h in range(nhead):                                       # nhead static
        q_h = q_tile[:, h * hd:(h + 1) * hd]                     # (tq, hd) bf16
        kt_h = kt_sc[h * hd:(h + 1) * hd, :]                     # (hd, L) bf16 (sublane slice)
        s = jnp.dot(q_h, kt_h, preferred_element_type=jnp.float32)   # (tq, L) f32
        s = s - jnp.max(s, axis=-1, keepdims=True)
        p = jnp.exp(s)                                           # unnormalized
        denom = jnp.sum(p, axis=-1, keepdims=True)               # (tq, 1)
        v_h = v_sc[:, h * hd:(h + 1) * hd]                       # (L, hd) bf16
        o_un = jnp.dot(p.astype(jnp.bfloat16), v_h,
                       preferred_element_type=jnp.float32)       # (tq, hd) f32
        # Deferred softmax normalization on the small (tq, hd) result; exact recip.
        o_heads.append(o_un * pl.reciprocal(denom, approx=False))

    # Fused output projection: one full-depth (tq, C) @ (C, C) matmul.
    o_cat = jnp.concatenate(o_heads, axis=-1)                    # (tq, C) f32
    attn = jnp.dot(o_cat.astype(jnp.bfloat16), wo_ref[...],
                   preferred_element_type=jnp.float32) + bo_ref[...]

    # Residual (dropout = identity) + LayerNorm in f32 (eps matches PyTorch).
    x_q = x_ref[0, pl.ds(qoff, tq), :]                           # (tq, C) f32
    y = x_q + attn
    mu = jnp.mean(y, axis=-1, keepdims=True)
    var = jnp.mean((y - mu) ** 2, axis=-1, keepdims=True)
    out_ref[0] = (y - mu) * jax.lax.rsqrt(var + 1e-5) * gamma_ref[...] + beta_ref[...]


# ----------------------------------------------------------------------------
# Wrapper: (L, N, C) sequence-first in/out, like nn.MultiheadAttention.
# ----------------------------------------------------------------------------
def self_attention_layer(x, pos, params, nhead, tq=None):
    # TODO(synk): key_padding_mask not implemented (reference is called with mask=None).
    L, N, C = x.shape
    assert C % nhead == 0
    hd = C // nhead
    assert C % 128 == 0, "d_model must be lane-aligned"
    # TODO(synk): pad C at this boundary if d_model is not a multiple of 128.

    has_pos = pos is not None
    if tq is None:
        tq = 256 if L >= 512 else 128                  # amortize per-step overhead
    tq = min(tq, L)
    assert L % tq == 0, "sequence length must be divisible by the query tile"
    # TODO(synk): pad / mask a tail tile for L not divisible by tq.

    wq, wk, wv, bq, bk, bv, wo, bo, gamma, beta = params
    scale = 1.0 / math.sqrt(hd)
    # Fold softmax scale into the Q projection; pre-transpose Wk for the
    # transposed-K projection; bf16 MXU operands everywhere.
    wq_s = (wq * scale).astype(jnp.bfloat16)           # (C, C)
    bq_s = (bq * scale).astype(jnp.float32)            # (1, C)
    wk_t = jnp.transpose(wk).astype(jnp.bfloat16)      # (C, C): K^T = wk_t @ x^T
    bk_t = jnp.reshape(bk, (C, 1)).astype(jnp.float32)  # broadcasts along lanes (L)
    wv_b = wv.astype(jnp.bfloat16)
    wo_b = wo.astype(jnp.bfloat16)

    x_b = jnp.transpose(x, (1, 0, 2))                  # (N, L, C) f32
    inputs = [x_b]
    if has_pos:
        inputs.append(jnp.transpose(pos, (1, 0, 2)).astype(jnp.bfloat16))
    inputs += [wq_s, bq_s, wk_t, bk_t, wv_b, bv, wo_b, bo, gamma, beta]

    seq_spec = pl.BlockSpec((1, L, C), lambda n, q: (n, 0, 0))

    def full(shape):
        # Constant-index weight blocks: never re-DMA'd across grid steps.
        return pl.BlockSpec(shape, lambda n, q: (0,) * len(shape))

    in_specs = [seq_spec] + ([seq_spec] if has_pos else [])
    in_specs += [full((C, C)), full((1, C)),           # wq (scaled), bq (scaled)
                 full((C, C)), full((C, 1)),           # wk^T, bk^T
                 full((C, C)), full((1, C)),           # wv, bv
                 full((C, C)), full((1, C)),           # wo, bo
                 full((1, C)), full((1, C))]           # gamma, beta

    # VMEM budget from actual footprint (scratch + double-buffered blocks +
    # per-head (tq, L) f32 score temps), capped for v7x's 64 MiB physical VMEM.
    scratch_bytes = 3 * L * C * 2                                      # q/k^T/v bf16
    block_bytes = 2 * L * C * 4 + (2 * L * C * 2 if has_pos else 0) + 2 * tq * C * 4
    weight_bytes = 2 * (4 * C * C * 2 + 7 * C * 4)
    temp_bytes = 4 * tq * L * 4
    vmem_limit = int(min(56 * 2 ** 20,
                         max(24 * 2 ** 20,
                             1.5 * (scratch_bytes + block_bytes + weight_bytes + temp_bytes))))

    out = pl.pallas_call(
        functools.partial(self_attn_layer_kernel, nhead=nhead, tq=tq, has_pos=has_pos),
        out_shape=jax.ShapeDtypeStruct((N, L, C), jnp.float32),
        grid=(N, L // tq),
        in_specs=in_specs,
        out_specs=pl.BlockSpec((1, tq, C), lambda n, q: (n, q, 0)),
        scratch_shapes=[pltpu.VMEM((L, C), jnp.bfloat16),   # Q  (lane-dense)
                        pltpu.VMEM((C, L), jnp.bfloat16),   # K^T (lane-dense)
                        pltpu.VMEM((L, C), jnp.bfloat16)],  # V  (lane-dense)
        compiler_params=pltpu.CompilerParams(
            # Batch is independent ("parallel", megacore); the query-tile axis
            # must be sequential ("arbitrary") because Q/K^T/V live in scratch.
            dimension_semantics=("parallel", "arbitrary"),
            vmem_limit_bytes=vmem_limit),
    )(*inputs)
    return jnp.transpose(out, (1, 0, 2))                               # (L, N, C)


# ----------------------------------------------------------------------------
# Parameter init (matches the module: xavier-uniform matrices, zero biases,
# default LayerNorm affine).  Weights pre-transposed to (in, out) layout.
# ----------------------------------------------------------------------------
def xavier_uniform(key, shape):
    fan_out, fan_in = shape                      # PyTorch (out, in) convention
    bound = math.sqrt(6.0 / (fan_in + fan_out))
    return jax.random.uniform(key, shape, jnp.float32, -bound, bound)


def init_params(key, d_model):
    k1, k2 = jax.random.split(key)
    in_proj = xavier_uniform(k1, (3 * d_model, d_model))       # (3C, C)
    out_proj = xavier_uniform(k2, (d_model, d_model))          # (C, C)
    wq = in_proj[:d_model].T
    wk = in_proj[d_model:2 * d_model].T
    wv = in_proj[2 * d_model:].T
    wo = out_proj.T
    z = jnp.zeros((1, d_model), jnp.float32)
    ones = jnp.ones((1, d_model), jnp.float32)
    #        wq, wk, wv, bq, bk, bv, wo, bo, gamma, beta
    return (wq, wk, wv, z, z, z, wo, z, ones, z)


# ----------------------------------------------------------------------------
# Pure-JAX f32 reference (PyTorch MultiheadAttention semantics) for checking.
# ----------------------------------------------------------------------------
def _ref_forward(x, pos, params, nhead):
    L, N, C = x.shape
    hd = C // nhead
    wq, wk, wv, bq, bk, bv, wo, bo, g, b = params
    xb = jnp.transpose(x, (1, 0, 2))
    pb = jnp.transpose(pos, (1, 0, 2)) if pos is not None else jnp.zeros_like(xb)
    qk_in = xb + pb
    q = (qk_in @ wq + bq).reshape(N, L, nhead, hd)
    k = (qk_in @ wk + bk).reshape(N, L, nhead, hd)
    v = (xb @ wv + bv).reshape(N, L, nhead, hd)
    s = jnp.einsum('nqhd,nkhd->nhqk', q, k) / math.sqrt(hd)
    p = jax.nn.softmax(s, axis=-1)
    o = jnp.einsum('nhqk,nkhd->nqhd', p, v).reshape(N, L, C)
    y = xb + (o @ wo + bo)
    mu = y.mean(-1, keepdims=True)
    var = ((y - mu) ** 2).mean(-1, keepdims=True)
    out = (y - mu) / jnp.sqrt(var + 1e-5) * g + b
    return jnp.transpose(out, (1, 0, 2))


if __name__ == "__main__":
    # Small, lane-aligned shapes: sequence-first (L, N, C), as the module expects.
    L, N, C = 256, 2, 128
    nhead = 4

    key = jax.random.PRNGKey(0)
    kx, kp, kw = jax.random.split(key, 3)
    x = jax.random.normal(kx, (L, N, C), jnp.float32)
    pos = jax.random.normal(kp, (L, N, C), jnp.float32)   # pos embedding is a forward() input
    params = init_params(kw, C)

    out = jax.block_until_ready(self_attention_layer(x, pos, params, nhead))
    assert out.shape == (L, N, C)

    ref = jax.block_until_ready(_ref_forward(x, pos, params, nhead))
    max_err = float(jnp.max(jnp.abs(out - ref)))
    # bf16 MXU operands (+ bf16 pos) vs f32 reference -> loosened tolerance.
    assert jnp.allclose(out, ref, atol=5e-2, rtol=5e-2), f"mismatch vs ref, max_err={max_err}"

    # Also exercise the pos=None specialization (no zeros tensor streamed).
    out_np = jax.block_until_ready(self_attention_layer(x, None, params, nhead))
    ref_np = jax.block_until_ready(_ref_forward(x, None, params, nhead))
    assert jnp.allclose(out_np, ref_np, atol=5e-2, rtol=5e-2), "mismatch vs ref (pos=None)"

    print("KERNEL_OK")
</pallas_src>

<mosaic_0001>
module attributes {stable_mosaic.version = 11 : i64} {
  func.func @self_attn_layer_kernel(%arg0: i32, %arg1: i32, %arg2: memref<1x256x128xf32, #tpu.memory_space<vmem>>, %arg3: memref<1x256x128xbf16, #tpu.memory_space<vmem>>, %arg4: memref<128x128xbf16, #tpu.memory_space<vmem>>, %arg5: memref<1x128xf32, #tpu.memory_space<vmem>>, %arg6: memref<128x128xbf16, #tpu.memory_space<vmem>>, %arg7: memref<128x1xf32, #tpu.memory_space<vmem>>, %arg8: memref<128x128xbf16, #tpu.memory_space<vmem>>, %arg9: memref<1x128xf32, #tpu.memory_space<vmem>>, %arg10: memref<128x128xbf16, #tpu.memory_space<vmem>>, %arg11: memref<1x128xf32, #tpu.memory_space<vmem>>, %arg12: memref<1x128xf32, #tpu.memory_space<vmem>>, %arg13: memref<1x128xf32, #tpu.memory_space<vmem>>, %arg14: memref<1x128x128xf32, #tpu.memory_space<vmem>>, %arg15: memref<256x128xbf16, #tpu.memory_space<vmem>>, %arg16: memref<128x256xbf16, #tpu.memory_space<vmem>>, %arg17: memref<256x128xbf16, #tpu.memory_space<vmem>>) attributes {dimension_semantics = [#tpu.dimension_semantics<parallel>, #tpu.dimension_semantics<arbitrary>], iteration_bounds = array<i64: 2, 2>, scalar_prefetch = 0 : i64, scratch_operands = 3 : i64, tpu.core_type = #tpu.core_type<tc>, window_params = [{transform_indices = @transform_0, window_bounds = array<i64: 1, 256, 128>}, {transform_indices = @transform_1, window_bounds = array<i64: 1, 256, 128>}, {pipeline_mode = #tpu.pipeline_mode<synchronous>, transform_indices = @transform_2, window_bounds = array<i64: 128, 128>}, {pipeline_mode = #tpu.pipeline_mode<synchronous>, transform_indices = @transform_3, window_bounds = array<i64: 1, 128>}, {pipeline_mode = #tpu.pipeline_mode<synchronous>, transform_indices = @transform_4, window_bounds = array<i64: 128, 128>}, {pipeline_mode = #tpu.pipeline_mode<synchronous>, transform_indices = @transform_5, window_bounds = array<i64: 128, 1>}, {pipeline_mode = #tpu.pipeline_mode<synchronous>, transform_indices = @transform_6, window_bounds = array<i64: 128, 128>}, {pipeline_mode = #tpu.pipeline_mode<synchronous>, transform_indices = @transform_7, window_bounds = array<i64: 1, 128>}, {pipeline_mode = #tpu.pipeline_mode<synchronous>, transform_indices = @transform_8, window_bounds = array<i64: 128, 128>}, {pipeline_mode = #tpu.pipeline_mode<synchronous>, transform_indices = @transform_9, window_bounds = array<i64: 1, 128>}, {pipeline_mode = #tpu.pipeline_mode<synchronous>, transform_indices = @transform_10, window_bounds = array<i64: 1, 128>}, {pipeline_mode = #tpu.pipeline_mode<synchronous>, transform_indices = @transform_11, window_bounds = array<i64: 1, 128>}, {transform_indices = @transform_12, window_bounds = array<i64: 1, 128, 128>}]} {
    %c0_i32 = arith.constant 0 : i32
    %0 = arith.cmpi eq, %arg1, %c0_i32 : i32
    %1 = arith.extui %0 : i1 to i32
    %c0_i32_0 = arith.constant 0 : i32
    %2 = arith.cmpi ne, %1, %c0_i32_0 : i32
    scf.if %2 {
      %c0_48 = arith.constant 0 : index
      %c0_49 = arith.constant 0 : index
      %c0_50 = arith.constant 0 : index
      %109 = vector.load %arg2[%c0_48, %c0_49, %c0_50] : memref<1x256x128xf32, #tpu.memory_space<vmem>>, vector<1x256x128xf32>
      %110 = vector.shape_cast %109 : vector<1x256x128xf32> to vector<256x128xf32>
      %c0_51 = arith.constant 0 : index
      %c0_52 = arith.constant 0 : index
      %c0_53 = arith.constant 0 : index
      %111 = vector.load %arg3[%c0_51, %c0_52, %c0_53] : memref<1x256x128xbf16, #tpu.memory_space<vmem>>, vector<1x256x128xbf16>
      %112 = vector.shape_cast %111 : vector<1x256x128xbf16> to vector<256x128xbf16>
      %113 = arith.extf %112 : vector<256x128xbf16> to vector<256x128xf32>
      %114 = arith.addf %110, %113 : vector<256x128xf32>
      %115 = arith.truncf %114 : vector<256x128xf32> to vector<256x128xbf16>
      %c0_54 = arith.constant 0 : index
      %c0_55 = arith.constant 0 : index
      %116 = vector.load %arg4[%c0_54, %c0_55] : memref<128x128xbf16, #tpu.memory_space<vmem>>, vector<128x128xbf16>
      %cst_56 = arith.constant dense<0.000000e+00> : vector<256x128xf32>
      %117 = tpu.matmul %115, %116, %cst_56 {dimension_numbers = #tpu.dot_dimension_numbers<[1], [0], [0], [1], [0, 0, 1, 1], [], []>} : vector<256x128xbf16>, vector<128x128xbf16>, vector<256x128xf32> -> vector<256x128xf32>
      %c0_57 = arith.constant 0 : index
      %c0_58 = arith.constant 0 : index
      %118 = vector.load %arg5[%c0_57, %c0_58] : memref<1x128xf32, #tpu.memory_space<vmem>>, vector<1x128xf32>
      %119 = vector.broadcast %118 : vector<1x128xf32> to vector<256x128xf32>
      %120 = arith.addf %117, %119 : vector<256x128xf32>
      %121 = arith.truncf %120 : vector<256x128xf32> to vector<256x128xbf16>
      %c0_59 = arith.constant 0 : index
      %c0_60 = arith.constant 0 : index
      %122 = vector.load %arg15[%c0_59, %c0_60] : memref<256x128xbf16, #tpu.memory_space<vmem>>, vector<256x128xbf16>
      tpu.vector_store %arg15[%c0_59, %c0_60], %121 {strides = array<i32>} : memref<256x128xbf16, #tpu.memory_space<vmem>>, vector<256x128xbf16>,
      %123 = tpu.transpose %114, [1, 0] : vector<256x128xf32> -> vector<128x256xf32>
      %124 = arith.truncf %123 : vector<128x256xf32> to vector<128x256xbf16>
      %c0_61 = arith.constant 0 : index
      %c0_62 = arith.constant 0 : index
      %125 = vector.load %arg6[%c0_61, %c0_62] : memref<128x128xbf16, #tpu.memory_space<vmem>>, vector<128x128xbf16>
      %cst_63 = arith.constant dense<0.000000e+00> : vector<128x256xf32>
      %126 = tpu.matmul %125, %124, %cst_63 {dimension_numbers = #tpu.dot_dimension_numbers<[1], [0], [0], [1], [0, 0, 1, 1], [], []>} : vector<128x128xbf16>, vector<128x256xbf16>, vector<128x256xf32> -> vector<128x256xf32>
      %c0_64 = arith.constant 0 : index
      %c0_65 = arith.constant 0 : index
      %127 = vector.load %arg7[%c0_64, %c0_65] : memref<128x1xf32, #tpu.memory_space<vmem>>, vector<128x1xf32>
      %128 = vector.broadcast %127 : vector<128x1xf32> to vector<128x256xf32>
      %129 = arith.addf %126, %128 : vector<128x256xf32>
      %130 = arith.truncf %129 : vector<128x256xf32> to vector<128x256xbf16>
      %c0_66 = arith.constant 0 : index
      %c0_67 = arith.constant 0 : index
      %131 = vector.load %arg16[%c0_66, %c0_67] : memref<128x256xbf16, #tpu.memory_space<vmem>>, vector<128x256xbf16>
      tpu.vector_store %arg16[%c0_66, %c0_67], %130 {strides = array<i32>} : memref<128x256xbf16, #tpu.memory_space<vmem>>, vector<128x256xbf16>,
      %132 = arith.truncf %110 : vector<256x128xf32> to vector<256x128xbf16>
      %c0_68 = arith.constant 0 : index
      %c0_69 = arith.constant 0 : index
      %133 = vector.load %arg8[%c0_68, %c0_69] : memref<128x128xbf16, #tpu.memory_space<vmem>>, vector<128x128xbf16>
      %cst_70 = arith.constant dense<0.000000e+00> : vector<256x128xf32>
      %134 = tpu.matmul %132, %133, %cst_70 {dimension_numbers = #tpu.dot_dimension_numbers<[1], [0], [0], [1], [0, 0, 1, 1], [], []>} : vector<256x128xbf16>, vector<128x128xbf16>, vector<256x128xf32> -> vector<256x128xf32>
      %c0_71 = arith.constant 0 : index
      %c0_72 = arith.constant 0 : index
      %135 = vector.load %arg9[%c0_71, %c0_72] : memref<1x128xf32, #tpu.memory_space<vmem>>, vector<1x128xf32>
      %136 = vector.broadcast %135 : vector<1x128xf32> to vector<256x128xf32>
      %137 = arith.addf %134, %136 : vector<256x128xf32>
      %138 = arith.truncf %137 : vector<256x128xf32> to vector<256x128xbf16>
      %c0_73 = arith.constant 0 : index
      %c0_74 = arith.constant 0 : index
      %139 = vector.load %arg17[%c0_73, %c0_74] : memref<256x128xbf16, #tpu.memory_space<vmem>>, vector<256x128xbf16>
      tpu.vector_store %arg17[%c0_73, %c0_74], %138 {strides = array<i32>} : memref<256x128xbf16, #tpu.memory_space<vmem>>, vector<256x128xbf16>,
    } else {
    }
    %c128_i32 = arith.constant 128 : i32
    %3 = arith.muli %arg1, %c128_i32 : i32
    %4 = tpu.assume_multiple %3, 128 : i32
    %5 = arith.index_cast %4 : i32 to index
    %c0 = arith.constant 0 : index
    %6 = vector.load %arg15[%5, %c0] : memref<256x128xbf16, #tpu.memory_space<vmem>>, vector<128x128xbf16>
    %7 = vector.extract_strided_slice %6 {offsets = [0, 0], sizes = [128, 32], strides = [1, 1]} : vector<128x128xbf16> to vector<128x32xbf16>
    %c0_1 = arith.constant 0 : index
    %c0_2 = arith.constant 0 : index
    %8 = vector.load %arg16[%c0_1, %c0_2] : memref<128x256xbf16, #tpu.memory_space<vmem>>, vector<32x256xbf16>
    %cst = arith.constant dense<0.000000e+00> : vector<128x256xf32>
    %9 = tpu.matmul %7, %8, %cst {dimension_numbers = #tpu.dot_dimension_numbers<[1], [0], [0], [1], [0, 0, 1, 1], [], []>} : vector<128x32xbf16>, vector<32x256xbf16>, vector<128x256xf32> -> vector<128x256xf32>
    %cst_3 = arith.constant dense<0xFF800000> : vector<128xf32>
    %10 = vector.multi_reduction <maximumf>, %9, %cst_3 [1] : vector<128x256xf32> to vector<128xf32>
    %11 = vector.shape_cast %10 : vector<128xf32> to vector<128x1xf32>
    %12 = vector.broadcast %11 : vector<128x1xf32> to vector<128x256xf32>
    %13 = arith.subf %9, %12 : vector<128x256xf32>
    %14 = math.exp %13 : vector<128x256xf32>
    %cst_4 = arith.constant dense<0.000000e+00> : vector<128xf32>
    %15 = vector.multi_reduction <add>, %14, %cst_4 [1] : vector<128x256xf32> to vector<128xf32>
    %16 = vector.shape_cast %15 : vector<128xf32> to vector<128x1xf32>
    %c0_5 = arith.constant 0 : index
    %c0_6 = arith.constant 0 : index
    %17 = vector.load %arg17[%c0_5, %c0_6] : memref<256x128xbf16, #tpu.memory_space<vmem>>, vector<256x32xbf16>
    %18 = arith.truncf %14 : vector<128x256xf32> to vector<128x256xbf16>
    %cst_7 = arith.constant dense<0.000000e+00> : vector<128x32xf32>
    %19 = tpu.matmul %18, %17, %cst_7 {dimension_numbers = #tpu.dot_dimension_numbers<[1], [0], [0], [1], [0, 0, 1, 1], [], []>} : vector<128x256xbf16>, vector<256x32xbf16>, vector<128x32xf32> -> vector<128x32xf32>
    %20 = tpu.reciprocal %16 : vector<128x1xf32> -> vector<128x1xf32>
    %21 = vector.broadcast %20 : vector<128x1xf32> to vector<128x32xf32>
    %22 = arith.mulf %19, %21 : vector<128x32xf32>
    %23 = vector.extract_strided_slice %6 {offsets = [0, 32], sizes = [128, 32], strides = [1, 1]} : vector<128x128xbf16> to vector<128x32xbf16>
    %c32 = arith.constant 32 : index
    %c0_8 = arith.constant 0 : index
    %24 = vector.load %arg16[%c32, %c0_8] : memref<128x256xbf16, #tpu.memory_space<vmem>>, vector<32x256xbf16>
    %cst_9 = arith.constant dense<0.000000e+00> : vector<128x256xf32>
    %25 = tpu.matmul %23, %24, %cst_9 {dimension_numbers = #tpu.dot_dimension_numbers<[1], [0], [0], [1], [0, 0, 1, 1], [], []>} : vector<128x32xbf16>, vector<32x256xbf16>, vector<128x256xf32> -> vector<128x256xf32>
    %cst_10 = arith.constant dense<0xFF800000> : vector<128xf32>
    %26 = vector.multi_reduction <maximumf>, %25, %cst_10 [1] : vector<128x256xf32> to vector<128xf32>
    %27 = vector.shape_cast %26 : vector<128xf32> to vector<128x1xf32>
    %28 = vector.broadcast %27 : vector<128x1xf32> to vector<128x256xf32>
    %29 = arith.subf %25, %28 : vector<128x256xf32>
    %30 = math.exp %29 : vector<128x256xf32>
    %cst_11 = arith.constant dense<0.000000e+00> : vector<128xf32>
    %31 = vector.multi_reduction <add>, %30, %cst_11 [1] : vector<128x256xf32> to vector<128xf32>
    %32 = vector.shape_cast %31 : vector<128xf32> to vector<128x1xf32>
    %c0_12 = arith.constant 0 : index
    %c32_13 = arith.constant 32 : index
    %33 = vector.load %arg17[%c0_12, %c32_13] : memref<256x128xbf16, #tpu.memory_space<vmem>>, vector<256x32xbf16>
    %34 = arith.truncf %30 : vector<128x256xf32> to vector<128x256xbf16>
    %cst_14 = arith.constant dense<0.000000e+00> : vector<128x32xf32>
    %35 = tpu.matmul %34, %33, %cst_14 {dimension_numbers = #tpu.dot_dimension_numbers<[1], [0], [0], [1], [0, 0, 1, 1], [], []>} : vector<128x256xbf16>, vector<256x32xbf16>, vector<128x32xf32> -> vector<128x32xf32>
    %36 = tpu.reciprocal %32 : vector<128x1xf32> -> vector<128x1xf32>
    %37 = vector.broadcast %36 : vector<128x1xf32> to vector<128x32xf32>
    %38 = arith.mulf %35, %37 : vector<128x32xf32>
    %39 = vector.extract_strided_slice %6 {offsets = [0, 64], sizes = [128, 32], strides = [1, 1]} : vector<128x128xbf16> to vector<128x32xbf16>
    %c64 = arith.constant 64 : index
    %c0_15 = arith.constant 0 : index
    %40 = vector.load %arg16[%c64, %c0_15] : memref<128x256xbf16, #tpu.memory_space<vmem>>, vector<32x256xbf16>
    %cst_16 = arith.constant dense<0.000000e+00> : vector<128x256xf32>
    %41 = tpu.matmul %39, %40, %cst_16 {dimension_numbers = #tpu.dot_dimension_numbers<[1], [0], [0], [1], [0, 0, 1, 1], [], []>} : vector<128x32xbf16>, vector<32x256xbf16>, vector<128x256xf32> -> vector<128x256xf32>
    %cst_17 = arith.constant dense<0xFF800000> : vector<128xf32>
    %42 = vector.multi_reduction <maximumf>, %41, %cst_17 [1] : vector<128x256xf32> to vector<128xf32>
    %43 = vector.shape_cast %42 : vector<128xf32> to vector<128x1xf32>
    %44 = vector.broadcast %43 : vector<128x1xf32> to vector<128x256xf32>
    %45 = arith.subf %41, %44 : vector<128x256xf32>
    %46 = math.exp %45 : vector<128x256xf32>
    %cst_18 = arith.constant dense<0.000000e+00> : vector<128xf32>
    %47 = vector.multi_reduction <add>, %46, %cst_18 [1] : vector<128x256xf32> to vector<128xf32>
    %48 = vector.shape_cast %47 : vector<128xf32> to vector<128x1xf32>
    %c0_19 = arith.constant 0 : index
    %c64_20 = arith.constant 64 : index
    %49 = vector.load %arg17[%c0_19, %c64_20] : memref<256x128xbf16, #tpu.memory_space<vmem>>, vector<256x32xbf16>
    %50 = arith.truncf %46 : vector<128x256xf32> to vector<128x256xbf16>
    %cst_21 = arith.constant dense<0.000000e+00> : vector<128x32xf32>
    %51 = tpu.matmul %50, %49, %cst_21 {dimension_numbers = #tpu.dot_dimension_numbers<[1], [0], [0], [1], [0, 0, 1, 1], [], []>} : vector<128x256xbf16>, vector<256x32xbf16>, vector<128x32xf32> -> vector<128x32xf32>
    %52 = tpu.reciprocal %48 : vector<128x1xf32> -> vector<128x1xf32>
    %53 = vector.broadcast %52 : vector<128x1xf32> to vector<128x32xf32>
    %54 = arith.mulf %51, %53 : vector<128x32xf32>
    %55 = vector.extract_strided_slice %6 {offsets = [0, 96], sizes = [128, 32], strides = [1, 1]} : vector<128x128xbf16> to vector<128x32xbf16>
    %c96 = arith.constant 96 : index
    %c0_22 = arith.constant 0 : index
    %56 = vector.load %arg16[%c96, %c0_22] : memref<128x256xbf16, #tpu.memory_space<vmem>>, vector<32x256xbf16>
    %cst_23 = arith.constant dense<0.000000e+00> : vector<128x256xf32>
    %57 = tpu.matmul %55, %56, %cst_23 {dimension_numbers = #tpu.dot_dimension_numbers<[1], [0], [0], [1], [0, 0, 1, 1], [], []>} : vector<128x32xbf16>, vector<32x256xbf16>, vector<128x256xf32> -> vector<128x256xf32>
    %cst_24 = arith.constant dense<0xFF800000> : vector<128xf32>
    %58 = vector.multi_reduction <maximumf>, %57, %cst_24 [1] : vector<128x256xf32> to vector<128xf32>
    %59 = vector.shape_cast %58 : vector<128xf32> to vector<128x1xf32>
    %60 = vector.broadcast %59 : vector<128x1xf32> to vector<128x256xf32>
    %61 = arith.subf %57, %60 : vector<128x256xf32>
    %62 = math.exp %61 : vector<128x256xf32>
    %cst_25 = arith.constant dense<0.000000e+00> : vector<128xf32>
    %63 = vector.multi_reduction <add>, %62, %cst_25 [1] : vector<128x256xf32> to vector<128xf32>
    %64 = vector.shape_cast %63 : vector<128xf32> to vector<128x1xf32>
    %c0_26 = arith.constant 0 : index
    %c96_27 = arith.constant 96 : index
    %65 = vector.load %arg17[%c0_26, %c96_27] : memref<256x128xbf16, #tpu.memory_space<vmem>>, vector<256x32xbf16>
    %66 = arith.truncf %62 : vector<128x256xf32> to vector<128x256xbf16>
    %cst_28 = arith.constant dense<0.000000e+00> : vector<128x32xf32>
    %67 = tpu.matmul %66, %65, %cst_28 {dimension_numbers = #tpu.dot_dimension_numbers<[1], [0], [0], [1], [0, 0, 1, 1], [], []>} : vector<128x256xbf16>, vector<256x32xbf16>, vector<128x32xf32> -> vector<128x32xf32>
    %68 = tpu.reciprocal %64 : vector<128x1xf32> -> vector<128x1xf32>
    %69 = vector.broadcast %68 : vector<128x1xf32> to vector<128x32xf32>
    %70 = arith.mulf %67, %69 : vector<128x32xf32>
    %71 = tpu.concatenate %22, %38, %54, %70 in 1 : vector<128x32xf32>, vector<128x32xf32>, vector<128x32xf32>, vector<128x32xf32> -> vector<128x128xf32>
    %72 = arith.truncf %71 : vector<128x128xf32> to vector<128x128xbf16>
    %c0_29 = arith.constant 0 : index
    %c0_30 = arith.constant 0 : index
    %73 = vector.load %arg10[%c0_29, %c0_30] : memref<128x128xbf16, #tpu.memory_space<vmem>>, vector<128x128xbf16>
    %cst_31 = arith.constant dense<0.000000e+00> : vector<128x128xf32>
    %74 = tpu.matmul %72, %73, %cst_31 {dimension_numbers = #tpu.dot_dimension_numbers<[1], [0], [0], [1], [0, 0, 1, 1], [], []>} : vector<128x128xbf16>, vector<128x128xbf16>, vector<128x128xf32> -> vector<128x128xf32>
    %c0_32 = arith.constant 0 : index
    %c0_33 = arith.constant 0 : index
    %75 = vector.load %arg11[%c0_32, %c0_33] : memref<1x128xf32, #tpu.memory_space<vmem>>, vector<1x128xf32>
    %76 = vector.broadcast %75 : vector<1x128xf32> to vector<128x128xf32>
    %77 = arith.addf %74, %76 : vector<128x128xf32>
    %c0_34 = arith.constant 0 : index
    %78 = arith.index_cast %4 : i32 to index
    %c0_35 = arith.constant 0 : index
    %79 = vector.load %arg2[%c0_34, %78, %c0_35] : memref<1x256x128xf32, #tpu.memory_space<vmem>>, vector<1x128x128xf32>
    %80 = vector.shape_cast %79 : vector<1x128x128xf32> to vector<128x128xf32>
    %81 = arith.addf %80, %77 : vector<128x128xf32>
    %cst_36 = arith.constant dense<0.000000e+00> : vector<128xf32>
    %82 = vector.multi_reduction <add>, %81, %cst_36 [1] : vector<128x128xf32> to vector<128xf32>
    %83 = vector.shape_cast %82 : vector<128xf32> to vector<128x1xf32>
    %cst_37 = arith.constant 1.280000e+02 : f32
    %84 = vector.broadcast %cst_37 : f32 to vector<128x1xf32>
    %85 = arith.divf %83, %84 : vector<128x1xf32>
    %86 = vector.broadcast %85 : vector<128x1xf32> to vector<128x128xf32>
    %87 = arith.subf %81, %86 : vector<128x128xf32>
    %88 = arith.mulf %87, %87 : vector<128x128xf32>
    %cst_38 = arith.constant dense<0.000000e+00> : vector<128xf32>
    %89 = vector.multi_reduction <add>, %88, %cst_38 [1] : vector<128x128xf32> to vector<128xf32>
    %90 = vector.shape_cast %89 : vector<128xf32> to vector<128x1xf32>
    %cst_39 = arith.constant 1.280000e+02 : f32
    %91 = vector.broadcast %cst_39 : f32 to vector<128x1xf32>
    %92 = arith.divf %90, %91 : vector<128x1xf32>
    %93 = vector.broadcast %85 : vector<128x1xf32> to vector<128x128xf32>
    %94 = arith.subf %81, %93 : vector<128x128xf32>
    %cst_40 = arith.constant 9.99999974E-6 : f32
    %95 = vector.broadcast %cst_40 : f32 to vector<128x1xf32>
    %96 = arith.addf %92, %95 : vector<128x1xf32>
    %97 = math.rsqrt %96 : vector<128x1xf32>
    %98 = vector.broadcast %97 : vector<128x1xf32> to vector<128x128xf32>
    %99 = arith.mulf %94, %98 : vector<128x128xf32>
    %c0_41 = arith.constant 0 : index
    %c0_42 = arith.constant 0 : index
    %100 = vector.load %arg12[%c0_41, %c0_42] : memref<1x128xf32, #tpu.memory_space<vmem>>, vector<1x128xf32>
    %101 = vector.broadcast %100 : vector<1x128xf32> to vector<128x128xf32>
    %102 = arith.mulf %99, %101 : vector<128x128xf32>
    %c0_43 = arith.constant 0 : index
    %c0_44 = arith.constant 0 : index
    %103 = vector.load %arg13[%c0_43, %c0_44] : memref<1x128xf32, #tpu.memory_space<vmem>>, vector<1x128xf32>
    %104 = vector.broadcast %103 : vector<1x128xf32> to vector<128x128xf32>
    %105 = arith.addf %102, %104 : vector<128x128xf32>
    %c0_45 = arith.constant 0 : index
    %c0_46 = arith.constant 0 : index
    %c0_47 = arith.constant 0 : index
    %106 = vector.load %arg14[%c0_45, %c0_46, %c0_47] : memref<1x128x128xf32, #tpu.memory_space<vmem>>, vector<1x128x128xf32>
    %107 = vector.shape_cast %106 : vector<1x128x128xf32> to vector<128x128xf32>
    %108 = vector.shape_cast %105 : vector<128x128xf32> to vector<1x128x128xf32>
    tpu.vector_store %arg14[%c0_45, %c0_46, %c0_47], %108 {strides = array<i32>} : memref<1x128x128xf32, #tpu.memory_space<vmem>>, vector<1x128x128xf32>,
    return
  }
  func.func @transform_0(%arg0: i32, %arg1: i32) -> (i32, i32, i32) {
    %c0_i32 = arith.constant 0 : i32
    %c0_i32_0 = arith.constant 0 : i32
    %c0_i32_1 = arith.constant 0 : i32
    return %arg0, %c0_i32, %c0_i32_0 : i32, i32, i32
  }
  func.func @transform_1(%arg0: i32, %arg1: i32) -> (i32, i32, i32) {
    %c0_i32 = arith.constant 0 : i32
    %c0_i32_0 = arith.constant 0 : i32
    %c0_i32_1 = arith.constant 0 : i32
    return %arg0, %c0_i32, %c0_i32_0 : i32, i32, i32
  }
  func.func @transform_2(%arg0: i32, %arg1: i32) -> (i32, i32) {
    %c0_i32 = arith.constant 0 : i32
    %c0_i32_0 = arith.constant 0 : i32
    %c0_i32_1 = arith.constant 0 : i32
    return %c0_i32, %c0_i32_0 : i32, i32
  }
  func.func @transform_3(%arg0: i32, %arg1: i32) -> (i32, i32) {
    %c0_i32 = arith.constant 0 : i32
    %c0_i32_0 = arith.constant 0 : i32
    %c0_i32_1 = arith.constant 0 : i32
    return %c0_i32, %c0_i32_0 : i32, i32
  }
  func.func @transform_4(%arg0: i32, %arg1: i32) -> (i32, i32) {
    %c0_i32 = arith.constant 0 : i32
    %c0_i32_0 = arith.constant 0 : i32
    %c0_i32_1 = arith.constant 0 : i32
    return %c0_i32, %c0_i32_0 : i32, i32
  }
  func.func @transform_5(%arg0: i32, %arg1: i32) -> (i32, i32) {
    %c0_i32 = arith.constant 0 : i32
    %c0_i32_0 = arith.constant 0 : i32
    %c0_i32_1 = arith.constant 0 : i32
    return %c0_i32, %c0_i32_0 : i32, i32
  }
  func.func @transform_6(%arg0: i32, %arg1: i32) -> (i32, i32) {
    %c0_i32 = arith.constant 0 : i32
    %c0_i32_0 = arith.constant 0 : i32
    %c0_i32_1 = arith.constant 0 : i32
    return %c0_i32, %c0_i32_0 : i32, i32
  }
  func.func @transform_7(%arg0: i32, %arg1: i32) -> (i32, i32) {
    %c0_i32 = arith.constant 0 : i32
    %c0_i32_0 = arith.constant 0 : i32
    %c0_i32_1 = arith.constant 0 : i32
    return %c0_i32, %c0_i32_0 : i32, i32
  }
  func.func @transform_8(%arg0: i32, %arg1: i32) -> (i32, i32) {
    %c0_i32 = arith.constant 0 : i32
    %c0_i32_0 = arith.constant 0 : i32
    %c0_i32_1 = arith.constant 0 : i32
    return %c0_i32, %c0_i32_0 : i32, i32
  }
  func.func @transform_9(%arg0: i32, %arg1: i32) -> (i32, i32) {
    %c0_i32 = arith.constant 0 : i32
    %c0_i32_0 = arith.constant 0 : i32
    %c0_i32_1 = arith.constant 0 : i32
    return %c0_i32, %c0_i32_0 : i32, i32
  }
  func.func @transform_10(%arg0: i32, %arg1: i32) -> (i32, i32) {
    %c0_i32 = arith.constant 0 : i32
    %c0_i32_0 = arith.constant 0 : i32
    %c0_i32_1 = arith.constant 0 : i32
    return %c0_i32, %c0_i32_0 : i32, i32
  }
  func.func @transform_11(%arg0: i32, %arg1: i32) -> (i32, i32) {
    %c0_i32 = arith.constant 0 : i32
    %c0_i32_0 = arith.constant 0 : i32
    %c0_i32_1 = arith.constant 0 : i32
    return %c0_i32, %c0_i32_0 : i32, i32
  }
  func.func @transform_12(%arg0: i32, %arg1: i32) -> (i32, i32, i32) {
    %c0_i32 = arith.constant 0 : i32
    %c0_i32_0 = arith.constant 0 : i32
    return %arg0, %arg1, %c0_i32 : i32, i32, i32
  }
}

</mosaic_0001>

<bundles_post_ra>
// kernel: tpu_custom_call.1
= control target key start
LH: loop header
LB: loop body
LE: loop exit
PB: predicated region body
PF: predicated region fallthrough
CT: control target
= control target key end

     0   :  { %s11165_s0 = inlined_call_operand.hbm [shape: f32[2,256,128], index: 0, kind: input, shape index: {}]   ;;  %s11166_s1 = inlined_call_operand.hbm [shape: bf16[2,256,128], index: 1, kind: input, shape index: {}]   ;;  %s11167_s2 = inlined_call_operand.vmem [shape: bf16[128,128], index: 2, kind: input, shape index: {}]   ;;  %s11168_s3 = inlined_call_operand.vmem [shape: f32[1,128], index: 3, kind: input, shape index: {}]   ;;  %s11169_s4 = inlined_call_operand.vmem [shape: bf16[128,128], index: 4, kind: input, shape index: {}]   ;;  %s11170_s5 = inlined_call_operand.vmem [shape: f32[128,1], index: 5, kind: input, shape index: {}]   ;;  %s11171_s6 = inlined_call_operand.hbm [shape: bf16[128,128], index: 6, kind: input, shape index: {}]   ;;  %s11172_s7 = inlined_call_operand.vmem [shape: f32[1,128], index: 7, kind: input, shape index: {}]   ;;  %s11173_s8 = inlined_call_operand.hbm [shape: bf16[128,128], index: 8, kind: input, shape index: {}]   ;;  %s11174_s9 = inlined_call_operand.vmem [shape: f32[1,128], index: 9, kind: input, shape index: {}]   ;;  %s11175_s10 = inlined_call_operand.vmem [shape: f32[1,128], index: 10, kind: input, shape index: {}]   ;;  %s11176_s11 = inlined_call_operand.vmem [shape: f32[1,128], index: 11, kind: input, shape index: {}]   ;;  %s11177_s12 = inlined_call_operand.hbm [shape: f32[2,256,128], index: 12, kind: output, shape index: {}]  }
   0x1   :  { %11261 = sst [smem:[#allocation168_spill]] %s11165_s0 }
   0x2   :  { %11262 = sst [smem:[#allocation169_spill]] %s11168_s3 }
   0x3   :  { %11263 = sst [smem:[#allocation170_spill]] %s11169_s4 }
   0x4   :  { %11264 = sst [smem:[#allocation171_spill]] %s11170_s5 }
   0x5   :  { %11265 = sst [smem:[#allocation172_spill]] %s11171_s6 }
   0x6   :  { %11266 = sst [smem:[#allocation173_spill]] %s11172_s7 }
   0x7   :  { %11267 = sst [smem:[#allocation174_spill]] %s11173_s8 }
   0x8   :  { %11268 = sst [smem:[#allocation175_spill]] %s11174_s9 }
   0x9   :  { %11269 = sst [smem:[#allocation176_spill]] %s11175_s10 }
   0xa   :  { %11270 = sst [smem:[#allocation177_spill]] %s11176_s11 }
   0xb   :  { %11271 = sst [smem:[#allocation178_spill]] %s11177_s12 }
   0xc   :  { %17 = vsyncpa [#allocation6], 0 }
   0xd   :  { %19 = vsyncpa [#allocation6 + $0x1], 0 }
   0xe   :  { %20 = vsyncpa [#allocation9], 0 }
   0xf   :  { %22 = vsyncpa [#allocation9 + $0x1], 0 }
  0x10   :  { %23 = vsyncpa [#allocation12], 0 }
  0x11   :  { %24 = vsyncpa [#allocation7], 0 }
  0x12   :  { %26 = vsyncpa [#allocation7 + $0x1], 0  ;;  %s7370_s21 = smov 0   ;;  %s7372_s22 = smov 0  }
  0x13   :  { %s7374_s23 = smov 0   ;;  %s7376_s24 = smov 0  }
  0x14   :  { %s7378_s25 = smov 0   ;;  %s7380_s26 = smov 0  }
  0x15   :  { %s7382_s27 = smov 0   ;;  %s7384_s28 = smov 0  }
  0x16   :  { %s7386_s29 = smov 0   ;;  %s7388_s30 = smov 0  }
  0x17   :  { %s7390_s13 = smov 0  }
  0x18 LB: > { %11272 = sst [smem:[#allocation19_spill]] %s7250_s21  ;;  %s7424_s14 = sadd.s32 4294967295, %s7290_s13   ;;  %s7290_s13 = sphi %s7390_s13, %s32_s13   ;;  %s7286_s30 = sphi %s7388_s30, %s11727_s30   ;;  %s7282_s29 = sphi %s7386_s29, %s11718_s29   ;;  %s7278_s28 = sphi %s7384_s28, %s11726_s28   ;;  %s7274_s27 = sphi %s7382_s27, %s11725_s27   ;;  %s7270_s26 = sphi %s7380_s26, %s11716_s26   ;;  %s7266_s25 = sphi %s7378_s25, %s11724_s25   ;;  %s7262_s24 = sphi %s7376_s24, %s11723_s24   ;;  %s7258_s23 = sphi %s7374_s23, %s11722_s23   ;;  %s7254_s22 = sphi %s7372_s22, %s11721_s22   ;;  %s7250_s21 = sphi %s7370_s21, %s11720_s21  }
  0x19   : > { %11273 = sst [smem:[#allocation20_spill]] %s7270_s26  ;;  %s5586_s15 = sadd.s32 4294967294, %s7290_s13  }
  0x1a   : > { %11274 = sst [smem:[#allocation21_spill]] %s7278_s28  ;;  %p64_p0 = scmp.ne.s32.totalorder %s7266_s25, %s7262_s24 }
  0x1b   : > { %11275 = sst [smem:[#allocation22_spill]] %s7282_s29  ;;  %p65_p1 = scmp.eq.s32.totalorder %s7424_s14, 0 }
  0x1c   : > { %p325_p2 = scmp.ne.s32.totalorder %s7258_s23, %s7254_s22  ;;  %p326_p4 = scmp.eq.s32.totalorder %s7424_s14, 3 }
  0x1d   : > { %p7434_p3 = por %p65_p1, %p64_p0  ;;  %p331_p5 = scmp.ne.s32.totalorder %s7254_s22, %s7250_s21 }
  0x1e   : > { %p332_p6 = scmp.eq.s32.totalorder %s5586_s15, 3  ;;  %p7441_p7 = por %p326_p4, %p325_p2 }
  0x1f   : > { %p5587_p8 = scmp.ge.s32.totalorder %s7290_s13, 1  ;;  %p339_p10 = scmp.lt.s32.totalorder %s7290_s13, 5 }
  0x20   : > { %s11277_s18 = scalar_select %p7441_p7, 1, 0 }
  0x21   : > { %p7446_p9 = por %p332_p6, %p331_p5  ;;  %s11281_s6 = sld [smem:[#allocation172_spill]] }
  0x22   : > { %11278 = sst [smem:[#allocation23_spill]] %s11277_s18  ;;  %p7454_p11 = pnand %p5587_p8, %p339_p10 }
  0x23   : > { %s11279_s19 = scalar_select %p7446_p9, 1, 0 }
  0x24   : > { %p6343_p12 = pneg %p7454_p11  ;;  %s7292_s15 = smov [#allocation10]  }
  0x25   : > { %11280 = sst [smem:[#allocation24_spill]] %s11279_s19  ;;  %s364_s21 = sshll.u32 %s7292_s15, 4  ;;  %s365_s21 = int_to_ptr.vmem [resolvable:$true] %s364_s21 }
  0x26   : > { %p6344_p13 = pnand %p6343_p12, %p65_p1  ;;  %s11283_s8 = sld [smem:[#allocation174_spill]] }
  0x27   : > { %s362_s16 = sshll.u32 %s11281_s6, 4  ;;  %s11183_s19 = smov 64   ;;  %s363_s16 = int_to_ptr.hbm [resolvable:$true] %s362_s16 }
  0x28   : > { %s11184_s18 = smov 4   ;;  %s7295_s15 = smov [#allocation11]  }
  0x29   : > { %6346 = dma.hbm_to_vmem [thread:$0]  (!%p6344_p13), %s363_s16, 1024, %s365_s21, [#allocation9], %s11183_s19, %s11183_s19, %s11184_s18  }
  0x2a   : > { %s381_s28 = sshll.u32 %s7295_s15, 4  ;;  %s41_s20 = sadd.s32 1, %s7282_s29  ;;  %s382_s28 = int_to_ptr.vmem [resolvable:$true] %s381_s28 }
  0x2b   : > { %s44_s24 = sadd.s32 1, %s7286_s30  ;;  %p42_p0 = scmp.ge.s32.totalorder %s41_s20, 2 }
  0x2c   : > { %s379_s6 = sshll.u32 %s11283_s8, 4  ;;  %s51_s8 = sadd.s32 1, %s7270_s26  ;;  %s380_s6 = int_to_ptr.hbm [resolvable:$true] %s379_s6 }
  0x2d   : > { %6349 = dma.hbm_to_vmem [thread:$0]  (!%p6344_p13), %s380_s6, 1024, %s382_s28, [#allocation12], %s11183_s19, %s11183_s19, %s11184_s18  }
  0x2e   : > { %p58_p2 = scmp.ne.s32.totalorder %s7270_s26, %s7266_s25  ;;  %p59_p4 = scmp.eq.s32.totalorder %s7290_s13, 0 }
  0x2f   : > { %s11729_s20 = smov (%p42_p0, %s41_s20), 0  ;;  %s11731_s24 = smov (!%p42_p0, %s44_s24), %s7286_s30 }
  0x30   : > { %11284 = sst [smem:[#allocation25_spill]] %s11729_s20  ;;  %p7480_p5 = por %p59_p4, %p58_p2 }
  0x31   : > { %s311_s16 = ssub.s32 %s7282_s29, %s11729_s20  ;;  %p46_p6 = scmp.ge.s32.totalorder %s11731_s24, 2 }
  0x32   : > { %p6363_p8 = scmp.lt.s32.totalorder %s7290_s13, 4  ;;  %s404_s6 = sand.u32 1, %s7270_s26  }
  0x33   : > { %s5964_s28 = sshll.u32 %s7286_s30, 8  ;;  %s11733_s24 = smov (%p46_p6, %s11731_s24), 0 }
  0x34   : > { %11286 = sst [smem:[#allocation26_spill]] %s11733_s24  ;;  %s5591_s15 = sshll.u32 %s404_s6, 8 }
  0x35   : > { %s48_s19 = ssub.s32 %s7286_s30, %s11733_s24  ;;  %s11287_s0 = sld [smem:[#allocation168_spill]] }
  0x36   : > { %p49_p10 = scmp.eq.s32.totalorder %s48_s19, 0  ;;  %s312_s18 = sor.u32 %s311_s16, %s48_s19 }
  0x37   : > { %p313_p12 = scmp.eq.s32.totalorder %s312_s18, 0  ;;  %s11289_s9 = sadd.s32 1, %s7258_s23 }
  0x38   : > { %s7497_s29 = scalar_select %p49_p10, %s7270_s26, %s51_s8  }
  0x39   : > { %s7502_s7 = scalar_select %p313_p12, %s7258_s23, %s11289_s9  }
  0x3a   : > { %11288 = sst [smem:[#allocation27_spill]] %s7497_s29  ;;  %s408_s4 = scalar_lea.vmem [#allocation5], %s5591_s15 }
  0x3b   : > { %s413_s20 = scalar_lea.hbm %s11287_s0, %s5964_s28  ;;  %s416_s5 = sshll.u32 %s408_s4, 4  ;;  %s417_s5 = int_to_ptr.vmem [resolvable:$true] %s416_s5 }
  0x3c   : > { %s414_s3 = sshll.u32 %s413_s20, 4  ;;  %p7508_p13 = pnand %p6363_p8, %p7480_p5  ;;  %s415_s3 = int_to_ptr.hbm [resolvable:$true] %s414_s3 }
  0x3d   : > { %s426_s10 = sand.u32 1, %s7290_s13   ;;  %s405_s11 = scalar_lea.sflag [#allocation6], %s404_s6 }
  0x3e   : > { %s7296_s8 = smov 128   ;;  %s7297_s18 = smov 8  }
  0x3f   : > { %6353 = dma.hbm_to_vmem [thread:$0]  (!%p7508_p13), %s415_s3, 4096, %s417_s5, %s405_s11, %s7296_s8, %s7296_s8, %s7297_s18  }
  0x40   : > { %s5594_s9 = sshll.u32 %s404_s6, 7  ;;  %s5965_s20 = sshll.u32 %s7286_s30, 7 }
  0x41   : > { %s435_s28 = scalar_lea.hbm %s11166_s1, %s5965_s20  ;;  %s430_s15 = scalar_lea.vmem [#allocation8], %s5594_s9 }
  0x42   : > { %s436_s21 = sshll.u32 %s435_s28, 4  ;;  %s438_s0 = sshll.u32 %s430_s15, 4  ;;  %s437_s21 = int_to_ptr.hbm [resolvable:$true] %s436_s21  ;;  %s439_s0 = int_to_ptr.vmem [resolvable:$true] %s438_s0 }
  0x43   : > { %s427_s24 = scalar_lea.sflag [#allocation9], %s426_s10  ;;  %s11291_s29 = smov 4  }
  0x44   : > { %s11292_s26 = smov 64   ;;  %450 = sbr.rel (%p7454_p11) target bundleno = 2759 (0xac7), region = 68 }
  0x45   : > { %6356 = dma.hbm_to_vmem [thread:$0]  (!%p7508_p13), %s437_s21, 2048, %s439_s0, %s427_s24, %s11292_s26, %s11292_s26, %s11291_s29  }
  0x49   : > { %s452_s3 = sand.u32 1, %s7266_s25  }
  0x4a   : > { %s5598_s5 = sshll.u32 %s452_s3, 8  ;;  %s453_s6 = scalar_lea.sflag [#allocation6], %s452_s3 }
  0x4b   : > { %s7527_s11 = scalar_lea.vmem [#allocation5], %s5598_s5 }
  0x4c   : > { %7229 = dma.done.wait (%p7434_p3), %s453_s6, 4096  }
  0x4d   : > { %7231 = vsyncadd (%p7434_p3), %s453_s6, 4294963200  ;;  %s462_s19 = sand.u32 1, %s7424_s14   ;;  %s5599_s10 = sshll.u32 %s452_s3, 7 }
  0x4e   : > { %s463_s0 = scalar_lea.sflag [#allocation9], %s462_s19  ;;  %s7534_s26 = scalar_lea.vmem [#allocation8], %s5599_s10 }
  0x4f   : > { %7233 = dma.done.wait (%p7434_p3), %s463_s0, 2048  }
  0x50   : > { %7235 = vsyncadd (%p7434_p3), %s463_s0, 4294965248 }
  0x51   : > { %7237 = dma.done.wait (%p65_p1), [#allocation9], 1024  }
  0x52   : > { %7239 = vsyncadd (%p65_p1), [#allocation9], 4294966272 }
  0x53   : > { %7241 = dma.done.wait (%p65_p1), [#allocation12], 1024  }
  0x54   : > { %7243 = vsyncadd (%p65_p1), [#allocation12], 4294966272  ;;  %s520_s12 = sand.u32 1, %s7254_s22   ;;  %p5603_p3 = scmp.ne.s32.totalorder %s7274_s27, 0 }
  0x55   : > { %s5602_s29 = sshll.u32 %s520_s12, 7 }
  0x56   : > { %s7551_s24 = scalar_lea.vmem [#allocation13], %s5602_s29  ;;  %528 = sbr.rel (%p5603_p3) target bundleno = 736 (0x2e0), region = 88 }
  0x5b   : > { %v7555_v0 = vld [vmem:[%s7527_s11 + $0x80] sm:$0xff]  ;;  %v7563_v5 = vld [vmem:[%s7527_s11 + $0x8] sm:$0xff]  ;;  %v7589_v18 = vld [vmem:[%s7527_s11 + $0x90] sm:$0xff]  ;;  %s11331_s29 = sld [smem:[#allocation171_spill]] }
  0x5c   : > { %v6269_v1 = vld [vmem:[%s7534_s26 + $0x40] sm:$0xff]   ;;  %11294 = vst [vmem:[#allocation29_spill] sm:$0xff] %v7563_v5  ;;  %v7576_v11 = vld [vmem:[%s7527_s11 + $0x88] sm:$0xff]  ;;  %v7592_v20 = vld [vmem:[%s7527_s11 + $0x10] sm:$0xff]  ;;  %s11339_s6 = sld [smem:[#allocation170_spill]] }
  0x5d   : > { %v6072_v2 = vunpack.c.l.bf16 %v6269_v1  ;;  %v7559_v3 = vld [vmem:[%s7527_s11] sm:$0xff]  ;;  %v6073_v10 = vunpack.c.h.bf16 %v6269_v1  ;;  %v6270_v15 = vld [vmem:[%s7534_s26 + $0x48] sm:$0xff]   ;;  %11297 = vst [vmem:[#allocation32_spill] sm:$0xff] %v7589_v18  ;;  %v7603_v24 = vld [vmem:[%s7527_s11 + $0x98] sm:$0xff]  ;;  %s11344_s15 = sld [smem:[#allocation169_spill]] }
  0x5e   : > { %11293 = vst [vmem:[#allocation28_spill] sm:$0xff] %v7559_v3  ;;  %v6039_v4 = vld [vmem:[%s7534_s26] sm:$0xff]   ;;  %v6262_v16 = vld [vmem:[%s7534_s26 + $0x8] sm:$0xff]   ;;  %v6076_v17 = vunpack.c.l.bf16 %v6270_v15  ;;  %v6077_v23 = vunpack.c.h.bf16 %v6270_v15  ;;  %v7606_v26 = vld [vmem:[%s7527_s11 + $0x18] sm:$0xff] }
  0x5f   : > { %v6040_v6 = vunpack.c.l.bf16 %v6039_v4  ;;  %v7568_v8 = vadd.f32 %v6072_v2, %v7555_v0  ;;  %v6041_v12 = vunpack.c.h.bf16 %v6039_v4  ;;  %v7579_v13 = vadd.f32 %v6073_v10, %v7576_v11  ;;  %11298 = vst [vmem:[#allocation33_spill] sm:$0xff] %v7592_v20  ;;  %v6271_v29 = vld [vmem:[%s7534_s26 + $0x50] sm:$0xff]   ;;  %v7619_v32 = vld [vmem:[%s7527_s11 + $0xa0] sm:$0xff]  ;;  %v7633_v38 = vld [vmem:[%s7527_s11 + $0xa8] sm:$0xff] }
  0x60   : > { %v6044_v19 = vunpack.c.l.bf16 %v6262_v16  ;;  %v7595_v21 = vadd.f32 %v6076_v17, %v7589_v18  ;;  %11300 = vst [vmem:[#allocation35_spill] sm:$0xff] %v7603_v24  ;;  %v6045_v25 = vunpack.c.h.bf16 %v6262_v16  ;;  %v7609_v27 = vadd.f32 %v6077_v23, %v7603_v24  ;;  %v6263_v30 = vld [vmem:[%s7534_s26 + $0x10] sm:$0xff]   ;;  %v7622_v34 = vld [vmem:[%s7527_s11 + $0x20] sm:$0xff]  ;;  %v7636_v40 = vld [vmem:[%s7527_s11 + $0x28] sm:$0xff] }
  0x61   : > { %11295 = vst [vmem:[#allocation30_spill] sm:$0xff] %v7568_v8  ;;  %v7571_v9 = vadd.f32 %v6040_v6, %v7559_v3  ;;  %926 = vxpose.xlu0.b32.start [1/16] %v7568_v8, 128  ;;  %v7582_v14 = vadd.f32 %v6041_v12, %v7563_v5  ;;  %v6080_v31 = vunpack.c.l.bf16 %v6271_v29  ;;  %v6048_v33 = vunpack.c.l.bf16 %v6263_v30  ;;  %v6272_v43 = vld [vmem:[%s7534_s26 + $0x58] sm:$0xff]   ;;  %v7649_v46 = vld [vmem:[%s7527_s11 + $0xb0] sm:$0xff]  ;;  %v6273_v57 = vld [vmem:[%s7534_s26 + $0x60] sm:$0xff]   ;;  %s11332_s14 = smov %s11331_s29 }
  0x62   : > { %11296 = vst [vmem:[#allocation31_spill] sm:$0xff] %v7579_v13  ;;  %v7598_v22 = vadd.f32 %v6044_v19, %v7592_v20  ;;  %v7612_v28 = vadd.f32 %v6045_v25, %v7606_v26  ;;  %v6081_v37 = vunpack.c.h.bf16 %v6271_v29  ;;  %v6049_v39 = vunpack.c.h.bf16 %v6263_v30  ;;  %v6264_v44 = vld [vmem:[%s7534_s26 + $0x18] sm:$0xff]   ;;  %v7652_v48 = vld [vmem:[%s7527_s11 + $0x30] sm:$0xff]  ;;  %v6265_v58 = vld [vmem:[%s7534_s26 + $0x20] sm:$0xff]  }
  0x63   : > { %894 = vxpose.xlu1.b32.start [1/16] %v7571_v9, 128  ;;  %11299 = vst [vmem:[#allocation34_spill] sm:$0xff] %v7595_v21  ;;  %v7625_v35 = vadd.f32 %v6080_v31, %v7619_v32  ;;  %v7628_v36 = vadd.f32 %v6048_v33, %v7622_v34  ;;  %v6084_v45 = vunpack.c.l.bf16 %v6272_v43  ;;  %v6052_v47 = vunpack.c.l.bf16 %v6264_v44  ;;  %v7663_v52 = vld [vmem:[%s7527_s11 + $0xb8] sm:$0xff]  ;;  %v7679_v60 = vld [vmem:[%s7527_s11 + $0xc0] sm:$0xff]  ;;  %v7693_v4 = vld [vmem:[%s7527_s11 + $0xc8] sm:$0xff] }
  0x64   : > { %11301 = vst [vmem:[#allocation36_spill] sm:$0xff] %v7606_v26  ;;  %v7639_v41 = vadd.f32 %v6081_v37, %v7633_v38  ;;  %v7642_v42 = vadd.f32 %v6049_v39, %v7636_v40  ;;  %v6085_v51 = vunpack.c.h.bf16 %v6272_v43  ;;  %v6053_v53 = vunpack.c.h.bf16 %v6264_v44  ;;  %v7666_v54 = vld [vmem:[%s7527_s11 + $0x38] sm:$0xff]  ;;  %v7682_v62 = vld [vmem:[%s7527_s11 + $0x40] sm:$0xff]  ;;  %v7696_v10 = vld [vmem:[%s7527_s11 + $0x48] sm:$0xff] }
  0x65   : > { %11302 = vst [vmem:[#allocation37_spill] sm:$0xff] %v7609_v27  ;;  %v7655_v49 = vadd.f32 %v6084_v45, %v7649_v46  ;;  %v7658_v50 = vadd.f32 %v6052_v47, %v7652_v48  ;;  %v6088_v59 = vunpack.c.l.bf16 %v6273_v57  ;;  %v6056_v61 = vunpack.c.l.bf16 %v6265_v58  ;;  %v6274_v16 = vld [vmem:[%s7534_s26 + $0x68] sm:$0xff]   ;;  %v7709_v23 = vld [vmem:[%s7527_s11 + $0xd0] sm:$0xff]  ;;  %v7723_v37 = vld [vmem:[%s7527_s11 + $0xd8] sm:$0xff] }
  0x66   : > { %11303 = vst [vmem:[#allocation38_spill] sm:$0xff] %v7619_v32  ;;  %v7669_v55 = vadd.f32 %v6085_v51, %v7663_v52  ;;  %v7672_v56 = vadd.f32 %v6053_v53, %v7666_v54  ;;  %v6089_v2 = vunpack.c.h.bf16 %v6273_v57  ;;  %v6057_v6 = vunpack.c.h.bf16 %v6265_v58  ;;  %v6266_v17 = vld [vmem:[%s7534_s26 + $0x28] sm:$0xff]   ;;  %v7712_v29 = vld [vmem:[%s7527_s11 + $0x50] sm:$0xff]  ;;  %v7726_v43 = vld [vmem:[%s7527_s11 + $0x58] sm:$0xff] }
  0x67   : > { %11304 = vst [vmem:[#allocation39_spill] sm:$0xff] %v7622_v34  ;;  %v7685_v63 = vadd.f32 %v6088_v59, %v7679_v60  ;;  %v7688_v1 = vadd.f32 %v6056_v61, %v7682_v62  ;;  %v6092_v19 = vunpack.c.l.bf16 %v6274_v16  ;;  %v6060_v25 = vunpack.c.l.bf16 %v6266_v17  ;;  %v6275_v47 = vld [vmem:[%s7534_s26 + $0x70] sm:$0xff]   ;;  %v7739_v57 = vld [vmem:[%s7527_s11 + $0xe0] sm:$0xff]  ;;  %v7786_v34 = vld [vmem:[%s7527_s11 + $0x78] sm:$0xff] }
  0x68   : > { %11305 = vst [vmem:[#allocation40_spill] sm:$0xff] %v7625_v35  ;;  %v7699_v12 = vadd.f32 %v6089_v2, %v7693_v4  ;;  %v7702_v15 = vadd.f32 %v6057_v6, %v7696_v10  ;;  %v6093_v33 = vunpack.c.h.bf16 %v6274_v16  ;;  %v6061_v39 = vunpack.c.h.bf16 %v6266_v17  ;;  %v6267_v51 = vld [vmem:[%s7534_s26 + $0x30] sm:$0xff]   ;;  %v7742_v59 = vld [vmem:[%s7527_s11 + $0x60] sm:$0xff]  ;;  %v7753_v16 = vld [vmem:[%s7527_s11 + $0xe8] sm:$0xff] }
  0x69   : > { %927 = vxpose.xlu0.b32.cont [2/16] %v7579_v13, 128  ;;  %11306 = vst [vmem:[#allocation41_spill] sm:$0xff] %v7633_v38  ;;  %v7715_v30 = vadd.f32 %v6092_v19, %v7709_v23  ;;  %v7718_v31 = vadd.f32 %v6060_v25, %v7712_v29  ;;  %v6096_v53 = vunpack.c.l.bf16 %v6275_v47  ;;  %v6064_v58 = vunpack.c.l.bf16 %v6267_v51  ;;  %v7756_v19 = vld [vmem:[%s7527_s11 + $0x68] sm:$0xff]  ;;  %v7772_v7 = vld [vmem:[%s7527_s11 + $0x70] sm:$0xff] }
  0x6a   : > { %11307 = vst [vmem:[#allocation42_spill] sm:$0xff] %v7636_v40  ;;  %v7729_v44 = vadd.f32 %v6093_v33, %v7723_v37  ;;  %v7732_v45 = vadd.f32 %v6061_v39, %v7726_v43  ;;  %v6097_v6 = vunpack.c.h.bf16 %v6275_v47  ;;  %v6065_v17 = vunpack.c.h.bf16 %v6267_v51  ;;  %v6276_v39 = vld [vmem:[%s7534_s26 + $0x78] sm:$0xff]   ;;  %v5971_v5 = vld [vmem:[%s11167_s2 + $0x28] sm:$0xff] }
  0x6b   : > { %895 = vxpose.xlu1.b32.cont [2/16] %v7582_v14, 128  ;;  %11308 = vst [vmem:[#allocation43_spill] sm:$0xff] %v7639_v41  ;;  %v7745_v61 = vadd.f32 %v6096_v53, %v7739_v57  ;;  %v7748_v2 = vadd.f32 %v6064_v58, %v7742_v59  ;;  %v6268_v53 = vld [vmem:[%s7534_s26 + $0x38] sm:$0xff]   ;;  %v6100_v47 = vunpack.c.l.bf16 %v6276_v39  ;;  %v7769_v58 = vld [vmem:[%s7527_s11 + $0xf0] sm:$0xff]  ;;  %v7298_v32 = vmov 0   ;;  %s11361_s26 = sld [smem:[#allocation173_spill]] }
  0x6c   : > { %11309 = vst [vmem:[#allocation44_spill] sm:$0xff] %v7649_v46  ;;  %v7759_v25 = vadd.f32 %v6097_v6, %v7753_v16  ;;  %v7762_v33 = vadd.f32 %v6065_v17, %v7756_v19  ;;  %v6068_v51 = vunpack.c.l.bf16 %v6268_v53  ;;  %v6101_v17 = vunpack.c.h.bf16 %v6276_v39  ;;  %v7894_v46 = vld [vmem:[#allocation10 + $0x18] sm:$0xff]  ;;  %6468 = vset.pattern.permute.xlu2 %v7298_v32 }
  0x6d   : > { %11310 = vst [vmem:[#allocation45_spill] sm:$0xff] %v7652_v48  ;;  %v7783_v48 = vld [vmem:[%s7527_s11 + $0xf8] sm:$0xff]  ;;  %v6069_v40 = vunpack.c.h.bf16 %v6268_v53 }
  0x6e   : > { %11311 = vst [vmem:[#allocation46_spill] sm:$0xff] %v7655_v49  ;;  %v7778_v6 = vadd.f32 %v6068_v51, %v7772_v7  ;;  %v5973_v53 = vld [vmem:[%s11167_s2 + $0x38] sm:$0xff]  ;;  %v671_v13 = vpack.c.bf16 %v7759_v25, %v7745_v61 }
  0x6f   : > { %11312 = vst [vmem:[#allocation47_spill] sm:$0xff] %v7663_v52  ;;  %6307 = vmatpush.bf16.msra.mxu1 %v5973_v53  ;;  %741 = vmatpush.bf16.msra.mxu0 %v5973_v53  ;;  %v5966_v53 = vld [vmem:[%s11167_s2] sm:$0xff]  ;;  %v7888_v52 = vld [vmem:[#allocation10 + $0x28] sm:$0xff] }
  0x70   : > { %11313 = vst [vmem:[#allocation48_spill] sm:$0xff] %v7666_v54  ;;  %v7775_v54 = vadd.f32 %v6100_v47, %v7769_v58 }
  0x71   : > { %928 = vxpose.xlu0.b32.cont [3/16] %v7595_v21, 128  ;;  %11314 = vst [vmem:[#allocation49_spill] sm:$0xff] %v7669_v55 }
  0x72   : > { %11315 = vst [vmem:[#allocation50_spill] sm:$0xff] %v7679_v60 }
  0x73   : > { %896 = vxpose.xlu1.b32.cont [3/16] %v7598_v22, 128  ;;  %11316 = vst [vmem:[#allocation51_spill] sm:$0xff] %v7688_v1 }
  0x74   : > { %11317 = vst [vmem:[#allocation52_spill] sm:$0xff] %v7693_v4 }
  0x75   : > { %11318 = vst [vmem:[#allocation53_spill] sm:$0xff] %v7702_v15 }
  0x76   : > { %11319 = vst [vmem:[#allocation54_spill] sm:$0xff] %v7709_v23  ;;  %v669_v23 = vpack.c.bf16 %v7699_v12, %v7685_v63 }
  0x77   : > { %11320 = vst [vmem:[#allocation55_spill] sm:$0xff] %v7718_v31 }
  0x78   : > { %11321 = vst [vmem:[#allocation56_spill] sm:$0xff] %v7723_v37 }
  0x79   : > { %929 = vxpose.xlu0.b32.cont [4/16] %v7609_v27, 128  ;;  %11322 = vst [vmem:[#allocation57_spill] sm:$0xff] %v7732_v45  ;;  %v5969_v27 = vld [vmem:[%s11167_s2 + $0x18] sm:$0xff] }
  0x7a   : > { %11323 = vst [vmem:[#allocation58_spill] sm:$0xff] %v7739_v57  ;;  %v5967_v57 = vld [vmem:[%s11167_s2 + $0x8] sm:$0xff] }
  0x7b   : > { %897 = vxpose.xlu1.b32.cont [4/16] %v7612_v28, 128  ;;  %11324 = vst [vmem:[#allocation59_spill] sm:$0xff] %v7748_v2 }
  0x7c   : > { %11325 = vst [vmem:[#allocation60_spill] sm:$0xff] %v7753_v16 }
  0x7d   : > { %11326 = vst [vmem:[#allocation61_spill] sm:$0xff] %v7762_v33 }
  0x7e   : > { %11327 = vst [vmem:[#allocation62_spill] sm:$0xff] %v7769_v58 }
  0x7f   : > { %11328 = vst [vmem:[#allocation63_spill] sm:$0xff] %v7778_v6 }
  0x80   : > { %11329 = vst [vmem:[#allocation64_spill] sm:$0xff] %v7783_v48 }
  0x81   : > { %930 = vxpose.xlu0.b32.cont [5/16] %v7625_v35, 128  ;;  %v5970_v35 = vld [vmem:[%s11167_s2 + $0x20] sm:$0xff] }
  0x83   : > { %898 = vxpose.xlu1.b32.cont [5/16] %v7628_v36, 128 }
  0x89   : > { %931 = vxpose.xlu0.b32.cont [6/16] %v7639_v41, 128 }
  0x8b   : > { %899 = vxpose.xlu1.b32.cont [6/16] %v7642_v42, 128 }
  0x91   : > { %932 = vxpose.xlu0.b32.cont [7/16] %v7655_v49, 128  ;;  %v7792_v49 = vadd.f32 %v6069_v40, %v7786_v34 }
  0x93   : > { %900 = vxpose.xlu1.b32.cont [7/16] %v7658_v50, 128  ;;  %11330 = vst [vmem:[#allocation65_spill] sm:$0xff] %v7792_v49 }
  0x99   : > { %933 = vxpose.xlu0.b32.cont [8/16] %v7669_v55, 128  ;;  %v7789_v55 = vadd.f32 %v6101_v17, %v7783_v48  ;;  %v5972_v17 = vld [vmem:[%s11167_s2 + $0x30] sm:$0xff] }
  0x9a   : > { %6308 = vmatpush.bf16.msra.mxu1 %v5972_v17  ;;  %742 = vmatpush.bf16.msra.mxu0 %v5972_v17 }
  0x9b   : > { %901 = vxpose.xlu1.b32.cont [8/16] %v7672_v56, 128 }
  0x9e   : > { %6309 = vmatpush.bf16.msra.mxu1 %v5971_v5  ;;  %743 = vmatpush.bf16.msra.mxu0 %v5971_v5  ;;  %v5968_v5 = vld [vmem:[%s11167_s2 + $0x10] sm:$0xff] }
  0xa1   : > { %934 = vxpose.xlu0.b32.cont [9/16] %v7685_v63, 128  ;;  %v7883_v63 = vld [vmem:[#allocation10 + $0x30] sm:$0xff] }
  0xa2   : > { %6310 = vmatpush.bf16.msra.mxu1 %v5970_v35  ;;  %744 = vmatpush.bf16.msra.mxu0 %v5970_v35 }
  0xa3   : > { %902 = vxpose.xlu1.b32.cont [9/16] %v7688_v1, 128 }
  0xa6   : > { %6311 = vmatpush.bf16.msra.mxu1 %v5969_v27  ;;  %745 = vmatpush.bf16.msra.mxu0 %v5969_v27 }
  0xa9   : > { %935 = vxpose.xlu0.b32.cont [10/16] %v7699_v12, 128 }
  0xaa   : > { %6312 = vmatpush.bf16.msra.mxu1 %v5968_v5  ;;  %746 = vmatpush.bf16.msra.mxu0 %v5968_v5 }
  0xab   : > { %903 = vxpose.xlu1.b32.cont [10/16] %v7702_v15, 128 }
  0xae   : > { %6313 = vmatpush.bf16.msra.mxu1 %v5967_v57  ;;  %747 = vmatpush.bf16.msra.mxu0 %v5967_v57 }
  0xb1   : > { %936 = vxpose.xlu0.b32.cont [11/16] %v7715_v30, 128 }
  0xb2   : > { %6314 = vmatpush.bf16.msra.mxu1 %v5966_v53  ;;  %748 = vmatpush.bf16.msra.mxu0 %v5966_v53  ;;  %v670_v53 = vpack.c.bf16 %v7729_v44, %v7715_v30  ;;  %v7891_v30 = vld [vmem:[#allocation10 + $0x20] sm:$0xff] }
  0xb3   : > { %904 = vxpose.xlu1.b32.cont [11/16] %v7718_v31, 128 }
  0xb5   : > { %809 = vmatmul.bf16.vlgmr.msra.gmra.mxu1 %v669_v23 }
  0xb9   : > { %937 = vxpose.xlu0.b32.cont [12/16] %v7729_v44, 128 }
  0xbb   : > { %905 = vxpose.xlu1.b32.cont [12/16] %v7732_v45, 128  ;;  %v7908_v45 = vld [vmem:[#allocation10] sm:$0xff] }
  0xc1   : > { %938 = vxpose.xlu0.b32.cont [13/16] %v7745_v61, 128  ;;  %v7902_v61 = vld [vmem:[#allocation10 + $0x8] sm:$0xff] }
  0xc3   : > { %906 = vxpose.xlu1.b32.cont [13/16] %v7748_v2, 128 }
  0xc5   : > { %814 = vmatmul.bf16.gmra.mxu1 %v670_v53 }
  0xc9   : > { %939 = vxpose.xlu0.b32.cont [14/16] %v7759_v25, 128  ;;  %v990_v25 = vld [vmem:[%s11331_s29] sm:$0xff] }
  0xca   : > { %1008 = vperm.xlu2 %6468, %v990_v25  }
  0xcb   : > { %907 = vxpose.xlu1.b32.cont [14/16] %v7762_v33, 128  ;;  %v7897_v33 = vld [vmem:[#allocation10 + $0x10] sm:$0xff] }
  0xd1   : > { %940 = vxpose.xlu0.b32.cont [15/16] %v7775_v54, 128 }
  0xd3   : > { %908 = vxpose.xlu1.b32.cont [15/16] %v7778_v6, 128  ;;  %v7880_v6 = vld [vmem:[#allocation10 + $0x38] sm:$0xff] }
  0xd4   : > { %6315 = vmatpush.bf16.msra.mxu3 %v7880_v6 }
  0xd5   : > { %819 = vmatmul.bf16.gmra.mxu1 %v671_v13  ;;  %v672_v13 = vpack.c.bf16 %v7789_v55, %v7775_v54  ;;  %v1268_v54 = vpack.c.bf16 %v7696_v10, %v7682_v62  ;;  %v992_v62 = vld [vmem:[%s11332_s14 + $0x10] sm:$0xff] }
  0xd8   : > { %6316 = vmatpush.bf16.msra.mxu3 %v7883_v63 }
  0xd9   : > { %941 = vxpose.xlu0.b32.end [16/16] %v7789_v55, 128  ;;  %v991_v55 = vld [vmem:[%s11332_s14 + $0x8] sm:$0xff] }
  0xda   : > { %1013 = vperm.xlu2 %6468, %v991_v55  }
  0xdb   : > { %909 = vxpose.xlu1.b32.end [16/16] %v7792_v49, 128 }
  0xdc   : > { %6317 = vmatpush.bf16.msra.mxu3 %v7888_v52 }
  0xe0   : > { %6318 = vmatpush.bf16.msra.mxu3 %v7891_v30 }
  0xe2   : > { %1018 = vperm.xlu2 %6468, %v992_v62   ;;  %v1004_v62 = vld [vmem:[%s11332_s14 + $0x70] sm:$0xff] }
  0xe4   : > { %6319 = vmatpush.bf16.msra.mxu3 %v7894_v46 }
  0xe5   : > { %824 = vmatmul.bf16.gmra.mxu1 %v672_v13 }
  0xe8   : > { %6320 = vmatpush.bf16.msra.mxu3 %v7897_v33 }
  0xec   : > { %6321 = vmatpush.bf16.msra.mxu3 %v7902_v61 }
  0xf0   : > { %6322 = vmatpush.bf16.msra.mxu3 %v7908_v45 }
  0xf3   : > { %1376 = vmatmul.bf16.vlgmr.msra.gmra.mxu3 %v1268_v54  ;;  %v1269_v54 = vpack.c.bf16 %v7726_v43, %v7712_v29  ;;  %v5974_v29 = vld [vmem:[%s11339_s6] sm:$0xff] }
 0x103   : > { %1381 = vmatmul.bf16.gmra.mxu3 %v1269_v54  ;;  %v11353_v54 = vld [vmem:[#allocation44_spill] sm:$0xff] }
 0x105   : > { %v7796_v47 = vpop.trf.xlu0 }
 0x107   : > { %v7798_v39 = vpop.trf.xlu1 }
 0x10d   : > { %v7800_v51 = vpop.trf.xlu0 }
 0x10f   : > { %v7804_v26 = vpop.trf.xlu1 }
 0x115   : > { %v7808_v40 = vpop.trf.xlu0 }
 0x117   : > { %v7810_v20 = vpop.trf.xlu1 }
 0x11d   : > { %v7812_v48 = vpop.trf.xlu0 }
 0x11f   : > { %v7816_v3 = vpop.trf.xlu1 }
 0x125   : > { %v7826_v41 = vpop.trf.xlu0 }
 0x127   : > { %v7828_v58 = vpop.trf.xlu1 }
 0x12d   : > { %v7836_v16 = vpop.trf.xlu0 }
 0x12f   : > { %v7840_v17 = vpop.trf.xlu1 }
 0x132   : > { %v810_v43 = vpop.f32.mrf.mxu1 }
 0x135   : > { %v7850_v21 = vpop.trf.xlu0 }
 0x137   : > { %v7852_v35 = vpop.trf.xlu1 }
 0x13d   : > { %v7860_v37 = vpop.trf.xlu0 }
 0x13f   : > { %v7864_v5 = vpop.trf.xlu1 }
 0x140   : > { %6469 = vset.pattern.permute.xlu0 %v7298_v32  ;;  %v657_v32 = vpack.c.bf16 %v7582_v14, %v7571_v9  ;;  %v993_v14 = vld [vmem:[%s11332_s14 + $0x18] sm:$0xff] }
 0x141   : > { %1023 = vperm.xlu2 %6468, %v993_v14  }
 0x142   : > { %749 = vmatmul.bf16.vlgmr.msra.gmra.mxu0 %v657_v32 }
 0x145   : > { %v7870_v8 = vpop.trf.xlu0 }
 0x147   : > { %v7872_v4 = vpop.trf.xlu1 }
 0x14d   : > { %v7874_v57 = vpop.trf.xlu0 }
 0x14f   : > { %v7876_v60 = vpop.trf.xlu1 }
 0x155   : > { %v952_v27 = vpop.trf.xlu0 }
 0x157   : > { %v920_v49 = vpop.trf.xlu1 }
 0x15d   : > { %v953_v12 = vpop.trf.xlu0 }
 0x15e   : > { %v969_v9 = vpack.c.bf16 %v953_v12, %v952_v27 }
 0x15f   : > { %v921_v23 = vpop.trf.xlu1 }
 0x160   : > { %v968_v55 = vpack.c.bf16 %v921_v23, %v920_v49  ;;  %v11333_v49 = vpack.c.bf16 %v7860_v37, %v7850_v21  ;;  %v11336_v21 = vpack.c.bf16 %v7840_v17, %v7828_v58  ;;  %v5976_v37 = vld [vmem:[%s11339_s6 + $0x10] sm:$0xff]  ;;  %v1001_v58 = vld [vmem:[%s11332_s14 + $0x58] sm:$0xff] }
 0x165   : > { %v954_v44 = vpop.trf.xlu0 }
 0x167   : > { %v922_v53 = vpop.trf.xlu1 }
 0x16d   : > { %v955_v2 = vpop.trf.xlu0 }
 0x16e   : > { %v971_v1 = vpack.c.bf16 %v955_v2, %v954_v44  ;;  %v11346_v2 = vld [vmem:[#allocation35_spill] sm:$0xff] }
 0x16f   : > { %v923_v38 = vpop.trf.xlu1 }
 0x170   : > { %v970_v10 = vpack.c.bf16 %v923_v38, %v922_v53  ;;  %v658_v38 = vpack.c.bf16 %v7612_v28, %v7598_v22  ;;  %v1270_v22 = vpack.c.bf16 %v7756_v19, %v7742_v59  ;;  %v995_v28 = vld [vmem:[%s11332_s14 + $0x28] sm:$0xff]  ;;  %v11345_v59 = vld [vmem:[#allocation32_spill] sm:$0xff]  ;;  %v812_v19 = vpop.f32.mrf.mxu1 }
 0x171   : > { %v11351_v53 = vld [vmem:[#allocation59_spill] sm:$0xff] }
 0x172   : > { %754 = vmatmul.bf16.gmra.mxu0 %v658_v38  ;;  %1386 = vmatmul.bf16.gmra.mxu3 %v1270_v22 }
 0x175   : > { %v956_v31 = vpop.trf.xlu0 }
 0x177   : > { %v924_v24 = vpop.trf.xlu1 }
 0x178   : > { %v815_v17 = vpop.f32.mrf.mxu1 }
 0x17d   : > { %v957_v13 = vpop.trf.xlu0 }
 0x17e   : > { %v973_v18 = vpack.c.bf16 %v957_v13, %v956_v31  ;;  %v11340_v31 = vpack.c.bf16 %v7800_v51, %v7796_v47  ;;  %v11347_v47 = vld [vmem:[#allocation55_spill] sm:$0xff]  ;;  %v5978_v13 = vld [vmem:[%s11339_s6 + $0x20] sm:$0xff] }
 0x17f   : > { %v925_v25 = vpop.trf.xlu1 }
 0x180   : > { %v972_v15 = vpack.c.bf16 %v925_v25, %v924_v24  ;;  %1183 = vmatpush.bf16.msra.mxu2 %v973_v18  ;;  %v966_v18 = vpack.c.bf16 %v7876_v60, %v7872_v4  ;;  %v967_v24 = vpack.c.bf16 %v7874_v57, %v7870_v8  ;;  %v11334_v60 = vpack.c.bf16 %v7864_v5, %v7852_v35  ;;  %v1002_v35 = vld [vmem:[%s11332_s14 + $0x60] sm:$0xff]  ;;  %v11350_v57 = vld [vmem:[#allocation41_spill] sm:$0xff]  ;;  %v817_v12 = vpop.f32.mrf.mxu1 }
 0x181   : > { %v11335_v8 = vpack.c.bf16 %v7836_v16, %v7826_v41  ;;  %v11337_v4 = vpack.c.bf16 %v7812_v48, %v7808_v40  ;;  %v11338_v41 = vpack.c.bf16 %v7816_v3, %v7810_v20  ;;  %v11341_v48 = vpack.c.bf16 %v7804_v26, %v7798_v39  ;;  %v996_v3 = vld [vmem:[%s11332_s14 + $0x30] sm:$0xff]  ;;  %v997_v26 = vld [vmem:[%s11332_s14 + $0x38] sm:$0xff]  ;;  %v11349_v5 = vld [vmem:[#allocation38_spill] sm:$0xff] }
 0x182   : > { %1134 = vmatpush.bf16.msrb.mxu1 %v972_v15  ;;  %v659_v15 = vpack.c.bf16 %v7642_v42, %v7628_v36  ;;  %v1271_v20 = vpack.c.bf16 %v7786_v34, %v7772_v7  ;;  %v660_v36 = vpack.c.bf16 %v7672_v56, %v7658_v50  ;;  %v5975_v42 = vld [vmem:[%s11339_s6 + $0x8] sm:$0xff]  ;;  %v998_v7 = vld [vmem:[%s11332_s14 + $0x40] sm:$0xff]  ;;  %v1272_v34 = vpack.c.bf16 %v7576_v11, %v7555_v0  ;;  %v1000_v11 = vld [vmem:[%s11332_s14 + $0x50] sm:$0xff] }
 0x183   : > { %v999_v50 = vld [vmem:[%s11332_s14 + $0x48] sm:$0xff]  ;;  %v8006_v0 = vld [vmem:[%s11344_s15] ss:$0 sm:$0xff]  ;;  %v1273_v16 = vpack.c.bf16 %v11346_v2, %v11345_v59  ;;  %v11348_v39 = vld [vmem:[#allocation57_spill] sm:$0xff] }
 0x184   : > { %1184 = vmatpush.bf16.msra.mxu2 %v971_v1  ;;  %v994_v1 = vld [vmem:[%s11332_s14 + $0x20] sm:$0xff]  ;;  %759 = vmatmul.bf16.gmra.mxu0 %v659_v15  ;;  %v662_v51 = vpack.c.bf16 %v11348_v39, %v11347_v47  ;;  %v5977_v40 = vld [vmem:[%s11339_s6 + $0x18] sm:$0xff]  ;;  %v816_v27 = vadd.f32 %v8006_v0, %v815_v17  ;;  %v818_v23 = vadd.f32 %v8006_v0, %v817_v12  ;;  %v11363_v59 = vld [vmem:[#allocation56_spill] sm:$0xff] }
 0x185   : > { %1028 = vperm.xlu2 %6468, %v994_v1   ;;  %1391 = vmatmul.bf16.gmra.mxu3 %v1271_v20  ;;  %v11356_v1 = vld [vmem:[#allocation65_spill] sm:$0xff]  ;;  %v1377_v20 = vpop.f32.mrf.mxu3  ;;  %v11366_v12 = vld [vmem:[#allocation58_spill] sm:$0xff] }
 0x186   : > { %1135 = vmatpush.bf16.msrb.mxu1 %v970_v10  ;;  %v6170_v44 = vpack.c.bf16 %v818_v23, %v816_v27  ;;  %v11365_v47 = vld [vmem:[#allocation37_spill] sm:$0xff]  ;;  %v11367_v23 = vld [vmem:[#allocation60_spill] sm:$0xff] }
 0x188   : > { %1185 = vmatpush.bf16.msra.mxu2 %v969_v9  ;;  %6289 = vst [vmem:[#allocation2 + $0x68] sm:$0xff] %v6170_v44   ;;  %v820_v25 = vpop.f32.mrf.mxu1 }
 0x189   : > { %v821_v10 = vadd.f32 %v8006_v0, %v820_v25  ;;  %v11369_v25 = vld [vmem:[#allocation43_spill] sm:$0xff] }
 0x18a   : > { %1136 = vmatpush.bf16.msrb.mxu1 %v968_v55  ;;  %v11354_v55 = vld [vmem:[#allocation47_spill] sm:$0xff] }
 0x18b   : > { %v1275_v9 = vpack.c.bf16 %v11354_v55, %v11353_v54  ;;  %v11370_v54 = vld [vmem:[#allocation29_spill] sm:$0xff]  ;;  %v11371_v55 = vld [vmem:[#allocation28_spill] sm:$0xff] }
 0x18c   : > { %1186 = vmatpush.bf16.msra.mxu2 %v967_v24  ;;  %v1005_v24 = vld [vmem:[%s11332_s14 + $0x78] sm:$0xff] }
 0x18d   : > { %1033 = vperm.xlu2 %6468, %v995_v28   ;;  %v11357_v28 = vld [vmem:[#allocation50_spill] sm:$0xff] }
 0x18e   : > { %1137 = vmatpush.bf16.msrb.mxu1 %v966_v18 }
 0x190   : > { %1187 = vmatpush.bf16.msra.mxu2 %v11333_v49  ;;  %v822_v14 = vpop.f32.mrf.mxu1  ;;  %v11355_v49 = vld [vmem:[#allocation63_spill] sm:$0xff] }
 0x191   : > { %v823_v18 = vadd.f32 %v8006_v0, %v822_v14 }
 0x192   : > { %1138 = vmatpush.bf16.msrb.mxu1 %v11334_v60  ;;  %v664_v60 = vpack.c.bf16 %v11356_v1, %v11355_v49 }
 0x193   : > { %v6175_v38 = vpack.c.bf16 %v823_v18, %v821_v10 }
 0x194   : > { %1188 = vmatpush.bf16.msra.mxu2 %v11335_v8  ;;  %764 = vmatmul.bf16.gmra.mxu0 %v660_v36  ;;  %v5979_v8 = vld [vmem:[%s11339_s6 + $0x28] sm:$0xff] }
 0x195   : > { %1038 = vperm.xlu2 %6468, %v996_v3   ;;  %1396 = vmatmul.bf16.gmra.mxu3 %v1272_v34  ;;  %6290 = vst [vmem:[#allocation2 + $0x70] sm:$0xff] %v6175_v38   ;;  %v11360_v36 = vld [vmem:[#allocation31_spill] sm:$0xff] }
 0x196   : > { %1139 = vmatpush.bf16.msrb.mxu1 %v11336_v21 }
 0x198   : > { %1189 = vmatpush.bf16.msra.mxu2 %v11337_v4  ;;  %v825_v22 = vpop.f32.mrf.mxu1  ;;  %v11358_v4 = vld [vmem:[#allocation52_spill] sm:$0xff] }
 0x199   : > { %v826_v21 = vadd.f32 %v8006_v0, %v825_v22 }
 0x19a   : > { %1140 = vmatpush.bf16.msrb.mxu1 %v11338_v41  ;;  %v1276_v41 = vpack.c.bf16 %v11358_v4, %v11357_v28 }
 0x19c   : > { %1190 = vmatpush.bf16.msra.mxu2 %v11340_v31 }
 0x19d   : > { %1043 = vperm.xlu2 %6468, %v997_v26   ;;  %v11359_v26 = vld [vmem:[#allocation30_spill] sm:$0xff] }
 0x19e   : > { %1141 = vmatpush.bf16.msrb.mxu1 %v11341_v48  ;;  %v5980_v48 = vld [vmem:[%s11339_s6 + $0x30] sm:$0xff] }
 0x19f   : > { %1191 = vmatmul.bf16.vlgmr.msra.gmra.mxu2 %v5974_v29 }
 0x1a0   : > { %1348 = vmatpush.bf16.msrb.mxu2 %v7880_v6  ;;  %v827_v15 = vpop.f32.mrf.mxu1 }
 0x1a1   : > { %1142 = vmatmul.bf16.vlgmr.msrb.gmra.mxu1 %v5974_v29  ;;  %v828_v29 = vadd.f32 %v8006_v0, %v827_v15  ;;  %v11373_v15 = vld [vmem:[#allocation62_spill] sm:$0xff] }
 0x1a3   : > { %v6180_v31 = vpack.c.bf16 %v828_v29, %v826_v21  ;;  %v11374_v29 = vld [vmem:[#allocation64_spill] sm:$0xff] }
 0x1a4   : > { %1349 = vmatpush.bf16.msrb.mxu2 %v7883_v63  ;;  %v1274_v63 = vpack.c.bf16 %v11350_v57, %v11349_v5 }
 0x1a5   : > { %1048 = vperm.xlu2 %6468, %v998_v7   ;;  %1401 = vmatmul.bf16.gmra.mxu3 %v1273_v16  ;;  %6291 = vst [vmem:[#allocation2 + $0x78] sm:$0xff] %v6180_v31   ;;  %v8065_v7 = vld [vmem:[%s11361_s26] ss:$0 sm:$0xff]  ;;  %v1279_v31 = vpack.c.bf16 %v11374_v29, %v11373_v15 }
 0x1a8   : > { %1350 = vmatpush.bf16.msrb.mxu2 %v7888_v52  ;;  %v11343_v52 = vld [vmem:[#allocation53_spill] sm:$0xff] }
 0x1ac   : > { %1351 = vmatpush.bf16.msrb.mxu2 %v7891_v30  ;;  %v1003_v30 = vld [vmem:[%s11332_s14 + $0x68] sm:$0xff] }
 0x1ad   : > { %1053 = vperm.xlu2 %6468, %v999_v50   ;;  %v1378_v50 = vadd.f32 %v8065_v7, %v1377_v20 }
 0x1af   : > { %1196 = vmatmul.bf16.gmra.mxu2 %v5975_v42 }
 0x1b0   : > { %1352 = vmatpush.bf16.msrb.mxu2 %v7894_v46  ;;  %v11342_v46 = vld [vmem:[#allocation51_spill] sm:$0xff] }
 0x1b1   : > { %1147 = vmatmul.bf16.gmra.mxu1 %v5975_v42  ;;  %v661_v56 = vpack.c.bf16 %v11343_v52, %v11342_v46  ;;  %v665_v42 = vpack.c.bf16 %v11360_v36, %v11359_v26  ;;  %v1009_v52 = vpop.permute.xlu2 %1008  ;;  %v11375_v36 = vld [vmem:[#allocation33_spill] sm:$0xff] }
 0x1b3   : > { %769 = vmatmul.bf16.gmra.mxu0 %v661_v56 }
 0x1b4   : > { %1353 = vmatpush.bf16.msrb.mxu2 %v7897_v33  ;;  %v813_v33 = vadd.f32 %v8006_v0, %v812_v19  ;;  %v5981_v19 = vld [vmem:[%s11339_s6 + $0x38] sm:$0xff] }
 0x1b5   : > { %1058 = vperm.xlu2 %6468, %v1000_v11   ;;  %1406 = vmatmul.bf16.gmra.mxu3 %v1274_v63 }
 0x1b8   : > { %1354 = vmatpush.bf16.msrb.mxu2 %v7902_v61  ;;  %v11352_v61 = vld [vmem:[#allocation61_spill] sm:$0xff] }
 0x1b9   : > { %v663_v32 = vpack.c.bf16 %v11352_v61, %v11351_v53 }
 0x1bc   : > { %1355 = vmatpush.bf16.msrb.mxu2 %v7908_v45  ;;  %v811_v45 = vadd.f32 %v8006_v0, %v810_v43 }
 0x1bd   : > { %1063 = vperm.xlu2 %6468, %v1001_v58  }
 0x1be   : > { %v6165_v6 = vpack.c.bf16 %v813_v33, %v811_v45  ;;  %v11362_v45 = vld [vmem:[#allocation54_spill] sm:$0xff] }
 0x1bf   : > { %1201 = vmatmul.bf16.gmra.mxu2 %v5976_v37  ;;  %v750_v3 = vpop.f32.mrf.mxu0  ;;  %v1277_v2 = vpack.c.bf16 %v11363_v59, %v11362_v45 }
 0x1c0   : > { %6288 = vst [vmem:[#allocation2 + $0x60] sm:$0xff] %v6165_v6   ;;  %v751_v34 = vadd.f32 %v8006_v0, %v750_v3  ;;  %v11364_v6 = vld [vmem:[#allocation34_spill] sm:$0xff] }
 0x1c1   : > { %1152 = vmatmul.bf16.gmra.mxu1 %v5976_v37  ;;  %v1379_v37 = vpop.f32.mrf.mxu3  ;;  %v666_v39 = vpack.c.bf16 %v11365_v47, %v11364_v6 }
 0x1c2   : > { %v1380_v43 = vadd.f32 %v8065_v7, %v1379_v37  ;;  %v11378_v37 = vld [vmem:[#allocation49_spill] sm:$0xff] }
 0x1c3   : > { %774 = vmatmul.bf16.gmra.mxu0 %v662_v51  ;;  %v1014_v51 = vpop.permute.xlu2 %1013 }
 0x1c4   : > { %v6205_v16 = vpack.c.bf16 %v1380_v43, %v1378_v50 }
 0x1c5   : > { %1068 = vperm.xlu2 %6468, %v1002_v35   ;;  %1411 = vmatmul.bf16.gmra.mxu3 %v1275_v9  ;;  %v11372_v9 = vpack.c.bf16 %v11370_v54, %v11371_v55 }
 0x1c6   : > { %6295 = vst [vmem:[#allocation4 + $0x50] sm:$0xff] %v6205_v16  }
 0x1c7   : > { %v752_v46 = vpop.f32.mrf.mxu0 }
 0x1c8   : > { %v753_v56 = vadd.f32 %v8006_v0, %v752_v46 }
 0x1c9   : > { %v1382_v58 = vpop.f32.mrf.mxu3 }
 0x1ca   : > { %v6105_v11 = vpack.c.bf16 %v753_v56, %v751_v34  ;;  %v1383_v17 = vadd.f32 %v8065_v7, %v1382_v58  ;;  %v11377_v56 = vld [vmem:[#allocation46_spill] sm:$0xff] }
 0x1cb   : > { %v1019_v53 = vpop.permute.xlu2 %1018  ;;  %v668_v43 = vpack.c.bf16 %v11378_v37, %v11377_v56 }
 0x1cc   : > { %6106 = vst [vmem:[#allocation2] sm:$0xff] %v6105_v11  }
 0x1cd   : > { %1073 = vperm.xlu2 %6468, %v1003_v30   ;;  %v1278_v30 = vpack.c.bf16 %v11367_v23, %v11366_v12  ;;  %v11379_v12 = vld [vmem:[#allocation39_spill] sm:$0xff]  ;;  %v11380_v23 = vld [vmem:[#allocation42_spill] sm:$0xff] }
 0x1cf   : > { %1206 = vmatmul.bf16.gmra.mxu2 %v5977_v40 }
 0x1d1   : > { %1157 = vmatmul.bf16.gmra.mxu1 %v5977_v40  ;;  %v1384_v5 = vpop.f32.mrf.mxu3 }
 0x1d2   : > { %v1385_v57 = vadd.f32 %v8065_v7, %v1384_v5 }
 0x1d3   : > { %779 = vmatmul.bf16.gmra.mxu0 %v663_v32  ;;  %v1024_v18 = vpop.permute.xlu2 %1023 }
 0x1d4   : > { %v6210_v44 = vpack.c.bf16 %v1385_v57, %v1383_v17 }
 0x1d5   : > { %1078 = vperm.xlu2 %6468, %v1004_v62   ;;  %1416 = vmatmul.bf16.gmra.mxu3 %v1276_v41 }
 0x1d6   : > { %6296 = vst [vmem:[#allocation4 + $0x68] sm:$0xff] %v6210_v44  }
 0x1dd   : > { %1083 = vperm.xlu2 %6468, %v1005_v24  }
 0x1df   : > { %1211 = vmatmul.bf16.gmra.mxu2 %v5978_v13  ;;  %v1029_v46 = vpop.permute.xlu2 %1028 }
 0x1e1   : > { %1162 = vmatmul.bf16.gmra.mxu1 %v5978_v13  ;;  %v11368_v13 = vld [vmem:[#allocation40_spill] sm:$0xff] }
 0x1e2   : > { %v667_v62 = vpack.c.bf16 %v11369_v25, %v11368_v13 }
 0x1e3   : > { %784 = vmatmul.bf16.gmra.mxu0 %v664_v60 }
 0x1e5   : > { %1421 = vmatmul.bf16.gmra.mxu3 %v1277_v2 }
 0x1e7   : > { %v1034_v17 = vpop.permute.xlu2 %1033 }
 0x1ef   : > { %1216 = vmatmul.bf16.gmra.mxu2 %v5979_v8  ;;  %v755_v33 = vpop.f32.mrf.mxu0  ;;  %v1039_v13 = vpop.permute.xlu2 %1038 }
 0x1f0   : > { %v756_v40 = vadd.f32 %v8006_v0, %v755_v33 }
 0x1f1   : > { %1167 = vmatmul.bf16.gmra.mxu1 %v5979_v8 }
 0x1f3   : > { %789 = vmatmul.bf16.gmra.mxu0 %v665_v42  ;;  %v11376_v42 = vld [vmem:[#allocation36_spill] sm:$0xff] }
 0x1f4   : > { %v1265_v34 = vpack.c.bf16 %v11376_v42, %v11375_v36 }
 0x1f5   : > { %1426 = vmatmul.bf16.gmra.mxu3 %v1278_v30  ;;  %v1387_v32 = vpop.f32.mrf.mxu3  ;;  %v1266_v30 = vpack.c.bf16 %v11380_v23, %v11379_v12 }
 0x1f6   : > { %v1388_v1 = vadd.f32 %v8065_v7, %v1387_v32 }
 0x1f7   : > { %v757_v35 = vpop.f32.mrf.mxu0 }
 0x1f8   : > { %v758_v27 = vadd.f32 %v8006_v0, %v757_v35 }
 0x1fa   : > { %v6110_v63 = vpack.c.bf16 %v758_v27, %v756_v40 }
 0x1fc   : > { %6277 = vst [vmem:[#allocation2 + $0x8] sm:$0xff] %v6110_v63  }
 0x1fd   : > { %v1389_v22 = vpop.f32.mrf.mxu3 }
 0x1fe   : > { %v1390_v4 = vadd.f32 %v8065_v7, %v1389_v22  ;;  %v1044_v22 = vpop.permute.xlu2 %1043 }
 0x1ff   : > { %1221 = vmatmul.bf16.gmra.mxu2 %v5980_v48 }
 0x201   : > { %1172 = vmatmul.bf16.gmra.mxu1 %v5980_v48  ;;  %v760_v61 = vpop.f32.mrf.mxu0  ;;  %v6215_v48 = vpack.c.bf16 %v1390_v4, %v1388_v1  ;;  %v11381_v4 = vld [vmem:[#allocation45_spill] sm:$0xff] }
 0x202   : > { %v761_v38 = vadd.f32 %v8006_v0, %v760_v61 }
 0x203   : > { %794 = vmatmul.bf16.gmra.mxu0 %v666_v39  ;;  %6297 = vst [vmem:[#allocation4 + $0x8] sm:$0xff] %v6215_v48  }
 0x205   : > { %1431 = vmatmul.bf16.gmra.mxu3 %v1279_v31 }
 0x209   : > { %v762_v60 = vpop.f32.mrf.mxu0 }
 0x20a   : > { %v763_v8 = vadd.f32 %v8006_v0, %v762_v60 }
 0x20c   : > { %v6115_v41 = vpack.c.bf16 %v763_v8, %v761_v38 }
 0x20e   : > { %6278 = vst [vmem:[#allocation2 + $0x10] sm:$0xff] %v6115_v41   ;;  %v11382_v41 = vld [vmem:[#allocation48_spill] sm:$0xff] }
 0x20f   : > { %1226 = vmatmul.bf16.gmra.mxu2 %v5981_v19  ;;  %v1267_v15 = vpack.c.bf16 %v11382_v41, %v11381_v4 }
 0x211   : > { %1177 = vmatmul.bf16.gmra.mxu1 %v5981_v19  ;;  %v765_v50 = vpop.f32.mrf.mxu0 }
 0x212   : > { %v766_v16 = vadd.f32 %v8006_v0, %v765_v50 }
 0x213   : > { %799 = vmatmul.bf16.gmra.mxu0 %v667_v62 }
 0x219   : > { %v767_v58 = vpop.f32.mrf.mxu0 }
 0x21a   : > { %v768_v6 = vadd.f32 %v8006_v0, %v767_v58 }
 0x21c   : > { %v6120_v35 = vpack.c.bf16 %v768_v6, %v766_v16 }
 0x21e   : > { %v1143_v10 = vpop.f32.mrf.mxu1  ;;  %6279 = vst [vmem:[#allocation2 + $0x18] sm:$0xff] %v6120_v35  }
 0x21f   : > { %1356 = vmatmul.bf16.vlgmr.msrb.gmra.mxu2 %v11372_v9  ;;  %v1144_v14 = vadd.f32 %v1143_v10, %v1009_v52 }
 0x222   : > { %v1192_v24 = vpop.f32.mrf.mxu2 }
 0x223   : > { %v1193_v49 = vadd.f32 %v1192_v24, %v1009_v52  ;;  %v1392_v52 = vpop.f32.mrf.mxu3  ;;  %804 = vmatmul.bf16.gmra.mxu0 %v668_v43 }
 0x224   : > { %v1393_v33 = vadd.f32 %v8065_v7, %v1392_v52 }
 0x225   : > { %v1232_v21 = vpack.c.bf16 %v1193_v49, %v1144_v14 }
 0x226   : > { %v1145_v28 = vpop.f32.mrf.mxu1 }
 0x227   : > { %1248 = vst [vmem:[#allocation3] sm:$0xff] %v1232_v21  ;;  %v1146_v3 = vadd.f32 %v1145_v28, %v1014_v51 }
 0x22a   : > { %v1194_v20 = vpop.f32.mrf.mxu2 }
 0x22b   : > { %v1195_v26 = vadd.f32 %v1194_v20, %v1014_v51  ;;  %v1394_v47 = vpop.f32.mrf.mxu3 }
 0x22c   : > { %v1395_v40 = vadd.f32 %v8065_v7, %v1394_v47 }
 0x22d   : > { %v1233_v11 = vpack.c.bf16 %v1195_v26, %v1146_v3 }
 0x22e   : > { %v1148_v45 = vpop.f32.mrf.mxu1  ;;  %v6220_v27 = vpack.c.bf16 %v1395_v40, %v1393_v33 }
 0x22f   : > { %1249 = vst [vmem:[#allocation3 + $0x8] sm:$0xff] %v1233_v11  ;;  %1361 = vmatmul.bf16.gmra.mxu2 %v1265_v34  ;;  %v1149_v59 = vadd.f32 %v1148_v45, %v1019_v53 }
 0x230   : > { %6298 = vst [vmem:[#allocation4 + $0x48] sm:$0xff] %v6220_v27   ;;  %v770_v44 = vpop.f32.mrf.mxu0 }
 0x231   : > { %v771_v10 = vadd.f32 %v8006_v0, %v770_v44 }
 0x232   : > { %v1197_v2 = vpop.f32.mrf.mxu2 }
 0x233   : > { %v1198_v19 = vadd.f32 %v1197_v2, %v1019_v53  ;;  %v1397_v53 = vpop.f32.mrf.mxu3 }
 0x234   : > { %v1398_v55 = vadd.f32 %v8065_v7, %v1397_v53 }
 0x235   : > { %v1234_v39 = vpack.c.bf16 %v1198_v19, %v1149_v59 }
 0x236   : > { %v1150_v51 = vpop.f32.mrf.mxu1 }
 0x237   : > { %1250 = vst [vmem:[#allocation3 + $0x10] sm:$0xff] %v1234_v39  ;;  %v1151_v5 = vadd.f32 %v1150_v51, %v1024_v18 }
 0x238   : > { %v772_v9 = vpop.f32.mrf.mxu0 }
 0x239   : > { %v773_v14 = vadd.f32 %v8006_v0, %v772_v9 }
 0x23a   : > { %v1199_v57 = vpop.f32.mrf.mxu2 }
 0x23b   : > { %v1200_v63 = vadd.f32 %v1199_v57, %v1024_v18  ;;  %v1399_v18 = vpop.f32.mrf.mxu3  ;;  %v6125_v1 = vpack.c.bf16 %v773_v14, %v771_v10 }
 0x23c   : > { %v1400_v49 = vadd.f32 %v8065_v7, %v1399_v18 }
 0x23d   : > { %v1235_v61 = vpack.c.bf16 %v1200_v63, %v1151_v5  ;;  %6280 = vst [vmem:[#allocation2 + $0x20] sm:$0xff] %v6125_v1  }
 0x23e   : > { %v1153_v32 = vpop.f32.mrf.mxu1  ;;  %v6225_v60 = vpack.c.bf16 %v1400_v49, %v1398_v55 }
 0x23f   : > { %1251 = vst [vmem:[#allocation3 + $0x18] sm:$0xff] %v1235_v61  ;;  %1366 = vmatmul.bf16.gmra.mxu2 %v1266_v30  ;;  %v1154_v25 = vadd.f32 %v1153_v32, %v1029_v46 }
 0x240   : > { %6299 = vst [vmem:[#allocation4 + $0x40] sm:$0xff] %v6225_v60   ;;  %v775_v29 = vpop.f32.mrf.mxu0 }
 0x241   : > { %v776_v36 = vadd.f32 %v8006_v0, %v775_v29 }
 0x242   : > { %v1202_v62 = vpop.f32.mrf.mxu2 }
 0x243   : > { %v1203_v54 = vadd.f32 %v1202_v62, %v1029_v46  ;;  %v1402_v31 = vpop.f32.mrf.mxu3  ;;  %v1049_v46 = vpop.permute.xlu2 %1048 }
 0x244   : > { %v1403_v34 = vadd.f32 %v8065_v7, %v1402_v31 }
 0x245   : > { %v1236_v24 = vpack.c.bf16 %v1203_v54, %v1154_v25 }
 0x246   : > { %v1155_v38 = vpop.f32.mrf.mxu1 }
 0x247   : > { %1252 = vst [vmem:[#allocation3 + $0x20] sm:$0xff] %v1236_v24  ;;  %v1156_v8 = vadd.f32 %v1155_v38, %v1034_v17 }
 0x248   : > { %v777_v50 = vpop.f32.mrf.mxu0 }
 0x249   : > { %v778_v52 = vadd.f32 %v8006_v0, %v777_v50 }
 0x24a   : > { %v1204_v21 = vpop.f32.mrf.mxu2 }
 0x24b   : > { %v1205_v28 = vadd.f32 %v1204_v21, %v1034_v17  ;;  %v1404_v56 = vpop.f32.mrf.mxu3  ;;  %v6130_v45 = vpack.c.bf16 %v778_v52, %v776_v36  ;;  %v1054_v39 = vpop.permute.xlu2 %1053 }
 0x24c   : > { %v1405_v11 = vadd.f32 %v8065_v7, %v1404_v56 }
 0x24d   : > { %v1237_v48 = vpack.c.bf16 %v1205_v28, %v1156_v8  ;;  %6281 = vst [vmem:[#allocation2 + $0x28] sm:$0xff] %v6130_v45  }
 0x24e   : > { %v1158_v3 = vpop.f32.mrf.mxu1  ;;  %v6230_v59 = vpack.c.bf16 %v1405_v11, %v1403_v34 }
 0x24f   : > { %1253 = vst [vmem:[#allocation3 + $0x28] sm:$0xff] %v1237_v48  ;;  %1371 = vmatmul.bf16.gmra.mxu2 %v1267_v15  ;;  %v1159_v20 = vadd.f32 %v1158_v3, %v1039_v13 }
 0x250   : > { %6300 = vst [vmem:[#allocation4 + $0x20] sm:$0xff] %v6230_v59   ;;  %v780_v33 = vpop.f32.mrf.mxu0 }
 0x251   : > { %v781_v17 = vadd.f32 %v8006_v0, %v780_v33 }
 0x252   : > { %v1207_v26 = vpop.f32.mrf.mxu2 }
 0x253   : > { %v1208_v42 = vadd.f32 %v1207_v26, %v1039_v13  ;;  %v1407_v58 = vpop.f32.mrf.mxu3  ;;  %v1059_v61 = vpop.permute.xlu2 %1058 }
 0x254   : > { %v1408_v27 = vadd.f32 %v8065_v7, %v1407_v58 }
 0x255   : > { %v1238_v37 = vpack.c.bf16 %v1208_v42, %v1159_v20 }
 0x256   : > { %v1160_v43 = vpop.f32.mrf.mxu1 }
 0x257   : > { %1254 = vst [vmem:[#allocation3 + $0x30] sm:$0xff] %v1238_v37  ;;  %v1161_v2 = vadd.f32 %v1160_v43, %v1044_v22 }
 0x258   : > { %v782_v5 = vpop.f32.mrf.mxu0 }
 0x259   : > { %v783_v57 = vadd.f32 %v8006_v0, %v782_v5 }
 0x25a   : > { %v1209_v16 = vpop.f32.mrf.mxu2 }
 0x25b   : > { %v1210_v19 = vadd.f32 %v1209_v16, %v1044_v22  ;;  %v1409_v63 = vpop.f32.mrf.mxu3  ;;  %v6135_v44 = vpack.c.bf16 %v783_v57, %v781_v17  ;;  %v1064_v9 = vpop.permute.xlu2 %1063 }
 0x25c   : > { %v1410_v30 = vadd.f32 %v8065_v7, %v1409_v63 }
 0x25d   : > { %v1239_v6 = vpack.c.bf16 %v1210_v19, %v1161_v2  ;;  %6282 = vst [vmem:[#allocation2 + $0x30] sm:$0xff] %v6135_v44  }
 0x25e   : > { %v1163_v47 = vpop.f32.mrf.mxu1  ;;  %v6235_v53 = vpack.c.bf16 %v1410_v30, %v1408_v27 }
 0x25f   : > { %1255 = vst [vmem:[#allocation3 + $0x38] sm:$0xff] %v1239_v6  ;;  %v1164_v51 = vadd.f32 %v1163_v47, %v1049_v46 }
 0x260   : > { %6301 = vst [vmem:[#allocation4 + $0x10] sm:$0xff] %v6235_v53   ;;  %v785_v62 = vpop.f32.mrf.mxu0 }
 0x261   : > { %v786_v18 = vadd.f32 %v8006_v0, %v785_v62 }
 0x262   : > { %v1212_v40 = vpop.f32.mrf.mxu2 }
 0x263   : > { %v1213_v35 = vadd.f32 %v1212_v40, %v1049_v46  ;;  %v1412_v10 = vpop.f32.mrf.mxu3  ;;  %v1069_v3 = vpop.permute.xlu2 %1068 }
 0x264   : > { %v1413_v49 = vadd.f32 %v8065_v7, %v1412_v10 }
 0x265   : > { %v1240_v12 = vpack.c.bf16 %v1213_v35, %v1164_v51 }
 0x266   : > { %v1165_v23 = vpop.f32.mrf.mxu1 }
 0x267   : > { %1256 = vst [vmem:[#allocation3 + $0x40] sm:$0xff] %v1240_v12  ;;  %v1166_v13 = vadd.f32 %v1165_v23, %v1054_v39 }
 0x268   : > { %v787_v1 = vpop.f32.mrf.mxu0 }
 0x269   : > { %v788_v60 = vadd.f32 %v8006_v0, %v787_v1 }
 0x26a   : > { %v1214_v32 = vpop.f32.mrf.mxu2 }
 0x26b   : > { %v1215_v25 = vadd.f32 %v1214_v32, %v1054_v39  ;;  %v1414_v8 = vpop.f32.mrf.mxu3  ;;  %v6140_v4 = vpack.c.bf16 %v788_v60, %v786_v18  ;;  %v1074_v2 = vpop.permute.xlu2 %1073 }
 0x26c   : > { %v1415_v28 = vadd.f32 %v8065_v7, %v1414_v8 }
 0x26d   : > { %v1241_v54 = vpack.c.bf16 %v1215_v25, %v1166_v13  ;;  %6283 = vst [vmem:[#allocation2 + $0x38] sm:$0xff] %v6140_v4  }
 0x26e   : > { %v1168_v55 = vpop.f32.mrf.mxu1  ;;  %v6240_v41 = vpack.c.bf16 %v1415_v28, %v1413_v49 }
 0x26f   : > { %1257 = vst [vmem:[#allocation3 + $0x48] sm:$0xff] %v1241_v54  ;;  %v1169_v24 = vadd.f32 %v1168_v55, %v1059_v61 }
 0x270   : > { %6302 = vst [vmem:[#allocation4 + $0x38] sm:$0xff] %v6240_v41   ;;  %v790_v48 = vpop.f32.mrf.mxu0 }
 0x271   : > { %v791_v34 = vadd.f32 %v8006_v0, %v790_v48 }
 0x272   : > { %v1217_v14 = vpop.f32.mrf.mxu2 }
 0x273   : > { %v1218_v38 = vadd.f32 %v1217_v14, %v1059_v61  ;;  %v1417_v20 = vpop.f32.mrf.mxu3  ;;  %v1079_v17 = vpop.permute.xlu2 %1078 }
 0x274   : > { %v1418_v52 = vadd.f32 %v8065_v7, %v1417_v20 }
 0x275   : > { %v1242_v22 = vpack.c.bf16 %v1218_v38, %v1169_v24 }
 0x276   : > { %v1170_v21 = vpop.f32.mrf.mxu1 }
 0x277   : > { %1258 = vst [vmem:[#allocation3 + $0x50] sm:$0xff] %v1242_v22  ;;  %v1171_v29 = vadd.f32 %v1170_v21, %v1064_v9 }
 0x278   : > { %v792_v56 = vpop.f32.mrf.mxu0 }
 0x279   : > { %v793_v37 = vadd.f32 %v8006_v0, %v792_v56 }
 0x27a   : > { %v1219_v15 = vpop.f32.mrf.mxu2 }
 0x27b   : > { %v1220_v31 = vadd.f32 %v1219_v15, %v1064_v9  ;;  %v1419_v43 = vpop.f32.mrf.mxu3  ;;  %v6145_v16 = vpack.c.bf16 %v793_v37, %v791_v34  ;;  %v1084_v25 = vpop.permute.xlu2 %1083 }
 0x27c   : > { %v1420_v59 = vadd.f32 %v8065_v7, %v1419_v43 }
 0x27d   : > { %v1243_v26 = vpack.c.bf16 %v1220_v31, %v1171_v29  ;;  %6284 = vst [vmem:[#allocation2 + $0x40] sm:$0xff] %v6145_v16  }
 0x27e   : > { %v1173_v36 = vpop.f32.mrf.mxu1  ;;  %v6245_v19 = vpack.c.bf16 %v1420_v59, %v1418_v52 }
 0x27f   : > { %1259 = vst [vmem:[#allocation3 + $0x58] sm:$0xff] %v1243_v26  ;;  %v1174_v50 = vadd.f32 %v1173_v36, %v1069_v3 }
 0x280   : > { %6303 = vst [vmem:[#allocation4 + $0x60] sm:$0xff] %v6245_v19   ;;  %v795_v47 = vpop.f32.mrf.mxu0 }
 0x281   : > { %v796_v27 = vadd.f32 %v8006_v0, %v795_v47 }
 0x282   : > { %v1222_v42 = vpop.f32.mrf.mxu2 }
 0x283   : > { %v1223_v46 = vadd.f32 %v1222_v42, %v1069_v3  ;;  %v1422_v39 = vpop.f32.mrf.mxu3 }
 0x284   : > { %v1423_v63 = vadd.f32 %v8065_v7, %v1422_v39 }
 0x285   : > { %v1244_v11 = vpack.c.bf16 %v1223_v46, %v1174_v50 }
 0x286   : > { %v1175_v45 = vpop.f32.mrf.mxu1 }
 0x287   : > { %1260 = vst [vmem:[#allocation3 + $0x60] sm:$0xff] %v1244_v11  ;;  %v1176_v58 = vadd.f32 %v1175_v45, %v1074_v2 }
 0x288   : > { %v797_v12 = vpop.f32.mrf.mxu0 }
 0x289   : > { %v798_v23 = vadd.f32 %v8006_v0, %v797_v12 }
 0x28a   : > { %v1224_v33 = vpop.f32.mrf.mxu2 }
 0x28b   : > { %v1225_v6 = vadd.f32 %v1224_v33, %v1074_v2  ;;  %v1424_v30 = vpop.f32.mrf.mxu3  ;;  %v6150_v61 = vpack.c.bf16 %v798_v23, %v796_v27 }
 0x28c   : > { %v1425_v53 = vadd.f32 %v8065_v7, %v1424_v30 }
 0x28d   : > { %v1245_v51 = vpack.c.bf16 %v1225_v6, %v1176_v58  ;;  %6285 = vst [vmem:[#allocation2 + $0x48] sm:$0xff] %v6150_v61  }
 0x28e   : > { %v1178_v40 = vpop.f32.mrf.mxu1  ;;  %v6250_v32 = vpack.c.bf16 %v1425_v53, %v1423_v63 }
 0x28f   : > { %1261 = vst [vmem:[#allocation3 + $0x68] sm:$0xff] %v1245_v51  ;;  %v1179_v5 = vadd.f32 %v1178_v40, %v1079_v17 }
 0x290   : > { %6304 = vst [vmem:[#allocation4 + $0x70] sm:$0xff] %v6250_v32   ;;  %v800_v55 = vpop.f32.mrf.mxu0 }
 0x291   : > { %v801_v24 = vadd.f32 %v8006_v0, %v800_v55 }
 0x292   : > { %v1227_v35 = vpop.f32.mrf.mxu2 }
 0x293   : > { %v1228_v57 = vadd.f32 %v1227_v35, %v1079_v17  ;;  %v1427_v9 = vpop.f32.mrf.mxu3 }
 0x294   : > { %v1428_v38 = vadd.f32 %v8065_v7, %v1427_v9 }
 0x295   : > { %v1246_v44 = vpack.c.bf16 %v1228_v57, %v1179_v5 }
 0x296   : > { %v1180_v13 = vpop.f32.mrf.mxu1 }
 0x297   : > { %1262 = vst [vmem:[#allocation3 + $0x70] sm:$0xff] %v1246_v44  ;;  %v1181_v10 = vadd.f32 %v1180_v13, %v1084_v25 }
 0x298   : > { %v802_v49 = vpop.f32.mrf.mxu0 }
 0x299   : > { %v803_v1 = vadd.f32 %v8006_v0, %v802_v49 }
 0x29a   : > { %v1229_v62 = vpop.f32.mrf.mxu2 }
 0x29b   : > { %v1230_v54 = vadd.f32 %v1229_v62, %v1084_v25  ;;  %v1429_v60 = vpop.f32.mrf.mxu3  ;;  %v6155_v22 = vpack.c.bf16 %v803_v1, %v801_v24 }
 0x29c   : > { %v1430_v8 = vadd.f32 %v8065_v7, %v1429_v60 }
 0x29d   : > { %v1247_v14 = vpack.c.bf16 %v1230_v54, %v1181_v10  ;;  %6286 = vst [vmem:[#allocation2 + $0x50] sm:$0xff] %v6155_v22  }
 0x29e   : > { %v6255_v21 = vpack.c.bf16 %v1430_v8, %v1428_v38 }
 0x29f   : > { %1263 = vst [vmem:[#allocation3 + $0x78] sm:$0xff] %v1247_v14 }
 0x2a0   : > { %6305 = vst [vmem:[#allocation4 + $0x78] sm:$0xff] %v6255_v21   ;;  %v805_v15 = vpop.f32.mrf.mxu0 }
 0x2a1   : > { %v806_v3 = vadd.f32 %v8006_v0, %v805_v15 }
 0x2a2   : > { %v1357_v18 = vpop.f32.mrf.mxu2 }
 0x2a3   : > { %v1358_v4 = vadd.f32 %v8065_v7, %v1357_v18  ;;  %v1432_v29 = vpop.f32.mrf.mxu3 }
 0x2a4   : > { %v1433_v20 = vadd.f32 %v8065_v7, %v1432_v29 }
 0x2a8   : > { %v807_v26 = vpop.f32.mrf.mxu0 }
 0x2a9   : > { %v808_v36 = vadd.f32 %v8006_v0, %v807_v26 }
 0x2aa   : > { %v1359_v28 = vpop.f32.mrf.mxu2 }
 0x2ab   : > { %v1360_v41 = vadd.f32 %v8065_v7, %v1359_v28  ;;  %v1434_v42 = vpop.f32.mrf.mxu3  ;;  %v6160_v50 = vpack.c.bf16 %v808_v36, %v806_v3 }
 0x2ac   : > { %v1435_v34 = vadd.f32 %v8065_v7, %v1434_v42 }
 0x2ad   : > { %v6185_v31 = vpack.c.bf16 %v1360_v41, %v1358_v4  ;;  %6287 = vst [vmem:[#allocation2 + $0x58] sm:$0xff] %v6160_v50  }
 0x2ae   : > { %v6260_v46 = vpack.c.bf16 %v1435_v34, %v1433_v20 }
 0x2af   : > { %6186 = vst [vmem:[#allocation4 + $0x30] sm:$0xff] %v6185_v31  }
 0x2b0   : > { %6306 = vst [vmem:[#allocation4 + $0x28] sm:$0xff] %v6260_v46  }
 0x2b2   : > { %v1362_v48 = vpop.f32.mrf.mxu2 }
 0x2b3   : > { %v1363_v56 = vadd.f32 %v8065_v7, %v1362_v48 }
 0x2ba   : > { %v1364_v52 = vpop.f32.mrf.mxu2 }
 0x2bb   : > { %v1365_v37 = vadd.f32 %v8065_v7, %v1364_v52 }
 0x2bd   : > { %v6190_v43 = vpack.c.bf16 %v1365_v37, %v1363_v56 }
 0x2bf   : > { %6292 = vst [vmem:[#allocation4] sm:$0xff] %v6190_v43  }
 0x2c2   : > { %v1367_v11 = vpop.f32.mrf.mxu2 }
 0x2c3   : > { %v1368_v59 = vadd.f32 %v8065_v7, %v1367_v11 }
 0x2ca   : > { %v1369_v45 = vpop.f32.mrf.mxu2 }
 0x2cb   : > { %v1370_v0 = vadd.f32 %v8065_v7, %v1369_v45 }
 0x2cd   : > { %v6195_v2 = vpack.c.bf16 %v1370_v0, %v1368_v59 }
 0x2cf   : > { %6293 = vst [vmem:[#allocation4 + $0x58] sm:$0xff] %v6195_v2  }
 0x2d2   : > { %v1372_v16 = vpop.f32.mrf.mxu2 }
 0x2d3   : > { %v1373_v33 = vadd.f32 %v8065_v7, %v1372_v16 }
 0x2da   : > { %v1374_v19 = vpop.f32.mrf.mxu2 }
 0x2db   : > { %v1375_v58 = vadd.f32 %v8065_v7, %v1374_v19 }
 0x2dd   : > { %v6200_v6 = vpack.c.bf16 %v1375_v58, %v1373_v33 }
 0x2df   : > { %6294 = vst [vmem:[#allocation4 + $0x18] sm:$0xff] %v6200_v6  }
 0x2e0 PF: > { %v5744_v47 = vld [vmem:[#allocation3 + $0x10] sm:$0xf]  ;;  %v6001_v39 = vld [vmem:[#allocation3 + $0x14] sm:$0xf0]  ;;  %v5736_v51 = vld [vmem:[#allocation3] sm:$0xf] }
 0x2e1   : > { %v5745_v40 = vor.u32 %v6001_v39, %v5744_v47  ;;  %v5999_v17 = vld [vmem:[#allocation3 + $0x4] sm:$0xf0]  ;;  %s5700_s8 = sshll.u32 %s7274_s27, 7  ;;  %v6000_v35 = vld [vmem:[#allocation3 + $0x14] sm:$0xf]  ;;  %vm1586_vm0 = vcmask 261120  }
 0x2e2   : > { %s1502_s18 = sshra.s32 %s5700_s8, 3  ;;  %v5746_v27 = vld [vmem:[#allocation3 + $0x18] sm:$0xf0]  ;;  %v5737_v5 = vor.u32 %v5999_v17, %v5736_v51  ;;  %v5998_v63 = vld [vmem:[#allocation3 + $0x4] sm:$0xf]  ;;  %s7299_s16 = smov 96  }
 0x2e3   : > { %6323 = vmatpush.bf16.msra.mxu1 %v5745_v40  ;;  %s5701_s9 = sshll.u32 %s1502_s18, 2  ;;  %1617 = vmatpush.bf16.msra.mxu0 %v5745_v40  ;;  %v5749_v7 = vor.u32 %v6000_v35, %v5746_v27  ;;  %v5738_v12 = vld [vmem:[#allocation3 + $0x8] sm:$0xf0]  ;;  %v6020_v61 = vld [vmem:[#allocation3 + $0x34] sm:$0xf]  ;;  %s7300_s4 = smov 64  }
 0x2e4   : > { %6324 = vmatpush.bf16.msra.mxu2 %v5745_v40  ;;  %6325 = vmatpush.bf16.msra.mxu3 %v5745_v40  ;;  %s8150_s20 = scalar_lea.vmem [#allocation2], %s5701_s9  ;;  %v5741_v44 = vor.u32 %v5998_v63, %v5738_v12  ;;  %v5842_v32 = vld [vmem:[#allocation3 + $0x38] sm:$0xf0]  ;;  %v6009_v54 = vld [vmem:[#allocation4 + $0x48] sm:$0xff]  ;;  %v6006_v38 = vld [vmem:[#allocation4 + $0x50] sm:$0xff]  ;;  %s7301_s28 = smov 32  }
 0x2e5   : > { %v8153_v57 = vld [vmem:[%s8150_s20] sm:$0xff]  ;;  %v5992_v23 = vld [vmem:[%s8150_s20 + $0x10] sm:$0xff]  ;;  %v8157_v30 = vld [vmem:[%s8150_s20 + $0x18] sm:$0xff]  ;;  %v5845_v25 = vor.u32 %v6020_v61, %v5842_v32  ;;  %s11697_s3 = sld [smem:[#allocation175_spill]]  ;;  %s10772_s5 = scalar_lea.vmem %s7527_s11, %s5700_s8 [#allocation5] }
 0x2e6   : > { %2387 = vrot.lane.b32.xlu0 %v8153_v57, %s7299_s16  ;;  %2391 = vrot.lane.b32.xlu1 %v5992_v23, %s7299_s16  ;;  %v5991_v53 = vld [vmem:[%s8150_s20 + $0x8] sm:$0xff]  ;;  %v8172_v13 = vld [vmem:[%s8150_s20 + $0x30] sm:$0xff]  ;;  %v6005_v18 = vld [vmem:[#allocation4 + $0x18] sm:$0xff]  ;;  %s11708_s10 = sld [smem:[#allocation176_spill]]  ;;  %s5959_s8 = sshll.u32 %s7274_s27, 4 }
 0x2e7   : > { %6326 = vmatpush.bf16.msra.mxu1 %v5737_v5  ;;  %1618 = vmatpush.bf16.msra.mxu0 %v5737_v5  ;;  %v8184_v62 = vld [vmem:[%s8150_s20 + $0x28] sm:$0xff]  ;;  %v8187_v10 = vld [vmem:[%s8150_s20 + $0x20] sm:$0xff]  ;;  %v8199_v55 = vld [vmem:[%s8150_s20 + $0x38] sm:$0xff]  ;;  %s11709_s29 = sld [smem:[#allocation177_spill]]  ;;  %s5449_s15 = sshll.u32 %s7551_s24, 4  ;;  %s5450_s15 = int_to_ptr.vmem [resolvable:$true] %s5449_s15 }
 0x2e8   : > { %2393 = vrot.lane.b32.xlu2 %v8157_v30, %s7299_s16  ;;  %6327 = vmatpush.bf16.msra.mxu2 %v5737_v5  ;;  %v6017_v9 = vld [vmem:[#allocation4 + $0x28] sm:$0xff]  ;;  %v6016_v24 = vld [vmem:[#allocation4 + $0x78] sm:$0xff]  ;;  %v6015_v1 = vld [vmem:[#allocation4 + $0x70] sm:$0xff]  ;;  %s11710_s17 = sld [smem:[#allocation21_spill]] }
 0x2e9   : > { %6328 = vmatpush.bf16.msra.mxu3 %v5737_v5  ;;  %v6008_v14 = vld [vmem:[#allocation4 + $0x8] sm:$0xff]  ;;  %v6013_v60 = vld [vmem:[#allocation4 + $0x38] sm:$0xff]  ;;  %v6018_v22 = vld [vmem:[#allocation3 + $0x24] sm:$0xf] }
 0x2ea   : > { %5752 = vmatmul.msk.bf16.vlgmr.msra.gmra.mxu1 %vm1586_vm0, %v5992_v23  ;;  %5750 = vmatmul.msk.bf16.vlgmr.msra.gmra.mxu0 %vm1586_vm0, %v8153_v57  ;;  %v6007_v49 = vld [vmem:[#allocation4 + $0x68] sm:$0xff]  ;;  %v6004_v8 = vld [vmem:[#allocation4 + $0x58] sm:$0xff]  ;;  %v6010_v28 = vld [vmem:[#allocation4 + $0x40] sm:$0xff] }
 0x2eb   : > { %1666 = vmatpush.bf16.msrb.mxu1 %v5749_v7  ;;  %5754 = vmatmul.msk.bf16.vlgmr.msra.gmra.mxu2 %vm1586_vm0, %v8187_v10  ;;  %v5834_v21 = vld [vmem:[#allocation3 + $0x28] sm:$0xf0]  ;;  %v6012_v41 = vld [vmem:[#allocation4 + $0x10] sm:$0xff]  ;;  %v6014_v15 = vld [vmem:[#allocation4 + $0x60] sm:$0xff] }
 0x2ec   : > { %5756 = vmatmul.msk.bf16.vlgmr.msra.gmra.mxu3 %vm1586_vm0, %v8172_v13  ;;  %2045 = vmatpush.bf16.msrb.mxu2 %v6009_v54  ;;  %v5837_v4 = vor.u32 %v6018_v22, %v5834_v21  ;;  %v5840_v29 = vld [vmem:[#allocation3 + $0x30] sm:$0xf]  ;;  %v6021_v31 = vld [vmem:[#allocation3 + $0x34] sm:$0xf0]  ;;  %v5832_v3 = vld [vmem:[#allocation3 + $0x20] sm:$0xf] }
 0x2ed   : > { %2094 = vmatpush.bf16.msrb.mxu3 %v6017_v9  ;;  %v5841_v48 = vor.u32 %v6021_v31, %v5840_v29  ;;  %v6019_v20 = vld [vmem:[#allocation3 + $0x24] sm:$0xf0]  ;;  %v6003_v26 = vld [vmem:[#allocation4] sm:$0xff]  ;;  %v6002_v34 = vld [vmem:[#allocation4 + $0x30] sm:$0xff] }
 0x2ee   : > { %2389 = vrot.lane.b32.xlu0 %v5991_v53, %s7299_s16  ;;  %2395 = vrot.lane.b32.xlu1 %v8187_v10, %s7299_s16  ;;  %v5833_v36 = vor.u32 %v6019_v20, %v5832_v3  ;;  %v6011_v42 = vld [vmem:[#allocation4 + $0x20] sm:$0xff]  ;;  %s5960_s18 = sshll.u32 %s11710_s17, 5 }
 0x2ef   : > { %1667 = vmatpush.bf16.msrb.mxu1 %v5741_v44  ;;  %2453 = vmatpush.bf16.msrb.mxu0 %v5841_v48  ;;  %s5446_s9 = sadd.s32 %s5960_s18, %s5959_s8 }
 0x2f0   : > { %2397 = vrot.lane.b32.xlu2 %v8184_v62, %s7299_s16  ;;  %2046 = vmatpush.bf16.msrb.mxu2 %v6008_v14 }
 0x2f1   : > { %2095 = vmatpush.bf16.msrb.mxu3 %v6016_v24 }
 0x2f3   : > { %2502 = vmatpush.bf16.msra.mxu1 %v5845_v25  ;;  %2454 = vmatpush.bf16.msrb.mxu0 %v5833_v36 }
 0x2f4   : > { %2047 = vmatpush.bf16.msrb.mxu2 %v6007_v49 }
 0x2f5   : > { %2096 = vmatpush.bf16.msrb.mxu3 %v6015_v1 }
 0x2f6   : > { %2399 = vrot.lane.b32.xlu0 %v8172_v13, %s7299_s16  ;;  %2401 = vrot.lane.b32.xlu1 %v8199_v55, %s7299_s16 }
 0x2f7   : > { %2503 = vmatpush.bf16.msra.mxu1 %v5837_v4  ;;  %v6023_v4 = vld [vmem:[#allocation3 + $0x44] sm:$0xf0] }
 0x2f8   : > { %3145 = vrot.lane.b32.xlu2 %v5991_v53, %s7300_s4  ;;  %2048 = vmatpush.bf16.msrb.mxu2 %v6006_v38 }
 0x2f9   : > { %2097 = vmatpush.bf16.msrb.mxu3 %v6014_v15 }
 0x2fa   : > { %5753 = vmatmul.msk.bf16.gmra.mxu1 %vm1586_vm0, %v8157_v30  ;;  %5751 = vmatmul.msk.bf16.gmra.mxu0 %vm1586_vm0, %v5991_v53 }
 0x2fb   : > { %5755 = vmatmul.msk.bf16.gmra.mxu2 %vm1586_vm0, %v8184_v62 }
 0x2fc   : > { %5757 = vmatmul.msk.bf16.gmra.mxu3 %vm1586_vm0, %v8199_v55  ;;  %2049 = vmatpush.bf16.msrb.mxu2 %v6005_v18 }
 0x2fd   : > { %2098 = vmatpush.bf16.msrb.mxu3 %v6013_v60 }
 0x2fe   : > { %3143 = vrot.lane.b32.xlu0 %v8153_v57, %s7300_s4  ;;  %2765 = vrot.lane.b32.xlu1 %v6008_v14, %s7299_s16 }
 0x300   : > { %3147 = vrot.lane.b32.xlu2 %v5992_v23, %s7300_s4  ;;  %2050 = vmatpush.bf16.msrb.mxu2 %v6004_v8 }
 0x301   : > { %2099 = vmatpush.bf16.msrb.mxu3 %v6012_v41 }
 0x304   : > { %2051 = vmatpush.bf16.msrb.mxu2 %v6003_v26 }
 0x305   : > { %2100 = vmatpush.bf16.msrb.mxu3 %v6011_v42 }
 0x306   : > { %2767 = vrot.lane.b32.xlu0 %v6009_v54, %s7299_s16  ;;  %2761 = vrot.lane.b32.xlu1 %v6006_v38, %s7299_s16 }
 0x308   : > { %2781 = vrot.lane.b32.xlu2 %v6016_v24, %s7299_s16  ;;  %2052 = vmatpush.bf16.msrb.mxu2 %v6002_v34 }
 0x309   : > { %2101 = vmatpush.bf16.msrb.mxu3 %v6010_v28 }
 0x30a   : > { %5758 = vmatmul.msk.bf16.vlgmr.msrb.gmra.mxu1 %vm1586_vm0, %v8153_v57 }
 0x30e   : > { %2783 = vrot.lane.b32.xlu0 %v6017_v9, %s7299_s16  ;;  %2775 = vrot.lane.b32.xlu1 %v6013_v60, %s7299_s16  ;;  %v6025_v60 = vld [vmem:[#allocation3 + $0x54] sm:$0xf0] }
 0x310   : > { %2763 = vrot.lane.b32.xlu2 %v6007_v49, %s7299_s16 }
 0x316   : > { %2759 = vrot.lane.b32.xlu0 %v6005_v18, %s7299_s16  ;;  %2769 = vrot.lane.b32.xlu1 %v6010_v28, %s7299_s16  ;;  %v5864_v28 = vld [vmem:[#allocation3 + $0x40] sm:$0xf] }
 0x318   : > { %2779 = vrot.lane.b32.xlu2 %v6015_v1, %s7299_s16  ;;  %v5872_v1 = vld [vmem:[#allocation3 + $0x50] sm:$0xf] }
 0x319   : > { %v5873_v22 = vor.u32 %v6025_v60, %v5872_v1 }
 0x31a   : > { %5759 = vmatmul.msk.bf16.gmra.mxu1 %vm1586_vm0, %v5991_v53 }
 0x31b   : > { %3209 = vmatpush.bf16.msra.mxu0 %v5873_v22 }
 0x31e   : > { %3149 = vrot.lane.b32.xlu0 %v8157_v30, %s7300_s4 }
 0x320   : > { %2777 = vrot.lane.b32.xlu2 %v6014_v15, %s7299_s16  ;;  %v5865_v15 = vor.u32 %v6023_v4, %v5864_v28 }
 0x322   : > { %3210 = vmatpush.bf16.msra.mxu0 %v5865_v15 }
 0x326   : > { %2757 = vrot.lane.b32.xlu0 %v6004_v8, %s7299_s16 }
 0x328   : > { %2771 = vrot.lane.b32.xlu2 %v6011_v42, %s7299_s16 }
 0x32a   : > { %5760 = vmatmul.msk.bf16.gmra.mxu1 %vm1586_vm0, %v5992_v23 }
 0x32e   : > { %2773 = vrot.lane.b32.xlu0 %v6012_v41, %s7299_s16 }
 0x336   : > { %2755 = vrot.lane.b32.xlu0 %v6003_v26, %s7299_s16 }
 0x33a   : > { %5761 = vmatmul.msk.bf16.gmra.mxu1 %vm1586_vm0, %v8157_v30 }
 0x33e   : > { %2753 = vrot.lane.b32.xlu0 %v6002_v34, %s7299_s16 }
 0x342   : > { %v2394_v2 = vpop.permute.xlu2 %2393 }
 0x34a   : > { %5762 = vmatmul.msk.bf16.gmra.mxu1 %vm1586_vm0, %v8187_v10  ;;  %v8277_v27 = vpop.permute.xlu2 %2397 }
 0x352   : > { %v8286_v12 = vpop.permute.xlu2 %3145 }
 0x358   : > { %v2388_v50 = vpop.permute.xlu0 %2387  ;;  %v2392_v43 = vpop.permute.xlu1 %2391 }
 0x359   : > { %5846 = vmatmul.msk.bf16.vlgmr.msrb.gmra.mxu0 %vm1586_vm0, %v2388_v50 }
 0x35a   : > { %5763 = vmatmul.msk.bf16.gmra.mxu1 %vm1586_vm0, %v8184_v62  ;;  %v8296_v61 = vpop.permute.xlu2 %3147 }
 0x360   : > { %v2390_v52 = vpop.permute.xlu0 %2389  ;;  %v2396_v39 = vpop.permute.xlu1 %2395 }
 0x362   : > { %v2782_v14 = vpop.permute.xlu2 %2781 }
 0x367   : > { %v8233_v46 = vpop.f32.mrf.mxu1  ;;  %v8247_v45 = vpop.f32.mrf.mxu0 }
 0x368   : > { %v8268_v51 = vpop.permute.xlu0 %2399  ;;  %v8294_v53 = vpop.permute.xlu1 %2401 }
 0x369   : > { %5847 = vmatmul.msk.bf16.gmra.mxu0 %vm1586_vm0, %v2390_v52 }
 0x36a   : > { %5764 = vmatmul.msk.bf16.gmra.mxu1 %vm1586_vm0, %v8172_v13  ;;  %v2764_v8 = vpop.permute.xlu2 %2763 }
 0x36e   : > { %v8307_v38 = vpop.f32.mrf.mxu2 }
 0x36f   : > { %v8238_v56 = vpop.f32.mrf.mxu1  ;;  %v8253_v16 = vpop.f32.mrf.mxu0 }
 0x370   : > { %v8279_v5 = vpop.permute.xlu0 %3143  ;;  %v2766_v9 = vpop.permute.xlu1 %2765 }
 0x372   : > { %v2780_v3 = vpop.permute.xlu2 %2779 }
 0x376   : > { %v8317_v48 = vpop.f32.mrf.mxu2 }
 0x377   : > { %v8240_v37 = vpop.f32.mrf.mxu1  ;;  %v8261_v58 = vpop.f32.mrf.mxu0 }
 0x378   : > { %v2768_v23 = vpop.permute.xlu0 %2767  ;;  %v2762_v41 = vpop.permute.xlu1 %2761 }
 0x379   : > { %5848 = vmatmul.msk.bf16.gmra.mxu0 %vm1586_vm0, %v2392_v43  ;;  %2801 = vmatpush.bf16.msra.mxu2 %v2768_v23  ;;  %v6024_v23 = vld [vmem:[#allocation3 + $0x54] sm:$0xf] }
 0x37a   : > { %5765 = vmatmul.msk.bf16.gmra.mxu1 %vm1586_vm0, %v8199_v55  ;;  %v2778_v42 = vpop.permute.xlu2 %2777 }
 0x37d   : > { %2802 = vmatpush.bf16.msra.mxu2 %v2766_v9  ;;  %v6022_v9 = vld [vmem:[#allocation3 + $0x44] sm:$0xf] }
 0x37e   : > { %v8326_v34 = vpop.f32.mrf.mxu2 }
 0x37f   : > { %v8245_v11 = vpop.f32.mrf.mxu1  ;;  %v8271_v40 = vpop.f32.mrf.mxu0 }
 0x380   : > { %v2784_v32 = vpop.permute.xlu0 %2783 }
 0x381   : > { %2850 = vmatpush.bf16.msra.mxu3 %v2784_v32  ;;  %2803 = vmatpush.bf16.msra.mxu2 %v2764_v8 }
 0x385   : > { %2851 = vmatpush.bf16.msra.mxu3 %v2782_v14  ;;  %2804 = vmatpush.bf16.msra.mxu2 %v2762_v41  ;;  %v5866_v14 = vld [vmem:[#allocation3 + $0x48] sm:$0xf0] }
 0x387   : > { %v8249_v59 = vpop.f32.mrf.mxu1 }
 0x388   : > { %v1709_v0 = vmax.f32 %v8247_v45, %v8249_v59  ;;  %v2760_v18 = vpop.permute.xlu0 %2759 }
 0x389   : > { %5849 = vmatmul.msk.bf16.gmra.mxu0 %vm1586_vm0, %v2394_v2  ;;  %2852 = vmatpush.bf16.msra.mxu3 %v2780_v3 }
 0x38a   : > { %5854 = vmatmul.msk.bf16.vlgmr.msra.gmra.mxu1 %vm1586_vm0, %v2388_v50  ;;  %1710 = vmax.xlane.f32.xlu1 %v1709_v0 }
 0x38b   : > { %2805 = vmatpush.bf16.msra.mxu2 %v2760_v18  ;;  %v5869_v18 = vor.u32 %v6022_v9, %v5866_v14 }
 0x38d   : > { %2853 = vmatpush.bf16.msra.mxu3 %v2778_v42 }
 0x38f   : > { %v8257_v19 = vpop.f32.mrf.mxu1 }
 0x390   : > { %v1712_v33 = vmax.f32 %v8253_v16, %v8257_v19  ;;  %v8311_v21 = vpop.permute.xlu0 %3149 }
 0x392   : > { %1713 = vmax.xlane.f32.xlu2 %v1712_v33  ;;  %v8336_v33 = vpop.f32.mrf.mxu2 }
 0x397   : > { %v8263_v6 = vpop.f32.mrf.mxu1 }
 0x398   : > { %v1715_v47 = vmax.f32 %v8261_v58, %v8263_v6  ;;  %v2758_v20 = vpop.permute.xlu0 %2757 }
 0x399   : > { %5850 = vmatmul.msk.bf16.gmra.mxu0 %vm1586_vm0, %v2396_v39  ;;  %2806 = vmatpush.bf16.msra.mxu2 %v2758_v20 }
 0x39a   : > { %5855 = vmatmul.msk.bf16.gmra.mxu1 %vm1586_vm0, %v2390_v52  ;;  %1716 = vmax.xlane.f32.xlu0 %v1715_v47  ;;  %v2776_v52 = vpop.permute.xlu1 %2775  ;;  %v2772_v47 = vpop.permute.xlu2 %2771 }
 0x39b   : > { %2854 = vmatpush.bf16.msra.mxu3 %v2776_v52 }
 0x39f   : > { %v8273_v17 = vpop.f32.mrf.mxu1 }
 0x3a0   : > { %v1718_v35 = vmax.f32 %v8271_v40, %v8273_v17  ;;  %v2774_v50 = vpop.permute.xlu0 %2773 }
 0x3a1   : > { %2855 = vmatpush.bf16.msra.mxu3 %v2774_v50 }
 0x3a2   : > { %1719 = vmax.xlane.f32.xlu2 %v1718_v35  ;;  %v8340_v35 = vpop.f32.mrf.mxu3 }
 0x3a5   : > { %2856 = vmatpush.bf16.msra.mxu3 %v2772_v47 }
 0x3a7   : > { %v8281_v7 = vpop.f32.mrf.mxu1 }
 0x3a8   : > { %v1721_v63 = vmax.f32 %v8233_v46, %v8281_v7 }
 0x3a9   : > { %5851 = vmatmul.msk.bf16.gmra.mxu0 %vm1586_vm0, %v8277_v27 }
 0x3aa   : > { %5856 = vmatmul.msk.bf16.gmra.mxu1 %vm1586_vm0, %v2392_v43  ;;  %1722 = vmax.xlane.f32.xlu0 %v1721_v63  ;;  %v8348_v60 = vpop.f32.mrf.mxu3 }
 0x3af   : > { %v8290_v30 = vpop.f32.mrf.mxu1 }
 0x3b0   : > { %v1724_v44 = vmax.f32 %v8238_v56, %v8290_v30 }
 0x3b2   : > { %1725 = vmax.xlane.f32.xlu0 %v1724_v44  ;;  %v2770_v44 = vpop.permute.xlu1 %2769  ;;  %v8358_v28 = vpop.f32.mrf.mxu3 }
 0x3b3   : > { %2857 = vmatpush.bf16.msra.mxu3 %v2770_v44 }
 0x3b7   : > { %v8298_v25 = vpop.f32.mrf.mxu1 }
 0x3b8   : > { %v1727_v54 = vmax.f32 %v8240_v37, %v8298_v25 }
 0x3b9   : > { %5852 = vmatmul.msk.bf16.gmra.mxu0 %vm1586_vm0, %v8268_v51 }
 0x3ba   : > { %5857 = vmatmul.msk.bf16.gmra.mxu1 %vm1586_vm0, %v2394_v2  ;;  %1728 = vmax.xlane.f32.xlu0 %v1727_v54  ;;  %v2756_v2 = vpop.permute.xlu0 %2755 }
 0x3bb   : > { %2807 = vmatpush.bf16.msra.mxu2 %v2756_v2 }
 0x3bf   : > { %v8305_v24 = vpop.f32.mrf.mxu1 }
 0x3c0   : > { %v1730_v49 = vmax.f32 %v8245_v11, %v8305_v24 }
 0x3c2   : > { %1731 = vmax.xlane.f32.xlu1 %v1730_v49  ;;  %v2754_v54 = vpop.permute.xlu0 %2753 }
 0x3c3   : > { %2808 = vmatpush.bf16.msra.mxu2 %v2754_v54 }
 0x3c7   : > { %v8313_v29 = vpop.f32.mrf.mxu1 }
 0x3c8   : > { %v1733_v31 = vmax.f32 %v8307_v38, %v8313_v29 }
 0x3c9   : > { %5853 = vmatmul.msk.bf16.gmra.mxu0 %vm1586_vm0, %v8294_v53 }
 0x3ca   : > { %5858 = vmatmul.msk.bf16.gmra.mxu1 %vm1586_vm0, %v2396_v39  ;;  %1734 = vmax.xlane.f32.xlu2 %v1733_v31  ;;  %v8370_v31 = vpop.f32.mrf.mxu3 }
 0x3cf   : > { %v8322_v26 = vpop.f32.mrf.mxu1 }
 0x3d0   : > { %v1736_v36 = vmax.f32 %v8317_v48, %v8322_v26 }
 0x3d2   : > { %1737 = vmax.xlane.f32.xlu0 %v1736_v36 }
 0x3d6   : > { %v8364_v15 = vpop.f32.mrf.mxu0 }
 0x3d7   : > { %v8328_v43 = vpop.f32.mrf.mxu1 }
 0x3d8   : > { %v1739_v0 = vmax.f32 %v8326_v34, %v8328_v43 }
 0x3d9   : > { %5878 = vmatmul.msk.bf16.vlgmr.msra.gmra.mxu0 %vm1586_vm0, %v8279_v5 }
 0x3da   : > { %5859 = vmatmul.msk.bf16.gmra.mxu1 %vm1586_vm0, %v8277_v27  ;;  %1740 = vmax.xlane.f32.xlu2 %v1739_v0  ;;  %v5874_v27 = vld [vmem:[#allocation3 + $0x58] sm:$0xf0] }
 0x3db   : > { %v5877_v32 = vor.u32 %v6024_v23, %v5874_v27 }
 0x3dd   : > { %3258 = vmatpush.bf16.msrb.mxu1 %v5877_v32 }
 0x3df   : > { %v8338_v39 = vpop.f32.mrf.mxu1 }
 0x3e0   : > { %v1742_v63 = vmax.f32 %v8336_v33, %v8338_v39 }
 0x3e1   : > { %3259 = vmatpush.bf16.msrb.mxu1 %v5869_v18 }
 0x3e2   : > { %1743 = vmax.xlane.f32.xlu1 %v1742_v63 }
 0x3e7   : > { %v8344_v49 = vpop.f32.mrf.mxu1 }
 0x3e8   : > { %v1745_v1 = vmax.f32 %v8340_v35, %v8344_v49 }
 0x3e9   : > { %5879 = vmatmul.msk.bf16.gmra.mxu0 %vm1586_vm0, %v8286_v12 }
 0x3ea   : > { %5860 = vmatmul.msk.bf16.gmra.mxu1 %vm1586_vm0, %v8268_v51  ;;  %1746 = vmax.xlane.f32.xlu2 %v1745_v1 }
 0x3ef   : > { %v8354_v8 = vpop.f32.mrf.mxu1 }
 0x3f0   : > { %v1748_v22 = vmax.f32 %v8348_v60, %v8354_v8 }
 0x3f2   : > { %1749 = vmax.xlane.f32.xlu2 %v1748_v22 }
 0x3f7   : > { %v8360_v4 = vpop.f32.mrf.mxu1 }
 0x3f8   : > { %v1751_v41 = vmax.f32 %v8358_v28, %v8360_v4 }
 0x3f9   : > { %5880 = vmatmul.msk.bf16.gmra.mxu0 %vm1586_vm0, %v8296_v61 }
 0x3fa   : > { %5861 = vmatmul.msk.bf16.gmra.mxu1 %vm1586_vm0, %v8294_v53  ;;  %1752 = vmax.xlane.f32.xlu0 %v1751_v41  ;;  %v8378_v53 = vpop.f32.mrf.mxu0 }
 0x3fd   : > { %v1711_v51 = vpop.xlane.xlu1 %1710 }
 0x3fe   : > { %v1757_v3 = vsub.f32 %v8247_v45, %v1711_v51  ;;  %v1758_v20 = vsub.f32 %v8249_v59, %v1711_v51 }
 0x3ff   : > { %v8374_v36 = vpop.f32.mrf.mxu1 }
 0x400   : > { %v1789_v42 = vmul.f32 1.442695, %v1757_v3  ;;  %v1791_v50 = vmul.f32 1.442695, %v1758_v20  ;;  %v1754_v52 = vmax.f32 %v8370_v31, %v8374_v36 }
 0x402   : > { %6595 = vpow2.f32 %v1789_v42  ;;  %1755 = vmax.xlane.f32.xlu1 %v1754_v52 }
 0x403   : > { %6597 = vpow2.f32 %v1791_v50 }
 0x405   : > { %v1714_v0 = vpop.xlane.xlu2 %1713 }
 0x406   : > { %v1759_v2 = vsub.f32 %v8253_v16, %v1714_v0  ;;  %v1760_v47 = vsub.f32 %v8257_v19, %v1714_v0  ;;  %v8392_v16 = vpop.f32.mrf.mxu0 }
 0x407   : > { %v8382_v45 = vpop.f32.mrf.mxu1 }
 0x408   : > { %v6596_v59 = vpop.eup %6595  ;;  %v1793_v63 = vmul.f32 1.442695, %v1759_v2  ;;  %v1795_v23 = vmul.f32 1.442695, %v1760_v47  ;;  %v2545_v27 = vmax.f32 %v8364_v15, %v8382_v45 }
 0x409   : > { %v6598_v44 = vpop.eup %6597  ;;  %5881 = vmatmul.msk.bf16.gmra.mxu0 %vm1586_vm0, %v8311_v21 }
 0x40a   : > { %6599 = vpow2.f32 %v1793_v63  ;;  %5886 = vmatmul.msk.bf16.vlgmr.msrb.gmra.mxu1 %vm1586_vm0, %v8279_v5  ;;  %2546 = vmax.xlane.f32.xlu2 %v2545_v27  ;;  %v8388_v32 = vadd.f32 %v6598_v44, %v6596_v59 }
 0x40b   : > { %6601 = vpow2.f32 %v1795_v23 }
 0x40d   : > { %v1717_v19 = vpop.xlane.xlu0 %1716 }
 0x40e   : > { %v1761_v54 = vsub.f32 %v8261_v58, %v1717_v19  ;;  %v1762_v9 = vsub.f32 %v8263_v6, %v1717_v19  ;;  %v8404_v50 = vpop.f32.mrf.mxu0 }
 0x40f   : > { %v8396_v14 = vpop.f32.mrf.mxu1 }
 0x410   : > { %v6600_v18 = vpop.eup %6599  ;;  %v1797_v1 = vmul.f32 1.442695, %v1761_v54  ;;  %v1799_v22 = vmul.f32 1.442695, %v1762_v9  ;;  %v2548_v5 = vmax.f32 %v8378_v53, %v8396_v14 }
 0x411   : > { %v6602_v41 = vpop.eup %6601  ;;  %v1933_v51 = vpack.c.bf16 %v6600_v18, %v6596_v59 }
 0x412   : > { %6603 = vpow2.f32 %v1797_v1  ;;  %2549 = vmax.xlane.f32.xlu1 %v2548_v5  ;;  %v1934_v3 = vpack.c.bf16 %v6602_v41, %v6598_v44  ;;  %v8400_v20 = vadd.f32 %v6602_v41, %v6600_v18 }
 0x413   : > { %6605 = vpow2.f32 %v1799_v22  ;;  %2053 = vmatmul.bf16.vlgmr.msrb.gmra.mxu2 %v1933_v51 }
 0x414   : > { %11383 = vst [vmem:[#allocation66_spill] sm:$0xff] %v8400_v20  ;;  %2102 = vmatmul.bf16.vlgmr.msrb.gmra.mxu3 %v1934_v3 }
 0x415   : > { %v1720_v58 = vpop.xlane.xlu2 %1719 }
 0x416   : > { %v1763_v6 = vsub.f32 %v8271_v40, %v1720_v58  ;;  %v1764_v42 = vsub.f32 %v8273_v17, %v1720_v58  ;;  %v8420_v22 = vpop.f32.mrf.mxu0 }
 0x417   : > { %v8406_v52 = vpop.f32.mrf.mxu1 }
 0x418   : > { %v6604_v0 = vpop.eup %6603  ;;  %v1801_v2 = vmul.f32 1.442695, %v1763_v6  ;;  %v1803_v47 = vmul.f32 1.442695, %v1764_v42  ;;  %v2551_v59 = vmax.f32 %v8392_v16, %v8406_v52 }
 0x419   : > { %v6606_v63 = vpop.eup %6605 }
 0x41a   : > { %6607 = vpow2.f32 %v1801_v2  ;;  %5887 = vmatmul.msk.bf16.gmra.mxu1 %vm1586_vm0, %v8286_v12  ;;  %2552 = vmax.xlane.f32.xlu0 %v2551_v59  ;;  %v8412_v23 = vadd.f32 %v6606_v63, %v6604_v0 }
 0x41b   : > { %6609 = vpow2.f32 %v1803_v47 }
 0x41c   : > { %11384 = vst [vmem:[#allocation67_spill] sm:$0xff] %v8412_v23 }
 0x41d   : > { %v1723_v40 = vpop.xlane.xlu0 %1722 }
 0x41e   : > { %v1765_v17 = vsub.f32 %v8233_v46, %v1723_v40  ;;  %v1766_v27 = vsub.f32 %v8281_v7, %v1723_v40  ;;  %v8432_v47 = vpop.f32.mrf.mxu0 }
 0x41f   : > { %v8416_v44 = vpop.f32.mrf.mxu1 }
 0x420   : > { %v6608_v19 = vpop.eup %6607  ;;  %v1805_v54 = vmul.f32 1.442695, %v1765_v17  ;;  %v1807_v9 = vmul.f32 1.442695, %v1766_v27  ;;  %v2554_v18 = vmax.f32 %v8404_v50, %v8416_v44 }
 0x421   : > { %v6610_v1 = vpop.eup %6609  ;;  %v1935_v12 = vpack.c.bf16 %v6608_v19, %v6604_v0 }
 0x422   : > { %6611 = vpow2.f32 %v1805_v54  ;;  %2555 = vmax.xlane.f32.xlu2 %v2554_v18  ;;  %v1936_v5 = vpack.c.bf16 %v6610_v1, %v6606_v63  ;;  %v8422_v41 = vadd.f32 %v6610_v1, %v6608_v19 }
 0x423   : > { %6613 = vpow2.f32 %v1807_v9  ;;  %2058 = vmatmul.bf16.gmra.mxu2 %v1935_v12 }
 0x424   : > { %11385 = vst [vmem:[#allocation68_spill] sm:$0xff] %v8422_v41  ;;  %2107 = vmatmul.bf16.gmra.mxu3 %v1936_v5 }
 0x425   : > { %v1726_v46 = vpop.xlane.xlu0 %1725 }
 0x426   : > { %v1767_v7 = vsub.f32 %v8238_v56, %v1726_v46  ;;  %v1768_v51 = vsub.f32 %v8290_v30, %v1726_v46 }
 0x427   : > { %v8426_v3 = vpop.f32.mrf.mxu1 }
 0x428   : > { %v6612_v58 = vpop.eup %6611  ;;  %v1809_v6 = vmul.f32 1.442695, %v1767_v7  ;;  %v1811_v42 = vmul.f32 1.442695, %v1768_v51 }
 0x429   : > { %v6614_v2 = vpop.eup %6613 }
 0x42a   : > { %6615 = vpow2.f32 %v1809_v6  ;;  %5888 = vmatmul.msk.bf16.gmra.mxu1 %vm1586_vm0, %v8296_v61  ;;  %v8430_v0 = vadd.f32 %v6614_v2, %v6612_v58 }
 0x42b   : > { %6617 = vpow2.f32 %v1811_v42  ;;  %3151 = vrot.lane.b32.xlu1 %v8187_v10, %s7300_s4  ;;  %v8444_v10 = vpop.f32.mrf.mxu0 }
 0x42c   : > { %11386 = vst [vmem:[#allocation69_spill] sm:$0xff] %v8430_v0 }
 0x42d   : > { %v1729_v56 = vpop.xlane.xlu0 %1728 }
 0x42e   : > { %v1769_v63 = vsub.f32 %v8240_v37, %v1729_v56  ;;  %v1770_v61 = vsub.f32 %v8298_v25, %v1729_v56 }
 0x42f   : > { %v8436_v30 = vpop.f32.mrf.mxu1 }
 0x430   : > { %v6616_v59 = vpop.eup %6615  ;;  %v2560_v40 = vmax.f32 %v8432_v47, %v8436_v30  ;;  %v1813_v9 = vmul.f32 1.442695, %v1769_v63  ;;  %v1815_v18 = vmul.f32 1.442695, %v1770_v61 }
 0x431   : > { %v6618_v17 = vpop.eup %6617  ;;  %v1937_v27 = vpack.c.bf16 %v6616_v59, %v6612_v58 }
 0x432   : > { %2561 = vmax.xlane.f32.xlu0 %v2560_v40  ;;  %v1938_v19 = vpack.c.bf16 %v6618_v17, %v6614_v2  ;;  %v8442_v54 = vadd.f32 %v6618_v17, %v6616_v59  ;;  %6619 = vpow2.f32 %v1813_v9 }
 0x433   : > { %2063 = vmatmul.bf16.gmra.mxu2 %v1937_v27  ;;  %6621 = vpow2.f32 %v1815_v18  ;;  %v8454_v6 = vpop.f32.mrf.mxu0 }
 0x434   : > { %11387 = vst [vmem:[#allocation70_spill] sm:$0xff] %v8442_v54  ;;  %2112 = vmatmul.bf16.gmra.mxu3 %v1938_v19 }
 0x435   : > { %v1732_v1 = vpop.xlane.xlu1 %1731 }
 0x436   : > { %v1771_v37 = vsub.f32 %v8245_v11, %v1732_v1  ;;  %v1772_v12 = vsub.f32 %v8305_v24, %v1732_v1 }
 0x437   : > { %v8448_v5 = vpop.f32.mrf.mxu1 }
 0x438   : > { %v1817_v25 = vmul.f32 1.442695, %v1771_v37  ;;  %v1819_v46 = vmul.f32 1.442695, %v1772_v12  ;;  %v2563_v7 = vmax.f32 %v8444_v10, %v8448_v5  ;;  %v6620_v58 = vpop.eup %6619 }
 0x439   : > { %v6622_v11 = vpop.eup %6621 }
 0x43a   : > { %6623 = vpow2.f32 %v1817_v25  ;;  %5889 = vmatmul.msk.bf16.gmra.mxu1 %vm1586_vm0, %v8311_v21  ;;  %2564 = vmax.xlane.f32.xlu2 %v2563_v7  ;;  %v2557_v7 = vmax.f32 %v8420_v22, %v8426_v3 }
 0x43b   : > { %6625 = vpow2.f32 %v1819_v46 }
 0x43d   : > { %v1735_v51 = vpop.xlane.xlu2 %1734 }
 0x43e   : > { %v1773_v2 = vsub.f32 %v8307_v38, %v1735_v51  ;;  %v1774_v63 = vsub.f32 %v8313_v29, %v1735_v51 }
 0x43f   : > { %v8456_v24 = vpop.f32.mrf.mxu1 }
 0x440   : > { %v8458_v42 = vpop.eup %6623  ;;  %v2566_v56 = vmax.f32 %v8454_v6, %v8456_v24  ;;  %v1821_v17 = vmul.f32 1.442695, %v1773_v2  ;;  %v1823_v61 = vmul.f32 1.442695, %v1774_v63 }
 0x441   : > { %v6626_v59 = vpop.eup %6625  ;;  %v1939_v21 = vpack.c.bf16 %v8458_v42, %v6620_v58 }
 0x442   : > { %2567 = vmax.xlane.f32.xlu2 %v2566_v56  ;;  %v1940_v40 = vpack.c.bf16 %v6626_v59, %v6622_v11  ;;  %6627 = vpow2.f32 %v1821_v17 }
 0x443   : > { %2068 = vmatmul.bf16.gmra.mxu2 %v1939_v21  ;;  %6629 = vpow2.f32 %v1823_v61 }
 0x444   : > { %2117 = vmatmul.bf16.gmra.mxu3 %v1940_v40 }
 0x445   : > { %v1738_v27 = vpop.xlane.xlu0 %1737 }
 0x446   : > { %v1775_v19 = vsub.f32 %v8317_v48, %v1738_v27  ;;  %v1776_v9 = vsub.f32 %v8322_v26, %v1738_v27  ;;  %3153 = vrot.lane.b32.xlu0 %v8184_v62, %s7300_s4  ;;  %v8495_v27 = vadd.f32 %v6622_v11, %v6620_v58 }
 0x447   : > { %v8489_v21 = vpop.f32.mrf.mxu1 }
 0x448   : > { %v1825_v38 = vmul.f32 1.442695, %v1775_v19  ;;  %v1827_v18 = vmul.f32 1.442695, %v1776_v9  ;;  %v8469_v1 = vpop.eup %6627  ;;  %11392 = vst [vmem:[#allocation75_spill] sm:$0xff] %v8495_v27 }
 0x449   : > { %11388 = vst [vmem:[#allocation71_spill] sm:$0xff] %v8469_v1  ;;  %v8471_v37 = vpop.eup %6629 }
 0x44a   : > { %6631 = vpow2.f32 %v1825_v38  ;;  %11389 = vst [vmem:[#allocation72_spill] sm:$0xff] %v8471_v37 }
 0x44b   : > { %6633 = vpow2.f32 %v1827_v18 }
 0x44d   : > { %v1741_v29 = vpop.xlane.xlu2 %1740 }
 0x44e   : > { %v1777_v48 = vsub.f32 %v8326_v34, %v1741_v29  ;;  %v1778_v26 = vsub.f32 %v8328_v43, %v1741_v29  ;;  %v8487_v43 = vpop.f32.mrf.mxu0 }
 0x44f   : > { %v2569_v61 = vmax.f32 %v8487_v43, %v8489_v21 }
 0x450   : > { %v8473_v12 = vpop.eup %6631  ;;  %v1829_v51 = vmul.f32 1.442695, %v1777_v48  ;;  %v1831_v2 = vmul.f32 1.442695, %v1778_v26  ;;  %v8512_v48 = vadd.f32 %v6626_v59, %v8458_v42 }
 0x451   : > { %11390 = vst [vmem:[#allocation73_spill] sm:$0xff] %v8473_v12  ;;  %v8476_v25 = vpop.eup %6633  ;;  %v1941_v62 = vpack.c.bf16 %v8473_v12, %v8469_v1 }
 0x452   : > { %11391 = vst [vmem:[#allocation74_spill] sm:$0xff] %v8476_v25  ;;  %v1942_v46 = vpack.c.bf16 %v8476_v25, %v8471_v37  ;;  %6635 = vpow2.f32 %v1829_v51  ;;  %v5898_v37 = vld [vmem:[#allocation3 + $0x68] sm:$0xf0] }
 0x453   : > { %2073 = vmatmul.bf16.gmra.mxu2 %v1941_v62  ;;  %6637 = vpow2.f32 %v1831_v2  ;;  %11397 = vst [vmem:[#allocation80_spill] sm:$0xff] %v8512_v48  ;;  %v8518_v2 = vpop.f32.mrf.mxu1 }
 0x454   : > { %2122 = vmatmul.bf16.gmra.mxu3 %v1942_v46 }
 0x455   : > { %v1744_v56 = vpop.xlane.xlu1 %1743  ;;  %2558 = vmax.xlane.f32.xlu1 %v2557_v7 }
 0x456   : > { %v1779_v34 = vsub.f32 %v8336_v33, %v1744_v56  ;;  %v1780_v63 = vsub.f32 %v8338_v39, %v1744_v56  ;;  %v8516_v51 = vpop.f32.mrf.mxu0 }
 0x457   : > { %v2572_v42 = vmax.f32 %v8516_v51, %v8518_v2 }
 0x458   : > { %v1833_v40 = vmul.f32 1.442695, %v1779_v34  ;;  %v1835_v17 = vmul.f32 1.442695, %v1780_v63  ;;  %v8497_v39 = vpop.eup %6635 }
 0x459   : > { %11393 = vst [vmem:[#allocation76_spill] sm:$0xff] %v8497_v39  ;;  %v8499_v19 = vpop.eup %6637 }
 0x45a   : > { %6639 = vpow2.f32 %v1833_v40  ;;  %3155 = vrot.lane.b32.xlu2 %v8172_v13, %s7300_s4  ;;  %11394 = vst [vmem:[#allocation77_spill] sm:$0xff] %v8499_v19 }
 0x45b   : > { %6641 = vpow2.f32 %v1835_v17 }
 0x45d   : > { %2570 = vmax.xlane.f32.xlu1 %v2569_v61  ;;  %v1747_v33 = vpop.xlane.xlu2 %1746 }
 0x45e   : > { %v1781_v38 = vsub.f32 %v8340_v35, %v1747_v33  ;;  %v1782_v29 = vsub.f32 %v8344_v49, %v1747_v33  ;;  %v8536_v33 = vpop.f32.mrf.mxu0 }
 0x460   : > { %v8501_v9 = vpop.eup %6639  ;;  %v1837_v11 = vmul.f32 1.442695, %v1781_v38  ;;  %v1839_v26 = vmul.f32 1.442695, %v1782_v29  ;;  %v8538_v38 = vpop.f32.mrf.mxu1 }
 0x461   : > { %11395 = vst [vmem:[#allocation78_spill] sm:$0xff] %v8501_v9  ;;  %v8504_v18 = vpop.eup %6641  ;;  %v1943_v13 = vpack.c.bf16 %v8501_v9, %v8497_v39 }
 0x462   : > { %11396 = vst [vmem:[#allocation79_spill] sm:$0xff] %v8504_v18  ;;  %v1944_v58 = vpack.c.bf16 %v8504_v18, %v8499_v19  ;;  %6643 = vpow2.f32 %v1837_v11 }
 0x463   : > { %2078 = vmatmul.bf16.gmra.mxu2 %v1943_v13  ;;  %6645 = vpow2.f32 %v1839_v26 }
 0x464   : > { %2127 = vmatmul.bf16.gmra.mxu3 %v1944_v58 }
 0x465   : > { %v1750_v62 = vpop.xlane.xlu2 %1749 }
 0x466   : > { %v1783_v35 = vsub.f32 %v8348_v60, %v1750_v62  ;;  %v1784_v46 = vsub.f32 %v8354_v8, %v1750_v62 }
 0x468   : > { %v1841_v49 = vmul.f32 1.442695, %v1783_v35  ;;  %v1843_v7 = vmul.f32 1.442695, %v1784_v46  ;;  %v8520_v34 = vpop.eup %6643  ;;  %v8546_v46 = vpop.f32.mrf.mxu0 }
 0x469   : > { %11398 = vst [vmem:[#allocation81_spill] sm:$0xff] %v8520_v34  ;;  %v8524_v59 = vpop.eup %6645 }
 0x46a   : > { %6647 = vpow2.f32 %v1841_v49  ;;  %11399 = vst [vmem:[#allocation82_spill] sm:$0xff] %v8524_v59  ;;  %v8548_v49 = vpop.f32.mrf.mxu1 }
 0x46b   : > { %6649 = vpow2.f32 %v1843_v7 }
 0x46d   : > { %v1753_v56 = vpop.xlane.xlu0 %1752 }
 0x46e   : > { %v1785_v8 = vsub.f32 %v8358_v28, %v1753_v56  ;;  %v1786_v40 = vsub.f32 %v8360_v4, %v1753_v56 }
 0x470   : > { %v8526_v60 = vpop.eup %6647  ;;  %2573 = vmax.xlane.f32.xlu0 %v2572_v42  ;;  %v1845_v29 = vmul.f32 1.442695, %v1785_v8  ;;  %v1847_v13 = vmul.f32 1.442695, %v1786_v40 }
 0x471   : > { %11400 = vst [vmem:[#allocation83_spill] sm:$0xff] %v8526_v60  ;;  %v8529_v63 = vpop.eup %6649  ;;  %v1945_v17 = vpack.c.bf16 %v8526_v60, %v8520_v34 }
 0x472   : > { %11401 = vst [vmem:[#allocation84_spill] sm:$0xff] %v8529_v63  ;;  %v1946_v61 = vpack.c.bf16 %v8529_v63, %v8524_v59  ;;  %6651 = vpow2.f32 %v1845_v29 }
 0x473   : > { %2083 = vmatmul.bf16.gmra.mxu2 %v1945_v17  ;;  %6653 = vpow2.f32 %v1847_v13 }
 0x474   : > { %2132 = vmatmul.bf16.gmra.mxu3 %v1946_v61 }
 0x475   : > { %v1756_v28 = vpop.xlane.xlu1 %1755 }
 0x476   : > { %v1787_v58 = vsub.f32 %v8370_v31, %v1756_v28  ;;  %v1788_v11 = vsub.f32 %v8374_v36, %v1756_v28  ;;  %3157 = vrot.lane.b32.xlu1 %v8199_v55, %s7300_s4  ;;  %v2575_v55 = vmax.f32 %v8536_v33, %v8538_v38  ;;  %v8568_v28 = vpop.f32.mrf.mxu0 }
 0x478   : > { %v1849_v4 = vmul.f32 1.442695, %v1787_v58  ;;  %v1851_v26 = vmul.f32 1.442695, %v1788_v11  ;;  %v8544_v35 = vpop.eup %6651  ;;  %v8570_v58 = vpop.f32.mrf.mxu1 }
 0x479   : > { %11402 = vst [vmem:[#allocation85_spill] sm:$0xff] %v8544_v35  ;;  %v8552_v7 = vpop.eup %6653 }
 0x47a   : > { %6655 = vpow2.f32 %v1849_v4  ;;  %11403 = vst [vmem:[#allocation86_spill] sm:$0xff] %v8552_v7 }
 0x47b   : > { %6657 = vpow2.f32 %v1851_v26 }
 0x47d   : > { %v2547_v62 = vpop.xlane.xlu2 %2546 }
 0x47e   : > { %v2593_v31 = vsub.f32 %v8364_v15, %v2547_v62  ;;  %v2594_v36 = vsub.f32 %v8382_v45, %v2547_v62  ;;  %v2581_v62 = vmax.f32 %v8568_v28, %v8570_v58 }
 0x480   : > { %v8556_v56 = vpop.eup %6655  ;;  %v2625_v42 = vmul.f32 1.442695, %v2593_v31  ;;  %v2627_v8 = vmul.f32 1.442695, %v2594_v36 }
 0x481   : > { %11404 = vst [vmem:[#allocation87_spill] sm:$0xff] %v8556_v56  ;;  %v8558_v40 = vpop.eup %6657  ;;  %v1947_v17 = vpack.c.bf16 %v8556_v56, %v8544_v35 }
 0x482   : > { %11405 = vst [vmem:[#allocation88_spill] sm:$0xff] %v8558_v40  ;;  %6659 = vpow2.f32 %v2625_v42  ;;  %v1948_v15 = vpack.c.bf16 %v8558_v40, %v8552_v7 }
 0x483   : > { %6661 = vpow2.f32 %v2627_v8  ;;  %2576 = vmax.xlane.f32.xlu2 %v2575_v55  ;;  %2088 = vmatmul.bf16.gmra.mxu2 %v1947_v17 }
 0x484   : > { %2137 = vmatmul.bf16.gmra.mxu3 %v1948_v15  ;;  %3899 = vrot.lane.b32.xlu0 %v8153_v57, %s7301_s28 }
 0x485   : > { %v2550_v45 = vpop.xlane.xlu1 %2549 }
 0x486   : > { %v2595_v61 = vsub.f32 %v8378_v53, %v2550_v45  ;;  %v2596_v29 = vsub.f32 %v8396_v14, %v2550_v45 }
 0x488   : > { %v6660_v13 = vpop.eup %6659  ;;  %v2629_v11 = vmul.f32 1.442695, %v2595_v61  ;;  %v2631_v4 = vmul.f32 1.442695, %v2596_v29 }
 0x489   : > { %v6662_v26 = vpop.eup %6661 }
 0x48a   : > { %6663 = vpow2.f32 %v2629_v11  ;;  %v8574_v31 = vadd.f32 %v6662_v26, %v6660_v13 }
 0x48b   : > { %6665 = vpow2.f32 %v2631_v4  ;;  %2582 = vmax.xlane.f32.xlu2 %v2581_v62 }
 0x48d   : > { %v2553_v57 = vpop.xlane.xlu0 %2552 }
 0x48e   : > { %v2597_v53 = vsub.f32 %v8392_v16, %v2553_v57  ;;  %v2598_v14 = vsub.f32 %v8406_v52, %v2553_v57 }
 0x490   : > { %v6664_v36 = vpop.eup %6663  ;;  %v2633_v55 = vmul.f32 1.442695, %v2597_v53  ;;  %v2635_v42 = vmul.f32 1.442695, %v2598_v14 }
 0x491   : > { %v6666_v8 = vpop.eup %6665  ;;  %v2737_v17 = vpack.c.bf16 %v6664_v36, %v6660_v13 }
 0x492   : > { %6667 = vpow2.f32 %v2633_v55  ;;  %v2738_v15 = vpack.c.bf16 %v6666_v8, %v6662_v26  ;;  %v8578_v45 = vadd.f32 %v6666_v8, %v6664_v36 }
 0x493   : > { %6669 = vpow2.f32 %v2635_v42  ;;  %2809 = vmatmul.bf16.vlgmr.msra.gmra.mxu2 %v2737_v17 }
 0x494   : > { %2858 = vmatmul.bf16.vlgmr.msra.gmra.mxu3 %v2738_v15 }
 0x495   : > { %v2556_v61 = vpop.xlane.xlu2 %2555 }
 0x496   : > { %v2599_v29 = vsub.f32 %v8404_v50, %v2556_v61  ;;  %v2600_v11 = vsub.f32 %v8416_v44, %v2556_v61  ;;  %v2054_v16 = vpop.f32.mrf.mxu2  ;;  %v2578_v50 = vmax.f32 %v8546_v46, %v8548_v49  ;;  %v7013_v61 = vld [vmem:[%s8150_s20 + $0x8] sm:$0xff] }
 0x497   : > { %v2103_v4 = vpop.f32.mrf.mxu3 }
 0x498   : > { %v6668_v52 = vpop.eup %6667  ;;  %v2637_v62 = vmul.f32 1.442695, %v2599_v29  ;;  %v2639_v57 = vmul.f32 1.442695, %v2600_v11  ;;  %v8582_v53 = vadd.f32 %v2103_v4, %v2054_v16 }
 0x499   : > { %v6670_v13 = vpop.eup %6669 }
 0x49a   : > { %11406 = vst [vmem:[#allocation89_spill] sm:$0xff] %v8582_v53  ;;  %6671 = vpow2.f32 %v2637_v62  ;;  %v8584_v26 = vadd.f32 %v6670_v13, %v6668_v52 }
 0x49b   : > { %6673 = vpow2.f32 %v2639_v57 }
 0x49d   : > { %v3152_v14 = vpop.permute.xlu1 %3151 }
 0x49e   : > { %v8586_v36 = vpop.f32.mrf.mxu2  ;;  %5882 = vmatmul.msk.bf16.gmra.mxu0 %vm1586_vm0, %v3152_v14  ;;  %5890 = vmatmul.msk.bf16.gmra.mxu1 %vm1586_vm0, %v3152_v14 }
 0x49f   : > { %11407 = vst [vmem:[#allocation90_spill] sm:$0xff] %v8586_v36  ;;  %v8592_v44 = vpop.f32.mrf.mxu3 }
 0x4a0   : > { %11408 = vst [vmem:[#allocation91_spill] sm:$0xff] %v8592_v44  ;;  %v6672_v55 = vpop.eup %6671  ;;  %2579 = vmax.xlane.f32.xlu1 %v2578_v50 }
 0x4a1   : > { %v6674_v42 = vpop.eup %6673  ;;  %v2739_v8 = vpack.c.bf16 %v6672_v55, %v6668_v52  ;;  %v8602_v52 = vpop.f32.mrf.mxu0 }
 0x4a2   : > { %v2740_v17 = vpack.c.bf16 %v6674_v42, %v6670_v13  ;;  %v8594_v15 = vadd.f32 %v6674_v42, %v6672_v55  ;;  %v8604_v13 = vpop.f32.mrf.mxu1  ;;  %v8606_v55 = vld [vmem:[#allocation4 + $0x28] sm:$0xff] }
 0x4a3   : > { %3901 = vrot.lane.b32.xlu2 %v7013_v61, %s7301_s28  ;;  %2814 = vmatmul.bf16.gmra.mxu2 %v2739_v8 }
 0x4a4   : > { %2863 = vmatmul.bf16.gmra.mxu3 %v2740_v17 }
 0x4a5   : > { %v2562_v29 = vpop.xlane.xlu0 %2561 }
 0x4a6   : > { %v2603_v11 = vsub.f32 %v8432_v47, %v2562_v29  ;;  %v2604_v16 = vsub.f32 %v8436_v30, %v2562_v29  ;;  %v2059_v4 = vpop.f32.mrf.mxu2  ;;  %v2584_v47 = vmax.f32 %v8602_v52, %v8604_v13 }
 0x4a7   : > { %v2108_v62 = vpop.f32.mrf.mxu3 }
 0x4a8   : > { %v2645_v57 = vmul.f32 1.442695, %v2603_v11  ;;  %v2647_v14 = vmul.f32 1.442695, %v2604_v16  ;;  %v8600_v50 = vadd.f32 %v2108_v62, %v2059_v4 }
 0x4aa   : > { %11409 = vst [vmem:[#allocation92_spill] sm:$0xff] %v8600_v50  ;;  %6675 = vpow2.f32 %v2645_v57 }
 0x4ab   : > { %6677 = vpow2.f32 %v2647_v14  ;;  %3539 = vrot.lane.b32.xlu2 %v8606_v55, %s7300_s4 }
 0x4ad   : > { %v2565_v30 = vpop.xlane.xlu2 %2564 }
 0x4ae   : > { %v2605_v42 = vsub.f32 %v8444_v10, %v2565_v30  ;;  %v2606_v8 = vsub.f32 %v8448_v5, %v2565_v30  ;;  %2585 = vmax.xlane.f32.xlu0 %v2584_v47  ;;  %v8614_v17 = vpop.f32.mrf.mxu2 }
 0x4af   : > { %11410 = vst [vmem:[#allocation93_spill] sm:$0xff] %v8614_v17  ;;  %v8616_v61 = vpop.f32.mrf.mxu3 }
 0x4b0   : > { %11411 = vst [vmem:[#allocation94_spill] sm:$0xff] %v8616_v61  ;;  %v8618_v29 = vpop.eup %6675  ;;  %v2649_v11 = vmul.f32 1.442695, %v2605_v42  ;;  %v2651_v16 = vmul.f32 1.442695, %v2606_v8  ;;  %v8790_v61 = vld [vmem:[#allocation4 + $0x20] sm:$0xff] }
 0x4b1   : > { %v8620_v4 = vpop.eup %6677 }
 0x4b2   : > { %6679 = vpow2.f32 %v2649_v11  ;;  %v8624_v62 = vadd.f32 %v8620_v4, %v8618_v29 }
 0x4b3   : > { %6681 = vpow2.f32 %v2651_v16 }
 0x4b4   : > { %11412 = vst [vmem:[#allocation95_spill] sm:$0xff] %v8624_v62 }
 0x4b5   : > { %v2568_v10 = vpop.xlane.xlu2 %2567 }
 0x4b6   : > { %v2607_v5 = vsub.f32 %v8454_v6, %v2568_v10  ;;  %v2608_v57 = vsub.f32 %v8456_v24, %v2568_v10  ;;  %v2064_v14 = vpop.f32.mrf.mxu2  ;;  %v8636_v6 = vld [vmem:[#allocation4 + $0x48] sm:$0xff] }
 0x4b7   : > { %v2113_v47 = vpop.f32.mrf.mxu3 }
 0x4b8   : > { %v8628_v30 = vpop.eup %6679  ;;  %v2653_v7 = vmul.f32 1.442695, %v2607_v5  ;;  %v2655_v42 = vmul.f32 1.442695, %v2608_v57  ;;  %v8630_v8 = vadd.f32 %v2113_v47, %v2064_v14  ;;  %v3154_v11 = vpop.permute.xlu0 %3153  ;;  %v7016_v14 = vld [vmem:[%s8150_s20 + $0x10] sm:$0xff] }
 0x4b9   : > { %v8632_v35 = vpop.eup %6681  ;;  %5883 = vmatmul.msk.bf16.gmra.mxu0 %vm1586_vm0, %v3154_v11  ;;  %5891 = vmatmul.msk.bf16.gmra.mxu1 %vm1586_vm0, %v3154_v11  ;;  %v8658_v47 = vpop.f32.mrf.mxu0 }
 0x4ba   : > { %11413 = vst [vmem:[#allocation96_spill] sm:$0xff] %v8630_v8  ;;  %6683 = vpow2.f32 %v2653_v7  ;;  %3523 = vrot.lane.b32.xlu1 %v8636_v6, %s7300_s4  ;;  %v8642_v24 = vadd.f32 %v8632_v35, %v8628_v30 }
 0x4bb   : > { %6685 = vpow2.f32 %v2655_v42  ;;  %v8660_v42 = vpop.f32.mrf.mxu1 }
 0x4bc   : > { %11414 = vst [vmem:[#allocation97_spill] sm:$0xff] %v8642_v24 }
 0x4bd   : > { %v3156_v63 = vpop.permute.xlu2 %3155 }
 0x4be   : > { %v8644_v16 = vpop.f32.mrf.mxu2 }
 0x4bf   : > { %11415 = vst [vmem:[#allocation98_spill] sm:$0xff] %v8644_v16  ;;  %v8646_v10 = vpop.f32.mrf.mxu3 }
 0x4c0   : > { %11416 = vst [vmem:[#allocation99_spill] sm:$0xff] %v8646_v10  ;;  %v8648_v5 = vpop.eup %6683 }
 0x4c1   : > { %v8650_v57 = vpop.eup %6685  ;;  %v8676_v18 = vpop.f32.mrf.mxu0 }
 0x4c2   : > { %3903 = vrot.lane.b32.xlu0 %v7016_v14, %s7301_s28  ;;  %v8656_v7 = vadd.f32 %v8650_v57, %v8648_v5  ;;  %v8668_v14 = vld [vmem:[#allocation4 + $0x8] sm:$0xff] }
 0x4c6   : > { %v2069_v11 = vpop.f32.mrf.mxu2 }
 0x4c7   : > { %v2118_v60 = vpop.f32.mrf.mxu3 }
 0x4c8   : > { %v8662_v40 = vadd.f32 %v2118_v60, %v2069_v11  ;;  %v2559_v56 = vpop.xlane.xlu1 %2558 }
 0x4c9   : > { %v2601_v59 = vsub.f32 %v8420_v22, %v2559_v56  ;;  %v2602_v34 = vsub.f32 %v8426_v3, %v2559_v56  ;;  %5884 = vmatmul.msk.bf16.gmra.mxu0 %vm1586_vm0, %v3156_v63  ;;  %5892 = vmatmul.msk.bf16.gmra.mxu1 %vm1586_vm0, %v3156_v63  ;;  %v6029_v3 = vld [vmem:[#allocation3 + $0x74] sm:$0xf0]  ;;  %v6028_v56 = vld [vmem:[#allocation3 + $0x74] sm:$0xf]  ;;  %v8678_v63 = vpop.f32.mrf.mxu1 }
 0x4ca   : > { %11417 = vst [vmem:[#allocation100_spill] sm:$0xff] %v8662_v40  ;;  %3521 = vrot.lane.b32.xlu0 %v8668_v14, %s7300_s4  ;;  %v5904_v40 = vld [vmem:[#allocation3 + $0x70] sm:$0xf] }
 0x4cb   : > { %v2641_v19 = vmul.f32 1.442695, %v2601_v59  ;;  %v2643_v39 = vmul.f32 1.442695, %v2602_v34  ;;  %v5905_v59 = vor.u32 %v6029_v3, %v5904_v40  ;;  %v5906_v34 = vld [vmem:[#allocation3 + $0x78] sm:$0xf0] }
 0x4cc   : > { %v6027_v40 = vld [vmem:[#allocation3 + $0x64] sm:$0xf0] }
 0x4cd   : > { %6687 = vpow2.f32 %v2641_v19  ;;  %v8682_v19 = vld [vmem:[#allocation4 + $0x78] sm:$0xff]  ;;  %3965 = vmatpush.bf16.msrb.mxu0 %v5905_v59 }
 0x4ce   : > { %6689 = vpow2.f32 %v2643_v39  ;;  %v8672_v60 = vpop.f32.mrf.mxu2  ;;  %v2590_v39 = vmax.f32 %v8676_v18, %v8678_v63 }
 0x4cf   : > { %11418 = vst [vmem:[#allocation101_spill] sm:$0xff] %v8672_v60  ;;  %v8674_v11 = vpop.f32.mrf.mxu3 }
 0x4d0   : > { %11419 = vst [vmem:[#allocation102_spill] sm:$0xff] %v8674_v11  ;;  %v2571_v22 = vpop.xlane.xlu1 %2570  ;;  %v5909_v11 = vor.u32 %v6028_v56, %v5906_v34 }
 0x4d1   : > { %v2609_v9 = vsub.f32 %v8487_v43, %v2571_v22  ;;  %v2610_v10 = vsub.f32 %v8489_v21, %v2571_v22  ;;  %v5896_v21 = vld [vmem:[#allocation3 + $0x60] sm:$0xf]  ;;  %v6026_v22 = vld [vmem:[#allocation3 + $0x64] sm:$0xf] }
 0x4d2   : > { %3537 = vrot.lane.b32.xlu0 %v8682_v19, %s7300_s4  ;;  %4014 = vmatpush.bf16.msra.mxu1 %v5909_v11  ;;  %v5897_v12 = vor.u32 %v6027_v40, %v5896_v21  ;;  %v2744_v21 = vpack.c.bf16 %v8650_v57, %v8632_v35 }
 0x4d3   : > { %v6688_v60 = vpop.eup %6687  ;;  %v2657_v16 = vmul.f32 1.442695, %v2609_v9  ;;  %v2659_v8 = vmul.f32 1.442695, %v2610_v10  ;;  %v5901_v9 = vor.u32 %v6026_v22, %v5898_v37  ;;  %v8704_v37 = vld [vmem:[#allocation4 + $0x60] sm:$0xff] }
 0x4d4   : > { %v6690_v25 = vpop.eup %6689  ;;  %2591 = vmax.xlane.f32.xlu2 %v2590_v39  ;;  %v2741_v43 = vpack.c.bf16 %v8618_v29, %v6688_v60  ;;  %3966 = vmatpush.bf16.msrb.mxu0 %v5897_v12  ;;  %v8694_v29 = vld [vmem:[#allocation4 + $0x68] sm:$0xff]  ;;  %v2587_v12 = vmax.f32 %v8658_v47, %v8660_v42 }
 0x4d5   : > { %6691 = vpow2.f32 %v2657_v16  ;;  %v2742_v3 = vpack.c.bf16 %v8620_v4, %v6690_v25  ;;  %v8690_v1 = vadd.f32 %v6690_v25, %v6688_v60 }
 0x4d6   : > { %6693 = vpow2.f32 %v2659_v8  ;;  %v2074_v56 = vpop.f32.mrf.mxu2  ;;  %2819 = vmatmul.bf16.gmra.mxu2 %v2741_v43  ;;  %4015 = vmatpush.bf16.msra.mxu1 %v5901_v9  ;;  %v2743_v43 = vpack.c.bf16 %v8648_v5, %v8628_v30 }
 0x4d7   : > { %v2123_v10 = vpop.f32.mrf.mxu3  ;;  %2868 = vmatmul.bf16.gmra.mxu3 %v2742_v3 }
 0x4d8   : > { %v8692_v59 = vadd.f32 %v2123_v10, %v2074_v56 }
 0x4da   : > { %11420 = vst [vmem:[#allocation103_spill] sm:$0xff] %v8692_v59  ;;  %3519 = vrot.lane.b32.xlu0 %v8694_v29, %s7300_s4 }
 0x4db   : > { %v6692_v4 = vpop.eup %6691 }
 0x4dc   : > { %v6694_v16 = vpop.eup %6693 }
 0x4dd   : > { %v8698_v11 = vadd.f32 %v6694_v16, %v6692_v4 }
 0x4de   : > { %v8700_v25 = vpop.f32.mrf.mxu2 }
 0x4df   : > { %11421 = vst [vmem:[#allocation104_spill] sm:$0xff] %v8698_v11  ;;  %v8702_v8 = vpop.f32.mrf.mxu3 }
 0x4e0   : > { %11422 = vst [vmem:[#allocation105_spill] sm:$0xff] %v8700_v25 }
 0x4e1   : > { %11423 = vst [vmem:[#allocation106_spill] sm:$0xff] %v8702_v8 }
 0x4e2   : > { %3533 = vrot.lane.b32.xlu0 %v8704_v37, %s7300_s4 }
 0x4e3   : > { %v2574_v60 = vpop.xlane.xlu0 %2573 }
 0x4e4   : > { %v2611_v34 = vsub.f32 %v8516_v51, %v2574_v60  ;;  %v2612_v39 = vsub.f32 %v8518_v2, %v2574_v60  ;;  %2588 = vmax.xlane.f32.xlu1 %v2587_v12  ;;  %v8720_v51 = vld [vmem:[#allocation4 + $0x18] sm:$0xff]  ;;  %v8724_v2 = vld [vmem:[#allocation4 + $0x50] sm:$0xff] }
 0x4e5   : > { %v8734_v60 = vld [vmem:[#allocation4 + $0x38] sm:$0xff] }
 0x4e6   : > { %v2661_v40 = vmul.f32 1.442695, %v2611_v34  ;;  %v2663_v22 = vmul.f32 1.442695, %v2612_v39  ;;  %v2079_v3 = vpop.f32.mrf.mxu2  ;;  %2824 = vmatmul.bf16.gmra.mxu2 %v2743_v43 }
 0x4e7   : > { %v2128_v56 = vpop.f32.mrf.mxu3  ;;  %2873 = vmatmul.bf16.gmra.mxu3 %v2744_v21 }
 0x4e8   : > { %6695 = vpow2.f32 %v2661_v40  ;;  %v8716_v9 = vadd.f32 %v2128_v56, %v2079_v3  ;;  %v3158_v10 = vpop.permute.xlu1 %3157  ;;  %v7024_v56 = vld [vmem:[%s8150_s20 + $0x18] sm:$0xff] }
 0x4e9   : > { %6697 = vpow2.f32 %v2663_v22  ;;  %5885 = vmatmul.msk.bf16.gmra.mxu0 %vm1586_vm0, %v3158_v10  ;;  %5893 = vmatmul.msk.bf16.gmra.mxu1 %vm1586_vm0, %v3158_v10  ;;  %v8744_v10 = vld [vmem:[#allocation4 + $0x70] sm:$0xff] }
 0x4ea   : > { %11424 = vst [vmem:[#allocation107_spill] sm:$0xff] %v8716_v9  ;;  %3515 = vrot.lane.b32.xlu0 %v8720_v51, %s7300_s4 }
 0x4ec   : > { %3517 = vrot.lane.b32.xlu2 %v8724_v2, %s7300_s4 }
 0x4ee   : > { %v6696_v35 = vpop.eup %6695  ;;  %v8728_v30 = vpop.f32.mrf.mxu2 }
 0x4ef   : > { %11425 = vst [vmem:[#allocation108_spill] sm:$0xff] %v8728_v30  ;;  %v6698_v5 = vpop.eup %6697  ;;  %v8730_v57 = vpop.f32.mrf.mxu3  ;;  %v2745_v34 = vpack.c.bf16 %v6696_v35, %v6692_v4 }
 0x4f0   : > { %11426 = vst [vmem:[#allocation109_spill] sm:$0xff] %v8730_v57  ;;  %v8732_v12 = vadd.f32 %v6698_v5, %v6696_v35  ;;  %v2746_v39 = vpack.c.bf16 %v6698_v5, %v6694_v16  ;;  %v8752_v5 = vld [vmem:[#allocation4 + $0x58] sm:$0xff] }
 0x4f2   : > { %11427 = vst [vmem:[#allocation110_spill] sm:$0xff] %v8732_v12  ;;  %3531 = vrot.lane.b32.xlu0 %v8734_v60, %s7300_s4 }
 0x4f6   : > { %v2084_v43 = vpop.f32.mrf.mxu2  ;;  %2829 = vmatmul.bf16.gmra.mxu2 %v2745_v34  ;;  %v2577_v21 = vpop.xlane.xlu2 %2576 }
 0x4f7   : > { %v2133_v40 = vpop.f32.mrf.mxu3  ;;  %2878 = vmatmul.bf16.gmra.mxu3 %v2746_v39  ;;  %v3900_v3 = vpop.permute.xlu0 %3899  ;;  %v2614_v30 = vsub.f32 %v8538_v38, %v2577_v21 }
 0x4f8   : > { %v8738_v22 = vadd.f32 %v2133_v40, %v2084_v43  ;;  %v8756_v34 = vpop.f32.mrf.mxu0  ;;  %v8758_v39 = vpop.f32.mrf.mxu1 }
 0x4f9   : > { %5910 = vmatmul.msk.bf16.vlgmr.msrb.gmra.mxu0 %vm1586_vm0, %v3900_v3  ;;  %5918 = vmatmul.msk.bf16.vlgmr.msra.gmra.mxu1 %vm1586_vm0, %v3900_v3  ;;  %v2667_v8 = vmul.f32 1.442695, %v2614_v30 }
 0x4fa   : > { %11428 = vst [vmem:[#allocation111_spill] sm:$0xff] %v8738_v22  ;;  %3905 = vrot.lane.b32.xlu0 %v7024_v56, %s7301_s28  ;;  %v8764_v22 = vld [vmem:[#allocation4 + $0x10] sm:$0xff] }
 0x4fd   : > { %3535 = vrot.lane.b32.xlu1 %v8744_v10, %s7300_s4 }
 0x4fe   : > { %v8748_v4 = vpop.f32.mrf.mxu2  ;;  %v2583_v16 = vpop.xlane.xlu2 %2582 }
 0x4ff   : > { %11429 = vst [vmem:[#allocation112_spill] sm:$0xff] %v8748_v4  ;;  %v8750_v35 = vpop.f32.mrf.mxu3 }
 0x500   : > { %11430 = vst [vmem:[#allocation113_spill] sm:$0xff] %v8750_v35  ;;  %v2613_v35 = vsub.f32 %v8536_v33, %v2577_v21 }
 0x502   : > { %3513 = vrot.lane.b32.xlu0 %v8752_v5, %s7300_s4 }
 0x506   : > { %v2089_v43 = vpop.f32.mrf.mxu2  ;;  %v3902_v40 = vpop.permute.xlu2 %3901 }
 0x507   : > { %v2138_v3 = vpop.f32.mrf.mxu3 }
 0x508   : > { %v8760_v56 = vadd.f32 %v2138_v3, %v2089_v43  ;;  %v8774_v43 = vpop.f32.mrf.mxu0  ;;  %v8776_v3 = vpop.f32.mrf.mxu1 }
 0x509   : > { %5911 = vmatmul.msk.bf16.gmra.mxu0 %vm1586_vm0, %v3902_v40  ;;  %5919 = vmatmul.msk.bf16.gmra.mxu1 %vm1586_vm0, %v3902_v40  ;;  %v2665_v40 = vmul.f32 1.442695, %v2613_v35 }
 0x50a   : > { %11431 = vst [vmem:[#allocation114_spill] sm:$0xff] %v8760_v56  ;;  %3529 = vrot.lane.b32.xlu0 %v8764_v22, %s7300_s4  ;;  %v8778_v56 = vld [vmem:[#allocation4] sm:$0xff] }
 0x50b   : > { %6699 = vpow2.f32 %v2665_v40  ;;  %v2618_v40 = vsub.f32 %v8570_v58, %v2583_v16 }
 0x50c   : > { %6701 = vpow2.f32 %v2667_v8 }
 0x50e   : > { %v8769_v4 = vpop.f32.mrf.mxu2  ;;  %v3540_v57 = vpop.permute.xlu2 %3539 }
 0x50f   : > { %11432 = vst [vmem:[#allocation115_spill] sm:$0xff] %v8769_v4  ;;  %v8772_v9 = vpop.f32.mrf.mxu3  ;;  %3606 = vmatpush.bf16.msrb.mxu3 %v3540_v57  ;;  %v3304_v4 = vmax.f32 %v8774_v43, %v8776_v3 }
 0x510   : > { %11433 = vst [vmem:[#allocation116_spill] sm:$0xff] %v8772_v9  ;;  %v8788_v30 = vpop.f32.mrf.mxu0 }
 0x512   : > { %3511 = vrot.lane.b32.xlu0 %v8778_v56, %s7300_s4 }
 0x513   : > { %v2580_v33 = vpop.xlane.xlu1 %2579 }
 0x514   : > { %v2615_v38 = vsub.f32 %v8546_v46, %v2580_v33  ;;  %v2616_v21 = vsub.f32 %v8548_v49, %v2580_v33  ;;  %v8794_v46 = vpop.f32.mrf.mxu1  ;;  %v2617_v49 = vsub.f32 %v8568_v28, %v2583_v16 }
 0x515   : > { %3305 = vmax.xlane.f32.xlu2 %v3304_v4  ;;  %v6700_v4 = vpop.eup %6699 }
 0x516   : > { %v2669_v57 = vmul.f32 1.442695, %v2615_v38  ;;  %v2671_v9 = vmul.f32 1.442695, %v2616_v21  ;;  %v2810_v25 = vpop.f32.mrf.mxu2  ;;  %v6702_v8 = vpop.eup %6701 }
 0x517   : > { %v2859_v35 = vpop.f32.mrf.mxu3  ;;  %v8804_v53 = vadd.f32 %v6702_v8, %v6700_v4 }
 0x518   : > { %6703 = vpow2.f32 %v2669_v57  ;;  %v8786_v59 = vadd.f32 %v2859_v35, %v2810_v25  ;;  %v2675_v35 = vmul.f32 1.442695, %v2618_v40  ;;  %v8806_v58 = vpop.f32.mrf.mxu0  ;;  %v3301_v40 = vmax.f32 %v8756_v34, %v8758_v39 }
 0x519   : > { %6705 = vpow2.f32 %v2671_v9  ;;  %v2673_v9 = vmul.f32 1.442695, %v2617_v49  ;;  %11437 = vst [vmem:[#allocation120_spill] sm:$0xff] %v8804_v53  ;;  %v8836_v53 = vld [vmem:[#allocation4 + $0x30] sm:$0xff] }
 0x51a   : > { %11434 = vst [vmem:[#allocation117_spill] sm:$0xff] %v8786_v59  ;;  %3527 = vrot.lane.b32.xlu0 %v8790_v61, %s7300_s4 }
 0x51b   : > { %6707 = vpow2.f32 %v2673_v9 }
 0x51c   : > { %6709 = vpow2.f32 %v2675_v35  ;;  %v8808_v44 = vpop.f32.mrf.mxu1 }
 0x51e   : > { %v6704_v33 = vpop.eup %6703  ;;  %v8798_v38 = vpop.f32.mrf.mxu2 }
 0x51f   : > { %11435 = vst [vmem:[#allocation118_spill] sm:$0xff] %v8798_v38  ;;  %v6706_v25 = vpop.eup %6705  ;;  %v8800_v21 = vpop.f32.mrf.mxu3  ;;  %v2747_v57 = vpack.c.bf16 %v6704_v33, %v6700_v4 }
 0x520   : > { %11436 = vst [vmem:[#allocation119_spill] sm:$0xff] %v8800_v21  ;;  %v2748_v17 = vpack.c.bf16 %v6706_v25, %v6702_v8 }
 0x521   : > { %v2586_v27 = vpop.xlane.xlu0 %2585  ;;  %2834 = vmatmul.bf16.gmra.mxu2 %v2747_v57 }
 0x522   : > { %v2619_v48 = vsub.f32 %v8602_v52, %v2586_v27  ;;  %v2620_v28 = vsub.f32 %v8604_v13, %v2586_v27  ;;  %2883 = vmatmul.bf16.gmra.mxu3 %v2748_v17  ;;  %v6708_v13 = vpop.eup %6707 }
 0x523   : > { %v6710_v17 = vpop.eup %6709 }
 0x524   : > { %v2677_v16 = vmul.f32 1.442695, %v2619_v48  ;;  %v2679_v49 = vmul.f32 1.442695, %v2620_v28  ;;  %v8818_v48 = vld [vmem:[#allocation4 + $0x40] sm:$0xff]  ;;  %v8822_v35 = vadd.f32 %v6710_v17, %v6708_v13  ;;  %v8824_v28 = vpop.f32.mrf.mxu0 }
 0x526   : > { %6711 = vpow2.f32 %v2677_v16  ;;  %v2815_v57 = vpop.f32.mrf.mxu2  ;;  %11441 = vst [vmem:[#allocation124_spill] sm:$0xff] %v8822_v35  ;;  %v8826_v16 = vpop.f32.mrf.mxu1 }
 0x527   : > { %6713 = vpow2.f32 %v2679_v49  ;;  %3302 = vmax.xlane.f32.xlu1 %v3301_v40  ;;  %v2864_v52 = vpop.f32.mrf.mxu3 }
 0x528   : > { %v8812_v27 = vadd.f32 %v2864_v52, %v2815_v57 }
 0x52a   : > { %11438 = vst [vmem:[#allocation121_spill] sm:$0xff] %v8812_v27  ;;  %v3310_v27 = vmax.f32 %v8806_v58, %v8808_v44 }
 0x52c   : > { %v8814_v4 = vpop.eup %6711  ;;  %v3524_v8 = vpop.permute.xlu1 %3523 }
 0x52d   : > { %11439 = vst [vmem:[#allocation122_spill] sm:$0xff] %v8814_v4  ;;  %v8816_v9 = vpop.eup %6713  ;;  %3557 = vmatpush.bf16.msrb.mxu2 %v3524_v8  ;;  %3525 = vrot.lane.b32.xlu2 %v8818_v48, %s7300_s4  ;;  %v2749_v49 = vpack.c.bf16 %v8814_v4, %v6708_v13  ;;  %v8832_v52 = vpop.f32.mrf.mxu0  ;;  %v7032_v4 = vld [vmem:[%s8150_s20 + $0x20] sm:$0xff] }
 0x52e   : > { %11440 = vst [vmem:[#allocation123_spill] sm:$0xff] %v8816_v9  ;;  %v2750_v40 = vpack.c.bf16 %v8816_v9, %v6710_v17  ;;  %v8834_v8 = vpop.f32.mrf.mxu1  ;;  %v3307_v17 = vmax.f32 %v8788_v30, %v8794_v46 }
 0x531   : > { %2839 = vmatmul.bf16.gmra.mxu2 %v2749_v49  ;;  %v8844_v49 = vadd.f32 %v6706_v25, %v6704_v33  ;;  %v8856_v25 = vpop.f32.mrf.mxu2 }
 0x532   : > { %2888 = vmatmul.bf16.gmra.mxu3 %v2750_v40  ;;  %11443 = vst [vmem:[#allocation126_spill] sm:$0xff] %v8856_v25 }
 0x533   : > { %11442 = vst [vmem:[#allocation125_spill] sm:$0xff] %v8844_v49 }
 0x534   : > { %v3904_v57 = vpop.permute.xlu0 %3903 }
 0x535   : > { %5912 = vmatmul.msk.bf16.gmra.mxu0 %vm1586_vm0, %v3904_v57  ;;  %5920 = vmatmul.msk.bf16.gmra.mxu1 %vm1586_vm0, %v3904_v57  ;;  %v8840_v13 = vpop.f32.mrf.mxu0 }
 0x536   : > { %v8846_v40 = vpop.f32.mrf.mxu1 }
 0x53c   : > { %v3522_v35 = vpop.permute.xlu0 %3521 }
 0x53d   : > { %3558 = vmatpush.bf16.msrb.mxu2 %v3522_v35  ;;  %v3316_v35 = vmax.f32 %v8832_v52, %v8834_v8  ;;  %v8852_v36 = vpop.f32.mrf.mxu0 }
 0x53e   : > { %v8854_v0 = vpop.f32.mrf.mxu1 }
 0x540   : > { %3509 = vrot.lane.b32.xlu1 %v8836_v53, %s7300_s4 }
 0x544   : > { %3308 = vmax.xlane.f32.xlu0 %v3307_v17  ;;  %v3538_v57 = vpop.permute.xlu0 %3537  ;;  %v8858_v17 = vpop.f32.mrf.mxu3 }
 0x545   : > { %3607 = vmatpush.bf16.msrb.mxu3 %v3538_v57  ;;  %11444 = vst [vmem:[#allocation127_spill] sm:$0xff] %v8858_v17  ;;  %v8862_v49 = vpop.f32.mrf.mxu0 }
 0x546   : > { %v8866_v54 = vpop.f32.mrf.mxu1 }
 0x547   : > { %v2592_v9 = vpop.xlane.xlu2 %2591 }
 0x548   : > { %3907 = vrot.lane.b32.xlu1 %v7032_v4, %s7301_s28  ;;  %v2623_v57 = vsub.f32 %v8676_v18, %v2592_v9  ;;  %v2624_v4 = vsub.f32 %v8678_v63, %v2592_v9 }
 0x54a   : > { %v2685_v12 = vmul.f32 1.442695, %v2623_v57  ;;  %v3319_v57 = vmax.f32 %v8840_v13, %v8846_v40 }
 0x54c   : > { %3317 = vmax.xlane.f32.xlu0 %v3316_v35  ;;  %v3520_v50 = vpop.permute.xlu0 %3519  ;;  %6715 = vpow2.f32 %v2685_v12 }
 0x54d   : > { %3559 = vmatpush.bf16.msrb.mxu2 %v3520_v50  ;;  %v2687_v50 = vmul.f32 1.442695, %v2624_v4  ;;  %v8874_v4 = vpop.f32.mrf.mxu0 }
 0x54f   : > { %v3518_v33 = vpop.permute.xlu2 %3517  ;;  %6717 = vpow2.f32 %v2687_v50 }
 0x551   : > { %3560 = vmatpush.bf16.msrb.mxu2 %v3518_v33 }
 0x554   : > { %v3534_v35 = vpop.permute.xlu0 %3533 }
 0x556   : > { %3311 = vmax.xlane.f32.xlu2 %v3310_v27 }
 0x557   : > { %v2589_v11 = vpop.xlane.xlu1 %2588 }
 0x558   : > { %v2621_v33 = vsub.f32 %v8658_v47, %v2589_v11  ;;  %v2622_v17 = vsub.f32 %v8660_v42, %v2589_v11  ;;  %v8876_v47 = vpop.f32.mrf.mxu1  ;;  %v8878_v42 = vpop.eup %6715  ;;  %v7033_v11 = vld [vmem:[%s8150_s20 + $0x28] sm:$0xff] }
 0x559   : > { %v2820_v25 = vpop.f32.mrf.mxu2  ;;  %11446 = vst [vmem:[#allocation129_spill] sm:$0xff] %v8878_v42  ;;  %v8882_v12 = vpop.eup %6717 }
 0x55a   : > { %v2681_v18 = vmul.f32 1.442695, %v2621_v33  ;;  %v2683_v63 = vmul.f32 1.442695, %v2622_v17  ;;  %v2869_v9 = vpop.f32.mrf.mxu3  ;;  %11447 = vst [vmem:[#allocation130_spill] sm:$0xff] %v8882_v12 }
 0x55b   : > { %v8870_v59 = vadd.f32 %v2869_v9, %v2820_v25  ;;  %v3322_v9 = vmax.f32 %v8852_v36, %v8854_v0 }
 0x55c   : > { %6719 = vpow2.f32 %v2681_v18  ;;  %v3516_v27 = vpop.permute.xlu0 %3515 }
 0x55d   : > { %11445 = vst [vmem:[#allocation128_spill] sm:$0xff] %v8870_v59  ;;  %6721 = vpow2.f32 %v2683_v63  ;;  %3561 = vmatpush.bf16.msrb.mxu2 %v3516_v27  ;;  %v8898_v27 = vpop.f32.mrf.mxu0  ;;  %v7034_v59 = vld [vmem:[%s8150_s20 + $0x30] sm:$0xff] }
 0x55e   : > { %3320 = vmax.xlane.f32.xlu2 %v3319_v57 }
 0x560   : > { %3909 = vrot.lane.b32.xlu0 %v7033_v11, %s7301_s28  ;;  %v8900_v11 = vpop.f32.mrf.mxu1 }
 0x561   : > { %v8884_v25 = vpop.f32.mrf.mxu2 }
 0x562   : > { %11448 = vst [vmem:[#allocation131_spill] sm:$0xff] %v8884_v25  ;;  %v8886_v17 = vpop.eup %6719  ;;  %v8888_v50 = vpop.f32.mrf.mxu3 }
 0x563   : > { %11449 = vst [vmem:[#allocation132_spill] sm:$0xff] %v8886_v17  ;;  %v8890_v33 = vpop.eup %6721  ;;  %v2751_v18 = vpack.c.bf16 %v8878_v42, %v8886_v17 }
 0x564   : > { %11450 = vst [vmem:[#allocation133_spill] sm:$0xff] %v8888_v50  ;;  %v2752_v63 = vpack.c.bf16 %v8882_v12, %v8890_v33  ;;  %v3532_v57 = vpop.permute.xlu0 %3531  ;;  %v3328_v12 = vmax.f32 %v8874_v4, %v8876_v47 }
 0x565   : > { %11451 = vst [vmem:[#allocation134_spill] sm:$0xff] %v8890_v33  ;;  %2844 = vmatmul.bf16.gmra.mxu2 %v2751_v18 }
 0x566   : > { %2893 = vmatmul.bf16.gmra.mxu3 %v2752_v63  ;;  %3323 = vmax.xlane.f32.xlu2 %v3322_v9  ;;  %v8910_v63 = vpop.f32.mrf.mxu0  ;;  %v7035_v9 = vld [vmem:[%s8150_s20 + $0x38] sm:$0xff]  ;;  %s5961_s20 = sshll.u32 %s5446_s9, 3 }
 0x568   : > { %3911 = vrot.lane.b32.xlu0 %v7034_v59, %s7301_s28  ;;  %v3313_v59 = vmax.f32 %v8824_v28, %v8826_v16 }
 0x569   : > { %v2825_v50 = vpop.f32.mrf.mxu2 }
 0x56a   : > { %v2874_v42 = vpop.f32.mrf.mxu3 }
 0x56b   : > { %v8904_v17 = vadd.f32 %v2874_v42, %v2825_v50  ;;  %v8916_v42 = vpop.f32.mrf.mxu1 }
 0x56c   : > { %v3906_v33 = vpop.permute.xlu0 %3905 }
 0x56d   : > { %11452 = vst [vmem:[#allocation135_spill] sm:$0xff] %v8904_v17  ;;  %5913 = vmatmul.msk.bf16.gmra.mxu0 %vm1586_vm0, %v3906_v33  ;;  %5921 = vmatmul.msk.bf16.gmra.mxu1 %vm1586_vm0, %v3906_v33 }
 0x56e   : > { %3329 = vmax.xlane.f32.xlu2 %v3328_v12  ;;  %v3334_v12 = vmax.f32 %v8910_v63, %v8916_v42  ;;  %v8926_v21 = vpop.f32.mrf.mxu0 }
 0x56f   : > { %v3536_v18 = vpop.permute.xlu1 %3535 }
 0x570   : > { %3608 = vmatpush.bf16.msrb.mxu3 %v3536_v18  ;;  %3913 = vrot.lane.b32.xlu0 %v7035_v9, %s7301_s28  ;;  %v3325_v18 = vmax.f32 %v8862_v49, %v8866_v54 }
 0x571   : > { %v8918_v50 = vpop.f32.mrf.mxu2 }
 0x572   : > { %11453 = vst [vmem:[#allocation136_spill] sm:$0xff] %v8918_v50  ;;  %3314 = vmax.xlane.f32.xlu1 %v3313_v59  ;;  %v8920_v25 = vpop.f32.mrf.mxu3 }
 0x573   : > { %11454 = vst [vmem:[#allocation137_spill] sm:$0xff] %v8920_v25  ;;  %v8928_v50 = vpop.f32.mrf.mxu1  ;;  %v3331_v25 = vmax.f32 %v8898_v27, %v8900_v11 }
 0x574   : > { %3609 = vmatpush.bf16.msrb.mxu3 %v3534_v35  ;;  %v3514_v33 = vpop.permute.xlu0 %3513 }
 0x575   : > { %3562 = vmatpush.bf16.msrb.mxu2 %v3514_v33 }
 0x576   : > { %3335 = vmax.xlane.f32.xlu2 %v3334_v12 }
 0x578   : > { %3610 = vmatpush.bf16.msrb.mxu3 %v3532_v57  ;;  %v8934_v57 = vpop.f32.mrf.mxu0 }
 0x579   : > { %v2830_v9 = vpop.f32.mrf.mxu2 }
 0x57a   : > { %3326 = vmax.xlane.f32.xlu1 %v3325_v18  ;;  %v2879_v17 = vpop.f32.mrf.mxu3 }
 0x57b   : > { %v8930_v59 = vadd.f32 %v2879_v17, %v2830_v9  ;;  %v8936_v33 = vpop.f32.mrf.mxu1 }
 0x57c   : > { %v3530_v35 = vpop.permute.xlu0 %3529  ;;  %v3340_v38 = vmax.f32 %v8934_v57, %v8936_v33 }
 0x57d   : > { %11455 = vst [vmem:[#allocation138_spill] sm:$0xff] %v8930_v59  ;;  %3611 = vmatpush.bf16.msrb.mxu3 %v3530_v35 }
 0x582   : > { %3332 = vmax.xlane.f32.xlu1 %v3331_v25 }
 0x584   : > { %v3512_v12 = vpop.permute.xlu0 %3511 }
 0x585   : > { %3563 = vmatpush.bf16.msrb.mxu2 %v3512_v12 }
 0x588   : > { %v3306_v18 = vpop.xlane.xlu2 %3305 }
 0x589   : > { %v3351_v23 = vsub.f32 %v8774_v43, %v3306_v18  ;;  %v3352_v17 = vsub.f32 %v8776_v3, %v3306_v18  ;;  %v3337_v43 = vmax.f32 %v8926_v21, %v8928_v50  ;;  %v8952_v18 = vpop.f32.mrf.mxu3 }
 0x58a   : > { %3341 = vmax.xlane.f32.xlu1 %v3340_v38  ;;  %11457 = vst [vmem:[#allocation140_spill] sm:$0xff] %v8952_v18 }
 0x58b   : > { %v3385_v9 = vmul.f32 1.442695, %v3351_v23  ;;  %v3387_v35 = vmul.f32 1.442695, %v3352_v17 }
 0x58c   : > { %v3528_v59 = vpop.permute.xlu0 %3527 }
 0x58d   : > { %6723 = vpow2.f32 %v3385_v9  ;;  %3612 = vmatpush.bf16.msrb.mxu3 %v3528_v59  ;;  %v8950_v59 = vpop.f32.mrf.mxu2 }
 0x58e   : > { %6725 = vpow2.f32 %v3387_v35  ;;  %4279 = vrot.lane.b32.xlu2 %v8636_v6, %s7301_s28  ;;  %11456 = vst [vmem:[#allocation139_spill] sm:$0xff] %v8950_v59 }
 0x590   : > { %v3526_v25 = vpop.permute.xlu2 %3525 }
 0x591   : > { %3613 = vmatpush.bf16.msrb.mxu3 %v3526_v25 }
 0x593   : > { %v6724_v12 = vpop.eup %6723 }
 0x594   : > { %v6726_v20 = vpop.eup %6725 }
 0x595   : > { %v8944_v41 = vadd.f32 %v6726_v20, %v6724_v12 }
 0x59a   : > { %v3303_v3 = vpop.xlane.xlu1 %3302  ;;  %3338 = vmax.xlane.f32.xlu0 %v3337_v43 }
 0x59b   : > { %v3349_v23 = vsub.f32 %v8756_v34, %v3303_v3  ;;  %v3350_v38 = vsub.f32 %v8758_v39, %v3303_v3 }
 0x59d   : > { %v3381_v6 = vmul.f32 1.442695, %v3349_v23  ;;  %v3383_v17 = vmul.f32 1.442695, %v3350_v38  ;;  %v8966_v38 = vpop.f32.mrf.mxu0 }
 0x59f   : > { %6727 = vpow2.f32 %v3381_v6 }
 0x5a0   : > { %6729 = vpow2.f32 %v3383_v17 }
 0x5a3   : > { %4295 = vrot.lane.b32.xlu1 %v8606_v55, %s7301_s28  ;;  %v8968_v55 = vpop.f32.mrf.mxu1 }
 0x5a4   : > { %v2835_v9 = vpop.f32.mrf.mxu2 }
 0x5a5   : > { %v6728_v35 = vpop.eup %6727  ;;  %v2884_v25 = vpop.f32.mrf.mxu3 }
 0x5a6   : > { %v6730_v24 = vpop.eup %6729  ;;  %v8956_v43 = vadd.f32 %v2884_v25, %v2835_v9  ;;  %v3493_v6 = vpack.c.bf16 %v6724_v12, %v6728_v35 }
 0x5a7   : > { %v3494_v34 = vpack.c.bf16 %v6726_v20, %v6730_v24  ;;  %v8958_v62 = vadd.f32 %v6730_v24, %v6728_v35  ;;  %v3343_v20 = vmax.f32 %v8966_v38, %v8968_v55 }
 0x5a8   : > { %11458 = vst [vmem:[#allocation141_spill] sm:$0xff] %v8956_v43 }
 0x5a9   : > { %3614 = vmatmul.bf16.vlgmr.msrb.gmra.mxu3 %v3494_v34 }
 0x5ac   : > { %v8960_v39 = vpop.f32.mrf.mxu2 }
 0x5ad   : > { %11459 = vst [vmem:[#allocation142_spill] sm:$0xff] %v8960_v39  ;;  %v8962_v3 = vpop.f32.mrf.mxu3 }
 0x5ae   : > { %11460 = vst [vmem:[#allocation143_spill] sm:$0xff] %v8962_v3  ;;  %4277 = vrot.lane.b32.xlu0 %v8668_v14, %s7301_s28 }
 0x5b2   : > { %v3510_v23 = vpop.permute.xlu1 %3509 }
 0x5b3   : > { %3564 = vmatpush.bf16.msrb.mxu2 %v3510_v23 }
 0x5b4   : > { %v2840_v17 = vpop.f32.mrf.mxu2 }
 0x5b5   : > { %v2889_v9 = vpop.f32.mrf.mxu3 }
 0x5b6   : > { %v8972_v24 = vadd.f32 %v2889_v9, %v2840_v17  ;;  %3565 = vmatmul.bf16.vlgmr.msrb.gmra.mxu2 %v3493_v6  ;;  %4293 = vrot.lane.b32.xlu0 %v8682_v19, %s7301_s28 }
 0x5b7   : > { %v3309_v25 = vpop.xlane.xlu0 %3308  ;;  %3344 = vmax.xlane.f32.xlu2 %v3343_v20 }
 0x5b8   : > { %11461 = vst [vmem:[#allocation144_spill] sm:$0xff] %v8972_v24  ;;  %v3353_v14 = vsub.f32 %v8788_v30, %v3309_v25  ;;  %v3354_v34 = vsub.f32 %v8794_v46, %v3309_v25  ;;  %v8990_v25 = vpop.f32.mrf.mxu1 }
 0x5ba   : > { %v3389_v23 = vmul.f32 1.442695, %v3353_v14  ;;  %v3391_v43 = vmul.f32 1.442695, %v3354_v34  ;;  %v3908_v12 = vpop.permute.xlu1 %3907 }
 0x5bb   : > { %5914 = vmatmul.msk.bf16.gmra.mxu0 %vm1586_vm0, %v3908_v12  ;;  %5922 = vmatmul.msk.bf16.gmra.mxu1 %vm1586_vm0, %v3908_v12 }
 0x5bc   : > { %6731 = vpow2.f32 %v3389_v23 }
 0x5bd   : > { %6733 = vpow2.f32 %v3391_v43  ;;  %v8988_v43 = vpop.f32.mrf.mxu0 }
 0x5be   : > { %4275 = vrot.lane.b32.xlu0 %v8694_v29, %s7301_s28  ;;  %v3346_v23 = vmax.f32 %v8988_v43, %v8990_v25 }
 0x5bf   : > { %v3318_v35 = vpop.xlane.xlu0 %3317 }
 0x5c0   : > { %v3359_v19 = vsub.f32 %v8832_v52, %v3318_v35  ;;  %v3360_v6 = vsub.f32 %v8834_v8, %v3318_v35 }
 0x5c2   : > { %v6732_v30 = vpop.eup %6731  ;;  %v3401_v17 = vmul.f32 1.442695, %v3359_v19  ;;  %v3403_v46 = vmul.f32 1.442695, %v3360_v6 }
 0x5c3   : > { %v6734_v9 = vpop.eup %6733 }
 0x5c4   : > { %6735 = vpow2.f32 %v3401_v17  ;;  %v8984_v20 = vadd.f32 %v6734_v9, %v6732_v30 }
 0x5c5   : > { %6737 = vpow2.f32 %v3403_v46 }
 0x5c6   : > { %4289 = vrot.lane.b32.xlu0 %v8704_v37, %s7301_s28 }
 0x5c9   : > { %v3312_v29 = vpop.xlane.xlu2 %3311 }
 0x5ca   : > { %v8992_v14 = vpop.eup %6735  ;;  %v3355_v52 = vsub.f32 %v8806_v58, %v3312_v29  ;;  %v3356_v8 = vsub.f32 %v8808_v44, %v3312_v29 }
 0x5cb   : > { %v8996_v34 = vpop.eup %6737 }
 0x5cc   : > { %v3393_v12 = vmul.f32 1.442695, %v3355_v52  ;;  %v3395_v35 = vmul.f32 1.442695, %v3356_v8  ;;  %v9002_v37 = vadd.f32 %v8996_v34, %v8992_v14 }
 0x5cd   : > { %3347 = vmax.xlane.f32.xlu1 %v3346_v23 }
 0x5ce   : > { %6739 = vpow2.f32 %v3393_v12  ;;  %4271 = vrot.lane.b32.xlu0 %v8720_v51, %s7301_s28 }
 0x5cf   : > { %6741 = vpow2.f32 %v3395_v35  ;;  %4291 = vrot.lane.b32.xlu2 %v8744_v10, %s7301_s28 }
 0x5d1   : > { %v3321_v44 = vpop.xlane.xlu2 %3320 }
 0x5d2   : > { %v3361_v58 = vsub.f32 %v8840_v13, %v3321_v44  ;;  %v3362_v19 = vsub.f32 %v8846_v40, %v3321_v44  ;;  %v3910_v6 = vpop.permute.xlu0 %3909 }
 0x5d3   : > { %5915 = vmatmul.msk.bf16.gmra.mxu0 %vm1586_vm0, %v3910_v6  ;;  %5923 = vmatmul.msk.bf16.gmra.mxu1 %vm1586_vm0, %v3910_v6 }
 0x5d4   : > { %v6740_v17 = vpop.eup %6739  ;;  %v3405_v46 = vmul.f32 1.442695, %v3361_v58  ;;  %v3407_v29 = vmul.f32 1.442695, %v3362_v19  ;;  %v9030_v58 = vpop.f32.mrf.mxu3 }
 0x5d5   : > { %v6742_v52 = vpop.eup %6741  ;;  %v3495_v8 = vpack.c.bf16 %v6740_v17, %v6732_v30  ;;  %11463 = vst [vmem:[#allocation146_spill] sm:$0xff] %v9030_v58 }
 0x5d6   : > { %6743 = vpow2.f32 %v3405_v46  ;;  %4287 = vrot.lane.b32.xlu0 %v8734_v60, %s7301_s28  ;;  %v3496_v51 = vpack.c.bf16 %v6742_v52, %v6734_v9  ;;  %v9014_v10 = vadd.f32 %v6742_v52, %v6740_v17  ;;  %v9028_v9 = vpop.f32.mrf.mxu2 }
 0x5d7   : > { %6745 = vpow2.f32 %v3407_v29  ;;  %3570 = vmatmul.bf16.gmra.mxu2 %v3495_v8  ;;  %11462 = vst [vmem:[#allocation145_spill] sm:$0xff] %v9028_v9 }
 0x5d8   : > { %3619 = vmatmul.bf16.gmra.mxu3 %v3496_v51 }
 0x5d9   : > { %v3324_v13 = vpop.xlane.xlu2 %3323 }
 0x5da   : > { %v3363_v40 = vsub.f32 %v8852_v36, %v3324_v13  ;;  %v3364_v23 = vsub.f32 %v8854_v0, %v3324_v13  ;;  %v3912_v36 = vpop.permute.xlu0 %3911 }
 0x5dc   : > { %v9018_v12 = vpop.eup %6743  ;;  %v3409_v35 = vmul.f32 1.442695, %v3363_v40  ;;  %v3411_v44 = vmul.f32 1.442695, %v3364_v23 }
 0x5dd   : > { %v9020_v30 = vpop.eup %6745 }
 0x5de   : > { %6747 = vpow2.f32 %v3409_v35  ;;  %4269 = vrot.lane.b32.xlu0 %v8752_v5, %s7301_s28  ;;  %v9026_v60 = vadd.f32 %v9020_v30, %v9018_v12 }
 0x5df   : > { %6749 = vpow2.f32 %v3411_v44 }
 0x5e1   : > { %v3330_v0 = vpop.xlane.xlu2 %3329 }
 0x5e2   : > { %v3367_v19 = vsub.f32 %v8874_v4, %v3330_v0  ;;  %v3368_v6 = vsub.f32 %v8876_v47, %v3330_v0 }
 0x5e3   : > { %5916 = vmatmul.msk.bf16.gmra.mxu0 %vm1586_vm0, %v3912_v36  ;;  %5924 = vmatmul.msk.bf16.gmra.mxu1 %vm1586_vm0, %v3912_v36 }
 0x5e4   : > { %v6748_v5 = vpop.eup %6747  ;;  %v3417_v17 = vmul.f32 1.442695, %v3367_v19  ;;  %v3419_v46 = vmul.f32 1.442695, %v3368_v6 }
 0x5e5   : > { %v6750_v29 = vpop.eup %6749  ;;  %v3315_v52 = vpop.xlane.xlu1 %3314 }
 0x5e6   : > { %6751 = vpow2.f32 %v3417_v17  ;;  %v3357_v8 = vsub.f32 %v8824_v28, %v3315_v52  ;;  %v3358_v51 = vsub.f32 %v8826_v16, %v3315_v52  ;;  %4273 = vrot.lane.b32.xlu1 %v8724_v2, %s7301_s28  ;;  %4285 = vrot.lane.b32.xlu0 %v8764_v22, %s7301_s28  ;;  %v9042_v4 = vadd.f32 %v6750_v29, %v6748_v5  ;;  %v9046_v28 = vpop.f32.mrf.mxu0  ;;  %v9048_v16 = vpop.f32.mrf.mxu1 }
 0x5e7   : > { %6753 = vpow2.f32 %v3419_v46 }
 0x5e8   : > { %v3397_v47 = vmul.f32 1.442695, %v3357_v8  ;;  %v3399_v13 = vmul.f32 1.442695, %v3358_v51  ;;  %v2845_v40 = vpop.f32.mrf.mxu2  ;;  %v3914_v8 = vpop.permute.xlu0 %3913 }
 0x5e9   : > { %v2894_v23 = vpop.f32.mrf.mxu3  ;;  %v3336_v35 = vpop.xlane.xlu2 %3335 }
 0x5ea   : > { %6755 = vpow2.f32 %v3397_v47  ;;  %v9044_v44 = vadd.f32 %v2894_v23, %v2845_v40 }
 0x5eb   : > { %6757 = vpow2.f32 %v3399_v13 }
 0x5ec   : > { %11464 = vst [vmem:[#allocation147_spill] sm:$0xff] %v9044_v44  ;;  %v6752_v2 = vpop.eup %6751 }
 0x5ed   : > { %v6754_v36 = vpop.eup %6753  ;;  %v3327_v0 = vpop.xlane.xlu1 %3326 }
 0x5ee   : > { %v3365_v22 = vsub.f32 %v8862_v49, %v3327_v0  ;;  %v3366_v19 = vsub.f32 %v8866_v54, %v3327_v0  ;;  %4267 = vrot.lane.b32.xlu0 %v8778_v56, %s7301_s28  ;;  %v9054_v6 = vadd.f32 %v6754_v36, %v6752_v2  ;;  %v9062_v54 = vpop.f32.mrf.mxu0  ;;  %v9064_v56 = vpop.f32.mrf.mxu1 }
 0x5f0   : > { %v6756_v17 = vpop.eup %6755  ;;  %v3413_v46 = vmul.f32 1.442695, %v3365_v22  ;;  %v3415_v52 = vmul.f32 1.442695, %v3366_v19 }
 0x5f1   : > { %v6758_v51 = vpop.eup %6757  ;;  %v3497_v47 = vpack.c.bf16 %v8992_v14, %v6756_v17  ;;  %v4280_v13 = vpop.permute.xlu2 %4279  ;;  %v4057_v14 = vmax.f32 %v9046_v28, %v9048_v16 }
 0x5f2   : > { %6759 = vpow2.f32 %v3413_v46  ;;  %v3498_v40 = vpack.c.bf16 %v8996_v34, %v6758_v51  ;;  %4313 = vmatpush.bf16.msra.mxu2 %v4280_v13  ;;  %v9058_v49 = vadd.f32 %v6758_v51, %v6756_v17  ;;  %v3499_v17 = vpack.c.bf16 %v6748_v5, %v9018_v12 }
 0x5f3   : > { %6761 = vpow2.f32 %v3415_v52  ;;  %3575 = vmatmul.bf16.gmra.mxu2 %v3497_v47  ;;  %5917 = vmatmul.msk.bf16.gmra.mxu0 %vm1586_vm0, %v3914_v8  ;;  %v3500_v46 = vpack.c.bf16 %v6750_v29, %v9020_v30  ;;  %v4060_v30 = vmax.f32 %v9062_v54, %v9064_v56 }
 0x5f4   : > { %3624 = vmatmul.bf16.gmra.mxu3 %v3498_v40  ;;  %5925 = vmatmul.msk.bf16.gmra.mxu1 %vm1586_vm0, %v3914_v8  ;;  %v3372_v8 = vsub.f32 %v8916_v42, %v3336_v35 }
 0x5f5   : > { %v3333_v52 = vpop.xlane.xlu1 %3332 }
 0x5f6   : > { %4283 = vrot.lane.b32.xlu0 %v8790_v61, %s7301_s28  ;;  %v9072_v22 = vpop.f32.mrf.mxu0  ;;  %v9074_v19 = vpop.f32.mrf.mxu1  ;;  %v3371_v61 = vsub.f32 %v8910_v63, %v3336_v35  ;;  %v3427_v40 = vmul.f32 1.442695, %v3372_v8  ;;  %v3369_v12 = vsub.f32 %v8898_v27, %v3333_v52  ;;  %v3370_v42 = vsub.f32 %v8900_v11, %v3333_v52 }
 0x5f8   : > { %v6760_v34 = vpop.eup %6759  ;;  %4058 = vmax.xlane.f32.xlu2 %v4057_v14  ;;  %v3425_v13 = vmul.f32 1.442695, %v3371_v61  ;;  %v3423_v61 = vmul.f32 1.442695, %v3370_v42 }
 0x5f9   : > { %v6762_v23 = vpop.eup %6761  ;;  %v3501_v35 = vpack.c.bf16 %v6752_v2, %v6760_v34 }
 0x5fa   : > { %v9070_v0 = vadd.f32 %v6762_v23, %v6760_v34  ;;  %6763 = vpow2.f32 %v3425_v13 }
 0x5fb   : > { %6765 = vpow2.f32 %v3427_v40 }
 0x5fe   : > { %4265 = vrot.lane.b32.xlu0 %v8836_v53, %s7301_s28  ;;  %v9082_v51 = vpop.f32.mrf.mxu0  ;;  %v9084_v47 = vpop.f32.mrf.mxu1 }
 0x5ff   : > { %v3342_v53 = vpop.xlane.xlu1 %3341  ;;  %v4066_v11 = vmax.f32 %v9082_v51, %v9084_v47 }
 0x600   : > { %v6764_v29 = vpop.eup %6763  ;;  %v3376_v34 = vsub.f32 %v8936_v33, %v3342_v53 }
 0x601   : > { %v6766_v14 = vpop.eup %6765 }
 0x602   : > { %v9096_v8 = vadd.f32 %v6766_v14, %v6764_v29 }
 0x603   : > { %3580 = vmatmul.bf16.gmra.mxu2 %v3499_v17  ;;  %v3421_v17 = vmul.f32 1.442695, %v3369_v12  ;;  %v3435_v12 = vmul.f32 1.442695, %v3376_v34 }
 0x604   : > { %3629 = vmatmul.bf16.gmra.mxu3 %v3500_v46  ;;  %v3502_v46 = vpack.c.bf16 %v6754_v36, %v6762_v23  ;;  %11465 = vst [vmem:[#allocation148_spill] sm:$0xff] %v9096_v8  ;;  %v3375_v36 = vsub.f32 %v8934_v57, %v3342_v53 }
 0x605   : > { %6767 = vpow2.f32 %v3421_v17 }
 0x606   : > { %v9089_v63 = vpop.f32.mrf.mxu0  ;;  %v9091_v5 = vpop.f32.mrf.mxu1  ;;  %6769 = vpow2.f32 %v3423_v61  ;;  %v3433_v40 = vmul.f32 1.442695, %v3375_v36 }
 0x608   : > { %6771 = vpow2.f32 %v3433_v40 }
 0x609   : > { %6773 = vpow2.f32 %v3435_v12 }
 0x60b   : > { %v6768_v23 = vpop.eup %6767 }
 0x60c   : > { %v6770_v13 = vpop.eup %6769  ;;  %v3503_v33 = vpack.c.bf16 %v6764_v29, %v6768_v23 }
 0x60d   : > { %v3339_v52 = vpop.xlane.xlu0 %3338  ;;  %v9109_v17 = vadd.f32 %v6770_v13, %v6768_v23  ;;  %v3504_v53 = vpack.c.bf16 %v6766_v14, %v6770_v13 }
 0x60e   : > { %v9102_v2 = vpop.f32.mrf.mxu1  ;;  %v3373_v42 = vsub.f32 %v8926_v21, %v3339_v52  ;;  %v3374_v57 = vsub.f32 %v8928_v50, %v3339_v52  ;;  %v4063_v21 = vmax.f32 %v9072_v22, %v9074_v19  ;;  %v6772_v34 = vpop.eup %6771 }
 0x60f   : > { %11466 = vst [vmem:[#allocation149_spill] sm:$0xff] %v9109_v17 }
 0x610   : > { %4061 = vmax.xlane.f32.xlu1 %v4060_v30  ;;  %4281 = vrot.lane.b32.xlu2 %v8818_v48, %s7301_s28  ;;  %v9100_v48 = vpop.f32.mrf.mxu0  ;;  %v4069_v30 = vmax.f32 %v9089_v63, %v9091_v5 }
 0x611   : > { %v4072_v36 = vmax.f32 %v9100_v48, %v9102_v2 }
 0x613   : > { %3585 = vmatmul.bf16.gmra.mxu2 %v3501_v35 }
 0x614   : > { %3634 = vmatmul.bf16.gmra.mxu3 %v3502_v46 }
 0x615   : > { %v4296_v27 = vpop.permute.xlu1 %4295 }
 0x616   : > { %4362 = vmatpush.bf16.msra.mxu3 %v4296_v27  ;;  %v9113_v61 = vpop.f32.mrf.mxu1  ;;  %v3429_v27 = vmul.f32 1.442695, %v3373_v42  ;;  %v9128_v42 = vpop.f32.mrf.mxu3 }
 0x617   : > { %11468 = vst [vmem:[#allocation151_spill] sm:$0xff] %v9128_v42 }
 0x618   : > { %4067 = vmax.xlane.f32.xlu1 %v4066_v11  ;;  %v9111_v46 = vpop.f32.mrf.mxu0  ;;  %v3431_v11 = vmul.f32 1.442695, %v3374_v57  ;;  %6775 = vpow2.f32 %v3429_v27  ;;  %v9130_v57 = vpop.f32.mrf.mxu2 }
 0x619   : > { %11469 = vst [vmem:[#allocation152_spill] sm:$0xff] %v9130_v57 }
 0x61a   : > { %6777 = vpow2.f32 %v3431_v11 }
 0x61e   : > { %v9122_v52 = vpop.f32.mrf.mxu1 }
 0x620   : > { %4070 = vmax.xlane.f32.xlu1 %v4069_v30  ;;  %v4278_v35 = vpop.permute.xlu0 %4277  ;;  %v6774_v30 = vpop.eup %6773 }
 0x621   : > { %4314 = vmatpush.bf16.msra.mxu2 %v4278_v35  ;;  %v9120_v14 = vpop.f32.mrf.mxu0  ;;  %v9124_v23 = vadd.f32 %v6774_v30, %v6772_v34  ;;  %v6776_v13 = vpop.eup %6775 }
 0x622   : > { %v4078_v40 = vmax.f32 %v9120_v14, %v9122_v52  ;;  %v6778_v12 = vpop.eup %6777 }
 0x623   : > { %3590 = vmatmul.bf16.gmra.mxu2 %v3503_v33  ;;  %11467 = vst [vmem:[#allocation150_spill] sm:$0xff] %v9124_v23  ;;  %v3505_v33 = vpack.c.bf16 %v6772_v34, %v6776_v13 }
 0x624   : > { %3639 = vmatmul.bf16.gmra.mxu3 %v3504_v53  ;;  %v3506_v53 = vpack.c.bf16 %v6774_v30, %v6778_v12 }
 0x628   : > { %4073 = vmax.xlane.f32.xlu1 %v4072_v36  ;;  %4064 = vmax.xlane.f32.xlu0 %v4063_v21  ;;  %v4294_v50 = vpop.permute.xlu0 %4293  ;;  %v4075_v21 = vmax.f32 %v9111_v46, %v9113_v61 }
 0x629   : > { %4363 = vmatpush.bf16.msra.mxu3 %v4294_v50 }
 0x62a   : > { %v3345_v29 = vpop.xlane.xlu2 %3344 }
 0x62b   : > { %v3377_v30 = vsub.f32 %v8966_v38, %v3345_v29 }
 0x62c   : > { %v3615_v11 = vpop.f32.mrf.mxu3 }
 0x630   : > { %4079 = vmax.xlane.f32.xlu1 %v4078_v40  ;;  %v4276_v35 = vpop.permute.xlu0 %4275 }
 0x631   : > { %4315 = vmatpush.bf16.msra.mxu2 %v4276_v35 }
 0x632   : > { %v4292_v27 = vpop.permute.xlu2 %4291 }
 0x633   : > { %3595 = vmatmul.bf16.gmra.mxu2 %v3505_v33  ;;  %4364 = vmatpush.bf16.msra.mxu3 %v4292_v27  ;;  %v3378_v33 = vsub.f32 %v8968_v55, %v3345_v29  ;;  %v3437_v27 = vmul.f32 1.442695, %v3377_v30 }
 0x634   : > { %3644 = vmatmul.bf16.gmra.mxu3 %v3506_v53  ;;  %v9144_v53 = vadd.f32 %v6778_v12, %v6776_v13 }
 0x635   : > { %v3439_v42 = vmul.f32 1.442695, %v3378_v33  ;;  %6779 = vpow2.f32 %v3437_v27  ;;  %v9174_v27 = vpop.f32.mrf.mxu3 }
 0x636   : > { %11470 = vst [vmem:[#allocation153_spill] sm:$0xff] %v9144_v53 }
 0x637   : > { %6781 = vpow2.f32 %v3439_v42 }
 0x638   : > { %v9134_v36 = vpop.f32.mrf.mxu0  ;;  %v9136_v50 = vpop.f32.mrf.mxu1 }
 0x639   : > { %v3566_v44 = vpop.f32.mrf.mxu2  ;;  %4076 = vmax.xlane.f32.xlu2 %v4075_v21  ;;  %v4081_v40 = vmax.f32 %v9134_v36, %v9136_v50  ;;  %v4290_v34 = vpop.permute.xlu0 %4289 }
 0x63a   : > { %v9140_v35 = vadd.f32 %v3615_v11, %v3566_v44  ;;  %4365 = vmatpush.bf16.msra.mxu3 %v4290_v34 }
 0x63b   : > { %4082 = vmax.xlane.f32.xlu1 %v4081_v40  ;;  %v9154_v29 = vpop.eup %6779 }
 0x63d   : > { %v9156_v13 = vpop.eup %6781 }
 0x640   : > { %v3348_v57 = vpop.xlane.xlu1 %3347  ;;  %v9146_v24 = vpop.f32.mrf.mxu0 }
 0x641   : > { %v3379_v21 = vsub.f32 %v8988_v43, %v3348_v57  ;;  %v3380_v58 = vsub.f32 %v8990_v25, %v3348_v57  ;;  %v9150_v9 = vpop.f32.mrf.mxu1  ;;  %v4272_v38 = vpop.permute.xlu0 %4271 }
 0x642   : > { %v4084_v44 = vmax.f32 %v9146_v24, %v9150_v9  ;;  %v9172_v30 = vpop.f32.mrf.mxu2 }
 0x643   : > { %v3441_v11 = vmul.f32 1.442695, %v3379_v21  ;;  %v3443_v55 = vmul.f32 1.442695, %v3380_v58 }
 0x644   : > { %4085 = vmax.xlane.f32.xlu1 %v4084_v44 }
 0x645   : > { %6783 = vpow2.f32 %v3441_v11 }
 0x646   : > { %6785 = vpow2.f32 %v3443_v55 }
 0x649   : > { %v4288_v43 = vpop.permute.xlu0 %4287 }
 0x64a   : > { %4366 = vmatpush.bf16.msra.mxu3 %v4288_v43 }
 0x64b   : > { %v9158_v12 = vpop.eup %6783 }
 0x64c   : > { %11471 = vst [vmem:[#allocation154_spill] sm:$0xff] %v9158_v12  ;;  %v9160_v25 = vpop.eup %6785  ;;  %v3507_v57 = vpack.c.bf16 %v9158_v12, %v9154_v29 }
 0x64d   : > { %11472 = vst [vmem:[#allocation155_spill] sm:$0xff] %v9160_v25  ;;  %v3508_v58 = vpack.c.bf16 %v9160_v25, %v9156_v13 }
 0x64e   : > { %3600 = vmatmul.bf16.gmra.mxu2 %v3507_v57 }
 0x64f   : > { %3649 = vmatmul.bf16.gmra.mxu3 %v3508_v58 }
 0x650   : > { %v9166_v42 = vpop.f32.mrf.mxu0  ;;  %v9168_v40 = vpop.f32.mrf.mxu1 }
 0x651   : > { %v4087_v34 = vmax.f32 %v9166_v42, %v9168_v40  ;;  %v4270_v33 = vpop.permute.xlu0 %4269 }
 0x653   : > { %4088 = vmax.xlane.f32.xlu0 %v4087_v34 }
 0x658   : > { %v4274_v21 = vpop.permute.xlu1 %4273  ;;  %v9176_v44 = vpop.f32.mrf.mxu0 }
 0x659   : > { %v9178_v11 = vpop.f32.mrf.mxu1  ;;  %4316 = vmatpush.bf16.msra.mxu2 %v4274_v21  ;;  %v4286_v57 = vpop.permute.xlu0 %4285 }
 0x65a   : > { %v3571_v55 = vpop.f32.mrf.mxu2  ;;  %v4090_v43 = vmax.f32 %v9176_v44, %v9178_v11  ;;  %4367 = vmatpush.bf16.msra.mxu3 %v4286_v57 }
 0x65b   : > { %v3620_v58 = vpop.f32.mrf.mxu3 }
 0x65c   : > { %v9182_v3 = vadd.f32 %v3620_v58, %v3571_v55  ;;  %4091 = vmax.xlane.f32.xlu1 %v4090_v43 }
 0x65d   : > { %4317 = vmatpush.bf16.msra.mxu2 %v4272_v38 }
 0x65e   : > { %11473 = vst [vmem:[#allocation156_spill] sm:$0xff] %v9182_v3 }
 0x660   : > { %v9184_v39 = vpop.f32.mrf.mxu0 }
 0x661   : > { %v9186_v34 = vpop.f32.mrf.mxu1  ;;  %4318 = vmatpush.bf16.msra.mxu2 %v4270_v33  ;;  %v4268_v21 = vpop.permute.xlu0 %4267 }
 0x662   : > { %v4093_v25 = vmax.f32 %v9184_v39, %v9186_v34  ;;  %v9196_v57 = vpop.f32.mrf.mxu2 }
 0x663   : > { %11474 = vst [vmem:[#allocation157_spill] sm:$0xff] %v9196_v57  ;;  %v9198_v33 = vpop.f32.mrf.mxu3 }
 0x664   : > { %4094 = vmax.xlane.f32.xlu0 %v4093_v25  ;;  %11475 = vst [vmem:[#allocation158_spill] sm:$0xff] %v9198_v33 }
 0x665   : > { %4319 = vmatpush.bf16.msra.mxu2 %v4268_v21 }
 0x668   : > { %v9190_v12 = vpop.f32.mrf.mxu0 }
 0x669   : > { %v9192_v18 = vpop.f32.mrf.mxu1  ;;  %v4284_v43 = vpop.permute.xlu0 %4283 }
 0x66a   : > { %v4096_v55 = vmax.f32 %v9190_v12, %v9192_v18  ;;  %4368 = vmatpush.bf16.msra.mxu3 %v4284_v43 }
 0x66b   : > { %v4059_v38 = vpop.xlane.xlu2 %4058 }
 0x66c   : > { %4097 = vmax.xlane.f32.xlu1 %v4096_v55  ;;  %v4105_v58 = vsub.f32 %v9046_v28, %v4059_v38  ;;  %v4106_v25 = vsub.f32 %v9048_v16, %v4059_v38 }
 0x66e   : > { %v4137_v43 = vmul.f32 1.442695, %v4105_v58  ;;  %v4139_v55 = vmul.f32 1.442695, %v4106_v25 }
 0x670   : > { %v9201_v59 = vpop.f32.mrf.mxu0  ;;  %6787 = vpow2.f32 %v4137_v43 }
 0x671   : > { %v9204_v21 = vpop.f32.mrf.mxu1  ;;  %v4266_v23 = vpop.permute.xlu0 %4265  ;;  %6789 = vpow2.f32 %v4139_v55 }
 0x672   : > { %v4099_v53 = vmax.f32 %v9201_v59, %v9204_v21  ;;  %4320 = vmatpush.bf16.msra.mxu2 %v4266_v23 }
 0x673   : > { %v4282_v17 = vpop.permute.xlu2 %4281 }
 0x674   : > { %2690 = vadd.xlane.f32.xlu1 %v8574_v31  ;;  %4100 = vmax.xlane.f32.xlu0 %v4099_v53 }
 0x675   : > { %4369 = vmatpush.bf16.msra.mxu3 %v4282_v17 }
 0x676   : > { %v3576_v8 = vpop.f32.mrf.mxu2  ;;  %v6788_v31 = vpop.eup %6787 }
 0x677   : > { %v3625_v28 = vpop.f32.mrf.mxu3  ;;  %v6790_v23 = vpop.eup %6789 }
 0x678   : > { %v9209_v3 = vadd.f32 %v3625_v28, %v3576_v8  ;;  %v9211_v16 = vpop.f32.mrf.mxu0  ;;  %v4201_v8 = vadd.f32 %v6790_v23, %v6788_v31  ;;  %v9229_v28 = vadd.f32 %v9156_v13, %v9154_v29 }
 0x679   : > { %v9213_v38 = vpop.f32.mrf.mxu1 }
 0x67a   : > { %v4102_v33 = vmax.f32 %v9211_v16, %v9213_v38  ;;  %11476 = vst [vmem:[#allocation159_spill] sm:$0xff] %v9229_v28 }
 0x67c   : > { %2693 = vadd.xlane.f32.xlu0 %v8578_v45  ;;  %4103 = vmax.xlane.f32.xlu2 %v4102_v33 }
 0x67d   : > { %3449 = vadd.xlane.f32.xlu1 %v8944_v41 }
 0x67e   : > { %v9219_v17 = vpop.f32.mrf.mxu2 }
 0x67f   : > { %v9221_v53 = vpop.f32.mrf.mxu3 }
 0x683   : > { %v4062_v58 = vpop.xlane.xlu1 %4061 }
 0x684   : > { %v4107_v25 = vsub.f32 %v9062_v54, %v4062_v58  ;;  %v4108_v43 = vsub.f32 %v9064_v56, %v4062_v58  ;;  %3446 = vadd.xlane.f32.xlu2 %v8958_v62  ;;  %4202 = vadd.xlane.f32.xlu0 %v4201_v8 }
 0x685   : > { %2696 = vadd.xlane.f32.xlu1 %v8584_v26 }
 0x686   : > { %v4141_v45 = vmul.f32 1.442695, %v4107_v25  ;;  %v4143_v33 = vmul.f32 1.442695, %v4108_v43  ;;  %v3581_v41 = vpop.f32.mrf.mxu2 }
 0x687   : > { %v3630_v55 = vpop.f32.mrf.mxu3 }
 0x688   : > { %6791 = vpow2.f32 %v4141_v45  ;;  %v9231_v57 = vadd.f32 %v3630_v55, %v3581_v41 }
 0x689   : > { %6793 = vpow2.f32 %v4143_v33 }
 0x68b   : > { %v4068_v54 = vpop.xlane.xlu1 %4067 }
 0x68c   : > { %2699 = vadd.xlane.f32.xlu0 %v8594_v15  ;;  %v4111_v26 = vsub.f32 %v9082_v51, %v4068_v54  ;;  %v4112_v25 = vsub.f32 %v9084_v47, %v4068_v54 }
 0x68d   : > { %3455 = vadd.xlane.f32.xlu1 %v9014_v10 }
 0x68e   : > { %v6792_v62 = vpop.eup %6791  ;;  %v9236_v56 = vpop.f32.mrf.mxu2  ;;  %v4149_v45 = vmul.f32 1.442695, %v4111_v26  ;;  %v4151_v15 = vmul.f32 1.442695, %v4112_v25 }
 0x68f   : > { %v6794_v8 = vpop.eup %6793  ;;  %v4249_v58 = vpack.c.bf16 %v6792_v62, %v6788_v31  ;;  %v9239_v29 = vpop.f32.mrf.mxu3 }
 0x690   : > { %v4250_v13 = vpack.c.bf16 %v6794_v8, %v6790_v23  ;;  %v4204_v43 = vadd.f32 %v6794_v8, %v6792_v62  ;;  %6795 = vpow2.f32 %v4149_v45 }
 0x691   : > { %4321 = vmatmul.bf16.vlgmr.msra.gmra.mxu2 %v4249_v58  ;;  %6797 = vpow2.f32 %v4151_v15 }
 0x692   : > { %4205 = vadd.xlane.f32.xlu2 %v4204_v43  ;;  %4370 = vmatmul.bf16.vlgmr.msra.gmra.mxu3 %v4250_v13 }
 0x693   : > { %v4071_v33 = vpop.xlane.xlu1 %4070 }
 0x695   : > { %2702 = vadd.xlane.f32.xlu1 %v8690_v1 }
 0x696   : > { %v3586_v10 = vpop.f32.mrf.mxu2  ;;  %v6796_v23 = vpop.eup %6795 }
 0x697   : > { %v3635_v51 = vpop.f32.mrf.mxu3  ;;  %v6798_v62 = vpop.eup %6797 }
 0x698   : > { %v9242_v41 = vadd.f32 %v3635_v51, %v3586_v10  ;;  %v4114_v10 = vsub.f32 %v9091_v5, %v4071_v33 }
 0x69a   : > { %11477 = vst [vmem:[#allocation160_spill] sm:$0xff] %v9242_v41  ;;  %3452 = vadd.xlane.f32.xlu2 %v8984_v20  ;;  %v4210_v20 = vadd.f32 %v6798_v62, %v6796_v23 }
 0x69b   : > { %v4074_v47 = vpop.xlane.xlu1 %4073  ;;  %v4065_v31 = vpop.xlane.xlu0 %4064 }
 0x69c   : > { %v4109_v55 = vsub.f32 %v9072_v22, %v4065_v31  ;;  %v4110_v54 = vsub.f32 %v9074_v19, %v4065_v31  ;;  %v4115_v1 = vsub.f32 %v9100_v48, %v4074_v47  ;;  %v4116_v58 = vsub.f32 %v9102_v2, %v4074_v47 }
 0x69d   : > { %3461 = vadd.xlane.f32.xlu1 %v9002_v37  ;;  %v4113_v37 = vsub.f32 %v9089_v63, %v4071_v33 }
 0x69e   : > { %v4145_v26 = vmul.f32 1.442695, %v4109_v55  ;;  %v3588_v8 = vpop.f32.mrf.mxu2  ;;  %v4147_v25 = vmul.f32 1.442695, %v4110_v54  ;;  %v4157_v45 = vmul.f32 1.442695, %v4115_v1 }
 0x69f   : > { %v3637_v13 = vpop.f32.mrf.mxu3  ;;  %v4159_v22 = vmul.f32 1.442695, %v4116_v58  ;;  %v4153_v55 = vmul.f32 1.442695, %v4113_v37  ;;  %v4155_v1 = vmul.f32 1.442695, %v4114_v10 }
 0x6a0   : > { %v9250_v43 = vadd.f32 %v3637_v13, %v3588_v8  ;;  %6799 = vpow2.f32 %v4145_v26 }
 0x6a1   : > { %6801 = vpow2.f32 %v4147_v25 }
 0x6a2   : > { %11478 = vst [vmem:[#allocation161_spill] sm:$0xff] %v9250_v43  ;;  %4211 = vadd.xlane.f32.xlu2 %v4210_v20  ;;  %6803 = vpow2.f32 %v4157_v45 }
 0x6a3   : > { %v9254_v19 = vpop.xlane.xlu1 %4079  ;;  %6805 = vpow2.f32 %v4159_v22 }
 0x6a4   : > { %6807 = vpow2.f32 %v4153_v55 }
 0x6a5   : > { %1854 = vadd.xlane.f32.xlu1 %v8388_v32  ;;  %6809 = vpow2.f32 %v4155_v1 }
 0x6a6   : > { %v3591_v48 = vpop.f32.mrf.mxu2  ;;  %v6800_v15 = vpop.eup %6799 }
 0x6a7   : > { %v3640_v2 = vpop.f32.mrf.mxu3  ;;  %v6802_v47 = vpop.eup %6801  ;;  %v4251_v31 = vpack.c.bf16 %v6796_v23, %v6800_v15 }
 0x6a8   : > { %v9257_v51 = vadd.f32 %v3640_v2, %v3591_v48  ;;  %v4207_v54 = vadd.f32 %v6802_v47, %v6800_v15  ;;  %v4252_v32 = vpack.c.bf16 %v6798_v62, %v6802_v47  ;;  %v6804_v63 = vpop.eup %6803 }
 0x6a9   : > { %4326 = vmatmul.bf16.gmra.mxu2 %v4251_v31  ;;  %v6806_v8 = vpop.eup %6805 }
 0x6aa   : > { %11479 = vst [vmem:[#allocation162_spill] sm:$0xff] %v9257_v51  ;;  %3458 = vadd.xlane.f32.xlu2 %v9058_v49  ;;  %4208 = vadd.xlane.f32.xlu0 %v4207_v54  ;;  %v4216_v22 = vadd.f32 %v6806_v8, %v6804_v63 }
 0x6ab   : > { %4375 = vmatmul.bf16.gmra.mxu3 %v4252_v32 }
 0x6ac   : > { %v4077_v26 = vpop.xlane.xlu2 %4076 }
 0x6ad   : > { %2711 = vadd.xlane.f32.xlu1 %v8656_v7  ;;  %v4117_v5 = vsub.f32 %v9111_v46, %v4077_v26  ;;  %v4118_v33 = vsub.f32 %v9113_v61, %v4077_v26  ;;  %v6808_v46 = vpop.eup %6807  ;;  %v11481_v61 = vld [vmem:[#allocation95_spill] sm:$0xff] }
 0x6ae   : > { %v4083_v23 = vpop.xlane.xlu1 %4082  ;;  %v3593_v58 = vpop.f32.mrf.mxu2  ;;  %v4253_v32 = vpack.c.bf16 %v6804_v63, %v6808_v46 }
 0x6af   : > { %v4161_v25 = vmul.f32 1.442695, %v4117_v5  ;;  %v4163_v49 = vmul.f32 1.442695, %v4118_v33  ;;  %v4121_v62 = vsub.f32 %v9134_v36, %v4083_v23  ;;  %v4122_v13 = vsub.f32 %v9136_v50, %v4083_v23  ;;  %v3642_v20 = vpop.f32.mrf.mxu3  ;;  %v6810_v48 = vpop.eup %6809 }
 0x6b0   : > { %v9265_v45 = vadd.f32 %v3642_v20, %v3593_v58  ;;  %v4213_v1 = vadd.f32 %v6810_v48, %v6808_v46  ;;  %v4119_v33 = vsub.f32 %v9120_v14, %v9254_v19 }
 0x6b1   : > { %6811 = vpow2.f32 %v4161_v25  ;;  %v4169_v7 = vmul.f32 1.442695, %v4121_v62  ;;  %v4171_v37 = vmul.f32 1.442695, %v4122_v13  ;;  %v11483_v25 = vld [vmem:[#allocation97_spill] sm:$0xff] }
 0x6b2   : > { %11480 = vst [vmem:[#allocation163_spill] sm:$0xff] %v9265_v45  ;;  %6813 = vpow2.f32 %v4163_v49  ;;  %4217 = vadd.xlane.f32.xlu2 %v4216_v22  ;;  %2705 = vadd.xlane.f32.xlu0 %v11481_v61  ;;  %v4254_v49 = vpack.c.bf16 %v6806_v8, %v6810_v48  ;;  %v4165_v63 = vmul.f32 1.442695, %v4119_v33  ;;  %v11487_v48 = vld [vmem:[#allocation67_spill] sm:$0xff] }
 0x6b3   : > { %6815 = vpow2.f32 %v4169_v7 }
 0x6b4   : > { %6817 = vpow2.f32 %v4171_v37 }
 0x6b6   : > { %v3596_v2 = vpop.f32.mrf.mxu2 }
 0x6b7   : > { %v6812_v36 = vpop.eup %6811  ;;  %v4086_v15 = vpop.xlane.xlu1 %4085 }
 0x6b8   : > { %v3645_v50 = vpop.f32.mrf.mxu3  ;;  %v6814_v10 = vpop.eup %6813  ;;  %v4123_v47 = vsub.f32 %v9146_v24, %v4086_v15  ;;  %v4124_v31 = vsub.f32 %v9150_v9, %v4086_v15  ;;  %v4120_v24 = vsub.f32 %v9122_v52, %v9254_v19  ;;  %v11485_v52 = vld [vmem:[#allocation68_spill] sm:$0xff]  ;;  %v11486_v19 = vld [vmem:[#allocation66_spill] sm:$0xff] }
 0x6b9   : > { %v9270_v55 = vadd.f32 %v3645_v50, %v3596_v2  ;;  %v6816_v54 = vpop.eup %6815  ;;  %v4219_v26 = vadd.f32 %v6814_v10, %v6812_v36  ;;  %4331 = vmatmul.bf16.gmra.mxu2 %v4253_v32 }
 0x6ba   : > { %v6818_v5 = vpop.eup %6817  ;;  %v4173_v23 = vmul.f32 1.442695, %v4123_v47  ;;  %v4175_v58 = vmul.f32 1.442695, %v4124_v31  ;;  %2708 = vadd.xlane.f32.xlu2 %v11483_v25  ;;  %4214 = vadd.xlane.f32.xlu0 %v4213_v1  ;;  %v4167_v13 = vmul.f32 1.442695, %v4120_v24 }
 0x6bb   : > { %11482 = vst [vmem:[#allocation95_spill] sm:$0xff] %v9270_v55  ;;  %4220 = vadd.xlane.f32.xlu1 %v4219_v26  ;;  %v9277_v9 = vadd.f32 %v6818_v5, %v6816_v54  ;;  %4380 = vmatmul.bf16.gmra.mxu3 %v4254_v49 }
 0x6bc   : > { %6819 = vpow2.f32 %v4173_v23 }
 0x6bd   : > { %6821 = vpow2.f32 %v4175_v58 }
 0x6be   : > { %v3598_v62 = vpop.f32.mrf.mxu2  ;;  %6823 = vpow2.f32 %v4165_v63 }
 0x6bf   : > { %6825 = vpow2.f32 %v4167_v13 }
 0x6c0   : > { %v3647_v14 = vpop.f32.mrf.mxu3 }
 0x6c1   : > { %v9279_v20 = vadd.f32 %v3647_v14, %v3598_v62 }
 0x6c2   : > { %v6820_v22 = vpop.eup %6819  ;;  %3467 = vadd.xlane.f32.xlu2 %v9042_v4  ;;  %1857 = vadd.xlane.f32.xlu0 %v11486_v19 }
 0x6c3   : > { %11484 = vst [vmem:[#allocation97_spill] sm:$0xff] %v9279_v20  ;;  %v6822_v8 = vpop.eup %6821  ;;  %1863 = vadd.xlane.f32.xlu1 %v11485_v52  ;;  %v4257_v33 = vpack.c.bf16 %v6820_v22, %v6816_v54 }
 0x6c4   : > { %v9284_v7 = vadd.f32 %v6822_v8, %v6820_v22  ;;  %v6824_v37 = vpop.eup %6823  ;;  %v4258_v58 = vpack.c.bf16 %v6822_v8, %v6818_v5 }
 0x6c5   : > { %v6826_v46 = vpop.eup %6825  ;;  %v4255_v61 = vpack.c.bf16 %v6824_v37, %v6812_v36 }
 0x6c6   : > { %v4256_v2 = vpack.c.bf16 %v6826_v46, %v6814_v10  ;;  %v4222_v50 = vadd.f32 %v6826_v46, %v6824_v37  ;;  %v4089_v32 = vpop.xlane.xlu0 %4088 }
 0x6c7   : > { %v4125_v10 = vsub.f32 %v9166_v42, %v4089_v32 }
 0x6c9   : > { %4336 = vmatmul.bf16.gmra.mxu2 %v4255_v61  ;;  %v4177_v63 = vmul.f32 1.442695, %v4125_v10 }
 0x6ca   : > { %1860 = vadd.xlane.f32.xlu2 %v11487_v48  ;;  %3464 = vadd.xlane.f32.xlu0 %v9026_v60  ;;  %v4126_v60 = vsub.f32 %v9168_v40, %v4089_v32 }
 0x6cb   : > { %4385 = vmatmul.bf16.gmra.mxu3 %v4256_v2 }
 0x6cc   : > { %v4179_v62 = vmul.f32 1.442695, %v4126_v60 }
 0x6cf   : > { %v4092_v31 = vpop.xlane.xlu1 %4091 }
 0x6d0   : > { %v4127_v1 = vsub.f32 %v9176_v44, %v4092_v31  ;;  %v4128_v26 = vsub.f32 %v9178_v11, %v4092_v31 }
 0x6d1   : > { %v3601_v15 = vpop.f32.mrf.mxu2 }
 0x6d2   : > { %v3650_v4 = vpop.f32.mrf.mxu3  ;;  %4223 = vadd.xlane.f32.xlu0 %v4222_v50  ;;  %v4181_v49 = vmul.f32 1.442695, %v4127_v1  ;;  %v4183_v24 = vmul.f32 1.442695, %v4128_v26 }
 0x6d3   : > { %v9288_v47 = vadd.f32 %v3650_v4, %v3601_v15 }
 0x6d4   : > { %6827 = vpow2.f32 %v4181_v49 }
 0x6d5   : > { %11488 = vst [vmem:[#allocation68_spill] sm:$0xff] %v9288_v47  ;;  %6829 = vpow2.f32 %v4183_v24 }
 0x6d6   : > { %6831 = vpow2.f32 %v4177_v63 }
 0x6d7   : > { %v4095_v13 = vpop.xlane.xlu0 %4094  ;;  %6833 = vpow2.f32 %v4179_v62 }
 0x6d8   : > { %v4129_v19 = vsub.f32 %v9184_v39, %v4095_v13 }
 0x6d9   : > { %v3603_v36 = vpop.f32.mrf.mxu2  ;;  %4341 = vmatmul.bf16.gmra.mxu2 %v4257_v33 }
 0x6da   : > { %v3652_v23 = vpop.f32.mrf.mxu3  ;;  %v9296_v11 = vpop.eup %6827  ;;  %v4185_v48 = vmul.f32 1.442695, %v4129_v19 }
 0x6db   : > { %v9294_v25 = vadd.f32 %v3652_v23, %v3603_v36  ;;  %4390 = vmatmul.bf16.gmra.mxu3 %v4258_v58  ;;  %v9299_v54 = vpop.eup %6829 }
 0x6dc   : > { %v6832_v22 = vpop.eup %6831 }
 0x6dd   : > { %11489 = vst [vmem:[#allocation66_spill] sm:$0xff] %v9294_v25  ;;  %v6834_v8 = vpop.eup %6833  ;;  %v4259_v52 = vpack.c.bf16 %v9296_v11, %v6832_v22 }
 0x6de   : > { %v4260_v46 = vpack.c.bf16 %v9299_v54, %v6834_v8  ;;  %v9323_v1 = vadd.f32 %v6834_v8, %v6832_v22 }
 0x6df   : > { %v4098_v44 = vpop.xlane.xlu1 %4097 }
 0x6e0   : > { %v4131_v42 = vsub.f32 %v9190_v12, %v4098_v44  ;;  %v4132_v40 = vsub.f32 %v9192_v18, %v4098_v44  ;;  %v4130_v12 = vsub.f32 %v9186_v34, %v4095_v13 }
 0x6e2   : > { %v4189_v37 = vmul.f32 1.442695, %v4131_v42  ;;  %v4191_v61 = vmul.f32 1.442695, %v4132_v40  ;;  %v4187_v2 = vmul.f32 1.442695, %v4130_v12 }
 0x6e3   : > { %v11494_v12 = vld [vmem:[#allocation118_spill] sm:$0xff] }
 0x6e7   : > { %v9302_v5 = vpop.xlane.xlu1 %2690  ;;  %v4101_v14 = vpop.xlane.xlu0 %4100 }
 0x6e8   : > { %6835 = vrcp.f32 %v9302_v5  ;;  %v4133_v33 = vsub.f32 %v9201_v59, %v4101_v14  ;;  %v4134_v44 = vsub.f32 %v9204_v21, %v4101_v14  ;;  %v2908_v8 = vand.u32 2147483647, %v9302_v5 }
 0x6e9   : > { %4346 = vmatmul.bf16.gmra.mxu2 %v4259_v52  ;;  %6837 = vpow2.f32 %v4189_v37  ;;  %v2910_v21 = vand.u32 2147483648, %v9302_v5  ;;  %vm2904_vm3 = vweird.f32 %v9302_v5 }
 0x6ea   : > { %6839 = vpow2.f32 %v4191_v61  ;;  %v4193_v40 = vmul.f32 1.442695, %v4133_v33  ;;  %v4195_v19 = vmul.f32 1.442695, %v4134_v44  ;;  %v11495_v61 = vld [vmem:[#allocation119_spill] sm:$0xff]  ;;  %vm9365_vm5 = vcmp.eq.f32.partialorder %v2908_v8, 8.507059e+37 }
 0x6eb   : > { %4395 = vmatmul.bf16.gmra.mxu3 %v4260_v46 }
 0x6ee   : > { %v9309_v18 = vpop.eup %6835 }
 0x6ef   : > { %v9311_v15 = vpop.xlane.xlu0 %2693  ;;  %v4104_v4 = vpop.xlane.xlu2 %4103  ;;  %v2900_v50 = vmul.f32 %v9309_v18, %v9302_v5  ;;  %vm2905_vm1 = vweird.f32 %v9309_v18 }
 0x6f0   : > { %6841 = vrcp.f32 %v9311_v15  ;;  %v9314_v39 = vpop.xlane.xlu1 %3449  ;;  %v9319_v34 = vpop.eup %6837  ;;  %v4135_v49 = vsub.f32 %v9211_v16, %v4104_v4  ;;  %v4136_v13 = vsub.f32 %v9213_v38, %v4104_v4  ;;  %v2924_v46 = vand.u32 2147483648, %v9311_v15  ;;  %vm9361_vm4 = vmor %vm2904_vm3, %vm2905_vm1 }
 0x6f1   : > { %6843 = vrcp.f32 %v9314_v39  ;;  %11490 = vst [vmem:[#allocation67_spill] sm:$0xff] %v9319_v34  ;;  %v9321_v31 = vpop.eup %6839  ;;  %v2901_v32 = vsub.f32 1.0, %v2900_v50  ;;  %vm2918_vm6 = vweird.f32 %v9311_v15  ;;  %v2922_v33 = vand.u32 2147483647, %v9311_v15 }
 0x6f2   : > { %6845 = vpow2.f32 %v4185_v48  ;;  %11491 = vst [vmem:[#allocation164_spill] sm:$0xff] %v9321_v31  ;;  %v4197_v52 = vmul.f32 1.442695, %v4135_v49  ;;  %v4199_v14 = vmul.f32 1.442695, %v4136_v13  ;;  %v2862_v48 = vadd.f32 %v11495_v61, %v11494_v12  ;;  %v11507_v12 = vld [vmem:[#allocation117_spill] sm:$0xff] }
 0x6f3   : > { %6847 = vpow2.f32 %v4187_v2  ;;  %v2902_v63 = vmul.f32 %v9309_v18, %v2901_v32  ;;  %v2911_v49 = vor.u32 1.1754944e-38, %v2910_v21  ;;  %v2925_v13 = vor.u32 1.1754944e-38, %v2924_v46 }
 0x6f4   : > { %vm3674_vm8 = vweird.f32 %v9314_v39  ;;  %vm2923_vm10 = vcmp.eq.f32.partialorder %v2922_v33, 8.507059e+37  ;;  %v3678_v44 = vand.u32 2147483647, %v9314_v39 }
 0x6f5   : > { %v2903_v38 = vadd.f32 %v9309_v18, %v2902_v63 }
 0x6f6   : > { %v9325_v26 = vpop.eup %6841  ;;  %vm3679_vm14 = vcmp.eq.f32.partialorder %v3678_v44, 8.507059e+37 }
 0x6f7   : > { %v9327_v36 = vpop.eup %6843  ;;  %v2914_v10 = vmul.f32 %v9325_v26, %v9311_v15  ;;  %v9332_v23 = vpop.xlane.xlu2 %3446  ;;  %vm2919_vm2 = vweird.f32 %v9325_v26 }
 0x6f8   : > { %v9334_v58 = vpop.eup %6845  ;;  %v3670_v60 = vmul.f32 %v9327_v36, %v9314_v39  ;;  %6849 = vrcp.f32 %v9332_v23  ;;  %v9373_v5 = vpop.xlane.xlu0 %4202  ;;  %vm9380_vm7 = vmor %vm2918_vm6, %vm2919_vm2  ;;  %vm3675_vm9 = vweird.f32 %v9327_v36  ;;  %vm3660_vm13 = vweird.f32 %v9332_v23 }
 0x6f9   : > { %11492 = vst [vmem:[#allocation165_spill] sm:$0xff] %v9334_v58  ;;  %v9339_v24 = vpop.eup %6847  ;;  %v2915_v62 = vsub.f32 1.0, %v2914_v10  ;;  %v4261_v59 = vpack.c.bf16 %v9319_v34, %v9334_v58  ;;  %6851 = vpow2.f32 %v4193_v40  ;;  %v9371_v10 = vpop.xlane.xlu1 %2696  ;;  %vm9405_vm12 = vmor %vm3674_vm8, %vm3675_vm9 }
 0x6fa   : > { %11493 = vst [vmem:[#allocation166_spill] sm:$0xff] %v9339_v24  ;;  %v4262_v42 = vpack.c.bf16 %v9321_v31, %v9339_v24  ;;  %v3671_v22 = vsub.f32 1.0, %v3670_v60  ;;  %6853 = vpow2.f32 %v4197_v52  ;;  %v2907_v60 = vsel %vm9361_vm4, %v9309_v18, %v2903_v38 }
 0x6fb   : > { %v2916_v16 = vmul.f32 %v9325_v26, %v2915_v62  ;;  %4351 = vmatmul.bf16.gmra.mxu2 %v4261_v59  ;;  %6855 = vpow2.f32 %v4199_v14  ;;  %v2912_v40 = vsel %vm9365_vm5, %v2911_v49, %v2907_v60  ;;  %v3664_v14 = vand.u32 2147483647, %v9332_v23 }
 0x6fc   : > { %4400 = vmatmul.bf16.gmra.mxu3 %v4262_v42  ;;  %v3672_v2 = vmul.f32 %v9327_v36, %v3671_v22  ;;  %6857 = vpow2.f32 %v4195_v19  ;;  %v3680_v42 = vand.u32 2147483648, %v9314_v39  ;;  %v3666_v22 = vand.u32 2147483648, %v9332_v23 }
 0x6fd   : > { %v2917_v37 = vadd.f32 %v9325_v26, %v2916_v16  ;;  %6859 = vrcp.f32 %v9373_v5  ;;  %v3123_v61 = vmul.f32 %v2912_v40, %v11507_v12  ;;  %vm3665_vm1 = vcmp.eq.f32.partialorder %v3664_v14, 8.507059e+37 }
 0x6fe   : > { %v6850_v4 = vpop.eup %6849  ;;  %v3673_v18 = vadd.f32 %v9327_v36, %v3672_v2  ;;  %v3681_v50 = vor.u32 1.1754944e-38, %v3680_v42  ;;  %v3667_v33 = vor.u32 1.1754944e-38, %v3666_v22  ;;  %vm4416_vm4 = vweird.f32 %v9373_v5 }
 0x6ff   : > { %v3656_v62 = vmul.f32 %v6850_v4, %v9332_v23  ;;  %v2921_v15 = vsel %vm9380_vm7, %v9325_v26, %v2917_v37  ;;  %v9396_v16 = vpop.eup %6851  ;;  %vm3661_vm11 = vweird.f32 %v6850_v4  ;;  %v4422_v12 = vand.u32 2147483648, %v9373_v5 }
 0x700   : > { %11502 = vst [vmem:[#allocation118_spill] sm:$0xff] %v9396_v16  ;;  %v2926_v52 = vsel %vm2923_vm10, %v2925_v13, %v2921_v15  ;;  %v9401_v38 = vpop.eup %6853  ;;  %v3677_v37 = vsel %vm9405_vm12, %v9327_v36, %v3673_v18  ;;  %vm3662_vm15 = vmor %vm3660_vm13, %vm3661_vm11  ;;  %v2936_v20 = vand.u32 2147483647, %v9371_v10  ;;  %v2938_v51 = vand.u32 2147483648, %v9371_v10 }
 0x701   : > { %v3657_v59 = vsub.f32 1.0, %v3656_v62  ;;  %11503 = vst [vmem:[#allocation119_spill] sm:$0xff] %v9401_v38  ;;  %v9412_v19 = vpop.eup %6855  ;;  %v3124_v39 = vmul.f32 %v2926_v52, %v2862_v48  ;;  %v4263_v49 = vpack.c.bf16 %v9401_v38, %v9396_v16  ;;  %v9423_v63 = vpop.xlane.xlu1 %3455  ;;  %v3682_v48 = vsel %vm3679_vm14, %v3681_v50, %v3677_v37 }
 0x702   : > { %11506 = vst [vmem:[#allocation167_spill] sm:$0xff] %v9412_v19  ;;  %v9418_v2 = vpop.eup %6857  ;;  %v3618_v62 = vadd.f32 %v9174_v27, %v9172_v30  ;;  %v9438_v37 = vpop.xlane.xlu0 %2699  ;;  %v4420_v50 = vand.u32 2147483647, %v9373_v5  ;;  %vm2932_vm12 = vweird.f32 %v9371_v10  ;;  %vm9555_vm14 = vcmp.eq.f32.partialorder %v2936_v20, 8.507059e+37 }
 0x703   : > { %v3658_v26 = vmul.f32 %v6850_v4, %v3657_v59  ;;  %11508 = vst [vmem:[#allocation117_spill] sm:$0xff] %v9418_v2  ;;  %v6860_v32 = vpop.eup %6859  ;;  %v6472_v60 = vpack.i.bf16 %v3124_v39, %v3123_v61  ;;  %v4264_v36 = vpack.c.bf16 %v9412_v19, %v9418_v2  ;;  %v2950_v28 = vand.u32 2147483647, %v9438_v37 }
 0x704   : > { %v4412_v13 = vmul.f32 %v6860_v32, %v9373_v5  ;;  %v3880_v44 = vmul.f32 %v3682_v48, %v3618_v62  ;;  %vm4417_vm2 = vweird.f32 %v6860_v32  ;;  %v4423_v62 = vor.u32 1.1754944e-38, %v4422_v12 }
 0x705   : > { %v9399_v8 = vpop.xlane.xlu2 %4205  ;;  %v3659_v46 = vadd.f32 %v6850_v4, %v3658_v26  ;;  %6473 = vrot.lane.b32.xlu0 %v6472_v60, %s7301_s28  ;;  %vm9444_vm6 = vmor %vm4416_vm4, %vm4417_vm2  ;;  %vm4421_vm8 = vcmp.eq.f32.partialorder %v4420_v50, 8.507059e+37  ;;  %v11511_v50 = vld [vmem:[#allocation104_spill] sm:$0xff]  ;;  %v2939_v20 = vor.u32 1.1754944e-38, %v2938_v51  ;;  %vm9577_vm2 = vcmp.eq.f32.partialorder %v2950_v28, 8.507059e+37 }
 0x706   : > { %6861 = vrcp.f32 %v9399_v8  ;;  %v4413_v40 = vsub.f32 1.0, %v4412_v13  ;;  %v4436_v61 = vand.u32 2147483648, %v9399_v8  ;;  %vm4430_vm5 = vweird.f32 %v9399_v8 }
 0x707   : > { %v3663_v23 = vsel %vm3662_vm15, %v6850_v4, %v3659_v46  ;;  %6863 = vrcp.f32 %v9371_v10  ;;  %vm2946_vm15 = vweird.f32 %v9438_v37 }
 0x708   : > { %v3668_v15 = vsel %vm3665_vm1, %v3667_v33, %v3663_v23  ;;  %v4414_v30 = vmul.f32 %v6860_v32, %v4413_v40  ;;  %v4434_v23 = vand.u32 2147483647, %v9399_v8  ;;  %v4437_v13 = vor.u32 1.1754944e-38, %v4436_v61 }
 0x709   : > { %v3879_v18 = vmul.f32 %v3668_v15, %v9140_v35  ;;  %v9436_v52 = vpop.xlane.xlu1 %2702  ;;  %6865 = vrcp.f32 %v9438_v37 }
 0x70a   : > { %v4415_v35 = vadd.f32 %v6860_v32, %v4414_v30  ;;  %vm4435_vm9 = vcmp.eq.f32.partialorder %v4434_v23, 8.507059e+37 }
 0x70b   : > { %4356 = vmatmul.bf16.gmra.mxu2 %v4263_v49  ;;  %v6477_v42 = vpack.i.bf16 %v3880_v44, %v3879_v18 }
 0x70c   : > { %v6862_v4 = vpop.eup %6861  ;;  %4405 = vmatmul.bf16.gmra.mxu3 %v4264_v36  ;;  %v4419_v60 = vsel %vm9444_vm6, %v6860_v32, %v4415_v35 }
 0x70d   : > { %v4426_v59 = vmul.f32 %v6862_v4, %v9399_v8  ;;  %6478 = vrot.lane.b32.xlu2 %v6477_v42, %s7300_s4  ;;  %v9434_v22 = vpop.xlane.xlu2 %3452  ;;  %vm4431_vm3 = vweird.f32 %v6862_v4  ;;  %v4424_v5 = vsel %vm4421_vm8, %v4423_v62, %v4419_v60 }
 0x70e   : > { %vm4432_vm7 = vmor %vm4430_vm5, %vm4431_vm3 }
 0x70f   : > { %v4427_v26 = vsub.f32 1.0, %v4426_v59 }
 0x711   : > { %v4428_v27 = vmul.f32 %v6862_v4, %v4427_v26  ;;  %v9454_v18 = vpop.xlane.xlu1 %3461 }
 0x712   : > { %6867 = vrcp.f32 %v9454_v18  ;;  %v3734_v43 = vand.u32 2147483647, %v9454_v18  ;;  %vm3730_vm3 = vweird.f32 %v9454_v18 }
 0x713   : > { %v4429_v46 = vadd.f32 %v6862_v4, %v4428_v27 }
 0x714   : > { %v4322_v21 = vpop.f32.mrf.mxu2  ;;  %vm9605_vm5 = vcmp.eq.f32.partialorder %v3734_v43, 8.507059e+37 }
 0x715   : > { %v4371_v14 = vpop.f32.mrf.mxu3  ;;  %v9452_v49 = vpop.xlane.xlu2 %4211  ;;  %v4433_v48 = vsel %vm4432_vm7, %v6862_v4, %v4429_v46 }
 0x716   : > { %v4372_v33 = vadd.f32 %v4371_v14, %v4322_v21  ;;  %v4438_v44 = vsel %vm4435_vm9, %v4437_v13, %v4433_v48  ;;  %v9475_v46 = vpop.eup %6863  ;;  %vm4458_vm7 = vweird.f32 %v9452_v49 }
 0x717   : > { %v9479_v61 = vpop.eup %6865  ;;  %v2928_v39 = vmul.f32 %v9475_v46, %v9371_v10  ;;  %vm2933_vm10 = vweird.f32 %v9475_v46 }
 0x718   : > { %v4635_v42 = vmul.f32 %v4424_v5, %v4372_v33  ;;  %v2942_v23 = vmul.f32 %v9479_v61, %v9438_v37  ;;  %v9495_v62 = vpop.eup %6867  ;;  %v11512_v5 = vld [vmem:[#allocation110_spill] sm:$0xff]  ;;  %vm2947_vm11 = vweird.f32 %v9479_v61  ;;  %vm9551_vm13 = vmor %vm2932_vm12, %vm2933_vm10 }
 0x719   : > { %v9463_v30 = vpop.xlane.xlu1 %1854  ;;  %v2929_v48 = vsub.f32 1.0, %v2928_v39  ;;  %vm9573_vm1 = vmor %vm2946_vm15, %vm2947_vm11  ;;  %vm3731_vm4 = vweird.f32 %v9495_v62 }
 0x71a   : > { %vm9623_vm8 = vmor %vm3730_vm3, %vm3731_vm4 }
 0x71c   : > { %v4324_v36 = vpop.f32.mrf.mxu2 }
 0x71d   : > { %v4373_v15 = vpop.f32.mrf.mxu3  ;;  %v9456_v8 = vpop.xlane.xlu0 %4208 }
 0x71e   : > { %v4374_v59 = vadd.f32 %v4373_v15, %v4324_v36  ;;  %v9459_v32 = vpop.xlane.xlu2 %3458  ;;  %v2943_v15 = vsub.f32 1.0, %v2942_v23 }
 0x71f   : > { %6869 = vrcp.f32 %v9459_v32  ;;  %v3720_v43 = vand.u32 2147483647, %v9459_v32  ;;  %vm3716_vm9 = vweird.f32 %v9459_v32 }
 0x720   : > { %v4636_v40 = vmul.f32 %v4438_v44, %v4374_v59  ;;  %6871 = vrcp.f32 %v9423_v63 }
 0x721   : > { %v9477_v12 = vpop.xlane.xlu1 %2711  ;;  %6873 = vrcp.f32 %v9452_v49  ;;  %vm3721_vm12 = vcmp.eq.f32.partialorder %v3720_v43, 8.507059e+37 }
 0x722   : > { %v6482_v26 = vpack.i.bf16 %v4636_v40, %v4635_v42  ;;  %6875 = vrcp.f32 %v9456_v8  ;;  %v2930_v42 = vmul.f32 %v9475_v46, %v2929_v48  ;;  %v2944_v40 = vmul.f32 %v9479_v61, %v2943_v15  ;;  %v11516_v15 = vld [vmem:[#allocation127_spill] sm:$0xff] }
 0x724   : > { %6483 = vrot.lane.b32.xlu1 %v6482_v26, %s7299_s16  ;;  %v3726_v26 = vmul.f32 %v9495_v62, %v9454_v18  ;;  %v2931_v45 = vadd.f32 %v9475_v46, %v2930_v42  ;;  %v2945_v19 = vadd.f32 %v9479_v61, %v2944_v40  ;;  %v2952_v40 = vand.u32 2147483648, %v9438_v37 }
 0x725   : > { %v9461_v4 = vpop.xlane.xlu0 %2705  ;;  %v9503_v44 = vpop.eup %6869 }
 0x726   : > { %v9473_v35 = vpop.xlane.xlu2 %4217  ;;  %v3712_v39 = vmul.f32 %v9503_v44, %v9459_v32  ;;  %v9516_v23 = vpop.eup %6871  ;;  %v3727_v38 = vsub.f32 1.0, %v3726_v26  ;;  %v2949_v16 = vsel %vm9573_vm1, %v9479_v61, %v2945_v19  ;;  %v2953_v58 = vor.u32 1.1754944e-38, %v2952_v40 }
 0x727   : > { %v9523_v25 = vpop.eup %6873  ;;  %v9548_v42 = vmul.f32 %v9516_v23, %v9423_v63  ;;  %vm3717_vm6 = vweird.f32 %v9503_v44 }
 0x728   : > { %v9530_v55 = vpop.eup %6875  ;;  %v3713_v2 = vsub.f32 1.0, %v3712_v39  ;;  %v2935_v39 = vsel %vm9551_vm13, %v9475_v46, %v2931_v45  ;;  %v3728_v51 = vmul.f32 %v9495_v62, %v3727_v38  ;;  %v2954_v28 = vsel %vm9577_vm2, %v2953_v58, %v2949_v16  ;;  %vm9630_vm10 = vmor %vm3716_vm9, %vm3717_vm6 }
 0x729   : > { %v2940_v40 = vsel %vm9555_vm14, %v2939_v20, %v2935_v39  ;;  %vm4459_vm11 = vweird.f32 %v9523_v25  ;;  %vm4444_vm13 = vweird.f32 %v9456_v8  ;;  %vm4445_vm14 = vweird.f32 %v9530_v55 }
 0x72a   : > { %v3714_v45 = vmul.f32 %v9503_v44, %v3713_v2  ;;  %v3729_v34 = vadd.f32 %v9495_v62, %v3728_v51  ;;  %v4462_v51 = vand.u32 2147483647, %v9452_v49  ;;  %vm9676_vm2 = vmor %vm4458_vm7, %vm4459_vm11 }
 0x72b   : > { %vm9688_vm4 = vmor %vm4444_vm13, %vm4445_vm14  ;;  %vm3703_vm13 = vweird.f32 %v9516_v23  ;;  %vm3688_vm14 = vweird.f32 %v9434_v22 }
 0x72c   : > { %v9467_v27 = vpop.f32.mrf.mxu2  ;;  %vm9662_vm15 = vcmp.eq.f32.partialorder %v4462_v51, 8.507059e+37 }
 0x72d   : > { %v9469_v21 = vpop.xlane.xlu0 %4214 }
 0x72e   : > { %v9471_v14 = vpop.f32.mrf.mxu3  ;;  %v9498_v13 = vpop.xlane.xlu2 %2708 }
 0x72f   : > { %2714 = vadd.xlane.f32.xlu0 %v11511_v50  ;;  %v9500_v59 = vpop.xlane.xlu1 %4220 }
 0x730   : > { %6877 = vrcp.f32 %v9500_v59 }
 0x731   : > { %6879 = vrcp.f32 %v9434_v22 }
 0x734   : > { %v9488_v33 = vpop.f32.mrf.mxu2 }
 0x735   : > { %v9490_v60 = vpop.xlane.xlu0 %1857 }
 0x736   : > { %v9492_v36 = vpop.f32.mrf.mxu3  ;;  %2717 = vadd.xlane.f32.xlu2 %v11512_v5  ;;  %v9564_v10 = vpop.xlane.xlu2 %3467 }
 0x737   : > { %3473 = vadd.xlane.f32.xlu0 %v9054_v6  ;;  %v11515_v6 = vld [vmem:[#allocation126_spill] sm:$0xff] }
 0x738   : > { %v9527_v47 = vadd.f32 %v11516_v15, %v11515_v6  ;;  %v9539_v6 = vpop.eup %6877  ;;  %v9543_v15 = vadd.f32 %v9221_v53, %v9219_v17  ;;  %v4454_v17 = vmul.f32 %v9523_v25, %v9452_v49  ;;  %v4440_v53 = vmul.f32 %v9530_v55, %v9456_v8 }
 0x739   : > { %v9566_v26 = vpop.eup %6879  ;;  %v4496_v46 = vmul.f32 %v9539_v6, %v9500_v59  ;;  %vm4501_vm1 = vweird.f32 %v9539_v6 }
 0x73a   : > { %v9601_v38 = vmul.f32 %v9566_v26, %v9434_v22  ;;  %v4455_v19 = vsub.f32 1.0, %v4454_v17  ;;  %v4441_v2 = vsub.f32 1.0, %v4440_v53  ;;  %v11527_v53 = vld [vmem:[#allocation70_spill] sm:$0xff] }
 0x73b   : > { %v4497_v17 = vsub.f32 1.0, %v4496_v46  ;;  %v11532_v46 = vld [vmem:[#allocation121_spill] sm:$0xff] }
 0x73c   : > { %v9514_v50 = vpop.f32.mrf.mxu2  ;;  %v4456_v20 = vmul.f32 %v9523_v25, %v4455_v19  ;;  %v4442_v37 = vmul.f32 %v9530_v55, %v4441_v2 }
 0x73d   : > { %11513 = vst [vmem:[#allocation104_spill] sm:$0xff] %v9514_v50  ;;  %v9519_v5 = vpop.xlane.xlu0 %3464  ;;  %v4498_v2 = vmul.f32 %v9539_v6, %v4497_v17 }
 0x73e   : > { %v9521_v48 = vpop.f32.mrf.mxu3  ;;  %4226 = vadd.xlane.f32.xlu2 %v9277_v9  ;;  %v3722_v9 = vand.u32 2147483648, %v9459_v32  ;;  %v3733_v32 = vsel %vm9623_vm8, %v9495_v62, %v3729_v34  ;;  %v9650_v39 = vpop.xlane.xlu2 %1860  ;;  %v4443_v62 = vadd.f32 %v9530_v55, %v4442_v37 }
 0x73f   : > { %11514 = vst [vmem:[#allocation110_spill] sm:$0xff] %v9521_v48  ;;  %4229 = vadd.xlane.f32.xlu0 %v9284_v7  ;;  %v3736_v7 = vand.u32 2147483648, %v9454_v18  ;;  %v3715_v48 = vadd.f32 %v9503_v44, %v3714_v45  ;;  %v4464_v45 = vand.u32 2147483648, %v9452_v49  ;;  %v9637_v18 = vmul.f32 %v2940_v40, %v11532_v46 }
 0x740   : > { %v4448_v49 = vand.u32 2147483647, %v9456_v8  ;;  %v4504_v46 = vand.u32 2147483647, %v9500_v59 }
 0x741   : > { %v3737_v50 = vor.u32 1.1754944e-38, %v3736_v7  ;;  %v9640_v7 = vmul.f32 %v2954_v28, %v9527_v47  ;;  %v3719_v19 = vsel %vm9630_vm10, %v9503_v44, %v3715_v48  ;;  %v3723_v47 = vor.u32 1.1754944e-38, %v3722_v9 }
 0x742   : > { %v4457_v44 = vadd.f32 %v9523_v25, %v4456_v20  ;;  %v4506_v48 = vand.u32 2147483648, %v9500_v59  ;;  %v4499_v9 = vadd.f32 %v9539_v6, %v4498_v2  ;;  %vm4505_vm10 = vcmp.eq.f32.partialorder %v4504_v46, 8.507059e+37 }
 0x743   : > { %v3724_v58 = vsel %vm3721_vm12, %v3723_v47, %v3719_v19  ;;  %vm4449_vm11 = vcmp.eq.f32.partialorder %v4448_v49, 8.507059e+37  ;;  %vm3689_vm12 = vweird.f32 %v9566_v26  ;;  %v6037_v19 = vld [vmem:[#allocation11 + $0x38] sm:$0xff] }
 0x744   : > { %v9590_v24 = vpop.f32.mrf.mxu2  ;;  %v9670_v20 = vmul.f32 %v3724_v58, %v9209_v3  ;;  %v4447_v58 = vsel %vm9688_vm4, %v9530_v55, %v4443_v62  ;;  %4969 = vmatpush.bf16.msra.mxu0 %v6037_v19 }
 0x745   : > { %v9595_v31 = vpop.xlane.xlu0 %4223 }
 0x746   : > { %v9597_v41 = vpop.f32.mrf.mxu3  ;;  %6881 = vrcp.f32 %v9595_v31  ;;  %1869 = vadd.xlane.f32.xlu2 %v11527_v53  ;;  %v4520_v37 = vand.u32 2147483648, %v9595_v31  ;;  %v4518_v16 = vand.u32 2147483647, %v9595_v31  ;;  %vm4514_vm6 = vweird.f32 %v9595_v31 }
 0x747   : > { %6883 = vrcp.f32 %v9650_v39 }
 0x748   : > { %vm4519_vm9 = vcmp.eq.f32.partialorder %v4518_v16, 8.507059e+37  ;;  %6885 = vrcp.f32 %v9477_v12 }
 0x749   : > { %6887 = vrcp.f32 %v9498_v13 }
 0x74a   : > { %6889 = vrcp.f32 %v9463_v30 }
 0x74b   : > { %6891 = vrcp.f32 %v9436_v52 }
 0x74c   : > { %v6882_v53 = vpop.eup %6881  ;;  %v4337_v40 = vpop.f32.mrf.mxu2  ;;  %6893 = vrcp.f32 %v9490_v60 }
 0x74d   : > { %v4510_v28 = vmul.f32 %v6882_v53, %v9595_v31  ;;  %vm4515_vm3 = vweird.f32 %v6882_v53  ;;  %6895 = vrcp.f32 %v9461_v4 }
 0x74e   : > { %3470 = vadd.xlane.f32.xlu1 %v9070_v0  ;;  %v4386_v34 = vpop.f32.mrf.mxu3  ;;  %v3738_v0 = vsel %vm9605_vm5, %v3737_v50, %v3733_v32  ;;  %vm4500_vm5 = vweird.f32 %v9500_v59  ;;  %v6487_v32 = vpack.i.bf16 %v9640_v7, %v9637_v18  ;;  %v4461_v59 = vsel %vm9676_vm2, %v9523_v25, %v4457_v44  ;;  %vm4516_vm8 = vmor %vm4514_vm6, %vm4515_vm3  ;;  %v11541_v7 = vld [vmem:[#allocation69_spill] sm:$0xff] }
 0x74f   : > { %v4511_v17 = vsub.f32 1.0, %v4510_v28  ;;  %v9682_v51 = vmul.f32 %v3738_v0, %v9543_v15  ;;  %v4450_v15 = vand.u32 2147483648, %v9456_v8  ;;  %vm9701_vm7 = vmor %vm4500_vm5, %vm4501_vm1  ;;  %v4387_v28 = vadd.f32 %v4386_v34, %v4337_v40 }
 0x750   : > { %v4503_v8 = vsel %vm9701_vm7, %v9539_v6, %v4499_v9  ;;  %v4521_v18 = vor.u32 1.1754944e-38, %v4520_v37  ;;  %v4507_v0 = vor.u32 1.1754944e-38, %v4506_v48  ;;  %v4379_v40 = vadd.f32 %v9492_v36, %v9488_v33 }
 0x751   : > { %v4512_v50 = vmul.f32 %v6882_v53, %v4511_v17  ;;  %v6507_v47 = vpack.i.bf16 %v9682_v51, %v9670_v20  ;;  %v9715_v17 = vpop.eup %6883  ;;  %v4451_v44 = vor.u32 1.1754944e-38, %v4450_v15  ;;  %v4465_v9 = vor.u32 1.1754944e-38, %v4464_v45 }
 0x752   : > { %v4508_v37 = vsel %vm4505_vm10, %v4507_v0, %v4503_v8  ;;  %v2172_v55 = vmul.f32 %v9715_v17, %v9650_v39  ;;  %v11542_v33 = vsub.f32 1.0, %v9601_v38  ;;  %v3694_v38 = vand.u32 2147483648, %v9434_v22 }
 0x753   : > { %v4513_v2 = vadd.f32 %v6882_v53, %v4512_v50  ;;  %6488 = vrot.lane.b32.xlu0 %v6487_v32, %s7301_s28  ;;  %v4377_v50 = vadd.f32 %v9471_v14, %v9467_v27  ;;  %v4452_v48 = vsel %vm4449_vm11, %v4451_v44, %v4447_v58  ;;  %v4466_v45 = vsel %vm9662_vm15, %v4465_v9, %v4461_v59  ;;  %vm9749_vm15 = vmor %vm3688_vm14, %vm3689_vm12  ;;  %v11548_v44 = vld [vmem:[#allocation156_spill] sm:$0xff] }
 0x754   : > { %v4339_v31 = vpop.f32.mrf.mxu2  ;;  %v3686_v36 = vmul.f32 %v9566_v26, %v11542_v33  ;;  %v4638_v16 = vmul.f32 %v4466_v45, %v4379_v40  ;;  %v11543_v27 = vsub.f32 1.0, %v9548_v42  ;;  %v2173_v46 = vsub.f32 1.0, %v2172_v55  ;;  %v6034_v33 = vld [vmem:[#allocation11 + $0x20] sm:$0xff]  ;;  %v6033_v45 = vld [vmem:[#allocation11 + $0x18] sm:$0xff] }
 0x755   : > { %v4517_v25 = vsel %vm4516_vm8, %v6882_v53, %v4513_v2  ;;  %v9727_v53 = vmul.f32 %v4508_v37, %v4387_v28  ;;  %v4637_v49 = vmul.f32 %v4452_v48, %v4377_v50  ;;  %v3692_v42 = vand.u32 2147483647, %v9434_v22  ;;  %v6036_v22 = vld [vmem:[#allocation11 + $0x30] sm:$0xff] }
 0x756   : > { %1866 = vadd.xlane.f32.xlu1 %v11541_v7  ;;  %v4388_v61 = vpop.f32.mrf.mxu3  ;;  %v4522_v34 = vsel %vm4519_vm9, %v4521_v18, %v4517_v25  ;;  %v3700_v14 = vmul.f32 %v9516_v23, %v11543_v27  ;;  %v3687_v32 = vadd.f32 %v9566_v26, %v3686_v36  ;;  %v3708_v2 = vand.u32 2147483648, %v9423_v63  ;;  %4970 = vmatpush.bf16.msra.mxu0 %v6036_v22  ;;  %v6035_v25 = vld [vmem:[#allocation11 + $0x28] sm:$0xff]  ;;  %v9779_v27 = vpop.eup %6885 }
 0x757   : > { %v4389_v6 = vadd.f32 %v4388_v61, %v4339_v31  ;;  %v6497_v15 = vpack.i.bf16 %v4638_v16, %v4637_v49  ;;  %v2174_v28 = vmul.f32 %v9715_v17, %v2173_v46  ;;  %vm3702_vm1 = vweird.f32 %v9423_v63  ;;  %v9781_v49 = vpop.eup %6887 }
 0x758   : > { %v3701_v43 = vadd.f32 %v9516_v23, %v3700_v14  ;;  %v3706_v8 = vand.u32 2147483647, %v9423_v63  ;;  %v3691_v31 = vsel %vm9749_vm15, %v9566_v26, %v3687_v32  ;;  %vm3704_vm2 = vmor %vm3702_vm1, %vm3703_vm13  ;;  %v3695_v18 = vor.u32 1.1754944e-38, %v3694_v38  ;;  %v6031_v14 = vld [vmem:[#allocation11 + $0x8] sm:$0xff]  ;;  %v9783_v46 = vpop.eup %6889 }
 0x759   : > { %v9729_v62 = vmul.f32 %v4522_v34, %v4389_v6  ;;  %vm3693_vm3 = vcmp.eq.f32.partialorder %v3692_v42, 8.507059e+37  ;;  %v3709_v58 = vor.u32 1.1754944e-38, %v3708_v2  ;;  %v2175_v0 = vadd.f32 %v9715_v17, %v2174_v28  ;;  %v11546_v6 = vld [vmem:[#allocation157_spill] sm:$0xff]  ;;  %v11547_v34 = vld [vmem:[#allocation158_spill] sm:$0xff]  ;;  %v9787_v38 = vpop.eup %6891 }
 0x75a   : > { %v3705_v7 = vsel %vm3704_vm2, %v9516_v23, %v3701_v43  ;;  %vm2177_vm4 = vweird.f32 %v9715_v17  ;;  %v3696_v61 = vsel %vm3693_vm3, %v3695_v18, %v3691_v31  ;;  %vm3707_vm5 = vcmp.eq.f32.partialorder %v3706_v8, 8.507059e+37  ;;  %4971 = vmatpush.bf16.msra.mxu0 %v6035_v25  ;;  %v6030_v42 = vld [vmem:[#allocation11] sm:$0xff]  ;;  %v11551_v25 = vld [vmem:[#allocation91_spill] sm:$0xff] }
 0x75b   : > { %v6527_v3 = vpack.i.bf16 %v9729_v62, %v9727_v53  ;;  %v2182_v63 = vand.u32 2147483648, %v9650_v39  ;;  %vm2176_vm6 = vweird.f32 %v9650_v39  ;;  %v2180_v26 = vand.u32 2147483647, %v9650_v39  ;;  %v11549_v39 = vld [vmem:[#allocation92_spill] sm:$0xff] }
 0x75c   : > { %v3710_v40 = vsel %vm3707_vm5, %v3709_v58, %v3705_v7  ;;  %v3623_v23 = vadd.f32 %v11547_v34, %v11546_v6  ;;  %vm2178_vm7 = vmor %vm2176_vm6, %vm2177_vm4  ;;  %v3881_v9 = vmul.f32 %v3696_v61, %v11548_v44  ;;  %v2998_v32 = vmul.f32 %v9779_v27, %v9477_v12  ;;  %v11550_v61 = vld [vmem:[#allocation90_spill] sm:$0xff]  ;;  %v11552_v34 = vld [vmem:[#allocation120_spill] sm:$0xff] }
 0x75d   : > { %v2179_v37 = vsel %vm2178_vm7, %v9715_v17, %v2175_v0  ;;  %v2183_v50 = vor.u32 1.1754944e-38, %v2182_v63  ;;  %vm2181_vm8 = vcmp.eq.f32.partialorder %v2180_v26, 8.507059e+37  ;;  %v6032_v17 = vld [vmem:[#allocation11 + $0x10] sm:$0xff]  ;;  %v2984_v19 = vmul.f32 %v9781_v49, %v9498_v13 }
 0x75e   : > { %6498 = vrot.lane.b32.xlu2 %v6497_v15, %s7299_s16  ;;  %v3882_v55 = vmul.f32 %v3710_v40, %v3623_v23  ;;  %4972 = vmatpush.bf16.msra.mxu0 %v6034_v33  ;;  %v9789_v15 = vpop.eup %6893  ;;  %v2144_v43 = vmul.f32 %v9783_v46, %v9463_v30  ;;  %v2956_v2 = vmul.f32 %v9787_v38, %v9436_v52  ;;  %v2999_v59 = vsub.f32 1.0, %v2998_v32 }
 0x75f   : > { %v2184_v36 = vsel %vm2181_vm8, %v2183_v50, %v2179_v37  ;;  %v2158_v28 = vmul.f32 %v9789_v15, %v9490_v60  ;;  %v2985_v8 = vsub.f32 1.0, %v2984_v19  ;;  %6897 = vrcp.f32 %v9564_v10  ;;  %v9804_v0 = vpop.eup %6895 }
 0x760   : > { %v6492_v48 = vpack.i.bf16 %v3882_v55, %v3881_v9  ;;  %v9773_v16 = vmul.f32 %v2184_v36, %v11549_v39  ;;  %v2145_v31 = vsub.f32 1.0, %v2144_v43  ;;  %v2957_v22 = vsub.f32 1.0, %v2956_v2 }
 0x761   : > { %v3000_v18 = vmul.f32 %v9779_v27, %v2999_v59  ;;  %v2159_v7 = vsub.f32 1.0, %v2158_v28  ;;  %v2986_v58 = vmul.f32 %v9781_v49, %v2985_v8  ;;  %6899 = vrcp.f32 %v9519_v5 }
 0x762   : > { %4973 = vmatpush.bf16.msra.mxu0 %v6033_v45  ;;  %v9808_v63 = vadd.f32 %v11551_v25, %v11550_v61  ;;  %v2146_v26 = vmul.f32 %v9783_v46, %v2145_v31  ;;  %v3006_v40 = vand.u32 2147483647, %v9477_v12  ;;  %v3008_v6 = vand.u32 2147483648, %v9477_v12 }
 0x763   : > { %v2958_v23 = vmul.f32 %v9787_v38, %v2957_v22  ;;  %vm2148_vm9 = vweird.f32 %v9463_v30  ;;  %v3001_v44 = vadd.f32 %v9779_v27, %v3000_v18  ;;  %vm3003_vm10 = vweird.f32 %v9779_v27  ;;  %v11562_v18 = vld [vmem:[#allocation149_spill] sm:$0xff] }
 0x764   : > { %v2152_v9 = vand.u32 2147483647, %v9463_v30  ;;  %v2154_v37 = vand.u32 2147483648, %v9463_v30  ;;  %v2994_v50 = vand.u32 2147483648, %v9498_v13  ;;  %v2160_v55 = vmul.f32 %v9789_v15, %v2159_v7  ;;  %v11564_v30 = vld [vmem:[#allocation137_spill] sm:$0xff] }
 0x765   : > { %v9822_v33 = vpop.eup %6897  ;;  %vm3002_vm11 = vweird.f32 %v9477_v12  ;;  %v2970_v36 = vmul.f32 %v9804_v0, %v9461_v4  ;;  %vm2989_vm12 = vweird.f32 %v9781_v49  ;;  %v2147_v45 = vadd.f32 %v9783_v46, %v2146_v26 }
 0x766   : > { %4974 = vmatpush.bf16.msra.mxu0 %v6032_v17  ;;  %vm2149_vm13 = vweird.f32 %v9783_v46  ;;  %vm9831_vm14 = vmor %vm3002_vm11, %vm3003_vm10  ;;  %vm9835_vm15 = vcmp.eq.f32.partialorder %v3006_v40, 8.507059e+37  ;;  %v3009_v12 = vor.u32 1.1754944e-38, %v3008_v6  ;;  %6901 = vrcp.f32 %v9473_v35 }
 0x767   : > { %v3005_v32 = vsel %vm9831_vm14, %v9779_v27, %v3001_v44  ;;  %vm2988_vm1 = vweird.f32 %v9498_v13  ;;  %v2992_v19 = vand.u32 2147483647, %v9498_v13  ;;  %v3754_v2 = vmul.f32 %v9822_v33, %v9564_v10  ;;  %vm9864_vm4 = vmor %vm2148_vm9, %vm2149_vm13 }
 0x768   : > { %vm9847_vm2 = vmor %vm2988_vm1, %vm2989_vm12  ;;  %v2161_v59 = vadd.f32 %v9789_v15, %v2160_v55  ;;  %vm2163_vm3 = vweird.f32 %v9789_v15  ;;  %v2971_v28 = vsub.f32 1.0, %v2970_v36  ;;  %6903 = vrcp.f32 %v9469_v21  ;;  %v11567_v36 = vld [vmem:[#allocation135_spill] sm:$0xff] }
 0x769   : > { %v2168_v13 = vand.u32 2147483648, %v9490_v60  ;;  %vm2162_vm5 = vweird.f32 %v9490_v60  ;;  %v2166_v31 = vand.u32 2147483647, %v9490_v60  ;;  %v3010_v7 = vsel %vm9835_vm15, %v3009_v12, %v3005_v32 }
 0x76a   : > { %4975 = vmatpush.bf16.msra.mxu0 %v6031_v14  ;;  %v9839_v14 = vpop.eup %6899  ;;  %v9880_v25 = vadd.f32 %v9239_v29, %v9236_v56  ;;  %v2155_v26 = vor.u32 1.1754944e-38, %v2154_v37  ;;  %vm2993_vm6 = vcmp.eq.f32.partialorder %v2992_v19, 8.507059e+37  ;;  %vm9884_vm7 = vmor %vm2162_vm5, %vm2163_vm3  ;;  %v2151_v40 = vsel %vm9864_vm4, %v9783_v46, %v2147_v45 }
 0x76b   : > { %v3740_v22 = vmul.f32 %v9839_v14, %v9519_v5  ;;  %v3755_v6 = vsub.f32 1.0, %v3754_v2  ;;  %v2972_v29 = vmul.f32 %v9804_v0, %v2971_v28  ;;  %v2169_v37 = vor.u32 1.1754944e-38, %v2168_v13 }
 0x76c   : > { %v9894_v56 = vpop.eup %6901  ;;  %v9905_v46 = vadd.f32 %v9787_v38, %v2958_v23  ;;  %vm2153_vm8 = vcmp.eq.f32.partialorder %v2152_v9, 8.507059e+37  ;;  %vm2167_vm9 = vcmp.eq.f32.partialorder %v2166_v31, 8.507059e+37  ;;  %vm2961_vm10 = vweird.f32 %v9787_v38 }
 0x76d   : > { %v2156_v17 = vsel %vm2153_vm8, %v2155_v26, %v2151_v40  ;;  %v4234_v32 = vadd.f32 %v9299_v54, %v9296_v11  ;;  %vm2974_vm11 = vweird.f32 %v9461_v4  ;;  %v3756_v23 = vmul.f32 %v9822_v33, %v3755_v6  ;;  %v6479_v54 = vpop.permute.xlu2 %6478 }
 0x76e   : > { %4976 = vmatpush.bf16.msra.mxu0 %v6030_v42  ;;  %v2995_v42 = vor.u32 1.1754944e-38, %v2994_v50  ;;  %v9897_v50 = vpop.xlane.xlu1 %1863  ;;  %v9907_v45 = vpop.eup %6903  ;;  %v2973_v2 = vadd.f32 %v9804_v0, %v2972_v29  ;;  %v2980_v28 = vand.u32 2147483648, %v9461_v4  ;;  %vm2975_vm12 = vweird.f32 %v9804_v0 }
 0x76f   : > { %6493 = vrot.lane.b32.xlu1 %v6492_v48, %s7300_s4  ;;  %v2987_v48 = vadd.f32 %v9781_v49, %v2986_v58  ;;  %v11563_v58 = vld [vmem:[#allocation136_spill] sm:$0xff]  ;;  %v4468_v31 = vmul.f32 %v9907_v45, %v9469_v21  ;;  %vm3758_vm13 = vweird.f32 %v9564_v10  ;;  %vm3759_vm14 = vweird.f32 %v9822_v33  ;;  %vm9955_vm5 = vmor %vm2974_vm11, %vm2975_vm12 }
 0x770   : > { %v2877_v61 = vadd.f32 %v11564_v30, %v11563_v58  ;;  %vm4859_vm15 = vcmask 523264   ;;  %v6481_v58 = vunpack.i.h.bf16 %v6479_v54  ;;  %vm4876_vm1 = vcmask 785408   ;;  %vm9943_vm3 = vmor %vm3758_vm13, %vm3759_vm14 }
 0x771   : > { %v2991_v27 = vsel %vm9847_vm2, %v9781_v49, %v2987_v48  ;;  %v11561_v49 = vld [vmem:[#allocation148_spill] sm:$0xff]  ;;  %vm3745_vm2 = vweird.f32 %v9839_v14  ;;  %vm3744_vm4 = vweird.f32 %v9519_v5  ;;  %v3750_v6 = vand.u32 2147483648, %v9519_v5 }
 0x772   : > { %v2996_v44 = vsel %vm2993_vm6, %v2995_v42, %v2991_v27  ;;  %v9902_v39 = vmul.f32 %v3010_v7, %v2877_v61  ;;  %v9918_v42 = vmul.f32 %v9894_v56, %v9473_v35  ;;  %v11568_v27 = vld [vmem:[#allocation89_spill] sm:$0xff]  ;;  %vm2960_vm6 = vweird.f32 %v9436_v52 }
 0x773   : > { %v9900_v48 = vmul.f32 %v2996_v44, %v11567_v36  ;;  %v2367_v13 = vmul.f32 %v2156_v17, %v11568_v27  ;;  %vm9976_vm8 = vmor %vm2960_vm6, %vm2961_vm10  ;;  %v3751_v27 = vor.u32 1.1754944e-38, %v3750_v6  ;;  %vm4487_vm13 = vweird.f32 %v9894_v56 }
 0x774   : > { %vm4473_vm14 = vweird.f32 %v9907_v45  ;;  %v4490_v40 = vand.u32 2147483647, %v9473_v35  ;;  %6905 = vrcp.f32 %v9897_v50 }
 0x775   : > { %v6517_v19 = vpack.i.bf16 %v9902_v39, %v9900_v48 }
 0x777   : > { %v6474_v55 = vpop.permute.xlu0 %6473 }
 0x778   : > { %v6476_v43 = vunpack.i.h.bf16 %v6474_v55  ;;  %v6475_v9 = vunpack.i.l.bf16 %v6474_v55 }
 0x77a   : > { %v4843_v7 = vsel %vm1586_vm0, %v2367_v13, %v6475_v9  ;;  %v11578_v9 = vld [vmem:[#allocation80_spill] sm:$0xff]  ;;  %v4483_v13 = vsub.f32 1.0, %v9918_v42 }
 0x77d   : > { %2720 = vadd.xlane.f32.xlu0 %v11552_v34  ;;  %v2165_v34 = vsel %vm9884_vm7, %v9789_v15, %v2161_v59  ;;  %v3741_v15 = vsub.f32 1.0, %v3740_v22  ;;  %v2978_v59 = vand.u32 2147483647, %v9461_v4  ;;  %v3762_v22 = vand.u32 2147483647, %v9564_v10  ;;  %vm9970_vm7 = vmor %vm3744_vm4, %vm3745_vm2 }
 0x77e   : > { %v2170_v12 = vsel %vm2167_vm9, %v2169_v37, %v2165_v34  ;;  %v3748_v37 = vand.u32 2147483647, %v9519_v5  ;;  %v2966_v4 = vand.u32 2147483648, %v9436_v52  ;;  %vm4486_vm2 = vweird.f32 %v9473_v35 }
 0x77f   : > { %v3742_v11 = vmul.f32 %v9839_v14, %v3741_v15  ;;  %v2368_v8 = vmul.f32 %v2170_v12, %v9808_v63  ;;  %v3764_v63 = vand.u32 2147483648, %v9564_v10  ;;  %v11573_v15 = vld [vmem:[#allocation125_spill] sm:$0xff]  ;;  %vm3763_vm9 = vcmp.eq.f32.partialorder %v3762_v22, 8.507059e+37  ;;  %vm4488_vm4 = vmor %vm4486_vm2, %vm4487_vm13 }
 0x780   : > { %vm2979_vm10 = vcmp.eq.f32.partialorder %v2978_v59, 8.507059e+37  ;;  %vm3749_vm11 = vcmp.eq.f32.partialorder %v3748_v37, 8.507059e+37  ;;  %v11581_v59 = vld [vmem:[#allocation75_spill] sm:$0xff]  ;;  %v11583_v37 = vld [vmem:[#allocation104_spill] sm:$0xff] }
 0x781   : > { %v3743_v61 = vadd.f32 %v9839_v14, %v3742_v11  ;;  %v3765_v17 = vor.u32 1.1754944e-38, %v3764_v63  ;;  %v2963_v11 = vsel %vm9976_vm8, %v9787_v38, %v9905_v46 }
 0x785   : > { %3479 = vadd.xlane.f32.xlu0 %v11561_v49  ;;  %v3757_v49 = vadd.f32 %v9822_v33, %v3756_v23  ;;  %v2977_v23 = vsel %vm9955_vm5, %v9804_v0, %v2973_v2  ;;  %v4469_v0 = vsub.f32 1.0, %v4468_v31  ;;  %v2967_v2 = vor.u32 1.1754944e-38, %v2966_v4 }
 0x787   : > { %3476 = vadd.xlane.f32.xlu2 %v11562_v18  ;;  %v4844_v18 = vsel %vm1586_vm0, %v2368_v8, %v6476_v43  ;;  %v3761_v10 = vsel %vm9943_vm3, %v9822_v33, %v3757_v49  ;;  %v3747_v43 = vsel %vm9970_vm7, %v9839_v14, %v3743_v61  ;;  %v11579_v14 = vld [vmem:[#allocation131_spill] sm:$0xff]  ;;  %v11580_v49 = vld [vmem:[#allocation133_spill] sm:$0xff]  ;;  %v4470_v42 = vmul.f32 %v9907_v45, %v4469_v0 }
 0x788   : > { %v4861_v44 = vsel %vm4859_vm15, %v4844_v18, %v6481_v58  ;;  %v3752_v22 = vsel %vm3749_vm11, %v3751_v27, %v3747_v43  ;;  %v2872_v18 = vadd.f32 %v11580_v49, %v11579_v14  ;;  %v11582_v58 = vld [vmem:[#allocation128_spill] sm:$0xff]  ;;  %v4478_v61 = vand.u32 2147483648, %v9469_v21  ;;  %v11586_v27 = vld [vmem:[#allocation150_spill] sm:$0xff] }
 0x789   : > { %vm4472_vm3 = vweird.f32 %v9469_v21  ;;  %vm4491_vm7 = vcmp.eq.f32.partialorder %v4490_v40, 8.507059e+37  ;;  %v11589_v14 = vld [vmem:[#allocation94_spill] sm:$0xff] }
 0x78a   : > { %vm4474_vm5 = vmor %vm4472_vm3, %vm4473_vm14  ;;  %v4479_v29 = vor.u32 1.1754944e-38, %v4478_v61 }
 0x78d   : > { %4235 = vadd.xlane.f32.xlu0 %v4234_v32  ;;  %v2964_v32 = vand.u32 2147483647, %v9436_v52  ;;  %v3766_v52 = vsel %vm3763_vm9, %v3765_v17, %v3761_v10  ;;  %vm2190_vm9 = vweird.f32 %v9897_v50 }
 0x78e   : > { %v9999_v38 = vmul.f32 %v3766_v52, %v9880_v25 }
 0x78f   : > { %4232 = vadd.xlane.f32.xlu2 %v9323_v1  ;;  %v6480_v1 = vunpack.i.l.bf16 %v6479_v54  ;;  %v2981_v54 = vor.u32 1.1754944e-38, %v2980_v28  ;;  %vm2965_vm12 = vcmp.eq.f32.partialorder %v2964_v32, 8.507059e+37  ;;  %v4484_v28 = vmul.f32 %v9894_v56, %v4483_v13 }
 0x790   : > { %v2968_v46 = vsel %vm2965_vm12, %v2967_v2, %v2963_v11  ;;  %v2194_v11 = vand.u32 2147483647, %v9897_v50  ;;  %v11587_v2 = vld [vmem:[#allocation153_spill] sm:$0xff] }
 0x791   : > { %v4860_v34 = vsel %vm4859_vm15, %v4843_v7, %v6480_v1  ;;  %v2982_v8 = vsel %vm2979_vm10, %v2981_v54, %v2977_v23  ;;  %v9996_v7 = vmul.f32 %v3752_v22, %v9231_v57  ;;  %v3127_v1 = vmul.f32 %v2968_v46, %v11582_v58  ;;  %v11585_v23 = vld [vmem:[#allocation124_spill] sm:$0xff]  ;;  %v11588_v22 = vld [vmem:[#allocation93_spill] sm:$0xff] }
 0x792   : > { %v3128_v31 = vmul.f32 %v2982_v8, %v2872_v18  ;;  %v4471_v57 = vadd.f32 %v9907_v45, %v4470_v42  ;;  %v4485_v25 = vadd.f32 %v9894_v56, %v4484_v28  ;;  %vm2195_vm11 = vcmp.eq.f32.partialorder %v2194_v11, 8.507059e+37  ;;  %v11590_v28 = vld [vmem:[#allocation67_spill] sm:$0xff]  ;;  %v11591_v42 = vld [vmem:[#allocation164_spill] sm:$0xff] }
 0x793   : > { %v6522_v63 = vpack.i.bf16 %v9999_v38, %v9996_v7  ;;  %v2111_v49 = vadd.f32 %v11589_v14, %v11588_v22 }
 0x794   : > { %v4475_v6 = vsel %vm4474_vm5, %v9907_v45, %v4471_v57  ;;  %v11593_v57 = vld [vmem:[#allocation72_spill] sm:$0xff] }
 0x796   : > { %v6484_v30 = vpop.permute.xlu1 %6483 }
 0x797   : > { %v6486_v26 = vunpack.i.h.bf16 %v6484_v30  ;;  %v6485_v60 = vunpack.i.l.bf16 %v6484_v30  ;;  %1875 = vadd.xlane.f32.xlu2 %v11578_v9  ;;  %v6502_v30 = vpack.i.bf16 %v3128_v31, %v3127_v1  ;;  %v2196_v9 = vand.u32 2147483648, %v9897_v50  ;;  %v11592_v1 = vld [vmem:[#allocation71_spill] sm:$0xff] }
 0x799   : > { %v4877_v55 = vsel %vm4876_vm1, %v4860_v34, %v6485_v60  ;;  %v4878_v36 = vsel %vm4876_vm1, %v4861_v44, %v6486_v26  ;;  %2723 = vadd.xlane.f32.xlu1 %v11573_v15  ;;  %v4492_v26 = vand.u32 2147483648, %v9473_v35  ;;  %v4476_v60 = vand.u32 2147483647, %v9469_v21 }
 0x79a   : > { %v4893_v33 = vpack.c.bf16 %v4878_v36, %v4877_v55  ;;  %v4384_v34 = vadd.f32 %v9597_v41, %v9590_v24  ;;  %v4489_v44 = vsel %vm4488_vm4, %v9894_v56, %v4485_v25  ;;  %v11584_v55 = vld [vmem:[#allocation110_spill] sm:$0xff]  ;;  %v6906_v56 = vpop.eup %6905  ;;  %v2197_v13 = vor.u32 1.1754944e-38, %v2196_v9 }
 0x79b   : > { %v4493_v10 = vor.u32 1.1754944e-38, %v4492_v26  ;;  %v4382_v36 = vadd.f32 %v11584_v55, %v11583_v37  ;;  %vm4477_vm6 = vcmp.eq.f32.partialorder %v4476_v60, 8.507059e+37  ;;  %v2186_v12 = vmul.f32 %v6906_v56, %v9897_v50  ;;  %v11594_v26 = vld [vmem:[#allocation122_spill] sm:$0xff]  ;;  %v11595_v60 = vld [vmem:[#allocation123_spill] sm:$0xff] }
 0x79c   : > { %4977 = vmatmul.bf16.vlgmr.msra.gmra.mxu0 %v4893_v33  ;;  %v4480_v21 = vsel %vm4477_vm6, %v4479_v29, %v4475_v6  ;;  %vm2191_vm8 = vweird.f32 %v6906_v56  ;;  %v4240_v50 = vadd.f32 %v11591_v42, %v11590_v28  ;;  %v1877_v25 = vadd.f32 %v11593_v57, %v11592_v1 }
 0x79d   : > { %v4494_v15 = vsel %vm4491_vm7, %v4493_v10, %v4489_v44  ;;  %v4639_v4 = vmul.f32 %v4480_v21, %v4382_v36  ;;  %v2187_v5 = vsub.f32 1.0, %v2186_v12  ;;  %vm2192_vm10 = vmor %vm2190_vm9, %vm2191_vm8  ;;  %v2728_v40 = vadd.f32 %v11595_v60, %v11594_v26  ;;  %v11601_v26 = vld [vmem:[#allocation138_spill] sm:$0xff] }
 0x79e   : > { %v4640_v35 = vmul.f32 %v4494_v15, %v4384_v34 }
 0x79f   : > { %v2188_v20 = vmul.f32 %v6906_v56, %v2187_v5 }
 0x7a0   : > { %v6512_v17 = vpack.i.bf16 %v4640_v35, %v4639_v4  ;;  %v11596_v35 = vld [vmem:[#allocation165_spill] sm:$0xff]  ;;  %v11597_v4 = vld [vmem:[#allocation166_spill] sm:$0xff] }
 0x7a1   : > { %1872 = vadd.xlane.f32.xlu1 %v11581_v59  ;;  %6503 = vrot.lane.b32.xlu0 %v6502_v30, %s7301_s28  ;;  %v2189_v43 = vadd.f32 %v6906_v56, %v2188_v20  ;;  %v11599_v20 = vld [vmem:[#allocation74_spill] sm:$0xff] }
 0x7a2   : > { %v10029_v24 = vpop.xlane.xlu0 %2714 }
 0x7a3   : > { %v2193_v52 = vsel %vm2192_vm10, %v6906_v56, %v2189_v43  ;;  %vm3016_vm4 = vweird.f32 %v10029_v24  ;;  %v3020_v28 = vand.u32 2147483647, %v10029_v24 }
 0x7a4   : > { %v2198_v8 = vsel %vm2195_vm11, %v2197_v13, %v2193_v52 }
 0x7a5   : > { %v2370_v31 = vmul.f32 %v2198_v8, %v2111_v49  ;;  %vm3021_vm6 = vcmp.eq.f32.partialorder %v3020_v28, 8.507059e+37 }
 0x7a9   : > { %v10032_v41 = vpop.xlane.xlu2 %2717 }
 0x7aa   : > { %v10034_v45 = vpop.xlane.xlu0 %3473  ;;  %vm3030_vm8 = vweird.f32 %v10032_v41 }
 0x7af   : > { %6513 = vrot.lane.b32.xlu2 %v6512_v17, %s7299_s16 }
 0x7b1   : > { %v10037_v33 = vpop.xlane.xlu2 %4226 }
 0x7b2   : > { %v10042_v51 = vpop.xlane.xlu0 %4229 }
 0x7ba   : > { %6508 = vrot.lane.b32.xlu1 %v6507_v47, %s7300_s4  ;;  %v10044_v47 = vpop.xlane.xlu2 %1869 }
 0x7c1   : > { %v10039_v32 = vpop.xlane.xlu1 %3470 }
 0x7c2   : > { %v6499_v59 = vpop.permute.xlu2 %6498 }
 0x7c3   : > { %v6501_v6 = vunpack.i.h.bf16 %v6499_v59  ;;  %v6500_v34 = vunpack.i.l.bf16 %v6499_v59 }
 0x7c5   : > { %v6489_v0 = vpop.permute.xlu0 %6488 }
 0x7c6   : > { %v6491_v18 = vunpack.i.h.bf16 %v6489_v0  ;;  %v6490_v46 = vunpack.i.l.bf16 %v6489_v0 }
 0x7c8   : > { %v4845_v44 = vsel %vm1586_vm0, %v9773_v16, %v6490_v46  ;;  %v4846_v29 = vsel %vm1586_vm0, %v2370_v31, %v6491_v18  ;;  %v4237_v16 = vadd.f32 %v11597_v4, %v11596_v35  ;;  %v3022_v46 = vand.u32 2147483648, %v10029_v24 }
 0x7c9   : > { %v10049_v54 = vpop.xlane.xlu1 %1866  ;;  %v3792_v35 = vand.u32 2147483648, %v10034_v45 }
 0x7ca   : > { %6907 = vrcp.f32 %v10049_v54  ;;  %vm2204_vm13 = vweird.f32 %v10049_v54  ;;  %v2208_v8 = vand.u32 2147483647, %v10049_v54  ;;  %v3023_v59 = vor.u32 1.1754944e-38, %v3022_v46 }
 0x7cb   : > { %2726 = vadd.xlane.f32.xlu0 %v11585_v23  ;;  %6909 = vrcp.f32 %v10029_v24  ;;  %v11598_v23 = vld [vmem:[#allocation73_spill] sm:$0xff] }
 0x7cc   : > { %6911 = vrcp.f32 %v10032_v41  ;;  %v1880_v43 = vadd.f32 %v11599_v20, %v11598_v23  ;;  %vm2209_vm3 = vcmp.eq.f32.partialorder %v2208_v8, 8.507059e+37  ;;  %v4532_v23 = vand.u32 2147483647, %v10037_v33 }
 0x7cd   : > { %6913 = vrcp.f32 %v10034_v45  ;;  %v4534_v20 = vand.u32 2147483648, %v10037_v33 }
 0x7ce   : > { %6915 = vrcp.f32 %v10037_v33 }
 0x7cf   : > { %6917 = vrcp.f32 %v10042_v51  ;;  %v4535_v62 = vor.u32 1.1754944e-38, %v4534_v20 }
 0x7d0   : > { %v6908_v15 = vpop.eup %6907  ;;  %6919 = vrcp.f32 %v10039_v32 }
 0x7d1   : > { %v2200_v17 = vmul.f32 %v6908_v15, %v10049_v54  ;;  %v6910_v56 = vpop.eup %6909  ;;  %vm2205_vm12 = vweird.f32 %v6908_v15  ;;  %6921 = vrcp.f32 %v10044_v47 }
 0x7d2   : > { %v3012_v5 = vmul.f32 %v6910_v56, %v10029_v24  ;;  %v10077_v11 = vpop.eup %6911  ;;  %vm2206_vm14 = vmor %vm2204_vm13, %vm2205_vm12  ;;  %vm3017_vm2 = vweird.f32 %v6910_v56  ;;  %vm3786_vm12 = vweird.f32 %v10034_v45  ;;  %vm4528_vm13 = vweird.f32 %v10037_v33 }
 0x7d3   : > { %3485 = vadd.xlane.f32.xlu0 %v11586_v27  ;;  %v2201_v12 = vsub.f32 1.0, %v2200_v17  ;;  %v3026_v52 = vmul.f32 %v10077_v11, %v10032_v41  ;;  %v10091_v22 = vpop.eup %6913  ;;  %vm3018_vm5 = vmor %vm3016_vm4, %vm3017_vm2  ;;  %vm3031_vm7 = vweird.f32 %v10077_v11  ;;  %v3790_v17 = vand.u32 2147483647, %v10034_v45 }
 0x7d4   : > { %v3013_v27 = vsub.f32 1.0, %v3012_v5  ;;  %vm3032_vm9 = vmor %vm3030_vm8, %vm3031_vm7  ;;  %vm3787_vm11 = vweird.f32 %v10091_v22  ;;  %vm4533_vm8 = vcmp.eq.f32.partialorder %v4532_v23, 8.507059e+37  ;;  %v11615_v5 = vld [vmem:[#allocation155_spill] sm:$0xff] }
 0x7d5   : > { %v2202_v9 = vmul.f32 %v6908_v15, %v2201_v12  ;;  %v3027_v48 = vsub.f32 1.0, %v3026_v52  ;;  %vm10141_vm2 = vmor %vm3786_vm12, %vm3787_vm11  ;;  %v3793_v52 = vor.u32 1.1754944e-38, %v3792_v35  ;;  %vm3772_vm11 = vweird.f32 %v10039_v32 }
 0x7d6   : > { %v3014_v0 = vmul.f32 %v6910_v56, %v3013_v27 }
 0x7d7   : > { %v2203_v13 = vadd.f32 %v6908_v15, %v2202_v9  ;;  %v4548_v9 = vand.u32 2147483648, %v10042_v51 }
 0x7d8   : > { %3482 = vadd.xlane.f32.xlu2 %v11587_v2  ;;  %v2210_v2 = vand.u32 2147483648, %v10049_v54  ;;  %v3015_v14 = vadd.f32 %v6910_v56, %v3014_v0  ;;  %v3782_v54 = vmul.f32 %v10091_v22, %v10034_v45  ;;  %v4546_v0 = vand.u32 2147483647, %v10042_v51 }
 0x7d9   : > { %v2207_v39 = vsel %vm2206_vm14, %v6908_v15, %v2203_v13  ;;  %v11603_v15 = vld [vmem:[#allocation140_spill] sm:$0xff]  ;;  %v11617_v13 = vld [vmem:[#allocation99_spill] sm:$0xff] }
 0x7da   : > { %v2211_v49 = vor.u32 1.1754944e-38, %v2210_v2  ;;  %v3019_v38 = vsel %vm3018_vm5, %v6910_v56, %v3015_v14  ;;  %v3783_v31 = vsub.f32 1.0, %v3782_v54  ;;  %vm4542_vm5 = vweird.f32 %v10042_v51 }
 0x7db   : > { %4241 = vadd.xlane.f32.xlu0 %v4240_v50  ;;  %v3028_v50 = vmul.f32 %v10077_v11, %v3027_v48 }
 0x7dc   : > { %v2212_v42 = vsel %vm2209_vm3, %v2211_v49, %v2207_v39 }
 0x7dd   : > { %v3029_v57 = vadd.f32 %v10077_v11, %v3028_v50 }
 0x7e0   : > { %1878 = vadd.xlane.f32.xlu2 %v1877_v25  ;;  %v3024_v25 = vsel %vm3021_vm6, %v3023_v59, %v3019_v38  ;;  %vm3791_vm6 = vcmp.eq.f32.partialorder %v3790_v17, 8.507059e+37 }
 0x7e1   : > { %v6494_v58 = vpop.permute.xlu1 %6493  ;;  %v10118_v60 = vmul.f32 %v3024_v25, %v11601_v26  ;;  %v3778_v25 = vand.u32 2147483648, %v10039_v32  ;;  %v11610_v26 = vld [vmem:[#allocation134_spill] sm:$0xff] }
 0x7e2   : > { %v6496_v30 = vunpack.i.h.bf16 %v6494_v58  ;;  %v6495_v61 = vunpack.i.l.bf16 %v6494_v58  ;;  %v11600_v58 = vld [vmem:[#allocation96_spill] sm:$0xff] }
 0x7e3   : > { %v10112_v1 = vmul.f32 %v2212_v42, %v11600_v58 }
 0x7e4   : > { %v4863_v10 = vsel %vm4859_vm15, %v4846_v29, %v6496_v30  ;;  %v4862_v37 = vsel %vm4859_vm15, %v4845_v44, %v6495_v61  ;;  %2729 = vadd.xlane.f32.xlu1 %v2728_v40  ;;  %v3036_v30 = vand.u32 2147483648, %v10032_v41  ;;  %v4342_v40 = vpop.f32.mrf.mxu2  ;;  %v3784_v44 = vmul.f32 %v10091_v22, %v3783_v31 }
 0x7e5   : > { %v4879_v55 = vsel %vm4876_vm1, %v4862_v37, %v6500_v34  ;;  %v4880_v36 = vsel %vm4876_vm1, %v4863_v10, %v6501_v6  ;;  %v4391_v6 = vpop.f32.mrf.mxu3  ;;  %v3034_v34 = vand.u32 2147483647, %v10032_v41  ;;  %v3033_v29 = vsel %vm3032_vm9, %v10077_v11, %v3029_v57 }
 0x7e6   : > { %v4894_v21 = vpack.c.bf16 %v4880_v36, %v4879_v55  ;;  %v3037_v37 = vor.u32 1.1754944e-38, %v3036_v30  ;;  %v3785_v36 = vadd.f32 %v10091_v22, %v3784_v44  ;;  %v4392_v48 = vadd.f32 %v4391_v6, %v4342_v40 }
 0x7e7   : > { %vm3035_vm10 = vcmp.eq.f32.partialorder %v3034_v34, 8.507059e+37  ;;  %vm4547_vm9 = vcmp.eq.f32.partialorder %v4546_v0, 8.507059e+37  ;;  %v3776_v30 = vand.u32 2147483647, %v10039_v32  ;;  %v3779_v44 = vor.u32 1.1754944e-38, %v3778_v25 }
 0x7e8   : > { %4982 = vmatmul.bf16.gmra.mxu0 %v4894_v21  ;;  %v11602_v21 = vld [vmem:[#allocation139_spill] sm:$0xff]  ;;  %v3038_v4 = vsel %vm3035_vm10, %v3037_v37, %v3033_v29  ;;  %v3789_v45 = vsel %vm10141_vm2, %v10091_v22, %v3785_v36  ;;  %v11611_v36 = vld [vmem:[#allocation160_spill] sm:$0xff]  ;;  %vm2218_vm2 = vweird.f32 %v10044_v47 }
 0x7e9   : > { %v2882_v41 = vadd.f32 %v11603_v15, %v11602_v21  ;;  %v11612_v15 = vld [vmem:[#allocation129_spill] sm:$0xff] }
 0x7eb   : > { %v10160_v27 = vmul.f32 %v3038_v4, %v2882_v41  ;;  %v11613_v41 = vld [vmem:[#allocation130_spill] sm:$0xff]  ;;  %v2222_v4 = vand.u32 2147483647, %v10044_v47 }
 0x7ec   : > { %4238 = vadd.xlane.f32.xlu1 %v4237_v16  ;;  %v4344_v8 = vpop.f32.mrf.mxu2  ;;  %v2734_v35 = vadd.f32 %v11613_v41, %v11612_v15 }
 0x7ed   : > { %v4393_v22 = vpop.f32.mrf.mxu3  ;;  %v6532_v39 = vpack.i.bf16 %v10160_v27, %v10118_v60 }
 0x7ee   : > { %v4394_v14 = vadd.f32 %v4393_v22, %v4344_v8  ;;  %v11618_v22 = vld [vmem:[#allocation118_spill] sm:$0xff] }
 0x7ef   : > { %6518 = vrot.lane.b32.xlu0 %v6517_v19, %s7301_s28  ;;  %v10093_v19 = vpop.eup %6915 }
 0x7f0   : > { %v10099_v18 = vpop.eup %6917  ;;  %v4524_v7 = vmul.f32 %v10093_v19, %v10037_v33  ;;  %vm4529_vm14 = vweird.f32 %v10093_v19  ;;  %v10139_v12 = vpop.xlane.xlu0 %2720  ;;  %v3794_v33 = vsel %vm3791_vm6, %v3793_v52, %v3789_v45  ;;  %v11616_v52 = vld [vmem:[#allocation98_spill] sm:$0xff] }
 0x7f1   : > { %v10133_v16 = vpop.eup %6919  ;;  %vm4543_vm3 = vweird.f32 %v10099_v18  ;;  %vm10164_vm4 = vmor %vm4528_vm13, %vm4529_vm14  ;;  %vm3777_vm13 = vcmp.eq.f32.partialorder %v3776_v30, 8.507059e+37  ;;  %v2116_v0 = vadd.f32 %v11617_v13, %v11616_v52 }
 0x7f2   : > { %v4525_v24 = vsub.f32 1.0, %v4524_v7  ;;  %v3768_v2 = vmul.f32 %v10133_v16, %v10039_v32  ;;  %vm4544_vm7 = vmor %vm4542_vm5, %vm4543_vm3  ;;  %v6922_v54 = vpop.eup %6921  ;;  %vm3773_vm10 = vweird.f32 %v10133_v16  ;;  %v2224_v32 = vand.u32 2147483648, %v10044_v47 }
 0x7f3   : > { %v2214_v38 = vmul.f32 %v6922_v54, %v10044_v47  ;;  %vm3774_vm12 = vmor %vm3772_vm11, %vm3773_vm10  ;;  %vm2219_vm14 = vweird.f32 %v6922_v54  ;;  %vm3044_vm5 = vweird.f32 %v10139_v12 }
 0x7f4   : > { %1881 = vadd.xlane.f32.xlu1 %v1880_v43  ;;  %v4526_v10 = vmul.f32 %v10093_v19, %v4525_v24  ;;  %v3769_v49 = vsub.f32 1.0, %v3768_v2  ;;  %vm2220_vm3 = vmor %vm2218_vm2, %vm2219_vm14 }
 0x7f5   : > { %v2215_v58 = vsub.f32 1.0, %v2214_v38 }
 0x7f6   : > { %v4527_v56 = vadd.f32 %v10093_v19, %v4526_v10 }
 0x7f7   : > { %v2216_v6 = vmul.f32 %v6922_v54, %v2215_v58 }
 0x7f8   : > { %6523 = vrot.lane.b32.xlu2 %v6522_v63, %s7300_s4  ;;  %v4538_v63 = vmul.f32 %v10099_v18, %v10042_v51  ;;  %v4531_v53 = vsel %vm10164_vm4, %v10093_v19, %v4527_v56  ;;  %v4549_v51 = vor.u32 1.1754944e-38, %v4548_v9  ;;  %v11608_v19 = vld [vmem:[#allocation161_spill] sm:$0xff]  ;;  %v11614_v56 = vld [vmem:[#allocation154_spill] sm:$0xff]  ;;  %vm2223_vm4 = vcmp.eq.f32.partialorder %v2222_v4, 8.507059e+37 }
 0x7f9   : > { %v4536_v46 = vsel %vm4533_vm8, %v4535_v62, %v4531_v53  ;;  %v10181_v42 = vmul.f32 %v3794_v33, %v11608_v19  ;;  %v3490_v23 = vadd.f32 %v11615_v5, %v11614_v56  ;;  %v11619_v53 = vld [vmem:[#allocation117_spill] sm:$0xff] }
 0x7fa   : > { %v4539_v61 = vsub.f32 1.0, %v4538_v63  ;;  %v10154_v11 = vpop.xlane.xlu2 %3476  ;;  %v10183_v50 = vmul.f32 %v4536_v46, %v4392_v48  ;;  %v3770_v63 = vmul.f32 %v10133_v16, %v3769_v49  ;;  %v4243_v62 = vadd.f32 %v11619_v53, %v11618_v22  ;;  %v11620_v48 = vld [vmem:[#allocation119_spill] sm:$0xff] }
 0x7fb   : > { %vm3800_vm10 = vweird.f32 %v10154_v11 }
 0x7fc   : > { %v4540_v55 = vmul.f32 %v10099_v18, %v4539_v61  ;;  %v3771_v57 = vadd.f32 %v10133_v16, %v3770_v63  ;;  %v11609_v61 = vld [vmem:[#allocation132_spill] sm:$0xff] }
 0x7fd   : > { %v2731_v40 = vadd.f32 %v11610_v26, %v11609_v61 }
 0x7fe   : > { %v4541_v43 = vadd.f32 %v10099_v18, %v4540_v55  ;;  %v3775_v34 = vsel %vm3774_vm12, %v10133_v16, %v3771_v57  ;;  %v2217_v55 = vadd.f32 %v6922_v54, %v2216_v6 }
 0x7ff   : > { %v3780_v37 = vsel %vm3777_vm13, %v3779_v44, %v3775_v34 }
 0x800   : > { %v10210_v21 = vmul.f32 %v3780_v37, %v11611_v36  ;;  %v2221_v20 = vsel %vm2220_vm3, %v6922_v54, %v2217_v55  ;;  %v11624_v36 = vld [vmem:[#allocation159_spill] sm:$0xff] }
 0x802   : > { %v10191_v59 = vpop.xlane.xlu2 %4232  ;;  %v6537_v17 = vpack.i.bf16 %v10181_v42, %v10210_v21 }
 0x80a   : > { %v10207_v10 = vpop.xlane.xlu2 %1875 }
 0x80c   : > { %v10197_v24 = vpop.xlane.xlu1 %2723 }
 0x80d   : > { %6528 = vrot.lane.b32.xlu1 %v6527_v3, %s7299_s16  ;;  %v4545_v3 = vsel %vm4544_vm7, %v10099_v18, %v4541_v43  ;;  %v10187_v18 = vpop.xlane.xlu0 %3479  ;;  %v2225_v43 = vor.u32 1.1754944e-38, %v2224_v32  ;;  %vm3058_vm3 = vweird.f32 %v10197_v24 }
 0x80e   : > { %v4550_v28 = vsel %vm4547_vm9, %v4549_v51, %v4545_v3  ;;  %6923 = vrcp.f32 %v10187_v18  ;;  %v11621_v51 = vld [vmem:[#allocation167_spill] sm:$0xff]  ;;  %vm3814_vm8 = vweird.f32 %v10187_v18 }
 0x80f   : > { %v10185_v7 = vmul.f32 %v4550_v28, %v4394_v14  ;;  %v2226_v9 = vsel %vm2223_vm4, %v2225_v43, %v2221_v20  ;;  %6925 = vrcp.f32 %v10154_v11  ;;  %v4246_v14 = vadd.f32 %v11621_v51, %v11620_v48  ;;  %v11625_v43 = vld [vmem:[#allocation76_spill] sm:$0xff] }
 0x810   : > { %v2372_v3 = vmul.f32 %v2226_v9, %v2116_v0  ;;  %6927 = vrcp.f32 %v10197_v24  ;;  %v3818_v0 = vand.u32 2147483647, %v10187_v18  ;;  %v3050_v48 = vand.u32 2147483648, %v10139_v12 }
 0x811   : > { %v6542_v31 = vpack.i.bf16 %v10185_v7, %v10183_v50  ;;  %6929 = vrcp.f32 %v10139_v12 }
 0x812   : > { %v6514_v8 = vpop.permute.xlu2 %6513  ;;  %vm10297_vm12 = vcmp.eq.f32.partialorder %v3818_v0, 8.507059e+37 }
 0x813   : > { %v6516_v54 = vunpack.i.h.bf16 %v6514_v8  ;;  %v6515_v28 = vunpack.i.l.bf16 %v6514_v8 }
 0x814   : > { %v10217_v16 = vpop.xlane.xlu1 %1872  ;;  %v10239_v30 = vpop.eup %6923 }
 0x815   : > { %v10205_v29 = vpop.xlane.xlu0 %4235  ;;  %v10242_v26 = vpop.eup %6925  ;;  %6931 = vrcp.f32 %v10217_v16  ;;  %v3810_v34 = vmul.f32 %v10239_v30, %v10187_v18  ;;  %vm3815_vm6 = vweird.f32 %v10239_v30 }
 0x816   : > { %v3796_v44 = vmul.f32 %v10242_v26, %v10154_v11  ;;  %v10251_v37 = vpop.eup %6927  ;;  %6933 = vrcp.f32 %v10191_v59  ;;  %vm3801_vm7 = vweird.f32 %v10242_v26  ;;  %vm10284_vm9 = vmor %vm3814_vm8, %vm3815_vm6 }
 0x817   : > { %v10253_v55 = vpop.eup %6929  ;;  %v3811_v15 = vsub.f32 1.0, %v3810_v34  ;;  %6935 = vrcp.f32 %v10205_v29  ;;  %vm10303_vm13 = vmor %vm3800_vm10, %vm3801_vm7  ;;  %vm3059_vm2 = vweird.f32 %v10251_v37  ;;  %vm2232_vm7 = vweird.f32 %v10217_v16 }
 0x818   : > { %v3797_v41 = vsub.f32 1.0, %v3796_v44  ;;  %v3040_v4 = vmul.f32 %v10253_v55, %v10139_v12  ;;  %vm3045_vm11 = vweird.f32 %v10253_v55  ;;  %vm10331_vm6 = vmor %vm3058_vm3, %vm3059_vm2  ;;  %v2236_v34 = vand.u32 2147483647, %v10217_v16  ;;  %v11639_v44 = vld [vmem:[#allocation162_spill] sm:$0xff] }
 0x819   : > { %2732 = vadd.xlane.f32.xlu0 %v2731_v40  ;;  %v11623_v40 = vld [vmem:[#allocation79_spill] sm:$0xff]  ;;  %v3812_v5 = vmul.f32 %v10239_v30, %v3811_v15  ;;  %vm10345_vm8 = vmor %vm3044_vm5, %vm3045_vm11  ;;  %vm4570_vm3 = vweird.f32 %v10205_v29 }
 0x81a   : > { %v3041_v52 = vsub.f32 1.0, %v3040_v4  ;;  %v11640_v15 = vld [vmem:[#allocation163_spill] sm:$0xff]  ;;  %vm2237_vm11 = vcmp.eq.f32.partialorder %v2236_v34, 8.507059e+37 }
 0x81b   : > { %v10256_v32 = vpop.eup %6931  ;;  %v3813_v8 = vadd.f32 %v10239_v30, %v3812_v5  ;;  %v11643_v5 = vld [vmem:[#allocation142_spill] sm:$0xff] }
 0x81c   : > { %v2228_v56 = vmul.f32 %v10256_v32, %v10217_v16  ;;  %vm2233_vm4 = vweird.f32 %v10256_v32 }
 0x81d   : > { %v6504_v45 = vpop.permute.xlu0 %6503  ;;  %v3817_v27 = vsel %vm10284_vm9, %v10239_v30, %v3813_v8  ;;  %vm10362_vm5 = vmor %vm2232_vm7, %vm2233_vm4 }
 0x81e   : > { %v6506_v47 = vunpack.i.h.bf16 %v6504_v45  ;;  %v6505_v2 = vunpack.i.l.bf16 %v6504_v45  ;;  %v11626_v45 = vld [vmem:[#allocation77_spill] sm:$0xff]  ;;  %v2229_v13 = vsub.f32 1.0, %v2228_v56 }
 0x81f   : > { %v1883_v9 = vadd.f32 %v11626_v45, %v11625_v43 }
 0x820   : > { %v4847_v19 = vsel %vm1586_vm0, %v10112_v1, %v6505_v2  ;;  %v4848_v38 = vsel %vm1586_vm0, %v2372_v3, %v6506_v47  ;;  %v11622_v1 = vld [vmem:[#allocation78_spill] sm:$0xff]  ;;  %v3820_v47 = vand.u32 2147483648, %v10187_v18  ;;  %v3804_v2 = vand.u32 2147483647, %v10154_v11  ;;  %v10294_v18 = vpop.eup %6933 }
 0x821   : > { %2735 = vadd.xlane.f32.xlu2 %v2734_v35  ;;  %3491 = vadd.xlane.f32.xlu0 %v3490_v23  ;;  %v1886_v6 = vadd.f32 %v11623_v40, %v11622_v1  ;;  %v3054_v35 = vmul.f32 %v10251_v37, %v10197_v24  ;;  %v3798_v23 = vmul.f32 %v10242_v26, %v3797_v41  ;;  %v3806_v3 = vand.u32 2147483648, %v10154_v11  ;;  %v10329_v30 = vpop.eup %6935 }
 0x822   : > { %vm10307_vm14 = vcmp.eq.f32.partialorder %v3804_v2, 8.507059e+37  ;;  %v4576_v11 = vand.u32 2147483648, %v10205_v29 }
 0x823   : > { %v3055_v20 = vsub.f32 1.0, %v3054_v35  ;;  %v3799_v22 = vadd.f32 %v10242_v26, %v3798_v23  ;;  %v11644_v23 = vld [vmem:[#allocation143_spill] sm:$0xff] }
 0x825   : > { %v3056_v53 = vmul.f32 %v10251_v37, %v3055_v20  ;;  %v2887_v20 = vadd.f32 %v11644_v23, %v11643_v5 }
 0x829   : > { %4244 = vadd.xlane.f32.xlu2 %v4243_v62  ;;  %4247 = vadd.xlane.f32.xlu0 %v4246_v14  ;;  %v3042_v62 = vmul.f32 %v10253_v55, %v3041_v52  ;;  %v2230_v14 = vmul.f32 %v10256_v32, %v2229_v13 }
 0x82c   : > { %v6509_v33 = vpop.permute.xlu1 %6508 }
 0x82d   : > { %v6511_v49 = vunpack.i.h.bf16 %v6509_v33  ;;  %v6510_v46 = vunpack.i.l.bf16 %v6509_v33  ;;  %v3048_v33 = vand.u32 2147483647, %v10139_v12 }
 0x82f   : > { %v4864_v63 = vsel %vm4859_vm15, %v4847_v19, %v6510_v46  ;;  %v4865_v58 = vsel %vm4859_vm15, %v4848_v38, %v6511_v49  ;;  %v3821_v46 = vor.u32 1.1754944e-38, %v3820_v47  ;;  %v3043_v19 = vadd.f32 %v10253_v55, %v3042_v62  ;;  %v11646_v62 = vld [vmem:[#allocation100_spill] sm:$0xff] }
 0x830   : > { %v4881_v57 = vsel %vm4876_vm1, %v4864_v63, %v6515_v28  ;;  %v4882_v25 = vsel %vm4876_vm1, %v4865_v58, %v6516_v54  ;;  %v3057_v28 = vadd.f32 %v10251_v37, %v3056_v53  ;;  %v3807_v38 = vor.u32 1.1754944e-38, %v3806_v3 }
 0x831   : > { %v4895_v61 = vpack.c.bf16 %v4882_v25, %v4881_v57  ;;  %1887 = vadd.xlane.f32.xlu2 %v1886_v6  ;;  %v3064_v63 = vand.u32 2147483648, %v10197_v24  ;;  %v4552_v58 = vmul.f32 %v10294_v18, %v10191_v59  ;;  %v3062_v57 = vand.u32 2147483647, %v10197_v24 }
 0x832   : > { %v2231_v25 = vadd.f32 %v10256_v32, %v2230_v14  ;;  %v3822_v24 = vsel %vm10297_vm12, %v3821_v46, %v3817_v27  ;;  %v3061_v6 = vsel %vm10331_vm6, %v10251_v37, %v3057_v28  ;;  %v3047_v12 = vsel %vm10345_vm8, %v10253_v55, %v3043_v19 }
 0x833   : > { %4987 = vmatmul.bf16.gmra.mxu0 %v4895_v61  ;;  %v10357_v41 = vmul.f32 %v3822_v24, %v11640_v15  ;;  %v3065_v35 = vor.u32 1.1754944e-38, %v3064_v63  ;;  %v4566_v37 = vmul.f32 %v10329_v30, %v10205_v29  ;;  %vm3063_vm9 = vcmp.eq.f32.partialorder %v3062_v57, 8.507059e+37 }
 0x834   : > { %v3051_v55 = vor.u32 1.1754944e-38, %v3050_v48  ;;  %vm3049_vm10 = vcmp.eq.f32.partialorder %v3048_v33, 8.507059e+37  ;;  %v4553_v52 = vsub.f32 1.0, %v4552_v58  ;;  %v4347_v33 = vpop.f32.mrf.mxu2  ;;  %v4396_v48 = vpop.f32.mrf.mxu3  ;;  %v4574_v14 = vand.u32 2147483647, %v10205_v29 }
 0x835   : > { %v4567_v0 = vsub.f32 1.0, %v4566_v37  ;;  %vm4557_vm12 = vweird.f32 %v10294_v18  ;;  %v4562_v54 = vand.u32 2147483648, %v10191_v59  ;;  %v4560_v28 = vand.u32 2147483647, %v10191_v59 }
 0x836   : > { %v3052_v13 = vsel %vm3049_vm10, %v3051_v55, %v3047_v12  ;;  %v4554_v8 = vmul.f32 %v10294_v18, %v4553_v52  ;;  %v4397_v57 = vadd.f32 %v4396_v48, %v4347_v33  ;;  %vm10423_vm6 = vcmp.eq.f32.partialorder %v4574_v14, 8.507059e+37  ;;  %v11656_v52 = vld [vmem:[#allocation97_spill] sm:$0xff]  ;;  %v11660_v14 = vld [vmem:[#allocation88_spill] sm:$0xff] }
 0x837   : > { %3488 = vadd.xlane.f32.xlu1 %v11624_v36  ;;  %v4568_v50 = vmul.f32 %v10329_v30, %v4567_v0  ;;  %vm4561_vm7 = vcmp.eq.f32.partialorder %v4560_v28, 8.507059e+37 }
 0x838   : > { %v4555_v49 = vadd.f32 %v10294_v18, %v4554_v8 }
 0x83c   : > { %v4349_v21 = vpop.f32.mrf.mxu2 }
 0x83d   : > { %6533 = vrot.lane.b32.xlu0 %v6532_v39, %s7301_s28  ;;  %v3803_v39 = vsel %vm10303_vm13, %v10242_v26, %v3799_v22  ;;  %v2238_v26 = vand.u32 2147483648, %v10217_v16  ;;  %v2235_v16 = vsel %vm10362_vm5, %v10256_v32, %v2231_v25  ;;  %v11645_v22 = vld [vmem:[#allocation141_spill] sm:$0xff]  ;;  %vm4556_vm13 = vweird.f32 %v10191_v59 }
 0x83e   : > { %v10311_v60 = vpop.xlane.xlu0 %2726  ;;  %v3808_v1 = vsel %vm10307_vm14, %v3807_v38, %v3803_v39  ;;  %v3133_v53 = vmul.f32 %v3052_v13, %v11645_v22  ;;  %v4569_v39 = vadd.f32 %v10329_v30, %v4568_v50  ;;  %vm4571_vm14 = vweird.f32 %v10329_v30  ;;  %vm10406_vm2 = vmor %vm4556_vm13, %vm4557_vm12  ;;  %v11657_v22 = vld [vmem:[#allocation81_spill] sm:$0xff] }
 0x83f   : > { %1884 = vadd.xlane.f32.xlu1 %v1883_v9  ;;  %v10354_v36 = vmul.f32 %v3808_v1, %v11639_v44  ;;  %v2239_v43 = vor.u32 1.1754944e-38, %v2238_v26  ;;  %v3066_v9 = vsel %vm3063_vm9, %v3065_v35, %v3061_v6  ;;  %v4559_v58 = vsel %vm10406_vm2, %v10294_v18, %v4555_v49  ;;  %vm10419_vm4 = vmor %vm4570_vm3, %vm4571_vm14 }
 0x840   : > { %v3134_v2 = vmul.f32 %v3066_v9, %v2887_v20  ;;  %v4577_v26 = vor.u32 1.1754944e-38, %v4576_v11  ;;  %v4563_v1 = vor.u32 1.1754944e-38, %v4562_v54  ;;  %v4573_v42 = vsel %vm10419_vm4, %v10329_v30, %v4569_v39  ;;  %v11664_v30 = vld [vmem:[#allocation84_spill] sm:$0xff] }
 0x841   : > { %v6552_v56 = vpack.i.bf16 %v10357_v41, %v10354_v36  ;;  %v2240_v32 = vsel %vm2237_vm11, %v2239_v43, %v2235_v16  ;;  %vm2246_vm3 = vweird.f32 %v10207_v10  ;;  %v2250_v11 = vand.u32 2147483647, %v10207_v10 }
 0x842   : > { %v10388_v3 = vmul.f32 %v2240_v32, %v11646_v62  ;;  %v6547_v7 = vpack.i.bf16 %v3134_v2, %v3133_v53  ;;  %v4564_v24 = vsel %vm4561_vm7, %v4563_v1, %v4559_v58  ;;  %v4578_v12 = vsel %vm10423_vm6, %v4577_v26, %v4573_v42  ;;  %v11658_v53 = vld [vmem:[#allocation82_spill] sm:$0xff]  ;;  %v11661_v58 = vld [vmem:[#allocation101_spill] sm:$0xff] }
 0x843   : > { %v4645_v37 = vmul.f32 %v4564_v24, %v4397_v57  ;;  %v1889_v62 = vadd.f32 %v11658_v53, %v11657_v22  ;;  %vm2251_vm6 = vcmp.eq.f32.partialorder %v2250_v11, 8.507059e+37 }
 0x846   : > { %v10375_v45 = vpop.xlane.xlu0 %3485 }
 0x847   : > { %6937 = vrcp.f32 %v10375_v45  ;;  %vm3842_vm9 = vweird.f32 %v10375_v45  ;;  %v3848_v40 = vand.u32 2147483648, %v10375_v45  ;;  %v3846_v44 = vand.u32 2147483647, %v10375_v45 }
 0x849   : > { %6543 = vrot.lane.b32.xlu2 %v6542_v31, %s7299_s16  ;;  %v3849_v16 = vor.u32 1.1754944e-38, %v3848_v40  ;;  %vm3847_vm13 = vcmp.eq.f32.partialorder %v3846_v44, 8.507059e+37 }
 0x84b   : > { %v10382_v47 = vpop.xlane.xlu2 %3482 }
 0x84c   : > { %6939 = vrcp.f32 %v10382_v47  ;;  %v3834_v34 = vand.u32 2147483648, %v10382_v47  ;;  %vm3828_vm11 = vweird.f32 %v10382_v47  ;;  %v3832_v15 = vand.u32 2147483647, %v10382_v47 }
 0x84d   : > { %v10390_v51 = vpop.eup %6937  ;;  %6941 = vrcp.f32 %v10207_v10 }
 0x84e   : > { %v3838_v31 = vmul.f32 %v10390_v51, %v10375_v45  ;;  %vm3843_vm8 = vweird.f32 %v10390_v51  ;;  %vm3833_vm14 = vcmp.eq.f32.partialorder %v3832_v15, 8.507059e+37  ;;  %v11655_v45 = vld [vmem:[#allocation95_spill] sm:$0xff]  ;;  %v10466_v8 = vpop.xlane.xlu0 %4241 }
 0x84f   : > { %vm10440_vm10 = vmor %vm3842_vm9, %vm3843_vm8  ;;  %v4604_v53 = vand.u32 2147483648, %v10466_v8 }
 0x850   : > { %v3839_v27 = vsub.f32 1.0, %v3838_v31  ;;  %v11659_v31 = vld [vmem:[#allocation87_spill] sm:$0xff] }
 0x851   : > { %6548 = vrot.lane.b32.xlu2 %v6547_v7, %s7301_s28  ;;  %v2252_v7 = vand.u32 2147483648, %v10207_v10  ;;  %v1898_v49 = vadd.f32 %v11660_v14, %v11659_v31 }
 0x852   : > { %v6940_v46 = vpop.eup %6939  ;;  %v3840_v63 = vmul.f32 %v10390_v51, %v3839_v27 }
 0x853   : > { %v3824_v19 = vmul.f32 %v6940_v46, %v10382_v47  ;;  %vm3829_vm5 = vweird.f32 %v6940_v46  ;;  %v6942_v23 = vpop.eup %6941  ;;  %v10474_v50 = vpop.xlane.xlu2 %1878  ;;  %v2253_v39 = vor.u32 1.1754944e-38, %v2252_v7  ;;  %v4602_v7 = vand.u32 2147483647, %v10466_v8 }
 0x854   : > { %v3841_v18 = vadd.f32 %v10390_v51, %v3840_v63  ;;  %vm3830_vm12 = vmor %vm3828_vm11, %vm3829_vm5  ;;  %v2242_v13 = vmul.f32 %v6942_v23, %v10207_v10  ;;  %vm2247_vm2 = vweird.f32 %v6942_v23 }
 0x855   : > { %v3825_v59 = vsub.f32 1.0, %v3824_v19  ;;  %vm2248_vm4 = vmor %vm2246_vm3, %vm2247_vm2 }
 0x856   : > { %v3845_v36 = vsel %vm10440_vm10, %v10390_v51, %v3841_v18  ;;  %v2243_v2 = vsub.f32 1.0, %v2242_v13  ;;  %v4352_v18 = vpop.f32.mrf.mxu2  ;;  %vm4598_vm10 = vweird.f32 %v10466_v8 }
 0x857   : > { %v3826_v29 = vmul.f32 %v6940_v46, %v3825_v59  ;;  %v10449_v4 = vpop.xlane.xlu1 %2729  ;;  %v3850_v43 = vsel %vm3847_vm13, %v3849_v16, %v3845_v36  ;;  %v11662_v59 = vld [vmem:[#allocation102_spill] sm:$0xff]  ;;  %vm4603_vm13 = vcmp.eq.f32.partialorder %v4602_v7, 8.507059e+37 }
 0x858   : > { %6538 = vrot.lane.b32.xlu1 %v6537_v17, %s7300_s4  ;;  %v4398_v17 = vpop.f32.mrf.mxu3  ;;  %v10459_v32 = vmul.f32 %v3850_v43, %v11656_v52  ;;  %v2244_v33 = vmul.f32 %v6942_v23, %v2243_v2  ;;  %v2121_v57 = vadd.f32 %v11662_v59, %v11661_v58  ;;  %v3092_v59 = vand.u32 2147483648, %v10449_v4 }
 0x859   : > { %v3827_v6 = vadd.f32 %v6940_v46, %v3826_v29  ;;  %6553 = vrot.lane.b32.xlu2 %v6552_v56, %s7300_s4  ;;  %v4399_v35 = vadd.f32 %v4398_v17, %v4349_v21  ;;  %v3835_v56 = vor.u32 1.1754944e-38, %v3834_v34  ;;  %v11663_v34 = vld [vmem:[#allocation83_spill] sm:$0xff]  ;;  %vm3086_vm3 = vweird.f32 %v10449_v4 }
 0x85a   : > { %v2245_v51 = vadd.f32 %v6942_v23, %v2244_v33  ;;  %v1892_v44 = vadd.f32 %v11664_v30, %v11663_v34  ;;  %v2264_v34 = vand.u32 2147483647, %v10474_v50 }
 0x85b   : > { %v3831_v41 = vsel %vm3830_vm12, %v6940_v46, %v3827_v6  ;;  %v4646_v5 = vmul.f32 %v4578_v12, %v4399_v35  ;;  %v6524_v42 = vpop.permute.xlu2 %6523 }
 0x85c   : > { %v3836_v55 = vsel %vm3833_vm14, %v3835_v56, %v3831_v41  ;;  %v2249_v27 = vsel %vm2248_vm4, %v6942_v23, %v2245_v51  ;;  %v6526_v35 = vunpack.i.h.bf16 %v6524_v42 }
 0x85d   : > { %v6557_v20 = vpack.i.bf16 %v4646_v5, %v4645_v37  ;;  %v10456_v9 = vmul.f32 %v3836_v55, %v11655_v45  ;;  %v2254_v63 = vsel %vm2251_vm6, %v2253_v39, %v2249_v27  ;;  %v6525_v37 = vunpack.i.l.bf16 %v6524_v42 }
 0x85e   : > { %v2374_v29 = vmul.f32 %v2254_v63, %v2121_v57  ;;  %v4354_v11 = vpop.f32.mrf.mxu2  ;;  %v4605_v27 = vor.u32 1.1754944e-38, %v4604_v53  ;;  %v11667_v57 = vld [vmem:[#allocation85_spill] sm:$0xff]  ;;  %vm3072_vm6 = vweird.f32 %v10311_v60 }
 0x85f   : > { %v6567_v0 = vpack.i.bf16 %v10459_v32, %v10456_v9  ;;  %v10464_v47 = vpop.xlane.xlu1 %4238  ;;  %v3090_v9 = vand.u32 2147483647, %v10449_v4 }
 0x860   : > { %6943 = vrcp.f32 %v10464_v47  ;;  %v4401_v24 = vpop.f32.mrf.mxu3  ;;  %vm4584_vm5 = vweird.f32 %v10464_v47  ;;  %v4590_v55 = vand.u32 2147483648, %v10464_v47  ;;  %v4588_v2 = vand.u32 2147483647, %v10464_v47 }
 0x861   : > { %6558 = vrot.lane.b32.xlu2 %v6557_v20, %s7299_s16  ;;  %6945 = vrcp.f32 %v10466_v8  ;;  %v6519_v19 = vpop.permute.xlu0 %6518 }
 0x862   : > { %6947 = vrcp.f32 %v10449_v4  ;;  %v6521_v25 = vunpack.i.h.bf16 %v6519_v19  ;;  %v6520_v61 = vunpack.i.l.bf16 %v6519_v19  ;;  %vm4589_vm12 = vcmp.eq.f32.partialorder %v4588_v2, 8.507059e+37 }
 0x863   : > { %6949 = vrcp.f32 %v10311_v60 }
 0x864   : > { %6951 = vrcp.f32 %v10474_v50  ;;  %v4849_v40 = vsel %vm1586_vm0, %v10388_v3, %v6520_v61  ;;  %v4850_v6 = vsel %vm1586_vm0, %v2374_v29, %v6521_v25  ;;  %v11668_v25 = vld [vmem:[#allocation86_spill] sm:$0xff]  ;;  %v3076_v29 = vand.u32 2147483647, %v10311_v60 }
 0x865   : > { %v4866_v23 = vsel %vm4859_vm15, %v4849_v40, %v6525_v37  ;;  %v4867_v20 = vsel %vm4859_vm15, %v4850_v6, %v6526_v35  ;;  %v1895_v61 = vadd.f32 %v11668_v25, %v11667_v57  ;;  %v3093_v40 = vor.u32 1.1754944e-38, %v3092_v59  ;;  %v11680_v59 = vld [vmem:[#allocation151_spill] sm:$0xff] }
 0x866   : > { %v10472_v48 = vpop.eup %6943  ;;  %v2266_v6 = vand.u32 2147483648, %v10474_v50 }
 0x867   : > { %1890 = vadd.xlane.f32.xlu0 %v1889_v62  ;;  %v10479_v46 = vpop.eup %6945  ;;  %v4580_v54 = vmul.f32 %v10472_v48, %v10464_v47  ;;  %v10489_v38 = vpop.xlane.xlu1 %1881  ;;  %vm4585_vm8 = vweird.f32 %v10472_v48  ;;  %v4591_v47 = vor.u32 1.1754944e-38, %v4590_v55 }
 0x868   : > { %v4594_v28 = vmul.f32 %v10479_v46, %v10466_v8  ;;  %v10494_v1 = vpop.eup %6947  ;;  %vm4599_vm7 = vweird.f32 %v10479_v46  ;;  %vm10525_vm9 = vmor %vm4584_vm5, %vm4585_vm8  ;;  %v4402_v8 = vadd.f32 %v4401_v24, %v4352_v18  ;;  %vm3091_vm5 = vcmp.eq.f32.partialorder %v3090_v9, 8.507059e+37 }
 0x869   : > { %v4581_v10 = vsub.f32 1.0, %v4580_v54  ;;  %v10496_v21 = vpop.eup %6949  ;;  %v3082_v12 = vmul.f32 %v10494_v1, %v10449_v4  ;;  %vm4600_vm11 = vmor %vm4598_vm10, %vm4599_vm7  ;;  %v4403_v54 = vpop.f32.mrf.mxu3  ;;  %vm3087_vm14 = vweird.f32 %v10494_v1  ;;  %vm3077_vm10 = vcmp.eq.f32.partialorder %v3076_v29, 8.507059e+37 }
 0x86a   : > { %v4595_v26 = vsub.f32 1.0, %v4594_v28  ;;  %v3068_v41 = vmul.f32 %v10496_v21, %v10311_v60  ;;  %v10510_v56 = vpop.eup %6951  ;;  %v4404_v63 = vadd.f32 %v4403_v54, %v4354_v11  ;;  %vm3073_vm2 = vweird.f32 %v10496_v21  ;;  %vm10554_vm4 = vmor %vm3086_vm3, %vm3087_vm14 }
 0x86b   : > { %v4582_v17 = vmul.f32 %v10472_v48, %v4581_v10  ;;  %v3083_v13 = vsub.f32 1.0, %v3082_v12  ;;  %v2256_v62 = vmul.f32 %v10510_v56, %v10474_v50  ;;  %vm10565_vm7 = vmor %vm3072_vm6, %vm3073_vm2  ;;  %vm2261_vm8 = vweird.f32 %v10510_v56  ;;  %v11674_v12 = vld [vmem:[#allocation146_spill] sm:$0xff] }
 0x86c   : > { %v4596_v15 = vmul.f32 %v10479_v46, %v4595_v26  ;;  %v3069_v51 = vsub.f32 1.0, %v3068_v41 }
 0x86d   : > { %v4583_v5 = vadd.f32 %v10472_v48, %v4582_v17  ;;  %v2257_v39 = vsub.f32 1.0, %v2256_v62 }
 0x86e   : > { %v4597_v52 = vadd.f32 %v10479_v46, %v4596_v15  ;;  %v3070_v19 = vmul.f32 %v10496_v21, %v3069_v51  ;;  %v11673_v15 = vld [vmem:[#allocation145_spill] sm:$0xff] }
 0x86f   : > { %1899 = vadd.xlane.f32.xlu0 %v1898_v49  ;;  %v4587_v31 = vsel %vm10525_vm9, %v10472_v48, %v4583_v5  ;;  %v3084_v49 = vmul.f32 %v10494_v1, %v3083_v13  ;;  %v2258_v58 = vmul.f32 %v10510_v56, %v2257_v39  ;;  %vm2260_vm9 = vweird.f32 %v10474_v50  ;;  %v4357_v13 = vpop.f32.mrf.mxu2 }
 0x870   : > { %v4601_v14 = vsel %vm4600_vm11, %v10479_v46, %v4597_v52  ;;  %v4592_v28 = vsel %vm4589_vm12, %v4591_v47, %v4587_v31  ;;  %v3071_v26 = vadd.f32 %v10496_v21, %v3070_v19  ;;  %v2892_v35 = vadd.f32 %v11674_v12, %v11673_v15  ;;  %vm2262_vm11 = vmor %vm2260_vm9, %vm2261_vm8 }
 0x871   : > { %v4606_v48 = vsel %vm4603_vm13, %v4605_v27, %v4601_v14  ;;  %v3085_v46 = vadd.f32 %v10494_v1, %v3084_v49  ;;  %v4647_v10 = vmul.f32 %v4592_v28, %v4402_v8  ;;  %v2259_v24 = vadd.f32 %v10510_v56, %v2258_v58  ;;  %v4406_v2 = vpop.f32.mrf.mxu3  ;;  %v11679_v58 = vld [vmem:[#allocation152_spill] sm:$0xff] }
 0x872   : > { %v4648_v32 = vmul.f32 %v4606_v48, %v4404_v63  ;;  %vm2265_vm12 = vcmp.eq.f32.partialorder %v2264_v34, 8.507059e+37  ;;  %v2897_v57 = vadd.f32 %v11680_v59, %v11679_v58  ;;  %v4407_v25 = vadd.f32 %v4406_v2, %v4357_v13 }
 0x873   : > { %v3089_v17 = vsel %vm10554_vm4, %v10494_v1, %v3085_v46 }
 0x874   : > { %v6572_v18 = vpack.i.bf16 %v4648_v32, %v4647_v10 }
 0x877   : > { %v4359_v8 = vpop.f32.mrf.mxu2 }
 0x879   : > { %v4408_v19 = vpop.f32.mrf.mxu3 }
 0x87f   : > { %v6529_v36 = vpop.permute.xlu1 %6528 }
 0x880   : > { %v6531_v16 = vunpack.i.h.bf16 %v6529_v36  ;;  %v6530_v3 = vunpack.i.l.bf16 %v6529_v36  ;;  %v2267_v36 = vor.u32 1.1754944e-38, %v2266_v6 }
 0x882   : > { %1893 = vadd.xlane.f32.xlu1 %v1892_v44  ;;  %v4883_v43 = vsel %vm4876_vm1, %v4866_v23, %v6530_v3  ;;  %v4884_v45 = vsel %vm4876_vm1, %v4867_v20, %v6531_v16  ;;  %v3094_v44 = vsel %vm3091_vm5, %v3093_v40, %v3089_v17  ;;  %v11675_v3 = vld [vmem:[#allocation144_spill] sm:$0xff] }
 0x883   : > { %v4896_v22 = vpack.c.bf16 %v4884_v45, %v4883_v43  ;;  %6568 = vrot.lane.b32.xlu0 %v6567_v0, %s7300_s4  ;;  %v3078_v0 = vand.u32 2147483648, %v10311_v60  ;;  %v3075_v60 = vsel %vm10565_vm7, %v10496_v21, %v3071_v26  ;;  %v2263_v21 = vsel %vm2262_vm11, %v10510_v56, %v2259_v24  ;;  %v11676_v45 = vld [vmem:[#allocation103_spill] sm:$0xff] }
 0x884   : > { %v3136_v41 = vmul.f32 %v3094_v44, %v2892_v35  ;;  %v2268_v16 = vsel %vm2265_vm12, %v2267_v36, %v2263_v21 }
 0x885   : > { %4992 = vmatmul.bf16.gmra.mxu0 %v4896_v22  ;;  %v3079_v1 = vor.u32 1.1754944e-38, %v3078_v0  ;;  %v10589_v52 = vmul.f32 %v2268_v16, %v11676_v45 }
 0x887   : > { %v3080_v37 = vsel %vm3077_vm10, %v3079_v1, %v3075_v60 }
 0x888   : > { %v3135_v5 = vmul.f32 %v3080_v37, %v11675_v3  ;;  %v11683_v37 = vld [vmem:[#allocation147_spill] sm:$0xff] }
 0x88a   : > { %1896 = vadd.xlane.f32.xlu2 %v1895_v61  ;;  %v6562_v20 = vpack.i.bf16 %v3136_v41, %v3135_v5 }
 0x88b   : > { %6573 = vrot.lane.b32.xlu0 %v6572_v18, %s7299_s16  ;;  %v4409_v18 = vadd.f32 %v4408_v19, %v4359_v8 }
 0x88c   : > { %v10578_v30 = vpop.xlane.xlu0 %2732 }
 0x88d   : > { %6953 = vrcp.f32 %v10578_v30  ;;  %v3106_v49 = vand.u32 2147483648, %v10578_v30  ;;  %vm3100_vm2 = vweird.f32 %v10578_v30  ;;  %v3104_v39 = vand.u32 2147483647, %v10578_v30 }
 0x88f   : > { %v3107_v26 = vor.u32 1.1754944e-38, %v3106_v49  ;;  %vm3105_vm7 = vcmp.eq.f32.partialorder %v3104_v39, 8.507059e+37 }
 0x893   : > { %v6954_v23 = vpop.eup %6953 }
 0x894   : > { %v2736_v50 = vpop.xlane.xlu2 %2735  ;;  %v3096_v55 = vmul.f32 %v6954_v23, %v10578_v30  ;;  %v10586_v43 = vpop.xlane.xlu0 %3491  ;;  %vm3101_vm13 = vweird.f32 %v6954_v23 }
 0x895   : > { %6955 = vrcp.f32 %v2736_v50  ;;  %v3120_v28 = vand.u32 2147483648, %v2736_v50  ;;  %vm10609_vm3 = vmor %vm3100_vm2, %vm3101_vm13  ;;  %vm3114_vm4 = vweird.f32 %v2736_v50  ;;  %v3118_v63 = vand.u32 2147483647, %v2736_v50 }
 0x896   : > { %v3097_v56 = vsub.f32 1.0, %v3096_v55  ;;  %6957 = vrcp.f32 %v10586_v43  ;;  %vm3870_vm13 = vweird.f32 %v10586_v43 }
 0x897   : > { %v3121_v4 = vor.u32 1.1754944e-38, %v3120_v28  ;;  %vm3119_vm8 = vcmp.eq.f32.partialorder %v3118_v63, 8.507059e+37 }
 0x898   : > { %v3098_v33 = vmul.f32 %v6954_v23, %v3097_v56 }
 0x89a   : > { %v3099_v14 = vadd.f32 %v6954_v23, %v3098_v33 }
 0x89b   : > { %6563 = vrot.lane.b32.xlu1 %v6562_v20, %s7301_s28  ;;  %v6956_v22 = vpop.eup %6955 }
 0x89c   : > { %v3110_v53 = vmul.f32 %v6956_v22, %v2736_v50  ;;  %v10593_v62 = vpop.xlane.xlu2 %4244  ;;  %v10596_v7 = vpop.xlane.xlu0 %4247  ;;  %vm3115_vm14 = vweird.f32 %v6956_v22  ;;  %v3103_v61 = vsel %vm10609_vm3, %v6954_v23, %v3099_v14 }
 0x89d   : > { %6959 = vrcp.f32 %v10593_v62  ;;  %v10598_v31 = vpop.eup %6957  ;;  %vm10622_vm6 = vmor %vm3114_vm4, %vm3115_vm14  ;;  %v3108_v60 = vsel %vm3105_vm7, %v3107_v26, %v3103_v61  ;;  %vm4612_vm5 = vweird.f32 %v10593_v62  ;;  %v4618_v1 = vand.u32 2147483648, %v10593_v62 }
 0x89e   : > { %v3111_v51 = vsub.f32 1.0, %v3110_v53  ;;  %6961 = vrcp.f32 %v10596_v7  ;;  %v3866_v11 = vmul.f32 %v10598_v31, %v10586_v43  ;;  %v4632_v35 = vand.u32 2147483648, %v10596_v7 }
 0x89f   : > { %6963 = vrcp.f32 %v10489_v38  ;;  %v4616_v21 = vand.u32 2147483647, %v10593_v62  ;;  %v3137_v36 = vmul.f32 %v3108_v60, %v11683_v37  ;;  %vm4626_vm11 = vweird.f32 %v10596_v7 }
 0x8a0   : > { %v3112_v47 = vmul.f32 %v6956_v22, %v3111_v51  ;;  %v3867_v32 = vsub.f32 1.0, %v3866_v11  ;;  %v4630_v5 = vand.u32 2147483647, %v10596_v7  ;;  %vm3871_vm14 = vweird.f32 %v10598_v31 }
 0x8a1   : > { %v4619_v2 = vor.u32 1.1754944e-38, %v4618_v1  ;;  %v4633_v33 = vor.u32 1.1754944e-38, %v4632_v35  ;;  %vm4617_vm3 = vcmp.eq.f32.partialorder %v4616_v21, 8.507059e+37  ;;  %v3874_v51 = vand.u32 2147483647, %v10586_v43 }
 0x8a2   : > { %v3113_v54 = vadd.f32 %v6956_v22, %v3112_v47  ;;  %v3868_v44 = vmul.f32 %v10598_v31, %v3867_v32  ;;  %vm4631_vm4 = vcmp.eq.f32.partialorder %v4630_v5, 8.507059e+37  ;;  %v11690_v32 = vld [vmem:[#allocation68_spill] sm:$0xff]  ;;  %v2278_v1 = vand.u32 2147483647, %v10489_v38 }
 0x8a3   : > { %v10604_v27 = vpop.eup %6959 }
 0x8a4   : > { %v4608_v46 = vmul.f32 %v10604_v27, %v10593_v62  ;;  %v10615_v10 = vpop.eup %6961  ;;  %v3117_v0 = vsel %vm10622_vm6, %v6956_v22, %v3113_v54  ;;  %vm4613_vm9 = vweird.f32 %v10604_v27  ;;  %v10639_v34 = vpop.xlane.xlu2 %1887  ;;  %v3869_v56 = vadd.f32 %v10598_v31, %v3868_v44  ;;  %vm10685_vm6 = vmor %vm3870_vm13, %vm3871_vm14 }
 0x8a5   : > { %v4622_v42 = vmul.f32 %v10615_v10, %v10596_v7  ;;  %v10634_v6 = vpop.eup %6963  ;;  %v3122_v30 = vsel %vm3119_vm8, %v3121_v4, %v3117_v0  ;;  %vm4627_vm10 = vweird.f32 %v10615_v10  ;;  %vm10657_vm12 = vmor %vm4612_vm5, %vm4613_vm9  ;;  %v3876_v62 = vand.u32 2147483648, %v10586_v43 }
 0x8a6   : > { %v4609_v29 = vsub.f32 1.0, %v4608_v46  ;;  %v3138_v41 = vmul.f32 %v3122_v30, %v2897_v57  ;;  %v2270_v16 = vmul.f32 %v10634_v6, %v10489_v38  ;;  %vm10663_vm2 = vmor %vm4626_vm11, %vm4627_vm10  ;;  %v3873_v39 = vsel %vm10685_vm6, %v10598_v31, %v3869_v56 }
 0x8a7   : > { %v4623_v24 = vsub.f32 1.0, %v4622_v42  ;;  %v3877_v19 = vor.u32 1.1754944e-38, %v3876_v62  ;;  %vm3875_vm8 = vcmp.eq.f32.partialorder %v3874_v51, 8.507059e+37  ;;  %v11691_v42 = vld [vmem:[#allocation66_spill] sm:$0xff]  ;;  %vm2275_vm11 = vweird.f32 %v10634_v6 }
 0x8a8   : > { %v4610_v40 = vmul.f32 %v10604_v27, %v4609_v29  ;;  %v6577_v45 = vpack.i.bf16 %v3138_v41, %v3137_v36  ;;  %v2271_v8 = vsub.f32 1.0, %v2270_v16  ;;  %vm2279_vm14 = vcmp.eq.f32.partialorder %v2278_v1, 8.507059e+37  ;;  %v11692_v36 = vld [vmem:[#allocation105_spill] sm:$0xff]  ;;  %v11693_v41 = vld [vmem:[#allocation106_spill] sm:$0xff] }
 0x8a9   : > { %v4624_v15 = vmul.f32 %v10615_v10, %v4623_v24  ;;  %v3878_v57 = vsel %vm3875_vm8, %v3877_v19, %v3873_v39  ;;  %v2126_v16 = vadd.f32 %v11693_v41, %v11692_v36  ;;  %v2308_v14 = vand.u32 2147483648, %v10639_v34  ;;  %v5022_v36 = vld [vmem:[%s10772_s5 + $0x18] sm:$0xff] }
 0x8aa   : > { %v10630_v17 = vpop.xlane.xlu1 %3488  ;;  %v4611_v12 = vadd.f32 %v10604_v27, %v4610_v40  ;;  %6578 = vrot.lane.b32.xlu1 %v6577_v45, %s7301_s28  ;;  %v2272_v61 = vmul.f32 %v10634_v6, %v2271_v8  ;;  %v3894_v29 = vmul.f32 %v3878_v57, %v11691_v42  ;;  %v2280_v40 = vand.u32 2147483648, %v10489_v38  ;;  %v11698_v57 = vld [vmem:[#allocation108_spill] sm:$0xff] }
 0x8ab   : > { %6965 = vrcp.f32 %v10630_v17  ;;  %v4625_v3 = vadd.f32 %v10615_v10, %v4624_v15  ;;  %v3862_v49 = vand.u32 2147483648, %v10630_v17  ;;  %v3860_v43 = vand.u32 2147483647, %v10630_v17 }
 0x8ac   : > { %v4615_v55 = vsel %vm10657_vm12, %v10604_v27, %v4611_v12  ;;  %v10691_v27 = vpop.f32.mrf.mxu0  ;;  %v10697_v48 = vpop.permute.xlu2 %6543  ;;  %vm3856_vm5 = vweird.f32 %v10630_v17  ;;  %vm2274_vm12 = vweird.f32 %v10489_v38  ;;  %v2281_v12 = vor.u32 1.1754944e-38, %v2280_v40 }
 0x8ad   : > { %v4629_v13 = vsel %vm10663_vm2, %v10615_v10, %v4625_v3  ;;  %v4620_v47 = vsel %vm4617_vm3, %v4619_v2, %v4615_v55  ;;  %v3863_v58 = vor.u32 1.1754944e-38, %v3862_v49  ;;  %vm3861_vm10 = vcmp.eq.f32.partialorder %v3860_v43, 8.507059e+37  ;;  %vm2276_vm13 = vmor %vm2274_vm12, %vm2275_vm11 }
 0x8ae   : > { %v4634_v11 = vsel %vm4631_vm4, %v4633_v33, %v4629_v13  ;;  %v4649_v54 = vmul.f32 %v4620_v47, %v4407_v25  ;;  %vm2302_vm3 = vweird.f32 %v10639_v34  ;;  %v6546_v56 = vunpack.i.h.bf16 %v10697_v48 }
 0x8af   : > { %v4650_v63 = vmul.f32 %v4634_v11, %v4409_v18  ;;  %v2273_v18 = vadd.f32 %v10634_v6, %v2272_v61  ;;  %v6534_v21 = vpop.permute.xlu0 %6533  ;;  %v6545_v13 = vunpack.i.l.bf16 %v10697_v48  ;;  %v2306_v39 = vand.u32 2147483647, %v10639_v34 }
 0x8b0   : > { %v6536_v38 = vunpack.i.h.bf16 %v6534_v21  ;;  %v6535_v50 = vunpack.i.l.bf16 %v6534_v21  ;;  %v2309_v48 = vor.u32 1.1754944e-38, %v2308_v14 }
 0x8b1   : > { %v6966_v23 = vpop.eup %6965  ;;  %v6587_v59 = vpack.i.bf16 %v4650_v63, %v4649_v54  ;;  %v2277_v44 = vsel %vm2276_vm13, %v10634_v6, %v2273_v18 }
 0x8b2   : > { %v3852_v22 = vmul.f32 %v6966_v23, %v10630_v17  ;;  %v10675_v53 = vpop.xlane.xlu1 %1884  ;;  %vm3857_vm7 = vweird.f32 %v6966_v23  ;;  %v2282_v37 = vsel %vm2279_vm14, %v2281_v12, %v2277_v44  ;;  %v4851_v47 = vsel %vm1586_vm0, %v10589_v52, %v6535_v50 }
 0x8b3   : > { %6967 = vrcp.f32 %v10675_v53  ;;  %vm3858_vm9 = vmor %vm3856_vm5, %vm3857_vm7  ;;  %6588 = vrot.lane.b32.xlu0 %v6587_v59, %s7299_s16  ;;  %v2376_v6 = vmul.f32 %v2282_v37, %v2126_v16  ;;  %v2294_v20 = vand.u32 2147483648, %v10675_v53  ;;  %vm2288_vm6 = vweird.f32 %v10675_v53  ;;  %v5020_v37 = vld [vmem:[%s10772_s5 + $0x8] sm:$0xff] }
 0x8b4   : > { %v3853_v7 = vsub.f32 1.0, %v3852_v22  ;;  %6969 = vrcp.f32 %v10639_v34  ;;  %v10714_v24 = vpop.f32.mrf.mxu0  ;;  %v10720_v30 = vpop.permute.xlu2 %6548  ;;  %v2292_v55 = vand.u32 2147483647, %v10675_v53 }
 0x8b5   : > { %v2295_v49 = vor.u32 1.1754944e-38, %v2294_v20  ;;  %v6550_v61 = vunpack.i.l.bf16 %v10720_v30  ;;  %v5023_v20 = vld [vmem:[%s10772_s5 + $0x20] sm:$0xff] }
 0x8b6   : > { %v3854_v28 = vmul.f32 %v6966_v23, %v3853_v7  ;;  %v4852_v7 = vsel %vm1586_vm0, %v2376_v6, %v6536_v38  ;;  %vm2293_vm8 = vcmp.eq.f32.partialorder %v2292_v55, 8.507059e+37  ;;  %v5021_v38 = vld [vmem:[%s10772_s5 + $0x10] sm:$0xff]  ;;  %v5024_v55 = vld [vmem:[%s10772_s5 + $0x28] sm:$0xff] }
 0x8b8   : > { %v3855_v46 = vadd.f32 %v6966_v23, %v3854_v28 }
 0x8b9   : > { %v10700_v10 = vpop.eup %6967 }
 0x8ba   : > { %v3859_v31 = vsel %vm3858_vm9, %v6966_v23, %v3855_v46  ;;  %v10702_v25 = vpop.eup %6969  ;;  %v2284_v9 = vmul.f32 %v10700_v10, %v10675_v53  ;;  %vm2289_vm2 = vweird.f32 %v10700_v10  ;;  %vm2307_vm9 = vcmp.eq.f32.partialorder %v2306_v39, 8.507059e+37  ;;  %v11696_v46 = vld [vmem:[#allocation107_spill] sm:$0xff] }
 0x8bb   : > { %v3864_v26 = vsel %vm3861_vm10, %v3863_v58, %v3859_v31  ;;  %v2298_v4 = vmul.f32 %v10702_v25, %v10639_v34  ;;  %vm2303_vm4 = vweird.f32 %v10702_v25  ;;  %vm10738_vm7 = vmor %vm2288_vm6, %vm2289_vm2  ;;  %v10764_v58 = vld [vmem:[%s11697_s3] ss:$0 sm:$0xff]  ;;  %v11699_v31 = vld [vmem:[#allocation109_spill] sm:$0xff] }
 0x8bc   : > { %v3893_v0 = vmul.f32 %v3864_v26, %v11690_v32  ;;  %v2285_v60 = vsub.f32 1.0, %v2284_v9  ;;  %v10727_v5 = vpop.f32.mrf.mxu0  ;;  %v6554_v22 = vpop.permute.xlu2 %6553  ;;  %vm2304_vm5 = vmor %vm2302_vm3, %vm2303_vm4  ;;  %v2131_v34 = vadd.f32 %v11699_v31, %v11698_v57  ;;  %v6551_v9 = vunpack.i.h.bf16 %v10720_v30 }
 0x8bd   : > { %v2299_v15 = vsub.f32 1.0, %v2298_v4  ;;  %v6556_v42 = vunpack.i.h.bf16 %v6554_v22  ;;  %v4981_v12 = vadd.f32 %v10764_v58, %v10714_v24  ;;  %v4984_v16 = vadd.f32 %v10764_v58, %v10727_v5 }
 0x8be   : > { %v6582_v17 = vpack.i.bf16 %v3894_v29, %v3893_v0  ;;  %v2286_v35 = vmul.f32 %v10700_v10, %v2285_v60  ;;  %v4979_v0 = vadd.f32 %v10764_v58, %v10691_v27  ;;  %v6555_v29 = vunpack.i.l.bf16 %v6554_v22 }
 0x8bf   : > { %v2300_v3 = vmul.f32 %v10702_v25, %v2299_v15  ;;  %v10792_v41 = vadd.f32 %v5020_v37, %v4981_v12  ;;  %v10801_v24 = vadd.f32 %v5021_v38, %v4984_v16 }
 0x8c0   : > { %6583 = vrot.lane.b32.xlu2 %v6582_v17, %s7300_s4  ;;  %v2287_v23 = vadd.f32 %v10700_v10, %v2286_v35  ;;  %v5019_v17 = vld [vmem:[%s10772_s5] sm:$0xff]  ;;  %s11711_s4 = sld [smem:[#allocation178_spill]] }
 0x8c1   : > { %v2301_v51 = vadd.f32 %v10702_v25, %v2300_v3  ;;  %v10781_v44 = vadd.f32 %v5019_v17, %v4979_v0  ;;  %v11702_v0 = vld [vmem:[#allocation112_spill] sm:$0xff] }
 0x8c2   : > { %v2291_v53 = vsel %vm10738_vm7, %v10700_v10, %v2287_v23 }
 0x8c3   : > { %v2296_v43 = vsel %vm2293_vm8, %v2295_v49, %v2291_v53  ;;  %v2305_v19 = vsel %vm2304_vm5, %v10702_v25, %v2301_v51 }
 0x8c4   : > { %v4985_v63 = vpop.f32.mrf.mxu0  ;;  %v2377_v10 = vmul.f32 %v2296_v43, %v11696_v46  ;;  %v2310_v59 = vsel %vm2307_vm9, %v2309_v48, %v2305_v19  ;;  %v6559_v25 = vpop.permute.xlu2 %6558 }
 0x8c5   : > { %v2378_v26 = vmul.f32 %v2310_v59, %v2131_v34  ;;  %v6561_v18 = vunpack.i.h.bf16 %v6559_v25  ;;  %v6560_v4 = vunpack.i.l.bf16 %v6559_v25  ;;  %v4986_v35 = vadd.f32 %v10764_v58, %v4985_v63  ;;  %v5026_v25 = vld [vmem:[%s10772_s5 + $0x38] sm:$0xff] }
 0x8c6   : > { %v4853_v32 = vsel %vm1586_vm0, %v2377_v10, %v6550_v61  ;;  %s5448_s21 = scalar_lea.hbm %s11711_s4, %s5961_s20  ;;  %s7176_s26 = scalar_lea.hbm %s11711_s4, 512 }
 0x8c7   : > { %v4870_v40 = vsel %vm4859_vm15, %v4853_v32, %v6555_v29  ;;  %v4854_v1 = vsel %vm1586_vm0, %v2378_v26, %v6551_v9  ;;  %v10796_v3 = vadd.f32 %v5022_v36, %v4986_v35  ;;  %s5451_s3 = sshll.u32 %s5448_s21, 4  ;;  %s5452_s3 = int_to_ptr.hbm [resolvable:$true] %s5451_s3 }
 0x8c8   : > { %v4871_v30 = vsel %vm4859_vm15, %v4854_v1, %v6556_v42  ;;  %v4887_v15 = vsel %vm4876_vm1, %v4870_v40, %v6560_v4  ;;  %v11703_v42 = vld [vmem:[#allocation113_spill] sm:$0xff]  ;;  %s7170_s11 = sshra.s32 %s5452_s3, 4  ;;  %s7171_s11 = int_to_ptr.hbm [resolvable:$true] %s7170_s11 }
 0x8c9   : > { %v4888_v27 = vsel %vm4876_vm1, %v4871_v30, %v6561_v18  ;;  %v2136_v29 = vadd.f32 %v11703_v42, %v11702_v0  ;;  %v11704_v30 = vld [vmem:[#allocation111_spill] sm:$0xff]  ;;  %s7172_s19 = scalar_lea.hbm %s7171_s11, 128  ;;  %p7177_p2 = scmp.lt.s32.totalorder %s7171_s11, %s11711_s4 }
 0x8ca   : > { %v6539_v45 = vpop.permute.xlu1 %6538  ;;  %v4898_v21 = vpack.c.bf16 %v4888_v27, %v4887_v15  ;;  %p7173_p1 = scmp.ne.s32.totalorder %s7171_s11, %s7172_s19  ;;  %p7178_p4 = scmp.lt.s32.totalorder %s7176_s26, %s7172_s19 }
 0x8cb   : > { %v6541_v62 = vunpack.i.h.bf16 %v6539_v45  ;;  %v6540_v33 = vunpack.i.l.bf16 %v6539_v45 }
 0x8cc   : > { %v4988_v60 = vpop.f32.mrf.mxu0  ;;  %p7174_p11 = pnand %p7173_p1, %p7441_p7  ;;  %p7179_p5 = por %p7178_p4, %p7177_p2 }
 0x8cd   : > { %v4868_v11 = vsel %vm4859_vm15, %v4851_v47, %v6540_v33  ;;  %v4869_v54 = vsel %vm4859_vm15, %v4852_v7, %v6541_v62  ;;  %v4989_v23 = vadd.f32 %v10764_v58, %v4988_v60 }
 0x8ce   : > { %v4885_v28 = vsel %vm4876_vm1, %v4868_v11, %v6545_v13  ;;  %v4886_v52 = vsel %vm4876_vm1, %v4869_v54, %v6546_v56  ;;  %v5025_v11 = vld [vmem:[%s10772_s5 + $0x30] sm:$0xff]  ;;  %p7175_p0 = pneg %p7174_p11 }
 0x8cf   : > { %v4897_v8 = vpack.c.bf16 %v4886_v52, %v4885_v28  ;;  %v10808_v45 = vadd.f32 %v5023_v20, %v4989_v23 }
 0x8d0   : > { %p7180_p6 = pnand %p7179_p5, %p7175_p0 }
 0x8d1   : > { %4997 = vmatmul.bf16.gmra.mxu0 %v4897_v8 }
 0x8d4   : > { %5051 = vadd.xlane.f32.xlu1 %v10781_v44  ;;  %v4990_v50 = vpop.f32.mrf.mxu0 }
 0x8d5   : > { %v4991_v6 = vadd.f32 %v10764_v58, %v4990_v50 }
 0x8d7   : > { %v10810_v5 = vadd.f32 %v5024_v55, %v4991_v6 }
 0x8da   : > { %v1891_v56 = vpop.xlane.xlu0 %1890 }
 0x8db   : > { %6971 = vrcp.f32 %v1891_v56  ;;  %vm2316_vm12 = vweird.f32 %v1891_v56  ;;  %v2322_v43 = vand.u32 2147483648, %v1891_v56  ;;  %v2320_v63 = vand.u32 2147483647, %v1891_v56 }
 0x8dc   : > { %5057 = vadd.xlane.f32.xlu1 %v10796_v3 }
 0x8dd   : > { %5053 = vadd.xlane.f32.xlu0 %v10792_v41  ;;  %v2323_v31 = vor.u32 1.1754944e-38, %v2322_v43  ;;  %vm2321_vm3 = vcmp.eq.f32.partialorder %v2320_v63, 8.507059e+37  ;;  %v11705_v63 = vld [vmem:[#allocation115_spill] sm:$0xff] }
 0x8e1   : > { %5002 = vmatmul.bf16.gmra.mxu0 %v4898_v21  ;;  %v6972_v13 = vpop.eup %6971 }
 0x8e2   : > { %v2312_v22 = vmul.f32 %v6972_v13, %v1891_v56  ;;  %v10814_v62 = vpop.xlane.xlu0 %1899  ;;  %vm2317_vm10 = vweird.f32 %v6972_v13 }
 0x8e3   : > { %vm10820_vm13 = vmor %vm2316_vm12, %vm2317_vm10  ;;  %vm2358_vm8 = vweird.f32 %v10814_v62 }
 0x8e4   : > { %5061 = vadd.xlane.f32.xlu1 %v10810_v5  ;;  %v2313_v51 = vsub.f32 1.0, %v2312_v22 }
 0x8e5   : > { %5059 = vadd.xlane.f32.xlu0 %v10808_v45 }
 0x8e6   : > { %v2314_v53 = vmul.f32 %v6972_v13, %v2313_v51 }
 0x8e8   : > { %v2315_v28 = vadd.f32 %v6972_v13, %v2314_v53  ;;  %v2364_v53 = vand.u32 2147483648, %v10814_v62 }
 0x8e9   : > { %5055 = vadd.xlane.f32.xlu2 %v10801_v24 }
 0x8ea   : > { %v2319_v10 = vsel %vm10820_vm13, %v6972_v13, %v2315_v28  ;;  %v2365_v28 = vor.u32 1.1754944e-38, %v2364_v53 }
 0x8eb   : > { %v2324_v26 = vsel %vm2321_vm3, %v2323_v31, %v2319_v10 }
 0x8ec   : > { %v2379_v15 = vmul.f32 %v2324_v26, %v11704_v30 }
 0x8f5   : > { %v1894_v2 = vpop.xlane.xlu1 %1893  ;;  %v6569_v54 = vpop.permute.xlu0 %6568 }
 0x8f6   : > { %6973 = vrcp.f32 %v1894_v2  ;;  %v2336_v8 = vand.u32 2147483648, %v1894_v2  ;;  %vm2330_vm14 = vweird.f32 %v1894_v2  ;;  %v2334_v46 = vand.u32 2147483647, %v1894_v2 }
 0x8f7   : > { %6975 = vrcp.f32 %v10814_v62  ;;  %v6571_v27 = vunpack.i.h.bf16 %v6569_v54  ;;  %v6570_v12 = vunpack.i.l.bf16 %v6569_v54 }
 0x8f8   : > { %v2337_v34 = vor.u32 1.1754944e-38, %v2336_v8  ;;  %vm2335_vm4 = vcmp.eq.f32.partialorder %v2334_v46, 8.507059e+37  ;;  %v11706_v46 = vld [vmem:[#allocation116_spill] sm:$0xff] }
 0x8f9   : > { %v2141_v10 = vadd.f32 %v11706_v46, %v11705_v63 }
 0x8fc   : > { %v6974_v33 = vpop.eup %6973 }
 0x8fd   : > { %v2326_v7 = vmul.f32 %v6974_v33, %v1894_v2  ;;  %vm2331_vm11 = vweird.f32 %v6974_v33  ;;  %v1897_v57 = vpop.xlane.xlu2 %1896  ;;  %v6574_v17 = vpop.permute.xlu0 %6573 }
 0x8fe   : > { %vm2332_vm2 = vmor %vm2330_vm14, %vm2331_vm11  ;;  %6977 = vrcp.f32 %v1897_v57  ;;  %v6976_v35 = vpop.eup %6975  ;;  %v6576_v21 = vunpack.i.h.bf16 %v6574_v17  ;;  %v6575_v37 = vunpack.i.l.bf16 %v6574_v17  ;;  %vm2344_vm9 = vweird.f32 %v1897_v57 }
 0x8ff   : > { %v2327_v47 = vsub.f32 1.0, %v2326_v7  ;;  %v2354_v56 = vmul.f32 %v6976_v35, %v10814_v62  ;;  %vm2359_vm6 = vweird.f32 %v6976_v35 }
 0x900   : > { %vm2360_vm5 = vmor %vm2358_vm8, %vm2359_vm6 }
 0x901   : > { %v2328_v14 = vmul.f32 %v6974_v33, %v2327_v47  ;;  %v2355_v2 = vsub.f32 1.0, %v2354_v56 }
 0x902   : > { %v4993_v49 = vpop.f32.mrf.mxu0 }
 0x903   : > { %v4994_v39 = vadd.f32 %v10764_v58, %v4993_v49  ;;  %v2329_v52 = vadd.f32 %v6974_v33, %v2328_v14  ;;  %v2350_v14 = vand.u32 2147483648, %v1897_v57  ;;  %v2362_v49 = vand.u32 2147483647, %v10814_v62  ;;  %v11707_v62 = vld [vmem:[#allocation114_spill] sm:$0xff] }
 0x904   : > { %v6978_v38 = vpop.eup %6977 }
 0x905   : > { %v10818_v19 = vadd.f32 %v5025_v11, %v4994_v39  ;;  %v2333_v59 = vsel %vm2332_vm2, %v6974_v33, %v2329_v52  ;;  %v2340_v13 = vmul.f32 %v6978_v38, %v1897_v57  ;;  %v2356_v33 = vmul.f32 %v6976_v35, %v2355_v2 }
 0x906   : > { %v2338_v9 = vsel %vm2335_vm4, %v2337_v34, %v2333_v59  ;;  %vm2345_vm7 = vweird.f32 %v6978_v38  ;;  %v2348_v11 = vand.u32 2147483647, %v1897_v57  ;;  %v2351_v52 = vor.u32 1.1754944e-38, %v2350_v14 }
 0x907   : > { %5063 = vadd.xlane.f32.xlu0 %v10818_v19  ;;  %v2380_v40 = vmul.f32 %v2338_v9, %v2136_v29  ;;  %v2341_v22 = vsub.f32 1.0, %v2340_v13  ;;  %v2357_v7 = vadd.f32 %v6976_v35, %v2356_v33  ;;  %vm2346_vm10 = vmor %vm2344_vm9, %vm2345_vm7  ;;  %vm2363_vm11 = vcmp.eq.f32.partialorder %v2362_v49, 8.507059e+37 }
 0x908   : > { %vm2349_vm12 = vcmp.eq.f32.partialorder %v2348_v11, 8.507059e+37  ;;  %v7302_v13 = vmov 128.0  }
 0x909   : > { %v2342_v51 = vmul.f32 %v6978_v38, %v2341_v22  ;;  %v2361_v54 = vsel %vm2360_vm5, %v6976_v35, %v2357_v7  ;;  %6979 = vrcp.f32 %v7302_v13 }
 0x90a   : > { %v4995_v61 = vpop.f32.mrf.mxu0  ;;  %v2366_v8 = vsel %vm2363_vm11, %v2365_v28, %v2361_v54 }
 0x90b   : > { %v4996_v32 = vadd.f32 %v10764_v58, %v4995_v61  ;;  %v2343_v47 = vadd.f32 %v6978_v38, %v2342_v51  ;;  %v2382_v61 = vmul.f32 %v2366_v8, %v2141_v10 }
 0x90d   : > { %v10832_v18 = vadd.f32 %v5026_v25, %v4996_v32  ;;  %v6564_v4 = vpop.permute.xlu1 %6563  ;;  %v2347_v39 = vsel %vm2346_vm10, %v6978_v38, %v2343_v47  ;;  %v5029_v38 = vld [vmem:[%s10772_s5 + $0x50] sm:$0xff]  ;;  %v5031_v47 = vld [vmem:[%s10772_s5 + $0x60] sm:$0xff] }
 0x90e   : > { %v6566_v60 = vunpack.i.h.bf16 %v6564_v4  ;;  %v6565_v1 = vunpack.i.l.bf16 %v6564_v4  ;;  %v2352_v48 = vsel %vm2349_vm12, %v2351_v52, %v2347_v39  ;;  %v5032_v52 = vld [vmem:[%s10772_s5 + $0x68] sm:$0xff] }
 0x90f   : > { %5065 = vadd.xlane.f32.xlu2 %v10832_v18  ;;  %v2381_v57 = vmul.f32 %v2352_v48, %v11707_v62  ;;  %v6980_v2 = vpop.eup %6979 }
 0x910   : > { %v4856_v36 = vsel %vm1586_vm0, %v2380_v40, %v6566_v60  ;;  %v4855_v16 = vsel %vm1586_vm0, %v2379_v15, %v6565_v1  ;;  %v5027_v15 = vld [vmem:[%s10772_s5 + $0x40] sm:$0xff]  ;;  %v5084_v22 = vmul.f32 128.0, %v6980_v2 }
 0x911   : > { %v4872_v50 = vsel %vm4859_vm15, %v4855_v16, %v6570_v12  ;;  %v4873_v23 = vsel %vm4859_vm15, %v4856_v36, %v6571_v27 }
 0x912   : > { %v4889_v6 = vsel %vm4876_vm1, %v4872_v50, %v6575_v37  ;;  %v4890_v20 = vsel %vm4876_vm1, %v4873_v23, %v6576_v21  ;;  %v5028_v21 = vld [vmem:[%s10772_s5 + $0x48] sm:$0xff]  ;;  %v5085_v33 = vsub.f32 1.0, %v5084_v22 }
 0x913   : > { %v4899_v55 = vpack.c.bf16 %v4890_v20, %v4889_v6  ;;  %v5030_v20 = vld [vmem:[%s10772_s5 + $0x58] sm:$0xff] }
 0x914   : > { %v5086_v51 = vmul.f32 %v6980_v2, %v5085_v33 }
 0x915   : > { %5007 = vmatmul.bf16.gmra.mxu0 %v4899_v55 }
 0x916   : > { %v5087_v49 = vadd.f32 %v6980_v2, %v5086_v51 }
 0x91a   : > { %v6584_v34 = vpop.permute.xlu2 %6583 }
 0x91b   : > { %v6586_v9 = vunpack.i.h.bf16 %v6584_v34  ;;  %v6585_v32 = vunpack.i.l.bf16 %v6584_v34 }
 0x91c   : > { %v6579_v43 = vpop.permute.xlu1 %6578 }
 0x91d   : > { %v6581_v59 = vunpack.i.h.bf16 %v6579_v43  ;;  %v6580_v31 = vunpack.i.l.bf16 %v6579_v43 }
 0x91f   : > { %v4858_v25 = vsel %vm1586_vm0, %v2382_v61, %v6581_v59  ;;  %v4857_v26 = vsel %vm1586_vm0, %v2381_v57, %v6580_v31  ;;  %vm5088_vm0 = vweird.f32 %v6980_v2 }
 0x920   : > { %v4874_v17 = vsel %vm4859_vm15, %v4857_v26, %v6585_v32  ;;  %v4875_v4 = vsel %vm4859_vm15, %v4858_v25, %v6586_v9  ;;  %v10880_v39 = vsel %vm5088_vm0, %v6980_v2, %v5087_v49  ;;  %v5033_v25 = vld [vmem:[%s10772_s5 + $0x70] sm:$0xff] }
 0x925   : > { %v6589_v0 = vpop.permute.xlu0 %6588 }
 0x926   : > { %v6591_v42 = vunpack.i.h.bf16 %v6589_v0  ;;  %v6590_v29 = vunpack.i.l.bf16 %v6589_v0 }
 0x928   : > { %v4891_v40 = vsel %vm4876_vm1, %v4874_v17, %v6590_v29  ;;  %v4892_v60 = vsel %vm4876_vm1, %v4875_v4, %v6591_v42  ;;  %v5034_v4 = vld [vmem:[%s10772_s5 + $0x78] sm:$0xff]  ;;  %s5435_s5 = scalar_lea.sflag [#allocation7], %s520_s12 }
 0x929   : > { %v4900_v1 = vpack.c.bf16 %v4892_v60, %v4891_v40 }
 0x92b   : > { %5012 = vmatmul.bf16.gmra.mxu0 %v4900_v1 }
 0x947   : > { %v5052_v11 = vpop.xlane.xlu1 %5051 }
 0x948   : > { %v5090_v8 = vmul.f32 %v10880_v39, %v5052_v11 }
 0x94a   : > { %v10889_v63 = vsub.f32 %v10781_v44, %v5090_v8 }
 0x94c   : > { %v5122_v31 = vmul.f32 %v10889_v63, %v10889_v63 }
 0x94e   : > { %v4998_v30 = vpop.f32.mrf.mxu0 }
 0x94f   : > { %v4999_v27 = vadd.f32 %v10764_v58, %v4998_v30  ;;  %v5058_v46 = vpop.xlane.xlu1 %5057 }
 0x950   : > { %v5054_v54 = vpop.xlane.xlu0 %5053  ;;  %v5093_v59 = vmul.f32 %v10880_v39, %v5058_v46 }
 0x951   : > { %v10857_v12 = vadd.f32 %v5027_v15, %v4999_v27  ;;  %v5091_v32 = vmul.f32 %v10880_v39, %v5054_v54 }
 0x952   : > { %v10895_v34 = vsub.f32 %v10796_v3, %v5093_v59 }
 0x953   : > { %5067 = vadd.xlane.f32.xlu1 %v10857_v12  ;;  %v10912_v42 = vsub.f32 %v10792_v41, %v5091_v32 }
 0x954   : > { %v5125_v57 = vmul.f32 %v10895_v34, %v10895_v34 }
 0x955   : > { %v5123_v30 = vmul.f32 %v10912_v42, %v10912_v42 }
 0x956   : > { %v5000_v35 = vpop.f32.mrf.mxu0 }
 0x957   : > { %v5001_v37 = vadd.f32 %v10764_v58, %v5000_v35  ;;  %v5062_v41 = vpop.xlane.xlu1 %5061 }
 0x958   : > { %v5060_v10 = vpop.xlane.xlu0 %5059  ;;  %v5095_v35 = vmul.f32 %v10880_v39, %v5062_v41 }
 0x959   : > { %v10862_v36 = vadd.f32 %v5028_v21, %v5001_v37  ;;  %v5094_v40 = vmul.f32 %v10880_v39, %v5060_v10 }
 0x95b   : > { %5069 = vadd.xlane.f32.xlu0 %v10862_v36  ;;  %v10924_v15 = vsub.f32 %v10808_v45, %v5094_v40  ;;  %v10936_v45 = vsub.f32 %v10810_v5, %v5095_v35 }
 0x95c   : > { %v5056_v29 = vpop.xlane.xlu2 %5055 }
 0x95d   : > { %v5092_v60 = vmul.f32 %v10880_v39, %v5056_v29 }
 0x95e   : > { %v5003_v16 = vpop.f32.mrf.mxu0 }
 0x95f   : > { %v5004_v50 = vadd.f32 %v10764_v58, %v5003_v16  ;;  %v10927_v27 = vsub.f32 %v10801_v24, %v5092_v60  ;;  %v5126_v16 = vmul.f32 %v10924_v15, %v10924_v15 }
 0x961   : > { %v10867_v23 = vadd.f32 %v5029_v38, %v5004_v50  ;;  %v5124_v37 = vmul.f32 %v10927_v27, %v10927_v27 }
 0x963   : > { %5071 = vadd.xlane.f32.xlu2 %v10867_v23 }
 0x966   : > { %v5005_v6 = vpop.f32.mrf.mxu0 }
 0x967   : > { %v5006_v55 = vadd.f32 %v10764_v58, %v5005_v6 }
 0x969   : > { %v10872_v56 = vadd.f32 %v5030_v20, %v5006_v55  ;;  %v5127_v20 = vmul.f32 %v10936_v45, %v10936_v45 }
 0x96b   : > { %5073 = vadd.xlane.f32.xlu1 %v10872_v56 }
 0x97a   : > { %v5064_v61 = vpop.xlane.xlu0 %5063 }
 0x97b   : > { %v5096_v62 = vmul.f32 %v10880_v39, %v5064_v61 }
 0x97d   : > { %v10902_v26 = vsub.f32 %v10818_v19, %v5096_v62 }
 0x97f   : > { %v5128_v3 = vmul.f32 %v10902_v26, %v10902_v26 }
 0x992   : > { %v5008_v7 = vpop.f32.mrf.mxu0 }
 0x993   : > { %v5009_v53 = vadd.f32 %v10764_v58, %v5008_v7 }
 0x995   : > { %v10877_v14 = vadd.f32 %v5031_v47, %v5009_v53 }
 0x997   : > { %5075 = vadd.xlane.f32.xlu0 %v10877_v14 }
 0x99a   : > { %v5010_v28 = vpop.f32.mrf.mxu0 }
 0x99b   : > { %v5011_v43 = vadd.f32 %v10764_v58, %v5010_v28 }
 0x99d   : > { %v10885_v48 = vadd.f32 %v5032_v52, %v5011_v43 }
 0x99f   : > { %5077 = vadd.xlane.f32.xlu2 %v10885_v48 }
 0x9a7   : > { %5138 = vadd.xlane.f32.xlu2 %v5122_v31 }
 0x9a8   : > { %v5013_v44 = vpop.f32.mrf.mxu0 }
 0x9a9   : > { %v5014_v9 = vadd.f32 %v10764_v58, %v5013_v44 }
 0x9ab   : > { %v10906_v0 = vadd.f32 %v5033_v25, %v5014_v9 }
 0x9ad   : > { %5079 = vadd.xlane.f32.xlu1 %v10906_v0 }
 0x9af   : > { %5144 = vadd.xlane.f32.xlu2 %v5125_v57 }
 0x9b0   : > { %v5015_v17 = vpop.f32.mrf.mxu0 }
 0x9b1   : > { %v5016_v19 = vadd.f32 %v10764_v58, %v5015_v17  ;;  %v5066_v58 = vpop.xlane.xlu2 %5065 }
 0x9b2   : > { %v5097_v21 = vmul.f32 %v10880_v39, %v5066_v58 }
 0x9b3   : > { %v10918_v1 = vadd.f32 %v5034_v4, %v5016_v19 }
 0x9b4   : > { %v10939_v24 = vsub.f32 %v10832_v18, %v5097_v21 }
 0x9b5   : > { %5081 = vadd.xlane.f32.xlu0 %v10918_v1  ;;  %5140 = vadd.xlane.f32.xlu1 %v5123_v30  ;;  %v10993_v30 = vld [vmem:[%s11708_s10] ss:$0 sm:$0xff] }
 0x9b6   : > { %v5129_v6 = vmul.f32 %v10939_v24, %v10939_v24 }
 0x9b7   : > { %5150 = vadd.xlane.f32.xlu2 %v5128_v3 }
 0x9bd   : > { %5142 = vadd.xlane.f32.xlu0 %v5124_v37  ;;  %5146 = vadd.xlane.f32.xlu1 %v5126_v16  ;;  %v10998_v37 = vld [vmem:[%s11709_s29] ss:$0 sm:$0xff] }
 0x9c5   : > { %5152 = vadd.xlane.f32.xlu1 %v5129_v6  ;;  %5148 = vadd.xlane.f32.xlu0 %v5127_v20 }
 0x9c6   : > { %v5068_v38 = vpop.xlane.xlu1 %5067 }
 0x9c7   : > { %v5098_v50 = vmul.f32 %v10880_v39, %v5068_v38 }
 0x9c9   : > { %v10947_v55 = vsub.f32 %v10857_v12, %v5098_v50 }
 0x9cb   : > { %v5130_v18 = vmul.f32 %v10947_v55, %v10947_v55 }
 0x9cd   : > { %5154 = vadd.xlane.f32.xlu0 %v5130_v18 }
 0x9ce   : > { %v5070_v13 = vpop.xlane.xlu0 %5069 }
 0x9cf   : > { %v5099_v5 = vmul.f32 %v10880_v39, %v5070_v13 }
 0x9d1   : > { %v10953_v2 = vsub.f32 %v10862_v36, %v5099_v5 }
 0x9d3   : > { %v5131_v22 = vmul.f32 %v10953_v2, %v10953_v2 }
 0x9d5   : > { %5156 = vadd.xlane.f32.xlu2 %v5131_v22 }
 0x9d6   : > { %v5072_v33 = vpop.xlane.xlu2 %5071 }
 0x9d7   : > { %v5100_v51 = vmul.f32 %v10880_v39, %v5072_v33 }
 0x9d9   : > { %v10959_v12 = vsub.f32 %v10867_v23, %v5100_v51 }
 0x9db   : > { %v5132_v7 = vmul.f32 %v10959_v12, %v10959_v12 }
 0x9dd   : > { %5158 = vadd.xlane.f32.xlu1 %v5132_v7 }
 0x9de   : > { %v5074_v47 = vpop.xlane.xlu1 %5073 }
 0x9df   : > { %v5101_v53 = vmul.f32 %v10880_v39, %v5074_v47 }
 0x9e1   : > { %v10965_v36 = vsub.f32 %v10872_v56, %v5101_v53 }
 0x9e3   : > { %v5133_v49 = vmul.f32 %v10965_v36, %v10965_v36 }
 0x9e5   : > { %5160 = vadd.xlane.f32.xlu0 %v5133_v49 }
 0xa0a   : > { %v5076_v11 = vpop.xlane.xlu0 %5075 }
 0xa0b   : > { %v5102_v54 = vmul.f32 %v10880_v39, %v5076_v11 }
 0xa0d   : > { %v10971_v23 = vsub.f32 %v10877_v14, %v5102_v54 }
 0xa0f   : > { %v5134_v28 = vmul.f32 %v10971_v23, %v10971_v23 }
 0xa11   : > { %5162 = vadd.xlane.f32.xlu2 %v5134_v28 }
 0xa12   : > { %v5078_v52 = vpop.xlane.xlu2 %5077 }
 0xa13   : > { %v5103_v43 = vmul.f32 %v10880_v39, %v5078_v52 }
 0xa15   : > { %v10977_v56 = vsub.f32 %v10885_v48, %v5103_v43 }
 0xa17   : > { %v5135_v8 = vmul.f32 %v10977_v56, %v10977_v56 }
 0xa19   : > { %5164 = vadd.xlane.f32.xlu1 %v5135_v8 }
 0xa1a   : > { %v5139_v46 = vpop.xlane.xlu2 %5138 }
 0xa1b   : > { %v5170_v10 = vmul.f32 %v5139_v46, %v10880_v39 }
 0xa1d   : > { %v5186_v59 = vadd.f32 1e-05, %v5170_v10 }
 0xa1f   : > { %6981 = vrsqrt.f32 %v5186_v59  ;;  %vm5208_vm1 = vweird.f32 %v5186_v59 }
 0xa20   : > { %v5080_v25 = vpop.xlane.xlu1 %5079 }
 0xa21   : > { %v5104_v48 = vmul.f32 %v10880_v39, %v5080_v25 }
 0xa22   : > { %v5145_v14 = vpop.xlane.xlu2 %5144 }
 0xa23   : > { %v5173_v31 = vmul.f32 %v5145_v14, %v10880_v39  ;;  %v10985_v32 = vsub.f32 %v10906_v0, %v5104_v48 }
 0xa25   : > { %v6982_v61 = vpop.eup %6981  ;;  %v5189_v62 = vadd.f32 1e-05, %v5173_v31  ;;  %v5136_v17 = vmul.f32 %v10985_v32, %v10985_v32 }
 0xa26   : > { %v5203_v57 = vmul.f32 %v6982_v61, %v5186_v59  ;;  %vm5209_vm15 = vweird.f32 %v6982_v61 }
 0xa27   : > { %6983 = vrsqrt.f32 %v5189_v62  ;;  %vm5210_vm13 = vmor %vm5208_vm1, %vm5209_vm15  ;;  %5166 = vadd.xlane.f32.xlu0 %v5136_v17  ;;  %vm5238_vm2 = vweird.f32 %v5189_v62 }
 0xa28   : > { %v5204_v44 = vmul.f32 %v6982_v61, %v5203_v57  ;;  %v5082_v58 = vpop.xlane.xlu0 %5081  ;;  %v5141_v35 = vpop.xlane.xlu1 %5140 }
 0xa29   : > { %v5105_v38 = vmul.f32 %v10880_v39, %v5082_v58  ;;  %v5171_v50 = vmul.f32 %v5141_v35, %v10880_v39 }
 0xa2a   : > { %v5205_v9 = vmul.f32 0.5, %v5204_v44  ;;  %v5151_v4 = vpop.xlane.xlu2 %5150 }
 0xa2b   : > { %v5176_v60 = vmul.f32 %v5151_v4, %v10880_v39  ;;  %v11005_v13 = vsub.f32 %v10918_v1, %v5105_v38  ;;  %v5187_v5 = vadd.f32 1e-05, %v5171_v50 }
 0xa2c   : > { %v5206_v3 = vsub.f32 1.5, %v5205_v9 }
 0xa2d   : > { %v6984_v29 = vpop.eup %6983  ;;  %v5192_v21 = vadd.f32 1e-05, %v5176_v60  ;;  %vm5218_vm5 = vweird.f32 %v5187_v5 }
 0xa2e   : > { %v5207_v19 = vmul.f32 %v6982_v61, %v5206_v3  ;;  %v5233_v40 = vmul.f32 %v6984_v29, %v5189_v62  ;;  %vm5239_vm14 = vweird.f32 %v6984_v29 }
 0xa2f   : > { %6985 = vrsqrt.f32 %v5192_v21  ;;  %vm5240_vm3 = vmor %vm5238_vm2, %vm5239_vm14  ;;  %vm5268_vm6 = vweird.f32 %v5192_v21 }
 0xa30   : > { %v5211_v0 = vsel %vm5210_vm13, %v6982_v61, %v5207_v19  ;;  %v5234_v41 = vmul.f32 %v6984_v29, %v5233_v40  ;;  %6987 = vrsqrt.f32 %v5187_v5  ;;  %v5143_v47 = vpop.xlane.xlu0 %5142  ;;  %v5147_v53 = vpop.xlane.xlu1 %5146 }
 0xa31   : > { %v5362_v16 = vmul.f32 %v5211_v0, %v10889_v63  ;;  %v5137_v63 = vmul.f32 %v11005_v13, %v11005_v13  ;;  %v5172_v11 = vmul.f32 %v5143_v47, %v10880_v39  ;;  %v5174_v54 = vmul.f32 %v5147_v53, %v10880_v39 }
 0xa32   : > { %v5235_v6 = vmul.f32 0.5, %v5234_v41 }
 0xa33   : > { %v5382_v20 = vmul.f32 %v10993_v30, %v5362_v16  ;;  %5168 = vadd.xlane.f32.xlu2 %v5137_v63  ;;  %v5188_v8 = vadd.f32 1e-05, %v5172_v11  ;;  %v11015_v10 = vadd.f32 1e-05, %v5174_v54 }
 0xa34   : > { %v5236_v18 = vsub.f32 1.5, %v5235_v6 }
 0xa35   : > { %v5402_v22 = vadd.f32 %v10998_v37, %v5382_v20  ;;  %v6986_v51 = vpop.eup %6985  ;;  %6989 = vrsqrt.f32 %v5188_v8  ;;  %vm5228_vm12 = vweird.f32 %v5188_v8  ;;  %vm5248_vm15 = vweird.f32 %v11015_v10 }
 0xa36   : > { %v5237_v33 = vmul.f32 %v6984_v29, %v5236_v18  ;;  %v5263_v49 = vmul.f32 %v6986_v51, %v5192_v21  ;;  %v6988_v28 = vpop.eup %6987  ;;  %6991 = vrsqrt.f32 %v11015_v10  ;;  %vm5269_vm4 = vweird.f32 %v6986_v51 }
 0xa37   : > { %5418 = vst [vmem:[%s7551_s24] sm:$0xff] %v5402_v22  ;;  %v5213_v46 = vmul.f32 %v6988_v28, %v5187_v5  ;;  %vm5219_vm7 = vweird.f32 %v6988_v28  ;;  %vm5270_vm8 = vmor %vm5268_vm6, %vm5269_vm4 }
 0xa38   : > { %v5241_v7 = vsel %vm5240_vm3, %v6984_v29, %v5237_v33  ;;  %v5264_v43 = vmul.f32 %v6986_v51, %v5263_v49  ;;  %v5149_v62 = vpop.xlane.xlu0 %5148  ;;  %v5153_v57 = vpop.xlane.xlu1 %5152  ;;  %vm5220_vm9 = vmor %vm5218_vm5, %vm5219_vm7 }
 0xa39   : > { %v5365_v1 = vmul.f32 %v5241_v7, %v10895_v34  ;;  %v5214_v31 = vmul.f32 %v6988_v28, %v5213_v46  ;;  %v5175_v25 = vmul.f32 %v5149_v62, %v10880_v39  ;;  %v5177_v48 = vmul.f32 %v5153_v57, %v10880_v39 }
 0xa3a   : > { %v5265_v14 = vmul.f32 0.5, %v5264_v43 }
 0xa3b   : > { %v5385_v52 = vmul.f32 %v10993_v30, %v5365_v1  ;;  %v5215_v61 = vmul.f32 0.5, %v5214_v31  ;;  %v6990_v3 = vpop.eup %6989  ;;  %v11022_v17 = vadd.f32 1e-05, %v5175_v25  ;;  %v11024_v4 = vadd.f32 1e-05, %v5177_v48 }
 0xa3c   : > { %v5266_v34 = vsub.f32 1.5, %v5265_v14  ;;  %v6992_v19 = vpop.eup %6991  ;;  %v5223_v0 = vmul.f32 %v6990_v3, %v5188_v8  ;;  %vm5229_vm10 = vweird.f32 %v6990_v3 }
 0xa3d   : > { %v5405_v59 = vadd.f32 %v10998_v37, %v5385_v52  ;;  %v5216_v9 = vsub.f32 1.5, %v5215_v61  ;;  %v5243_v41 = vmul.f32 %v6992_v19, %v11015_v10  ;;  %6993 = vrsqrt.f32 %v11022_v17  ;;  %vm5230_vm0 = vmor %vm5228_vm12, %vm5229_vm10 }
 0xa3e   : > { %v5267_v44 = vmul.f32 %v6986_v51, %v5266_v34  ;;  %v5224_v21 = vmul.f32 %v6990_v3, %v5223_v0  ;;  %6995 = vrsqrt.f32 %v11024_v4  ;;  %vm5249_vm11 = vweird.f32 %v6992_v19 }
 0xa3f   : > { %5421 = vst [vmem:[%s7551_s24 + $0x18] sm:$0xff] %v5405_v59  ;;  %v5217_v40 = vmul.f32 %v6988_v28, %v5216_v9  ;;  %v5244_v38 = vmul.f32 %v6992_v19, %v5243_v41  ;;  %vm5250_vm1 = vmor %vm5248_vm15, %vm5249_vm11  ;;  %vm5258_vm2 = vweird.f32 %v11022_v17  ;;  %vm5278_vm4 = vweird.f32 %v11024_v4 }
 0xa40   : > { %v5271_v29 = vsel %vm5270_vm8, %v6986_v51, %v5267_v44  ;;  %v5225_v6 = vmul.f32 0.5, %v5224_v21 }
 0xa41   : > { %v5368_v60 = vmul.f32 %v5271_v29, %v10902_v26  ;;  %v5221_v58 = vsel %vm5220_vm9, %v6988_v28, %v5217_v40  ;;  %v5155_v26 = vpop.xlane.xlu0 %5154  ;;  %v5245_v18 = vmul.f32 0.5, %v5244_v38 }
 0xa42   : > { %v5363_v16 = vmul.f32 %v5221_v58, %v10912_v42  ;;  %v5178_v22 = vmul.f32 %v5155_v26, %v10880_v39  ;;  %v5226_v33 = vsub.f32 1.5, %v5225_v6 }
 0xa43   : > { %v5388_v35 = vmul.f32 %v10993_v30, %v5368_v60  ;;  %v6994_v51 = vpop.eup %6993  ;;  %v5246_v7 = vsub.f32 1.5, %v5245_v18 }
 0xa44   : > { %v5383_v5 = vmul.f32 %v10993_v30, %v5363_v16  ;;  %v11038_v47 = vadd.f32 1e-05, %v5178_v22  ;;  %v6996_v1 = vpop.eup %6995  ;;  %v5227_v49 = vmul.f32 %v6990_v3, %v5226_v33  ;;  %v5253_v11 = vmul.f32 %v6994_v51, %v11022_v17 }
 0xa45   : > { %v5408_v50 = vadd.f32 %v10998_v37, %v5388_v35  ;;  %v5247_v54 = vmul.f32 %v6992_v19, %v5246_v7  ;;  %v5273_v28 = vmul.f32 %v6996_v1, %v11024_v4  ;;  %vm5259_vm13 = vweird.f32 %v6994_v51 }
 0xa46   : > { %v5403_v42 = vadd.f32 %v10998_v37, %v5383_v5  ;;  %6997 = vrsqrt.f32 %v11038_v47  ;;  %v5231_v52 = vsel %vm5230_vm0, %v6990_v3, %v5227_v49  ;;  %v5254_v43 = vmul.f32 %v6994_v51, %v5253_v11  ;;  %vm5260_vm3 = vmor %vm5258_vm2, %vm5259_vm13 }
 0xa47   : > { %5424 = vst [vmem:[%s7551_s24 + $0x30] sm:$0xff] %v5408_v50  ;;  %v5364_v46 = vmul.f32 %v5231_v52, %v10927_v27  ;;  %v5251_v8 = vsel %vm5250_vm1, %v6992_v19, %v5247_v54  ;;  %v5274_v59 = vmul.f32 %v6996_v1, %v5273_v28  ;;  %vm5279_vm14 = vweird.f32 %v6996_v1 }
 0xa48   : > { %v5157_v20 = vpop.xlane.xlu2 %5156  ;;  %5419 = vst [vmem:[%s7551_s24 + $0x8] sm:$0xff] %v5403_v42  ;;  %v5366_v14 = vmul.f32 %v5251_v8, %v10924_v15  ;;  %v5255_v31 = vmul.f32 0.5, %v5254_v43  ;;  %vm5280_vm6 = vmor %vm5278_vm4, %vm5279_vm14  ;;  %vm5288_vm5 = vweird.f32 %v11038_v47 }
 0xa49   : > { %v5179_v63 = vmul.f32 %v5157_v20, %v10880_v39  ;;  %v5384_v10 = vmul.f32 %v10993_v30, %v5364_v46  ;;  %v5275_v61 = vmul.f32 0.5, %v5274_v59 }
 0xa4a   : > { %v5386_v57 = vmul.f32 %v10993_v30, %v5366_v14  ;;  %v5256_v44 = vsub.f32 1.5, %v5255_v31 }
 0xa4b   : > { %v11040_v53 = vadd.f32 1e-05, %v5179_v63  ;;  %v5404_v27 = vadd.f32 %v10998_v37, %v5384_v10  ;;  %v5276_v48 = vsub.f32 1.5, %v5275_v61 }
 0xa4c   : > { %v6998_v25 = vpop.eup %6997  ;;  %v5406_v3 = vadd.f32 %v10998_v37, %v5386_v57  ;;  %v5257_v29 = vmul.f32 %v6994_v51, %v5256_v44 }
 0xa4d   : > { %6999 = vrsqrt.f32 %v11040_v53  ;;  %v5283_v19 = vmul.f32 %v6998_v25, %v11038_v47  ;;  %5420 = vst [vmem:[%s7551_s24 + $0x10] sm:$0xff] %v5404_v27  ;;  %v5277_v40 = vmul.f32 %v6996_v1, %v5276_v48  ;;  %vm5289_vm7 = vweird.f32 %v6998_v25 }
 0xa4e   : > { %5422 = vst [vmem:[%s7551_s24 + $0x20] sm:$0xff] %v5406_v3  ;;  %v5261_v0 = vsel %vm5260_vm3, %v6994_v51, %v5257_v29  ;;  %vm5290_vm9 = vmor %vm5288_vm5, %vm5289_vm7  ;;  %vm5298_vm10 = vweird.f32 %v11040_v53 }
 0xa4f   : > { %v5284_v41 = vmul.f32 %v6998_v25, %v5283_v19  ;;  %v5367_v58 = vmul.f32 %v5261_v0, %v10936_v45  ;;  %v5281_v35 = vsel %vm5280_vm6, %v6996_v1, %v5277_v40 }
 0xa50   : > { %v5159_v34 = vpop.xlane.xlu1 %5158  ;;  %v5369_v17 = vmul.f32 %v5281_v35, %v10939_v24 }
 0xa51   : > { %v5180_v62 = vmul.f32 %v5159_v34, %v10880_v39  ;;  %v5285_v16 = vmul.f32 0.5, %v5284_v41  ;;  %v5387_v50 = vmul.f32 %v10993_v30, %v5367_v58 }
 0xa52   : > { %v5389_v26 = vmul.f32 %v10993_v30, %v5369_v17 }
 0xa53   : > { %v5196_v9 = vadd.f32 1e-05, %v5180_v62  ;;  %v7000_v15 = vpop.eup %6999  ;;  %v5286_v20 = vsub.f32 1.5, %v5285_v16  ;;  %v5407_v45 = vadd.f32 %v10998_v37, %v5387_v50 }
 0xa54   : > { %v5293_v60 = vmul.f32 %v7000_v15, %v11040_v53  ;;  %vm5299_vm8 = vweird.f32 %v7000_v15  ;;  %v5409_v24 = vadd.f32 %v10998_v37, %v5389_v26 }
 0xa55   : > { %7001 = vrsqrt.f32 %v5196_v9  ;;  %v5287_v63 = vmul.f32 %v6998_v25, %v5286_v20  ;;  %5423 = vst [vmem:[%s7551_s24 + $0x28] sm:$0xff] %v5407_v45  ;;  %vm5300_vm11 = vmor %vm5298_vm10, %vm5299_vm8  ;;  %vm5308_vm0 = vweird.f32 %v5196_v9 }
 0xa56   : > { %v5294_v21 = vmul.f32 %v7000_v15, %v5293_v60  ;;  %5425 = vst [vmem:[%s7551_s24 + $0x38] sm:$0xff] %v5409_v24 }
 0xa57   : > { %v5291_v42 = vsel %vm5290_vm9, %v6998_v25, %v5287_v63 }
 0xa58   : > { %v5161_v38 = vpop.xlane.xlu0 %5160  ;;  %v5295_v4 = vmul.f32 0.5, %v5294_v21  ;;  %v5370_v1 = vmul.f32 %v5291_v42, %v10947_v55 }
 0xa59   : > { %v5181_v6 = vmul.f32 %v5161_v38, %v10880_v39 }
 0xa5a   : > { %v5296_v18 = vsub.f32 1.5, %v5295_v4  ;;  %v5390_v47 = vmul.f32 %v10993_v30, %v5370_v1 }
 0xa5b   : > { %v7002_v5 = vpop.eup %7001  ;;  %v5197_v22 = vadd.f32 1e-05, %v5181_v6 }
 0xa5c   : > { %v5303_v33 = vmul.f32 %v7002_v5, %v5196_v9  ;;  %v5297_v51 = vmul.f32 %v7000_v15, %v5296_v18  ;;  %vm5309_vm12 = vweird.f32 %v7002_v5  ;;  %v5410_v43 = vadd.f32 %v10998_v37, %v5390_v47 }
 0xa5d   : > { %7003 = vrsqrt.f32 %v5197_v22  ;;  %vm5310_vm15 = vmor %vm5308_vm0, %vm5309_vm12  ;;  %vm5318_vm13 = vweird.f32 %v5197_v22 }
 0xa5e   : > { %v5304_v7 = vmul.f32 %v7002_v5, %v5303_v33  ;;  %v5301_v49 = vsel %vm5300_vm11, %v7000_v15, %v5297_v51  ;;  %5426 = vst [vmem:[%s7551_s24 + $0x40] sm:$0xff] %v5410_v43 }
 0xa5f   : > { %v5371_v11 = vmul.f32 %v5301_v49, %v10953_v2 }
 0xa60   : > { %v5305_v54 = vmul.f32 0.5, %v5304_v7 }
 0xa61   : > { %v5391_v28 = vmul.f32 %v10993_v30, %v5371_v11 }
 0xa62   : > { %v5306_v52 = vsub.f32 1.5, %v5305_v54 }
 0xa63   : > { %v7004_v53 = vpop.eup %7003  ;;  %v5411_v46 = vadd.f32 %v10998_v37, %v5391_v28 }
 0xa64   : > { %v5307_v8 = vmul.f32 %v7002_v5, %v5306_v52  ;;  %v5313_v55 = vmul.f32 %v7004_v53, %v5197_v22  ;;  %vm5319_vm1 = vweird.f32 %v7004_v53 }
 0xa65   : > { %5427 = vst [vmem:[%s7551_s24 + $0x48] sm:$0xff] %v5411_v46  ;;  %vm5320_vm14 = vmor %vm5318_vm13, %vm5319_vm1 }
 0xa66   : > { %v5311_v2 = vsel %vm5310_vm15, %v7002_v5, %v5307_v8  ;;  %v5314_v59 = vmul.f32 %v7004_v53, %v5313_v55 }
 0xa67   : > { %v5372_v14 = vmul.f32 %v5311_v2, %v10959_v12 }
 0xa68   : > { %v5315_v31 = vmul.f32 0.5, %v5314_v59 }
 0xa69   : > { %v5392_v34 = vmul.f32 %v10993_v30, %v5372_v14 }
 0xa6a   : > { %v5316_v10 = vsub.f32 1.5, %v5315_v31 }
 0xa6b   : > { %v5412_v61 = vadd.f32 %v10998_v37, %v5392_v34 }
 0xa6c   : > { %v5317_v62 = vmul.f32 %v7004_v53, %v5316_v10 }
 0xa6d   : > { %5428 = vst [vmem:[%s7551_s24 + $0x50] sm:$0xff] %v5412_v61 }
 0xa6e   : > { %v5321_v57 = vsel %vm5320_vm14, %v7004_v53, %v5317_v62 }
 0xa6f   : > { %v5373_v44 = vmul.f32 %v5321_v57, %v10965_v36 }
 0xa71   : > { %v5393_v25 = vmul.f32 %v10993_v30, %v5373_v44 }
 0xa73   : > { %v5413_v27 = vadd.f32 %v10998_v37, %v5393_v25 }
 0xa75   : > { %5429 = vst [vmem:[%s7551_s24 + $0x58] sm:$0xff] %v5413_v27 }
 0xa84   : > { %v5163_v12 = vpop.xlane.xlu2 %5162 }
 0xa85   : > { %v5182_v48 = vmul.f32 %v5163_v12, %v10880_v39 }
 0xa87   : > { %v5198_v9 = vadd.f32 1e-05, %v5182_v48 }
 0xa89   : > { %7005 = vrsqrt.f32 %v5198_v9  ;;  %vm5328_vm3 = vweird.f32 %v5198_v9 }
 0xa8c   : > { %v5165_v15 = vpop.xlane.xlu1 %5164 }
 0xa8d   : > { %v5183_v3 = vmul.f32 %v5165_v15, %v10880_v39 }
 0xa8f   : > { %v7006_v29 = vpop.eup %7005  ;;  %v5199_v19 = vadd.f32 1e-05, %v5183_v3 }
 0xa90   : > { %v5323_v40 = vmul.f32 %v7006_v29, %v5198_v9  ;;  %vm5329_vm2 = vweird.f32 %v7006_v29 }
 0xa91   : > { %7007 = vrsqrt.f32 %v5199_v19  ;;  %vm5330_vm4 = vmor %vm5328_vm3, %vm5329_vm2  ;;  %vm5338_vm7 = vweird.f32 %v5199_v19 }
 0xa92   : > { %v5324_v60 = vmul.f32 %v7006_v29, %v5323_v40 }
 0xa94   : > { %v5325_v0 = vmul.f32 0.5, %v5324_v60 }
 0xa96   : > { %v5326_v36 = vsub.f32 1.5, %v5325_v0 }
 0xa97   : > { %v7008_v41 = vpop.eup %7007 }
 0xa98   : > { %v5327_v58 = vmul.f32 %v7006_v29, %v5326_v36  ;;  %v5333_v35 = vmul.f32 %v7008_v41, %v5199_v19  ;;  %vm5339_vm6 = vweird.f32 %v7008_v41 }
 0xa99   : > { %vm5340_vm8 = vmor %vm5338_vm7, %vm5339_vm6 }
 0xa9a   : > { %v5331_v21 = vsel %vm5330_vm4, %v7006_v29, %v5327_v58  ;;  %v5334_v17 = vmul.f32 %v7008_v41, %v5333_v35  ;;  %v5167_v5 = vpop.xlane.xlu0 %5166 }
 0xa9b   : > { %v5374_v16 = vmul.f32 %v5331_v21, %v10971_v23  ;;  %v5184_v18 = vmul.f32 %v5167_v5, %v10880_v39 }
 0xa9c   : > { %v5335_v38 = vmul.f32 0.5, %v5334_v17 }
 0xa9d   : > { %v5394_v50 = vmul.f32 %v10993_v30, %v5374_v16  ;;  %v5200_v22 = vadd.f32 1e-05, %v5184_v18 }
 0xa9e   : > { %v5336_v4 = vsub.f32 1.5, %v5335_v38 }
 0xa9f   : > { %v5414_v6 = vadd.f32 %v10998_v37, %v5394_v50  ;;  %7009 = vrsqrt.f32 %v5200_v22  ;;  %vm5348_vm9 = vweird.f32 %v5200_v22 }
 0xaa0   : > { %v5337_v26 = vmul.f32 %v7008_v41, %v5336_v4 }
 0xaa1   : > { %5430 = vst [vmem:[%s7551_s24 + $0x60] sm:$0xff] %v5414_v6 }
 0xaa2   : > { %v5341_v20 = vsel %vm5340_vm8, %v7008_v41, %v5337_v26 }
 0xaa3   : > { %v5375_v45 = vmul.f32 %v5341_v20, %v10977_v56 }
 0xaa5   : > { %v5395_v23 = vmul.f32 %v10993_v30, %v5375_v45  ;;  %v7010_v51 = vpop.eup %7009 }
 0xaa6   : > { %v5169_v63 = vpop.xlane.xlu2 %5168  ;;  %v5343_v7 = vmul.f32 %v7010_v51, %v5200_v22  ;;  %vm5349_vm5 = vweird.f32 %v7010_v51 }
 0xaa7   : > { %v5415_v24 = vadd.f32 %v10998_v37, %v5395_v23  ;;  %v5185_v33 = vmul.f32 %v5169_v63, %v10880_v39  ;;  %vm5350_vm10 = vmor %vm5348_vm9, %vm5349_vm5 }
 0xaa8   : > { %v5344_v1 = vmul.f32 %v7010_v51, %v5343_v7 }
 0xaa9   : > { %5431 = vst [vmem:[%s7551_s24 + $0x68] sm:$0xff] %v5415_v24  ;;  %v5201_v42 = vadd.f32 1e-05, %v5185_v33 }
 0xaaa   : > { %v5345_v56 = vmul.f32 0.5, %v5344_v1 }
 0xaab   : > { %7011 = vrsqrt.f32 %v5201_v42  ;;  %vm5358_vm12 = vweird.f32 %v5201_v42 }
 0xaac   : > { %v5346_v49 = vsub.f32 1.5, %v5345_v56 }
 0xaae   : > { %v5347_v54 = vmul.f32 %v7010_v51, %v5346_v49 }
 0xab0   : > { %v5351_v28 = vsel %vm5350_vm10, %v7010_v51, %v5347_v54 }
 0xab1   : > { %v7012_v11 = vpop.eup %7011  ;;  %v5376_v39 = vmul.f32 %v5351_v28, %v10985_v32 }
 0xab2   : > { %v5353_v47 = vmul.f32 %v7012_v11, %v5201_v42  ;;  %vm5359_vm11 = vweird.f32 %v7012_v11 }
 0xab3   : > { %v5396_v43 = vmul.f32 %v10993_v30, %v5376_v39  ;;  %vm5360_vm0 = vmor %vm5358_vm12, %vm5359_vm11 }
 0xab4   : > { %v5354_v52 = vmul.f32 %v7012_v11, %v5353_v47 }
 0xab5   : > { %v5416_v8 = vadd.f32 %v10998_v37, %v5396_v43 }
 0xab6   : > { %v5355_v53 = vmul.f32 0.5, %v5354_v52 }
 0xab7   : > { %5432 = vst [vmem:[%s7551_s24 + $0x70] sm:$0xff] %v5416_v8 }
 0xab8   : > { %v5356_v46 = vsub.f32 1.5, %v5355_v53 }
 0xaba   : > { %v5357_v55 = vmul.f32 %v7012_v11, %v5356_v46 }
 0xabc   : > { %v5361_v32 = vsel %vm5360_vm0, %v7012_v11, %v5357_v55 }
 0xabd   : > { %v5377_v2 = vmul.f32 %v5361_v32, %v11005_v13 }
 0xabf   : > { %v5397_v59 = vmul.f32 %v10993_v30, %v5377_v2 }
 0xac1   : > { %v5417_v14 = vadd.f32 %v10998_v37, %v5397_v59 }
 0xac3   : > { %5433 = vst [vmem:[%s7551_s24 + $0x78] sm:$0xff] %v5417_v14 }
 0xac4   : > { %7183 = shalt.err (!%p7180_p6)
}
 0xac5   : > { %s7303_s12 = smov 128   ;;  %s7304_s24 = smov 8  }
 0xac6   : > { %6341 = dma.vmem_to_hbm [thread:$0]  (%p7441_p7), %s5450_s15, 2048, %s5452_s3, %s5435_s5, %s7303_s12, %s7303_s12, %s7304_s24  }
 0xac7 PF: > { %s11713_s8 = sld [smem:[#allocation19_spill]]  ;;  %p6366_p8 = scmp.ge.s32.totalorder %s7290_s13, 2 }
 0xac9   : > { %p6358_p10 = pnand %p6366_p8, %p7446_p9 }
 0xacb   : > { %p6359_p12 = pneg %p6358_p10 }
 0xacd   : > { %s5466_s9 = sand.u32 1, %s11713_s8  }
 0xace   : > { %s5467_s20 = scalar_lea.sflag [#allocation7], %s5466_s9 }
 0xacf   : > { %7245 = dma.done.wait (%p6359_p12), %s5467_s20, 2048  }
 0xad0   : > { %7247 = vsyncadd (%p6359_p12), %s5467_s20, 4294965248  ;;  %s32_s13 = sadd.s32 1, %s7290_s13   ;;  %s11715_s27 = sld [smem:[#allocation20_spill]] }
 0xad1   : > { %p29_p13 = scmp.ge.s32.totalorder %s32_s13, 6   ;;  %s11716_s26 = sld [smem:[#allocation27_spill]] }
 0xad2   : > { %s11717_s16 = sld [smem:[#allocation22_spill]]  ;;  %s11720_s21 = smov %s7254_s22 }
 0xad3   : > { %s11718_s29 = sld [smem:[#allocation25_spill]]  ;;  %s11721_s22 = smov %s7258_s23 }
 0xad4   : > { %s11719_s15 = sld [smem:[#allocation26_spill]]  ;;  %s11722_s23 = smov %s7502_s7 }
 0xad5   : > { %s11723_s24 = smov %s7266_s25  ;;  %s11726_s28 = smov %s7286_s30 }
 0xad6   : > { %s11724_s25 = smov %s11715_s27  ;;  %31 = sbr.rel (!%p29_p13) target bundleno = 24 (0x18), region = 140 }
 0xad8   : > { %s11725_s27 = smov %s11717_s16 }
 0xada   : > { %s11727_s30 = smov %s11719_s15 }
 0xadb   :  { %5473 = vsyncpa [#allocation6], 1 }
 0xadc   :  { %5475 = vsyncpa [#allocation6 + $0x1], 1 }
 0xadd   :  { %5476 = vsyncpa [#allocation9], 1 }
 0xade   :  { %5478 = vsyncpa [#allocation9 + $0x1], 1 }
 0xadf   :  { %5479 = vsyncpa [#allocation12], 1 }
 0xae0   :  { %5480 = vsyncpa [#allocation7], 1 }
 0xae1   :  { %5482 = vsyncpa [#allocation7 + $0x1], 1 }

</bundles_post_ra>
